<compile_context>
chip_gen: v6e
topology: v6e:2x2x1
jax: 0.10.0
libtpu: 0.0.40
codegen_flags: <defaults>
</compile_context>

<pallas_src>
import jax
import jax.numpy as jnp
import numpy as np
from jax.experimental import pallas as pl
from jax.experimental.pallas import tpu as pltpu

D = 32
N_LAYERS = 5
BN_EPS = 1e-5


def _round_up(v, m):
    return ((v + m - 1) // m) * m


def _wflat(w):
    """(Cout, Cin, 4, 4) torch-layout conv weight -> (16*Cin, Cout) matmul weight, column-block
    order k = kh*4 + kw (matches the in-kernel patch concat order)."""
    cout, cin = w.shape[0], w.shape[1]
    return jnp.transpose(w, (2, 3, 1, 0)).reshape(16 * cin, cout).astype(jnp.bfloat16)


def _offset_grid(batch, o_in):
    o_out = o_in // 2
    nn, oh, ow = np.meshgrid(np.arange(batch), np.arange(o_out), np.arange(o_out), indexing="ij")
    return o_out, nn.ravel(), oh.ravel(), ow.ravel()


def _layer1_row_gather(batch, o_in):
    """Static row-gather (indices + validity mask) mapping layer-0 output rows (flat n,h,w
    order over an o_in x o_in grid) into the k-major layer-1 patch-row order."""
    o_out, nn, oh, ow = _offset_grid(batch, o_in)
    m_out = batch * o_out * o_out
    idx = np.zeros(16 * m_out, np.int32)
    mask = np.zeros(16 * m_out, np.float32)
    for kh in range(4):
        for kw in range(4):
            k = kh * 4 + kw
            h = 2 * oh - 1 + kh
            w = 2 * ow - 1 + kw
            valid = (h >= 0) & (h < o_in) & (w >= 0) & (w < o_in)
            src = (nn * o_in + np.clip(h, 0, o_in - 1)) * o_in + np.clip(w, 0, o_in - 1)
            sl = slice(k * m_out, (k + 1) * m_out)
            idx[sl] = src.astype(np.int32)
            mask[sl] = valid.astype(np.float32)
    return idx, mask


def _stacked_gather_mat(batch, o_in, dtype=jnp.bfloat16):
    """Single stacked 0/1 gather matrix (16*m_out, m_in), rows in k-major order, performing the
    whole k=4,s=2,p=1 im2col row selection of one layer in ONE matmul. Zero-padded (invalid)
    positions are all-zero rows."""
    o_out, nn, oh, ow = _offset_grid(batch, o_in)
    m_in = batch * o_in * o_in
    m_out = batch * o_out * o_out
    g = np.zeros((16 * m_out, m_in), np.float32)
    rows0 = np.arange(m_out)
    for kh in range(4):
        for kw in range(4):
            k = kh * 4 + kw
            h = 2 * oh - 1 + kh
            w = 2 * ow - 1 + kw
            valid = (h >= 0) & (h < o_in) & (w >= 0) & (w < o_in)
            src = (nn * o_in + np.clip(h, 0, o_in - 1)) * o_in + np.clip(w, 0, o_in - 1)
            g[(k * m_out + rows0)[valid], src[valid]] = 1.0
    return jnp.asarray(g, dtype)


def _extract_patches(x):
    """im2col for kernel=4, stride=2, pad=1 (layer 0, wrapper-side). x: NHWC -> (N*OH*OW, 16*C)."""
    N, H, W, C = x.shape
    OH, OW = H // 2, W // 2
    xp = jnp.pad(x, ((0, 0), (1, 1), (1, 1), (0, 0)))
    cols = []
    for kh in range(4):
        for kw in range(4):
            cols.append(xp[:, kh:kh + 2 * OH:2, kw:kw + 2 * OW:2, :])
    patches = jnp.concatenate(cols, axis=-1)            # (N, OH, OW, 16*C)
    return patches.reshape(N * OH * OW, 16 * C), (N, OH, OW)


def _fused_kernel(*refs):
    p0g_ref, w0_ref, b0_ref, m1_ref = refs[0:4]
    wf1_ref, ga1_ref, be1_ref = refs[4:7]
    out_ref = refs[-1]
    wl_ref, rs_ref, ga4_ref, be4_ref = refs[-5:-1]
    mid_refs = refs[7:-5]                      # (gather, wflat, gamma, beta) per middle layer
    n_mid = len(mid_refs) // 4

    def lrelu(v):
        return jnp.where(v > 0, v, 0.2 * v)

    def batchnorm(acc, gamma_ref, beta_ref):
        # train-mode BatchNorm over the full (N,H,W) row axis (always block-resident);
        # conv bias omitted upstream: exactly cancelled by this mean subtraction.
        mean = jnp.mean(acc, axis=0, keepdims=True)
        var = jnp.mean(jnp.square(acc - mean), axis=0, keepdims=True)
        return (acc - mean) * jax.lax.rsqrt(var + BN_EPS) * gamma_ref[...] + beta_ref[...]

    def to_patches(t, m_out):
        # k-major stacked rows (16*m_out, cin) -> (m_out, 16*cin) patch matrix via tile-aligned
        # sublane slices + a tree of equal-width lane concats (no general reshape needed).
        pieces = [t[k * m_out:(k + 1) * m_out, :] for k in range(16)]
        while len(pieces) > 1:
            pieces = [jnp.concatenate(pieces[i:i + 2], axis=1)
                      for i in range(0, len(pieces), 2)]
        return pieces[0].astype(jnp.bfloat16)

    # ---- layer 0 (+ layer-1 im2col): the wrapper pre-gathered layer-0 patch rows into the
    # k-major layer-1 ordering, so ONE matmul yields all 16 layer-1 patch pieces at once;
    # zero-padded positions are masked after bias + LeakyReLU(0.2). ----
    y0 = jnp.dot(p0g_ref[...], w0_ref[...], preferred_element_type=jnp.float32)
    y0 = lrelu(y0 + b0_ref[...]) * m1_ref[...]
    patches = to_patches(y0, p0g_ref.shape[0] // 16)

    # ---- layer 1: ONE (M, 16*Cin)@(16*Cin, Cout) conv matmul + BN + LeakyReLU ----
    acc = jnp.dot(patches, wf1_ref[...], preferred_element_type=jnp.float32)
    y = lrelu(batchnorm(acc, ga1_ref, be1_ref))

    # ---- layers 2..n-2: ONE stacked gather matmul (in-kernel im2col) + ONE conv matmul ----
    for li in range(n_mid):
        g_ref, wf_ref, ga_ref, be_ref = mid_refs[4 * li:4 * li + 4]
        t = jnp.dot(g_ref[...], y.astype(jnp.bfloat16), preferred_element_type=jnp.float32)
        patches = to_patches(t, g_ref.shape[0] // 16)
        acc = jnp.dot(patches, wf_ref[...], preferred_element_type=jnp.float32)
        y = lrelu(batchnorm(acc, ga_ref, be_ref))

    # ---- final ConvBN (Cout=1, 2x2 input -> 1x1 output): VPU multiply + one tiny per-image
    # aggregation matmul + lane reduction + BN + Sigmoid (no 16-dot MXU pass). ----
    z = y * wl_ref[...]                                                    # (N*4, Cin) f32
    per_img = jnp.dot(rs_ref[...], z, preferred_element_type=jnp.float32)  # (N, Cin)
    acc = jnp.sum(per_img, axis=1, keepdims=True)                          # (N, 1)
    out_ref[...] = jax.nn.sigmoid(batchnorm(acc, ga4_ref, be4_ref)).astype(out_ref.dtype)


def init_params(key, d=D, n_layers=N_LAYERS, batch=2, in_hw=32):
    """Deterministic synthetic parameters mirroring the PyTorch module shapes, pre-packed into
    the matmul-friendly layouts the kernel consumes."""
    channels = [d * 2 ** i for i in range(n_layers - 1)] + [1]
    cfgs = [(6, d, False)] + [(ci, co, True) for ci, co in zip(channels[:-1], channels[1:])]
    params = []
    hw = in_hw
    for idx, (cin, cout, has_bn) in enumerate(cfgs):
        key, k1, k2, k3, k4 = jax.random.split(key, 5)
        bound = 1.0 / ((cin * 16) ** 0.5)
        w = jax.random.uniform(k1, (cout, cin, 4, 4), jnp.float32, -bound, bound)
        p = {}
        if not has_bn:
            # layer 0: (16*Cin padded to 128, Cout) matmul weight + bias, plus the static
            # row-gather (indices + mask) that lays layer-0 outputs out as layer-1 patches.
            b = jax.random.uniform(k2, (cout,), jnp.float32, -bound, bound)
            w_mat = jnp.transpose(w, (2, 3, 1, 0)).reshape(16 * cin, cout)
            w_mat = jnp.pad(w_mat, ((0, _round_up(16 * cin, 128) - 16 * cin), (0, 0)))
            p["w"] = w_mat.astype(jnp.bfloat16)
            p["b"] = b.reshape(1, cout)
            idx_np, mask_np = _layer1_row_gather(batch, hw // 2)
            p["gather_idx"] = jnp.asarray(idx_np)
            p["mask"] = jnp.asarray(mask_np).reshape(-1, 1)
        else:
            # Conv bias intentionally not created: cancelled by train-mode BN mean subtraction.
            p["gamma"] = (1.0 + 0.1 * jax.random.normal(k3, (cout,), jnp.float32)).reshape(1, cout)
            p["beta"] = (0.1 * jax.random.normal(k4, (cout,), jnp.float32)).reshape(1, cout)
            if idx == n_layers - 1:
                assert hw == 2 and cout == 1, "final layer expects a 2x2 input -> 1x1 output"
                # only the 2x2 valid window of the 4x4 kernel contributes at the 1x1 output
                rows = [w[0, :, h + 1, ww + 1] for h in range(2) for ww in range(2)]
                p["w"] = jnp.tile(jnp.stack(rows, axis=0), (batch, 1))       # (batch*4, Cin) f32
                rsum = np.zeros((batch, batch * 4), np.float32)
                for n in range(batch):
                    rsum[n, n * 4:(n + 1) * 4] = 1.0
                p["rsum"] = jnp.asarray(rsum)
            else:
                p["w"] = _wflat(w)                                           # (16*Cin, Cout)
                if idx > 1:
                    # TODO(synk): G scales O(N^2) with batch; for large batches build it
                    # per-image (batch-independent) and/or split rows across v7x's 2 TCs.
                    p["g"] = _stacked_gather_mat(batch, hw)
        params.append(p)
        hw //= 2
    return params


def discriminator_forward(params, x_nchw, y_nchw):
    x = jnp.concatenate([x_nchw, y_nchw], axis=1)        # torch.cat((x, y), 1), NCHW
    h = jnp.transpose(x, (0, 2, 3, 1))                   # -> NHWC
    N, H = x.shape[0], x.shape[2]
    patches, _ = _extract_patches(h)                     # (N*OH*OW, 96)
    k0 = patches.shape[1]
    patches = jnp.pad(patches, ((0, 0), (0, _round_up(k0, 128) - k0))).astype(jnp.bfloat16)

    p0 = params[0]
    assert p0["mask"].shape[0] == 16 * N * (H // 4) ** 2, "params were built for a different N/H"
    # Pre-gather layer-0 patch rows into the k-major layer-1 patch-row order (cheap XLA gather
    # in HBM): removes the big layer-1 one-hot gather matmul AND its gather-matrix DMA.
    p0g = jnp.take(patches, p0["gather_idx"], axis=0, mode="clip")

    args = [p0g, p0["w"], p0["b"], p0["mask"],
            params[1]["w"], params[1]["gamma"], params[1]["beta"]]
    for p in params[2:-1]:
        args += [p["g"], p["w"], p["gamma"], p["beta"]]
    pL = params[-1]
    args += [pL["w"], pL["rsum"], pL["gamma"], pL["beta"]]

    vmem_spec = pl.BlockSpec(memory_space=pltpu.MemorySpace.VMEM)
    out = pl.pallas_call(
        _fused_kernel,
        in_specs=[vmem_spec] * len(args),
        out_specs=vmem_spec,
        out_shape=jax.ShapeDtypeStruct((N, 1), jnp.float32),
        compiler_params=pltpu.CompilerParams(vmem_limit_bytes=32 * 1024 * 1024),
        cost_estimate=pl.CostEstimate(flops=52_000_000, transcendentals=512,
                                      bytes_accessed=2_200_000),
    )(*args)
    return out.reshape(N, 1, 1, 1)                       # back to NCHW


if __name__ == "__main__":
    key = jax.random.PRNGKey(0)
    kp, kx, ky = jax.random.split(key, 3)
    params = init_params(kp, batch=2, in_hw=32)
    # 32x32 spatial -> 5 stride-2 convs -> 1x1 output per image.
    x = jax.random.normal(kx, (2, 3, 32, 32), jnp.float32)
    y = jax.random.normal(ky, (2, 3, 32, 32), jnp.float32)
    out = jax.jit(discriminator_forward)(params, x, y)
    out = jax.block_until_ready(out)
    assert out.shape == (2, 1, 1, 1), out.shape
    assert bool(jnp.all(jnp.isfinite(out)))
    assert bool(jnp.all((out >= 0.0) & (out <= 1.0)))
    print("KERNEL_OK")
</pallas_src>

<mosaic_0001>
module attributes {stable_mosaic.version = 11 : i64} {
  func.func @_fused_kernel(%arg0: memref<2048x128xbf16, #tpu.memory_space<vmem>>, %arg1: memref<128x32xbf16, #tpu.memory_space<vmem>>, %arg2: memref<1x32xf32, #tpu.memory_space<vmem>>, %arg3: memref<2048x1xf32, #tpu.memory_space<vmem>>, %arg4: memref<512x64xbf16, #tpu.memory_space<vmem>>, %arg5: memref<1x64xf32, #tpu.memory_space<vmem>>, %arg6: memref<1x64xf32, #tpu.memory_space<vmem>>, %arg7: memref<512x128xbf16, #tpu.memory_space<vmem>>, %arg8: memref<1024x128xbf16, #tpu.memory_space<vmem>>, %arg9: memref<1x128xf32, #tpu.memory_space<vmem>>, %arg10: memref<1x128xf32, #tpu.memory_space<vmem>>, %arg11: memref<128x32xbf16, #tpu.memory_space<vmem>>, %arg12: memref<2048x256xbf16, #tpu.memory_space<vmem>>, %arg13: memref<1x256xf32, #tpu.memory_space<vmem>>, %arg14: memref<1x256xf32, #tpu.memory_space<vmem>>, %arg15: memref<8x256xf32, #tpu.memory_space<vmem>>, %arg16: memref<2x8xf32, #tpu.memory_space<vmem>>, %arg17: memref<1x1xf32, #tpu.memory_space<vmem>>, %arg18: memref<1x1xf32, #tpu.memory_space<vmem>>, %arg19: memref<2x1xf32, #tpu.memory_space<vmem>>) attributes {dimension_semantics = [], scalar_prefetch = 0 : i64, scratch_operands = 0 : i64, tpu.core_type = #tpu.core_type<tc>} {
    %c0 = arith.constant 0 : index
    %c0_0 = arith.constant 0 : index
    %0 = vector.load %arg0[%c0, %c0_0] : memref<2048x128xbf16, #tpu.memory_space<vmem>>, vector<2048x128xbf16>
    %c0_1 = arith.constant 0 : index
    %c0_2 = arith.constant 0 : index
    %1 = vector.load %arg1[%c0_1, %c0_2] : memref<128x32xbf16, #tpu.memory_space<vmem>>, vector<128x32xbf16>
    %cst = arith.constant dense<0.000000e+00> : vector<2048x32xf32>
    %2 = tpu.matmul %0, %1, %cst {dimension_numbers = #tpu.dot_dimension_numbers<[1], [0], [0], [1], [0, 0, 1, 1], [], []>} : vector<2048x128xbf16>, vector<128x32xbf16>, vector<2048x32xf32> -> vector<2048x32xf32>
    %c0_3 = arith.constant 0 : index
    %c0_4 = arith.constant 0 : index
    %3 = vector.load %arg2[%c0_3, %c0_4] : memref<1x32xf32, #tpu.memory_space<vmem>>, vector<1x32xf32>
    %4 = vector.broadcast %3 : vector<1x32xf32> to vector<2048x32xf32>
    %5 = arith.addf %2, %4 : vector<2048x32xf32>
    %cst_5 = arith.constant 0.000000e+00 : f32
    %6 = vector.broadcast %cst_5 : f32 to vector<2048x32xf32>
    %7 = arith.cmpf ogt, %5, %6 : vector<2048x32xf32>
    %cst_6 = arith.constant 2.000000e-01 : f32
    %8 = vector.broadcast %cst_6 : f32 to vector<2048x32xf32>
    %9 = arith.mulf %8, %5 : vector<2048x32xf32>
    %10 = arith.select %7, %5, %9 : vector<2048x32xi1>, vector<2048x32xf32>
    %c0_7 = arith.constant 0 : index
    %c0_8 = arith.constant 0 : index
    %11 = vector.load %arg3[%c0_7, %c0_8] : memref<2048x1xf32, #tpu.memory_space<vmem>>, vector<2048x1xf32>
    %12 = vector.broadcast %11 : vector<2048x1xf32> to vector<2048x32xf32>
    %13 = arith.mulf %10, %12 : vector<2048x32xf32>
    %14 = vector.extract_strided_slice %13 {offsets = [0, 0], sizes = [128, 32], strides = [1, 1]} : vector<2048x32xf32> to vector<128x32xf32>
    %15 = vector.extract_strided_slice %13 {offsets = [128, 0], sizes = [128, 32], strides = [1, 1]} : vector<2048x32xf32> to vector<128x32xf32>
    %16 = vector.extract_strided_slice %13 {offsets = [256, 0], sizes = [128, 32], strides = [1, 1]} : vector<2048x32xf32> to vector<128x32xf32>
    %17 = vector.extract_strided_slice %13 {offsets = [384, 0], sizes = [128, 32], strides = [1, 1]} : vector<2048x32xf32> to vector<128x32xf32>
    %18 = vector.extract_strided_slice %13 {offsets = [512, 0], sizes = [128, 32], strides = [1, 1]} : vector<2048x32xf32> to vector<128x32xf32>
    %19 = vector.extract_strided_slice %13 {offsets = [640, 0], sizes = [128, 32], strides = [1, 1]} : vector<2048x32xf32> to vector<128x32xf32>
    %20 = vector.extract_strided_slice %13 {offsets = [768, 0], sizes = [128, 32], strides = [1, 1]} : vector<2048x32xf32> to vector<128x32xf32>
    %21 = vector.extract_strided_slice %13 {offsets = [896, 0], sizes = [128, 32], strides = [1, 1]} : vector<2048x32xf32> to vector<128x32xf32>
    %22 = vector.extract_strided_slice %13 {offsets = [1024, 0], sizes = [128, 32], strides = [1, 1]} : vector<2048x32xf32> to vector<128x32xf32>
    %23 = vector.extract_strided_slice %13 {offsets = [1152, 0], sizes = [128, 32], strides = [1, 1]} : vector<2048x32xf32> to vector<128x32xf32>
    %24 = vector.extract_strided_slice %13 {offsets = [1280, 0], sizes = [128, 32], strides = [1, 1]} : vector<2048x32xf32> to vector<128x32xf32>
    %25 = vector.extract_strided_slice %13 {offsets = [1408, 0], sizes = [128, 32], strides = [1, 1]} : vector<2048x32xf32> to vector<128x32xf32>
    %26 = vector.extract_strided_slice %13 {offsets = [1536, 0], sizes = [128, 32], strides = [1, 1]} : vector<2048x32xf32> to vector<128x32xf32>
    %27 = vector.extract_strided_slice %13 {offsets = [1664, 0], sizes = [128, 32], strides = [1, 1]} : vector<2048x32xf32> to vector<128x32xf32>
    %28 = vector.extract_strided_slice %13 {offsets = [1792, 0], sizes = [128, 32], strides = [1, 1]} : vector<2048x32xf32> to vector<128x32xf32>
    %29 = vector.extract_strided_slice %13 {offsets = [1920, 0], sizes = [128, 32], strides = [1, 1]} : vector<2048x32xf32> to vector<128x32xf32>
    %30 = tpu.concatenate %14, %15 in 1 : vector<128x32xf32>, vector<128x32xf32> -> vector<128x64xf32>
    %31 = tpu.concatenate %16, %17 in 1 : vector<128x32xf32>, vector<128x32xf32> -> vector<128x64xf32>
    %32 = tpu.concatenate %18, %19 in 1 : vector<128x32xf32>, vector<128x32xf32> -> vector<128x64xf32>
    %33 = tpu.concatenate %20, %21 in 1 : vector<128x32xf32>, vector<128x32xf32> -> vector<128x64xf32>
    %34 = tpu.concatenate %22, %23 in 1 : vector<128x32xf32>, vector<128x32xf32> -> vector<128x64xf32>
    %35 = tpu.concatenate %24, %25 in 1 : vector<128x32xf32>, vector<128x32xf32> -> vector<128x64xf32>
    %36 = tpu.concatenate %26, %27 in 1 : vector<128x32xf32>, vector<128x32xf32> -> vector<128x64xf32>
    %37 = tpu.concatenate %28, %29 in 1 : vector<128x32xf32>, vector<128x32xf32> -> vector<128x64xf32>
    %38 = tpu.concatenate %30, %31 in 1 : vector<128x64xf32>, vector<128x64xf32> -> vector<128x128xf32>
    %39 = tpu.concatenate %32, %33 in 1 : vector<128x64xf32>, vector<128x64xf32> -> vector<128x128xf32>
    %40 = tpu.concatenate %34, %35 in 1 : vector<128x64xf32>, vector<128x64xf32> -> vector<128x128xf32>
    %41 = tpu.concatenate %36, %37 in 1 : vector<128x64xf32>, vector<128x64xf32> -> vector<128x128xf32>
    %42 = tpu.concatenate %38, %39 in 1 : vector<128x128xf32>, vector<128x128xf32> -> vector<128x256xf32>
    %43 = tpu.concatenate %40, %41 in 1 : vector<128x128xf32>, vector<128x128xf32> -> vector<128x256xf32>
    %44 = tpu.concatenate %42, %43 in 1 : vector<128x256xf32>, vector<128x256xf32> -> vector<128x512xf32>
    %45 = arith.truncf %44 : vector<128x512xf32> to vector<128x512xbf16>
    %c0_9 = arith.constant 0 : index
    %c0_10 = arith.constant 0 : index
    %46 = vector.load %arg4[%c0_9, %c0_10] : memref<512x64xbf16, #tpu.memory_space<vmem>>, vector<512x64xbf16>
    %cst_11 = arith.constant dense<0.000000e+00> : vector<128x64xf32>
    %47 = tpu.matmul %45, %46, %cst_11 {dimension_numbers = #tpu.dot_dimension_numbers<[1], [0], [0], [1], [0, 0, 1, 1], [], []>} : vector<128x512xbf16>, vector<512x64xbf16>, vector<128x64xf32> -> vector<128x64xf32>
    %cst_12 = arith.constant dense<0.000000e+00> : vector<64xf32>
    %48 = vector.multi_reduction <add>, %47, %cst_12 [0] : vector<128x64xf32> to vector<64xf32>
    %49 = vector.shape_cast %48 : vector<64xf32> to vector<1x64xf32>
    %cst_13 = arith.constant 1.280000e+02 : f32
    %50 = vector.broadcast %cst_13 : f32 to vector<1x64xf32>
    %51 = arith.divf %49, %50 : vector<1x64xf32>
    %52 = vector.broadcast %51 : vector<1x64xf32> to vector<128x64xf32>
    %53 = arith.subf %47, %52 : vector<128x64xf32>
    %54 = arith.mulf %53, %53 : vector<128x64xf32>
    %cst_14 = arith.constant dense<0.000000e+00> : vector<64xf32>
    %55 = vector.multi_reduction <add>, %54, %cst_14 [0] : vector<128x64xf32> to vector<64xf32>
    %56 = vector.shape_cast %55 : vector<64xf32> to vector<1x64xf32>
    %cst_15 = arith.constant 1.280000e+02 : f32
    %57 = vector.broadcast %cst_15 : f32 to vector<1x64xf32>
    %58 = arith.divf %56, %57 : vector<1x64xf32>
    %59 = vector.broadcast %51 : vector<1x64xf32> to vector<128x64xf32>
    %60 = arith.subf %47, %59 : vector<128x64xf32>
    %cst_16 = arith.constant 9.99999974E-6 : f32
    %61 = vector.broadcast %cst_16 : f32 to vector<1x64xf32>
    %62 = arith.addf %58, %61 : vector<1x64xf32>
    %63 = math.rsqrt %62 : vector<1x64xf32>
    %64 = vector.broadcast %63 : vector<1x64xf32> to vector<128x64xf32>
    %65 = arith.mulf %60, %64 : vector<128x64xf32>
    %c0_17 = arith.constant 0 : index
    %c0_18 = arith.constant 0 : index
    %66 = vector.load %arg5[%c0_17, %c0_18] : memref<1x64xf32, #tpu.memory_space<vmem>>, vector<1x64xf32>
    %67 = vector.broadcast %66 : vector<1x64xf32> to vector<128x64xf32>
    %68 = arith.mulf %65, %67 : vector<128x64xf32>
    %c0_19 = arith.constant 0 : index
    %c0_20 = arith.constant 0 : index
    %69 = vector.load %arg6[%c0_19, %c0_20] : memref<1x64xf32, #tpu.memory_space<vmem>>, vector<1x64xf32>
    %70 = vector.broadcast %69 : vector<1x64xf32> to vector<128x64xf32>
    %71 = arith.addf %68, %70 : vector<128x64xf32>
    %cst_21 = arith.constant 0.000000e+00 : f32
    %72 = vector.broadcast %cst_21 : f32 to vector<128x64xf32>
    %73 = arith.cmpf ogt, %71, %72 : vector<128x64xf32>
    %cst_22 = arith.constant 2.000000e-01 : f32
    %74 = vector.broadcast %cst_22 : f32 to vector<128x64xf32>
    %75 = arith.mulf %74, %71 : vector<128x64xf32>
    %76 = arith.select %73, %71, %75 : vector<128x64xi1>, vector<128x64xf32>
    %c0_23 = arith.constant 0 : index
    %c0_24 = arith.constant 0 : index
    %77 = vector.load %arg7[%c0_23, %c0_24] : memref<512x128xbf16, #tpu.memory_space<vmem>>, vector<512x128xbf16>
    %78 = arith.truncf %76 : vector<128x64xf32> to vector<128x64xbf16>
    %cst_25 = arith.constant dense<0.000000e+00> : vector<512x64xf32>
    %79 = tpu.matmul %77, %78, %cst_25 {dimension_numbers = #tpu.dot_dimension_numbers<[1], [0], [0], [1], [0, 0, 1, 1], [], []>} : vector<512x128xbf16>, vector<128x64xbf16>, vector<512x64xf32> -> vector<512x64xf32>
    %80 = vector.extract_strided_slice %79 {offsets = [0, 0], sizes = [32, 64], strides = [1, 1]} : vector<512x64xf32> to vector<32x64xf32>
    %81 = vector.extract_strided_slice %79 {offsets = [32, 0], sizes = [32, 64], strides = [1, 1]} : vector<512x64xf32> to vector<32x64xf32>
    %82 = vector.extract_strided_slice %79 {offsets = [64, 0], sizes = [32, 64], strides = [1, 1]} : vector<512x64xf32> to vector<32x64xf32>
    %83 = vector.extract_strided_slice %79 {offsets = [96, 0], sizes = [32, 64], strides = [1, 1]} : vector<512x64xf32> to vector<32x64xf32>
    %84 = vector.extract_strided_slice %79 {offsets = [128, 0], sizes = [32, 64], strides = [1, 1]} : vector<512x64xf32> to vector<32x64xf32>
    %85 = vector.extract_strided_slice %79 {offsets = [160, 0], sizes = [32, 64], strides = [1, 1]} : vector<512x64xf32> to vector<32x64xf32>
    %86 = vector.extract_strided_slice %79 {offsets = [192, 0], sizes = [32, 64], strides = [1, 1]} : vector<512x64xf32> to vector<32x64xf32>
    %87 = vector.extract_strided_slice %79 {offsets = [224, 0], sizes = [32, 64], strides = [1, 1]} : vector<512x64xf32> to vector<32x64xf32>
    %88 = vector.extract_strided_slice %79 {offsets = [256, 0], sizes = [32, 64], strides = [1, 1]} : vector<512x64xf32> to vector<32x64xf32>
    %89 = vector.extract_strided_slice %79 {offsets = [288, 0], sizes = [32, 64], strides = [1, 1]} : vector<512x64xf32> to vector<32x64xf32>
    %90 = vector.extract_strided_slice %79 {offsets = [320, 0], sizes = [32, 64], strides = [1, 1]} : vector<512x64xf32> to vector<32x64xf32>
    %91 = vector.extract_strided_slice %79 {offsets = [352, 0], sizes = [32, 64], strides = [1, 1]} : vector<512x64xf32> to vector<32x64xf32>
    %92 = vector.extract_strided_slice %79 {offsets = [384, 0], sizes = [32, 64], strides = [1, 1]} : vector<512x64xf32> to vector<32x64xf32>
    %93 = vector.extract_strided_slice %79 {offsets = [416, 0], sizes = [32, 64], strides = [1, 1]} : vector<512x64xf32> to vector<32x64xf32>
    %94 = vector.extract_strided_slice %79 {offsets = [448, 0], sizes = [32, 64], strides = [1, 1]} : vector<512x64xf32> to vector<32x64xf32>
    %95 = vector.extract_strided_slice %79 {offsets = [480, 0], sizes = [32, 64], strides = [1, 1]} : vector<512x64xf32> to vector<32x64xf32>
    %96 = tpu.concatenate %80, %81 in 1 : vector<32x64xf32>, vector<32x64xf32> -> vector<32x128xf32>
    %97 = tpu.concatenate %82, %83 in 1 : vector<32x64xf32>, vector<32x64xf32> -> vector<32x128xf32>
    %98 = tpu.concatenate %84, %85 in 1 : vector<32x64xf32>, vector<32x64xf32> -> vector<32x128xf32>
    %99 = tpu.concatenate %86, %87 in 1 : vector<32x64xf32>, vector<32x64xf32> -> vector<32x128xf32>
    %100 = tpu.concatenate %88, %89 in 1 : vector<32x64xf32>, vector<32x64xf32> -> vector<32x128xf32>
    %101 = tpu.concatenate %90, %91 in 1 : vector<32x64xf32>, vector<32x64xf32> -> vector<32x128xf32>
    %102 = tpu.concatenate %92, %93 in 1 : vector<32x64xf32>, vector<32x64xf32> -> vector<32x128xf32>
    %103 = tpu.concatenate %94, %95 in 1 : vector<32x64xf32>, vector<32x64xf32> -> vector<32x128xf32>
    %104 = tpu.concatenate %96, %97 in 1 : vector<32x128xf32>, vector<32x128xf32> -> vector<32x256xf32>
    %105 = tpu.concatenate %98, %99 in 1 : vector<32x128xf32>, vector<32x128xf32> -> vector<32x256xf32>
    %106 = tpu.concatenate %100, %101 in 1 : vector<32x128xf32>, vector<32x128xf32> -> vector<32x256xf32>
    %107 = tpu.concatenate %102, %103 in 1 : vector<32x128xf32>, vector<32x128xf32> -> vector<32x256xf32>
    %108 = tpu.concatenate %104, %105 in 1 : vector<32x256xf32>, vector<32x256xf32> -> vector<32x512xf32>
    %109 = tpu.concatenate %106, %107 in 1 : vector<32x256xf32>, vector<32x256xf32> -> vector<32x512xf32>
    %110 = tpu.concatenate %108, %109 in 1 : vector<32x512xf32>, vector<32x512xf32> -> vector<32x1024xf32>
    %111 = arith.truncf %110 : vector<32x1024xf32> to vector<32x1024xbf16>
    %c0_26 = arith.constant 0 : index
    %c0_27 = arith.constant 0 : index
    %112 = vector.load %arg8[%c0_26, %c0_27] : memref<1024x128xbf16, #tpu.memory_space<vmem>>, vector<1024x128xbf16>
    %cst_28 = arith.constant dense<0.000000e+00> : vector<32x128xf32>
    %113 = tpu.matmul %111, %112, %cst_28 {dimension_numbers = #tpu.dot_dimension_numbers<[1], [0], [0], [1], [0, 0, 1, 1], [], []>} : vector<32x1024xbf16>, vector<1024x128xbf16>, vector<32x128xf32> -> vector<32x128xf32>
    %cst_29 = arith.constant dense<0.000000e+00> : vector<128xf32>
    %114 = vector.multi_reduction <add>, %113, %cst_29 [0] : vector<32x128xf32> to vector<128xf32>
    %115 = vector.shape_cast %114 : vector<128xf32> to vector<1x128xf32>
    %cst_30 = arith.constant 3.200000e+01 : f32
    %116 = vector.broadcast %cst_30 : f32 to vector<1x128xf32>
    %117 = arith.divf %115, %116 : vector<1x128xf32>
    %118 = vector.broadcast %117 : vector<1x128xf32> to vector<32x128xf32>
    %119 = arith.subf %113, %118 : vector<32x128xf32>
    %120 = arith.mulf %119, %119 : vector<32x128xf32>
    %cst_31 = arith.constant dense<0.000000e+00> : vector<128xf32>
    %121 = vector.multi_reduction <add>, %120, %cst_31 [0] : vector<32x128xf32> to vector<128xf32>
    %122 = vector.shape_cast %121 : vector<128xf32> to vector<1x128xf32>
    %cst_32 = arith.constant 3.200000e+01 : f32
    %123 = vector.broadcast %cst_32 : f32 to vector<1x128xf32>
    %124 = arith.divf %122, %123 : vector<1x128xf32>
    %125 = vector.broadcast %117 : vector<1x128xf32> to vector<32x128xf32>
    %126 = arith.subf %113, %125 : vector<32x128xf32>
    %cst_33 = arith.constant 9.99999974E-6 : f32
    %127 = vector.broadcast %cst_33 : f32 to vector<1x128xf32>
    %128 = arith.addf %124, %127 : vector<1x128xf32>
    %129 = math.rsqrt %128 : vector<1x128xf32>
    %130 = vector.broadcast %129 : vector<1x128xf32> to vector<32x128xf32>
    %131 = arith.mulf %126, %130 : vector<32x128xf32>
    %c0_34 = arith.constant 0 : index
    %c0_35 = arith.constant 0 : index
    %132 = vector.load %arg9[%c0_34, %c0_35] : memref<1x128xf32, #tpu.memory_space<vmem>>, vector<1x128xf32>
    %133 = vector.broadcast %132 : vector<1x128xf32> to vector<32x128xf32>
    %134 = arith.mulf %131, %133 : vector<32x128xf32>
    %c0_36 = arith.constant 0 : index
    %c0_37 = arith.constant 0 : index
    %135 = vector.load %arg10[%c0_36, %c0_37] : memref<1x128xf32, #tpu.memory_space<vmem>>, vector<1x128xf32>
    %136 = vector.broadcast %135 : vector<1x128xf32> to vector<32x128xf32>
    %137 = arith.addf %134, %136 : vector<32x128xf32>
    %cst_38 = arith.constant 0.000000e+00 : f32
    %138 = vector.broadcast %cst_38 : f32 to vector<32x128xf32>
    %139 = arith.cmpf ogt, %137, %138 : vector<32x128xf32>
    %cst_39 = arith.constant 2.000000e-01 : f32
    %140 = vector.broadcast %cst_39 : f32 to vector<32x128xf32>
    %141 = arith.mulf %140, %137 : vector<32x128xf32>
    %142 = arith.select %139, %137, %141 : vector<32x128xi1>, vector<32x128xf32>
    %c0_40 = arith.constant 0 : index
    %c0_41 = arith.constant 0 : index
    %143 = vector.load %arg11[%c0_40, %c0_41] : memref<128x32xbf16, #tpu.memory_space<vmem>>, vector<128x32xbf16>
    %144 = arith.truncf %142 : vector<32x128xf32> to vector<32x128xbf16>
    %cst_42 = arith.constant dense<0.000000e+00> : vector<128x128xf32>
    %145 = tpu.matmul %143, %144, %cst_42 {dimension_numbers = #tpu.dot_dimension_numbers<[1], [0], [0], [1], [0, 0, 1, 1], [], []>} : vector<128x32xbf16>, vector<32x128xbf16>, vector<128x128xf32> -> vector<128x128xf32>
    %146 = vector.extract_strided_slice %145 {offsets = [0, 0], sizes = [8, 128], strides = [1, 1]} : vector<128x128xf32> to vector<8x128xf32>
    %147 = vector.extract_strided_slice %145 {offsets = [8, 0], sizes = [8, 128], strides = [1, 1]} : vector<128x128xf32> to vector<8x128xf32>
    %148 = vector.extract_strided_slice %145 {offsets = [16, 0], sizes = [8, 128], strides = [1, 1]} : vector<128x128xf32> to vector<8x128xf32>
    %149 = vector.extract_strided_slice %145 {offsets = [24, 0], sizes = [8, 128], strides = [1, 1]} : vector<128x128xf32> to vector<8x128xf32>
    %150 = vector.extract_strided_slice %145 {offsets = [32, 0], sizes = [8, 128], strides = [1, 1]} : vector<128x128xf32> to vector<8x128xf32>
    %151 = vector.extract_strided_slice %145 {offsets = [40, 0], sizes = [8, 128], strides = [1, 1]} : vector<128x128xf32> to vector<8x128xf32>
    %152 = vector.extract_strided_slice %145 {offsets = [48, 0], sizes = [8, 128], strides = [1, 1]} : vector<128x128xf32> to vector<8x128xf32>
    %153 = vector.extract_strided_slice %145 {offsets = [56, 0], sizes = [8, 128], strides = [1, 1]} : vector<128x128xf32> to vector<8x128xf32>
    %154 = vector.extract_strided_slice %145 {offsets = [64, 0], sizes = [8, 128], strides = [1, 1]} : vector<128x128xf32> to vector<8x128xf32>
    %155 = vector.extract_strided_slice %145 {offsets = [72, 0], sizes = [8, 128], strides = [1, 1]} : vector<128x128xf32> to vector<8x128xf32>
    %156 = vector.extract_strided_slice %145 {offsets = [80, 0], sizes = [8, 128], strides = [1, 1]} : vector<128x128xf32> to vector<8x128xf32>
    %157 = vector.extract_strided_slice %145 {offsets = [88, 0], sizes = [8, 128], strides = [1, 1]} : vector<128x128xf32> to vector<8x128xf32>
    %158 = vector.extract_strided_slice %145 {offsets = [96, 0], sizes = [8, 128], strides = [1, 1]} : vector<128x128xf32> to vector<8x128xf32>
    %159 = vector.extract_strided_slice %145 {offsets = [104, 0], sizes = [8, 128], strides = [1, 1]} : vector<128x128xf32> to vector<8x128xf32>
    %160 = vector.extract_strided_slice %145 {offsets = [112, 0], sizes = [8, 128], strides = [1, 1]} : vector<128x128xf32> to vector<8x128xf32>
    %161 = vector.extract_strided_slice %145 {offsets = [120, 0], sizes = [8, 128], strides = [1, 1]} : vector<128x128xf32> to vector<8x128xf32>
    %162 = tpu.concatenate %146, %147 in 1 : vector<8x128xf32>, vector<8x128xf32> -> vector<8x256xf32>
    %163 = tpu.concatenate %148, %149 in 1 : vector<8x128xf32>, vector<8x128xf32> -> vector<8x256xf32>
    %164 = tpu.concatenate %150, %151 in 1 : vector<8x128xf32>, vector<8x128xf32> -> vector<8x256xf32>
    %165 = tpu.concatenate %152, %153 in 1 : vector<8x128xf32>, vector<8x128xf32> -> vector<8x256xf32>
    %166 = tpu.concatenate %154, %155 in 1 : vector<8x128xf32>, vector<8x128xf32> -> vector<8x256xf32>
    %167 = tpu.concatenate %156, %157 in 1 : vector<8x128xf32>, vector<8x128xf32> -> vector<8x256xf32>
    %168 = tpu.concatenate %158, %159 in 1 : vector<8x128xf32>, vector<8x128xf32> -> vector<8x256xf32>
    %169 = tpu.concatenate %160, %161 in 1 : vector<8x128xf32>, vector<8x128xf32> -> vector<8x256xf32>
    %170 = tpu.concatenate %162, %163 in 1 : vector<8x256xf32>, vector<8x256xf32> -> vector<8x512xf32>
    %171 = tpu.concatenate %164, %165 in 1 : vector<8x256xf32>, vector<8x256xf32> -> vector<8x512xf32>
    %172 = tpu.concatenate %166, %167 in 1 : vector<8x256xf32>, vector<8x256xf32> -> vector<8x512xf32>
    %173 = tpu.concatenate %168, %169 in 1 : vector<8x256xf32>, vector<8x256xf32> -> vector<8x512xf32>
    %174 = tpu.concatenate %170, %171 in 1 : vector<8x512xf32>, vector<8x512xf32> -> vector<8x1024xf32>
    %175 = tpu.concatenate %172, %173 in 1 : vector<8x512xf32>, vector<8x512xf32> -> vector<8x1024xf32>
    %176 = tpu.concatenate %174, %175 in 1 : vector<8x1024xf32>, vector<8x1024xf32> -> vector<8x2048xf32>
    %177 = arith.truncf %176 : vector<8x2048xf32> to vector<8x2048xbf16>
    %c0_43 = arith.constant 0 : index
    %c0_44 = arith.constant 0 : index
    %178 = vector.load %arg12[%c0_43, %c0_44] : memref<2048x256xbf16, #tpu.memory_space<vmem>>, vector<2048x256xbf16>
    %cst_45 = arith.constant dense<0.000000e+00> : vector<8x256xf32>
    %179 = tpu.matmul %177, %178, %cst_45 {dimension_numbers = #tpu.dot_dimension_numbers<[1], [0], [0], [1], [0, 0, 1, 1], [], []>} : vector<8x2048xbf16>, vector<2048x256xbf16>, vector<8x256xf32> -> vector<8x256xf32>
    %cst_46 = arith.constant dense<0.000000e+00> : vector<256xf32>
    %180 = vector.multi_reduction <add>, %179, %cst_46 [0] : vector<8x256xf32> to vector<256xf32>
    %181 = vector.shape_cast %180 : vector<256xf32> to vector<1x256xf32>
    %cst_47 = arith.constant 8.000000e+00 : f32
    %182 = vector.broadcast %cst_47 : f32 to vector<1x256xf32>
    %183 = arith.divf %181, %182 : vector<1x256xf32>
    %184 = vector.broadcast %183 : vector<1x256xf32> to vector<8x256xf32>
    %185 = arith.subf %179, %184 : vector<8x256xf32>
    %186 = arith.mulf %185, %185 : vector<8x256xf32>
    %cst_48 = arith.constant dense<0.000000e+00> : vector<256xf32>
    %187 = vector.multi_reduction <add>, %186, %cst_48 [0] : vector<8x256xf32> to vector<256xf32>
    %188 = vector.shape_cast %187 : vector<256xf32> to vector<1x256xf32>
    %cst_49 = arith.constant 8.000000e+00 : f32
    %189 = vector.broadcast %cst_49 : f32 to vector<1x256xf32>
    %190 = arith.divf %188, %189 : vector<1x256xf32>
    %191 = vector.broadcast %183 : vector<1x256xf32> to vector<8x256xf32>
    %192 = arith.subf %179, %191 : vector<8x256xf32>
    %cst_50 = arith.constant 9.99999974E-6 : f32
    %193 = vector.broadcast %cst_50 : f32 to vector<1x256xf32>
    %194 = arith.addf %190, %193 : vector<1x256xf32>
    %195 = math.rsqrt %194 : vector<1x256xf32>
    %196 = vector.broadcast %195 : vector<1x256xf32> to vector<8x256xf32>
    %197 = arith.mulf %192, %196 : vector<8x256xf32>
    %c0_51 = arith.constant 0 : index
    %c0_52 = arith.constant 0 : index
    %198 = vector.load %arg13[%c0_51, %c0_52] : memref<1x256xf32, #tpu.memory_space<vmem>>, vector<1x256xf32>
    %199 = vector.broadcast %198 : vector<1x256xf32> to vector<8x256xf32>
    %200 = arith.mulf %197, %199 : vector<8x256xf32>
    %c0_53 = arith.constant 0 : index
    %c0_54 = arith.constant 0 : index
    %201 = vector.load %arg14[%c0_53, %c0_54] : memref<1x256xf32, #tpu.memory_space<vmem>>, vector<1x256xf32>
    %202 = vector.broadcast %201 : vector<1x256xf32> to vector<8x256xf32>
    %203 = arith.addf %200, %202 : vector<8x256xf32>
    %cst_55 = arith.constant 0.000000e+00 : f32
    %204 = vector.broadcast %cst_55 : f32 to vector<8x256xf32>
    %205 = arith.cmpf ogt, %203, %204 : vector<8x256xf32>
    %cst_56 = arith.constant 2.000000e-01 : f32
    %206 = vector.broadcast %cst_56 : f32 to vector<8x256xf32>
    %207 = arith.mulf %206, %203 : vector<8x256xf32>
    %208 = arith.select %205, %203, %207 : vector<8x256xi1>, vector<8x256xf32>
    %c0_57 = arith.constant 0 : index
    %c0_58 = arith.constant 0 : index
    %209 = vector.load %arg15[%c0_57, %c0_58] : memref<8x256xf32, #tpu.memory_space<vmem>>, vector<8x256xf32>
    %210 = arith.mulf %208, %209 : vector<8x256xf32>
    %c0_59 = arith.constant 0 : index
    %c0_60 = arith.constant 0 : index
    %211 = vector.load %arg16[%c0_59, %c0_60] : memref<2x8xf32, #tpu.memory_space<vmem>>, vector<2x8xf32>
    %cst_61 = arith.constant dense<0.000000e+00> : vector<2x256xf32>
    %212 = tpu.matmul %211, %210, %cst_61 {dimension_numbers = #tpu.dot_dimension_numbers<[1], [0], [0], [1], [0, 0, 1, 1], [], []>} : vector<2x8xf32>, vector<8x256xf32>, vector<2x256xf32> -> vector<2x256xf32>
    %cst_62 = arith.constant dense<0.000000e+00> : vector<2xf32>
    %213 = vector.multi_reduction <add>, %212, %cst_62 [1] : vector<2x256xf32> to vector<2xf32>
    %214 = vector.shape_cast %213 : vector<2xf32> to vector<2x1xf32>
    %cst_63 = arith.constant dense<0.000000e+00> : vector<1xf32>
    %215 = vector.multi_reduction <add>, %214, %cst_63 [0] : vector<2x1xf32> to vector<1xf32>
    %216 = vector.shape_cast %215 : vector<1xf32> to vector<1x1xf32>
    %cst_64 = arith.constant 2.000000e+00 : f32
    %217 = vector.broadcast %cst_64 : f32 to vector<1x1xf32>
    %218 = arith.divf %216, %217 : vector<1x1xf32>
    %219 = vector.broadcast %218 : vector<1x1xf32> to vector<2x1xf32>
    %220 = arith.subf %214, %219 : vector<2x1xf32>
    %221 = arith.mulf %220, %220 : vector<2x1xf32>
    %cst_65 = arith.constant dense<0.000000e+00> : vector<1xf32>
    %222 = vector.multi_reduction <add>, %221, %cst_65 [0] : vector<2x1xf32> to vector<1xf32>
    %223 = vector.shape_cast %222 : vector<1xf32> to vector<1x1xf32>
    %cst_66 = arith.constant 2.000000e+00 : f32
    %224 = vector.broadcast %cst_66 : f32 to vector<1x1xf32>
    %225 = arith.divf %223, %224 : vector<1x1xf32>
    %226 = vector.broadcast %218 : vector<1x1xf32> to vector<2x1xf32>
    %227 = arith.subf %214, %226 : vector<2x1xf32>
    %cst_67 = arith.constant 9.99999974E-6 : f32
    %228 = vector.broadcast %cst_67 : f32 to vector<1x1xf32>
    %229 = arith.addf %225, %228 : vector<1x1xf32>
    %230 = math.rsqrt %229 : vector<1x1xf32>
    %231 = vector.broadcast %230 : vector<1x1xf32> to vector<2x1xf32>
    %232 = arith.mulf %227, %231 : vector<2x1xf32>
    %c0_68 = arith.constant 0 : index
    %c0_69 = arith.constant 0 : index
    %233 = vector.load %arg17[%c0_68, %c0_69] : memref<1x1xf32, #tpu.memory_space<vmem>>, vector<1x1xf32>
    %234 = vector.broadcast %233 : vector<1x1xf32> to vector<2x1xf32>
    %235 = arith.mulf %232, %234 : vector<2x1xf32>
    %c0_70 = arith.constant 0 : index
    %c0_71 = arith.constant 0 : index
    %236 = vector.load %arg18[%c0_70, %c0_71] : memref<1x1xf32, #tpu.memory_space<vmem>>, vector<1x1xf32>
    %237 = vector.broadcast %236 : vector<1x1xf32> to vector<2x1xf32>
    %238 = arith.addf %235, %237 : vector<2x1xf32>
    %239 = arith.negf %238 : vector<2x1xf32>
    %240 = math.exp %239 : vector<2x1xf32>
    %cst_72 = arith.constant 1.000000e+00 : f32
    %241 = vector.broadcast %cst_72 : f32 to vector<2x1xf32>
    %242 = arith.addf %241, %240 : vector<2x1xf32>
    %243 = arith.divf %241, %242 : vector<2x1xf32>
    %c0_73 = arith.constant 0 : index
    %c0_74 = arith.constant 0 : index
    %244 = vector.load %arg19[%c0_73, %c0_74] : memref<2x1xf32, #tpu.memory_space<vmem>>, vector<2x1xf32>
    tpu.vector_store %arg19[%c0_73, %c0_74], %243 {strides = array<i32>} : memref<2x1xf32, #tpu.memory_space<vmem>>, vector<2x1xf32>,
    return
  }
}

</mosaic_0001>

<bundles_post_ra>
// kernel: discriminator_forward.1
= control target key start
LH: loop header
LB: loop body
LE: loop exit
PB: predicated region body
PF: predicated region fallthrough
CT: control target
= control target key end

     0   :  { %v12802_v0 = vmov 0   ;;  %s12803_s27 = smov 32   ;;  %s12804_s21 = smov 64   ;;  %s18565_s3 = inlined_call_operand.vmem [shape: f32[2048,1], index: 3, kind: input, shape index: {}]   ;;  %s18566_s1 = inlined_call_operand.vmem [shape: bf16[128,32], index: 1, kind: input, shape index: {}]   ;;  %s18567_s0 = inlined_call_operand.vmem [shape: bf16[2048,128], index: 0, kind: input, shape index: {}]   ;;  %s18568_s2 = inlined_call_operand.vmem [shape: f32[1,32], index: 2, kind: input, shape index: {}]   ;;  %s18569_s4 = inlined_call_operand.vmem [shape: bf16[512,64], index: 4, kind: input, shape index: {}]   ;;  %s18570_s7 = inlined_call_operand.vmem [shape: bf16[512,128], index: 7, kind: input, shape index: {}]   ;;  %s18571_s5 = inlined_call_operand.vmem [shape: f32[1,64], index: 5, kind: input, shape index: {}]   ;;  %s18572_s6 = inlined_call_operand.vmem [shape: f32[1,64], index: 6, kind: input, shape index: {}]   ;;  %s18573_s8 = inlined_call_operand.vmem [shape: bf16[1024,128], index: 8, kind: input, shape index: {}]   ;;  %s18574_s12 = inlined_call_operand.vmem [shape: bf16[2048,256], index: 12, kind: input, shape index: {}]   ;;  %s18575_s11 = inlined_call_operand.vmem [shape: bf16[128,32], index: 11, kind: input, shape index: {}]   ;;  %s18576_s9 = inlined_call_operand.vmem [shape: f32[1,128], index: 9, kind: input, shape index: {}]   ;;  %s18577_s10 = inlined_call_operand.vmem [shape: f32[1,128], index: 10, kind: input, shape index: {}]   ;;  %s18578_s13 = inlined_call_operand.vmem [shape: f32[1,256], index: 13, kind: input, shape index: {}]   ;;  %s18579_s14 = inlined_call_operand.vmem [shape: f32[1,256], index: 14, kind: input, shape index: {}]   ;;  %s18580_s15 = inlined_call_operand.vmem [shape: f32[8,256], index: 15, kind: input, shape index: {}]   ;;  %s18581_s16 = inlined_call_operand.vmem [shape: f32[2,8], index: 16, kind: input, shape index: {}]   ;;  %s18582_s17 = inlined_call_operand.<no memory space> [shape: f32[1,1], index: 17, kind: input, shape index: {}]   ;;  %s18583_s18 = inlined_call_operand.<no memory space> [shape: f32[1,1], index: 18, kind: input, shape index: {}]   ;;  %s18584_s19 = inlined_call_operand.vmem [shape: f32[2,1], index: 19, kind: output, shape index: {}]  }
   0x1   :  { %18625 = sst [smem:[#allocation183_spill]] %s18565_s3  ;;  %11566 = vset.pattern.permute.xlu1 %v12802_v0  ;;  %11565 = vset.pattern.permute.xlu0 %v12802_v0 }
   0x2   :  { %18626 = sst [smem:[#allocation184_spill]] %s18566_s1 }
   0x3   :  { %18627 = sst [smem:[#allocation185_spill]] %s18567_s0 }
   0x4   :  { %18628 = sst [smem:[#allocation186_spill]] %s18568_s2 }
   0x5   :  { %s18629_s20 = sld [smem:[#allocation183_spill]] }
   0x6   :  { %s18630_s23 = sld [smem:[#allocation184_spill]] }
   0x7   :  { %s18631_s24 = sld [smem:[#allocation185_spill]] }
   0x8   :  { %s18690_s2 = sld [smem:[#allocation186_spill]] }
   0xb   :  { %v3099_v1 = vld [vmem:[%s18629_s20 + $0x380] sm:$0xff]  ;;  %v3100_v4 = vld [vmem:[%s18629_s20 + $0x388] sm:$0xff]  ;;  %v3101_v7 = vld [vmem:[%s18629_s20 + $0x390] sm:$0xff] }
   0xc   :  { %v3035_v2 = vld [vmem:[%s18629_s20 + $0x180] sm:$0xff]  ;;  %3805 = vperm.xlu0 %11565, %v3099_v1   ;;  %v12127_v3 = vld [vmem:[%s18630_s23 + $0x38] sm:$0xff]   ;;  %v3036_v5 = vld [vmem:[%s18629_s20 + $0x188] sm:$0xff] }
   0xd   :  { %3485 = vperm.xlu1 %11566, %v3035_v2   ;;  %11189 = vmatprep.subr.bf16.mxu0 %v12127_v3  ;;  %v12128_v6 = vld [vmem:[%s18630_s23 + $0x30] sm:$0xff]   ;;  %v3102_v8 = vld [vmem:[%s18629_s20 + $0x398] sm:$0xff]  ;;  %v12129_v9 = vld [vmem:[%s18630_s23 + $0x28] sm:$0xff]  }
   0xe   :  { %11190 = vmatpush3.bf16.msra.mxu0 %v12127_v3  ;;  %v3037_v10 = vld [vmem:[%s18629_s20 + $0x190] sm:$0xff]  ;;  %v3038_v11 = vld [vmem:[%s18629_s20 + $0x198] sm:$0xff]  ;;  %v12130_v12 = vld [vmem:[%s18630_s23 + $0x20] sm:$0xff]  }
   0xf   :  { %11191 = vmatprep.subr.bf16.mxu0 %v12128_v6  ;;  %v3103_v13 = vld [vmem:[%s18629_s20 + $0x3a0] sm:$0xff]  ;;  %v3104_v14 = vld [vmem:[%s18629_s20 + $0x3a8] sm:$0xff]  ;;  %v12131_v15 = vld [vmem:[%s18630_s23 + $0x18] sm:$0xff]  }
  0x10   :  { %3810 = vperm.xlu0 %11565, %v3100_v4   ;;  %v12135_v16 = vld [vmem:[%s18631_s24] sm:$0xff]   ;;  %v3040_v18 = vld [vmem:[%s18629_s20 + $0x1a8] sm:$0xff]  ;;  %v12132_v19 = vld [vmem:[%s18630_s23 + $0x10] sm:$0xff]  }
  0x11   :  { %3490 = vperm.xlu1 %11566, %v3036_v5   ;;  %v3039_v17 = vld [vmem:[%s18629_s20 + $0x1a0] sm:$0xff]  ;;  %11205 = vmatprep.mubr.bf16.mxu0 %v12135_v16  ;;  %v3105_v20 = vld [vmem:[%s18629_s20 + $0x3b0] sm:$0xff]  ;;  %v3106_v21 = vld [vmem:[%s18629_s20 + $0x3b8] sm:$0xff] }
  0x12   :  { %11192 = vmatpush3.bf16.msra.mxu0 %v12128_v6  ;;  %v12133_v22 = vld [vmem:[%s18630_s23 + $0x8] sm:$0xff]   ;;  %v3041_v23 = vld [vmem:[%s18629_s20 + $0x1b0] sm:$0xff]  ;;  %v3042_v24 = vld [vmem:[%s18629_s20 + $0x1b8] sm:$0xff] }
  0x13   :  { %11193 = vmatprep.subr.bf16.mxu0 %v12129_v9  ;;  %v12134_v25 = vld [vmem:[%s18630_s23] sm:$0xff]   ;;  %v3108_v27 = vld [vmem:[%s18629_s20 + $0x3c8] sm:$0xff]  ;;  %v12137_v29 = vld [vmem:[%s18631_s24 + $0x10] sm:$0xff]  }
  0x14   :  { %3815 = vperm.xlu0 %11565, %v3101_v7   ;;  %v3107_v26 = vld [vmem:[%s18629_s20 + $0x3c0] sm:$0xff]  ;;  %v12136_v28 = vld [vmem:[%s18631_s24 + $0x8] sm:$0xff]   ;;  %v3109_v32 = vld [vmem:[%s18629_s20 + $0x3d0] sm:$0xff] }
  0x15   :  { %3820 = vperm.xlu1 %11566, %v3102_v8   ;;  %v3043_v30 = vld [vmem:[%s18629_s20 + $0x1c0] sm:$0xff]  ;;  %v3044_v31 = vld [vmem:[%s18629_s20 + $0x1c8] sm:$0xff]  ;;  %v3110_v33 = vld [vmem:[%s18629_s20 + $0x3d8] sm:$0xff] }
  0x16   :  { %11194 = vmatpush3.bf16.msra.mxu0 %v12129_v9  ;;  %v12138_v34 = vld [vmem:[%s18631_s24 + $0x18] sm:$0xff]   ;;  %v12139_v35 = vld [vmem:[%s18631_s24 + $0x20] sm:$0xff]   ;;  %v3045_v36 = vld [vmem:[%s18629_s20 + $0x1d0] sm:$0xff] }
  0x17   :  { %11195 = vmatprep.subr.bf16.mxu0 %v12130_v12  ;;  %v3046_v37 = vld [vmem:[%s18629_s20 + $0x1d8] sm:$0xff]  ;;  %v3111_v38 = vld [vmem:[%s18629_s20 + $0x3e0] sm:$0xff]  ;;  %v3112_v39 = vld [vmem:[%s18629_s20 + $0x3e8] sm:$0xff] }
  0x18   :  { %3495 = vperm.xlu0 %11565, %v3037_v10   ;;  %v12140_v40 = vld [vmem:[%s18631_s24 + $0x28] sm:$0xff]   ;;  %v12141_v41 = vld [vmem:[%s18631_s24 + $0x30] sm:$0xff]   ;;  %v3047_v42 = vld [vmem:[%s18629_s20 + $0x1e0] sm:$0xff] }
  0x19   :  { %3500 = vperm.xlu1 %11566, %v3038_v11   ;;  %v3048_v43 = vld [vmem:[%s18629_s20 + $0x1e8] sm:$0xff]  ;;  %v3113_v44 = vld [vmem:[%s18629_s20 + $0x3f0] sm:$0xff]  ;;  %v3114_v45 = vld [vmem:[%s18629_s20 + $0x3f8] sm:$0xff] }
  0x1a   :  { %11196 = vmatpush3.bf16.msra.mxu0 %v12130_v12  ;;  %v12142_v46 = vld [vmem:[%s18631_s24 + $0x38] sm:$0xff]   ;;  %v12143_v47 = vld [vmem:[%s18631_s24 + $0x40] sm:$0xff]   ;;  %v3049_v48 = vld [vmem:[%s18629_s20 + $0x1f0] sm:$0xff] }
  0x1b   :  { %11197 = vmatprep.subr.bf16.mxu0 %v12131_v15  ;;  %v3050_v49 = vld [vmem:[%s18629_s20 + $0x1f8] sm:$0xff]  ;;  %v3067_v50 = vld [vmem:[%s18629_s20 + $0x280] sm:$0xff]  ;;  %v3068_v51 = vld [vmem:[%s18629_s20 + $0x288] sm:$0xff] }
  0x1c   :  { %3825 = vperm.xlu0 %11565, %v3103_v13   ;;  %v12144_v52 = vld [vmem:[%s18631_s24 + $0x48] sm:$0xff]   ;;  %v12145_v53 = vld [vmem:[%s18631_s24 + $0x50] sm:$0xff]   ;;  %v3083_v54 = vld [vmem:[%s18629_s20 + $0x300] sm:$0xff] }
  0x1d   :  { %3830 = vperm.xlu1 %11566, %v3104_v14   ;;  %v3084_v55 = vld [vmem:[%s18629_s20 + $0x308] sm:$0xff]  ;;  %v3003_v57 = vld [vmem:[%s18629_s20 + $0x80] sm:$0xff]  ;;  %v12146_v58 = vld [vmem:[%s18631_s24 + $0x58] sm:$0xff]  }
  0x1e   :  { %11198 = vmatpush3.bf16.msra.mxu0 %v12131_v15  ;;  %v3004_v56 = vld [vmem:[%s18629_s20 + $0x88] sm:$0xff]  ;;  %v12147_v59 = vld [vmem:[%s18631_s24 + $0x60] sm:$0xff]   ;;  %v12149_v1 = vld [vmem:[%s18631_s24 + $0x70] sm:$0xff]  }
  0x1f   :  { %11199 = vmatprep.subr.bf16.mxu0 %v12132_v19  ;;  %v3020_v60 = vld [vmem:[%s18629_s20 + $0x108] sm:$0xff]  ;;  %v3019_v61 = vld [vmem:[%s18629_s20 + $0x100] sm:$0xff]  ;;  %v3069_v4 = vld [vmem:[%s18629_s20 + $0x290] sm:$0xff] }
  0x20   :  { %3505 = vperm.xlu0 %11565, %v3039_v17   ;;  %v3228_v62 = vld [vmem:[%s18629_s20 + $0x788] sm:$0xff]  ;;  %v3227_v63 = vld [vmem:[%s18629_s20 + $0x780] sm:$0xff]  ;;  %v3070_v5 = vld [vmem:[%s18629_s20 + $0x298] sm:$0xff] }
  0x21   :  { %3510 = vperm.xlu1 %11566, %v3040_v18   ;;  %v12148_v0 = vld [vmem:[%s18631_s24 + $0x68] sm:$0xff]   ;;  %v3163_v3 = vld [vmem:[%s18629_s20 + $0x580] sm:$0xff]  ;;  %v12150_v6 = vld [vmem:[%s18631_s24 + $0x78] sm:$0xff]  }
  0x22   :  { %11200 = vmatpush3.bf16.msra.mxu0 %v12132_v19  ;;  %v3164_v2 = vld [vmem:[%s18629_s20 + $0x588] sm:$0xff]  ;;  %v12151_v7 = vld [vmem:[%s18631_s24 + $0x80] sm:$0xff]   ;;  %v3085_v8 = vld [vmem:[%s18629_s20 + $0x310] sm:$0xff] }
  0x23   :  { %11201 = vmatprep.subr.bf16.mxu0 %v12133_v22  ;;  %v3086_v9 = vld [vmem:[%s18629_s20 + $0x318] sm:$0xff]  ;;  %v3005_v11 = vld [vmem:[%s18629_s20 + $0x90] sm:$0xff]  ;;  %v12152_v12 = vld [vmem:[%s18631_s24 + $0x88] sm:$0xff]  }
  0x24   :  { %3835 = vperm.xlu0 %11565, %v3105_v20   ;;  %v3006_v10 = vld [vmem:[%s18629_s20 + $0x98] sm:$0xff]  ;;  %v12153_v13 = vld [vmem:[%s18631_s24 + $0x90] sm:$0xff]   ;;  %v12155_v19 = vld [vmem:[%s18631_s24 + $0xa0] sm:$0xff]  }
  0x25   :  { %3840 = vperm.xlu1 %11566, %v3106_v21   ;;  %v3022_v14 = vld [vmem:[%s18629_s20 + $0x118] sm:$0xff]  ;;  %v3021_v15 = vld [vmem:[%s18629_s20 + $0x110] sm:$0xff] }
  0x26   :  { %11202 = vmatpush3.bf16.msra.mxu0 %v12133_v22  ;;  %v3230_v16 = vld [vmem:[%s18629_s20 + $0x798] sm:$0xff]  ;;  %v3229_v17 = vld [vmem:[%s18629_s20 + $0x790] sm:$0xff]  ;;  %v3071_v22 = vld [vmem:[%s18629_s20 + $0x2a0] sm:$0xff] }
  0x27   :  { %11203 = vmatprep.subr.bf16.mxu0 %v12134_v25  ;;  %v12154_v18 = vld [vmem:[%s18631_s24 + $0x98] sm:$0xff]   ;;  %v3165_v21 = vld [vmem:[%s18629_s20 + $0x590] sm:$0xff] }
  0x28   :  { %3515 = vperm.xlu0 %11565, %v3041_v23   ;;  %v3166_v20 = vld [vmem:[%s18629_s20 + $0x598] sm:$0xff]  ;;  %v3072_v23 = vld [vmem:[%s18629_s20 + $0x2a8] sm:$0xff] }
  0x29   :  { %3520 = vperm.xlu1 %11566, %v3042_v24   ;;  %v12156_v24 = vld [vmem:[%s18631_s24 + $0xa8] sm:$0xff]  }
  0x2a   :  { %11204 = vmatpush3.bf16.msra.mxu0 %v12134_v25  ;;  %v12157_v25 = vld [vmem:[%s18631_s24 + $0xb0] sm:$0xff]  }
  0x2c   :  { %3845 = vperm.xlu0 %11565, %v3107_v26   ;;  %v3087_v26 = vld [vmem:[%s18629_s20 + $0x320] sm:$0xff] }
  0x2d   :  { %3850 = vperm.xlu1 %11566, %v3108_v27   ;;  %11206 = vmatmul.mubr.bf16.vlgmr.msra.gmra.mxu0 %v12136_v28  ;;  %v3088_v27 = vld [vmem:[%s18629_s20 + $0x328] sm:$0xff] }
  0x2e   :  { %11209 = vmatprep.mubr.bf16.mxu0 %v12137_v29  ;;  %v3008_v28 = vld [vmem:[%s18629_s20 + $0xa8] sm:$0xff]  ;;  %v3007_v29 = vld [vmem:[%s18629_s20 + $0xa0] sm:$0xff] }
  0x30   :  { %3525 = vperm.xlu0 %11565, %v3043_v30   ;;  %v12158_v30 = vld [vmem:[%s18631_s24 + $0xb8] sm:$0xff]  }
  0x31   :  { %3530 = vperm.xlu1 %11566, %v3044_v31   ;;  %v12159_v31 = vld [vmem:[%s18631_s24 + $0xc0] sm:$0xff]  }
  0x34   :  { %3855 = vperm.xlu0 %11565, %v3109_v32   ;;  %v3024_v32 = vld [vmem:[%s18629_s20 + $0x128] sm:$0xff] }
  0x35   :  { %3860 = vperm.xlu1 %11566, %v3110_v33   ;;  %11210 = vmatmul.mubr.bf16.gmra.mxu0 %v12138_v34  ;;  %v3023_v33 = vld [vmem:[%s18629_s20 + $0x120] sm:$0xff] }
  0x36   :  { %11213 = vmatprep.mubr.bf16.mxu0 %v12139_v35 }
  0x38   :  { %3535 = vperm.xlu0 %11565, %v3045_v36   ;;  %v3232_v36 = vld [vmem:[%s18629_s20 + $0x7a8] sm:$0xff] }
  0x39   :  { %3540 = vperm.xlu1 %11566, %v3046_v37   ;;  %v3231_v37 = vld [vmem:[%s18629_s20 + $0x7a0] sm:$0xff] }
  0x3c   :  { %3865 = vperm.xlu0 %11565, %v3111_v38   ;;  %v12160_v38 = vld [vmem:[%s18631_s24 + $0xc8] sm:$0xff]  }
  0x3d   :  { %3870 = vperm.xlu1 %11566, %v3112_v39   ;;  %11214 = vmatmul.mubr.bf16.gmra.mxu0 %v12140_v40 }
  0x3e   :  { %11217 = vmatprep.mubr.bf16.mxu0 %v12141_v41  ;;  %v12161_v41 = vld [vmem:[%s18631_s24 + $0xd0] sm:$0xff]  }
  0x40   :  { %3545 = vperm.xlu0 %11565, %v3047_v42   ;;  %v3168_v42 = vld [vmem:[%s18629_s20 + $0x5a8] sm:$0xff] }
  0x41   :  { %3550 = vperm.xlu1 %11566, %v3048_v43   ;;  %v3167_v43 = vld [vmem:[%s18629_s20 + $0x5a0] sm:$0xff] }
  0x44   :  { %3875 = vperm.xlu0 %11565, %v3113_v44  }
  0x45   :  { %3880 = vperm.xlu1 %11566, %v3114_v45   ;;  %11218 = vmatmul.mubr.bf16.gmra.mxu0 %v12142_v46  ;;  %v3073_v46 = vld [vmem:[%s18629_s20 + $0x2b0] sm:$0xff] }
  0x46   :  { %11221 = vmatprep.mubr.bf16.mxu0 %v12143_v47  ;;  %v3074_v47 = vld [vmem:[%s18629_s20 + $0x2b8] sm:$0xff] }
  0x48   :  { %3555 = vperm.xlu0 %11565, %v3049_v48   ;;  %v12162_v48 = vld [vmem:[%s18631_s24 + $0xd8] sm:$0xff]  }
  0x49   :  { %3560 = vperm.xlu1 %11566, %v3050_v49  }
  0x4c   :  { %3645 = vperm.xlu0 %11565, %v3067_v50  }
  0x4d   :  { %3650 = vperm.xlu1 %11566, %v3068_v51   ;;  %11222 = vmatmul.mubr.bf16.gmra.mxu0 %v12144_v52  ;;  %v12163_v51 = vld [vmem:[%s18631_s24 + $0xe0] sm:$0xff]   ;;  %v3089_v52 = vld [vmem:[%s18629_s20 + $0x330] sm:$0xff] }
  0x4e   :  { %11225 = vmatprep.mubr.bf16.mxu0 %v12145_v53  ;;  %v3090_v53 = vld [vmem:[%s18629_s20 + $0x338] sm:$0xff] }
  0x50   :  { %3725 = vperm.xlu0 %11565, %v3083_v54  }
  0x51   :  { %3730 = vperm.xlu1 %11566, %v3084_v55  }
  0x54   :  { %3325 = vperm.xlu0 %11565, %v3003_v57   ;;  %v3009_v57 = vld [vmem:[%s18629_s20 + $0xb0] sm:$0xff] }
  0x55   :  { %3330 = vperm.xlu1 %11566, %v3004_v56   ;;  %11226 = vmatmul.mubr.bf16.gmra.mxu0 %v12146_v58  ;;  %v3010_v56 = vld [vmem:[%s18629_s20 + $0xb8] sm:$0xff]  ;;  %v12164_v58 = vld [vmem:[%s18631_s24 + $0xe8] sm:$0xff]  }
  0x56   :  { %11229 = vmatprep.mubr.bf16.mxu0 %v12147_v59 }
  0x58   :  { %3405 = vperm.xlu0 %11565, %v3019_v61   ;;  %v12165_v61 = vld [vmem:[%s18631_s24 + $0xf0] sm:$0xff]  }
  0x59   :  { %3410 = vperm.xlu1 %11566, %v3020_v60  }
  0x5c   :  { %4445 = vperm.xlu0 %11565, %v3227_v63   ;;  %v3025_v63 = vld [vmem:[%s18629_s20 + $0x130] sm:$0xff] }
  0x5d   :  { %4450 = vperm.xlu1 %11566, %v3228_v62   ;;  %11230 = vmatmul.mubr.bf16.gmra.mxu0 %v12148_v0  ;;  %v3026_v62 = vld [vmem:[%s18629_s20 + $0x138] sm:$0xff] }
  0x5e   :  { %11233 = vmatprep.mubr.bf16.mxu0 %v12149_v1 }
  0x60   :  { %4125 = vperm.xlu0 %11565, %v3163_v3   ;;  %v3233_v3 = vld [vmem:[%s18629_s20 + $0x7b0] sm:$0xff] }
  0x61   :  { %4130 = vperm.xlu1 %11566, %v3164_v2   ;;  %v3234_v2 = vld [vmem:[%s18629_s20 + $0x7b8] sm:$0xff] }
  0x64   :  { %3660 = vperm.xlu0 %11565, %v3070_v5  }
  0x65   :  { %3655 = vperm.xlu1 %11566, %v3069_v4   ;;  %11234 = vmatmul.mubr.bf16.gmra.mxu0 %v12150_v6  ;;  %v12166_v4 = vld [vmem:[%s18631_s24 + $0xf8] sm:$0xff]  }
  0x66   :  { %11237 = vmatprep.mubr.bf16.mxu0 %v12151_v7  ;;  %v12167_v7 = vld [vmem:[%s18631_s24 + $0x100] sm:$0xff]  }
  0x68   :  { %3740 = vperm.xlu0 %11565, %v3086_v9   ;;  %v3169_v9 = vld [vmem:[%s18629_s20 + $0x5b0] sm:$0xff] }
  0x69   :  { %3735 = vperm.xlu1 %11566, %v3085_v8   ;;  %v3170_v8 = vld [vmem:[%s18629_s20 + $0x5b8] sm:$0xff] }
  0x6c   :  { %3335 = vperm.xlu0 %11565, %v3005_v11  }
  0x6d   :  { %3340 = vperm.xlu1 %11566, %v3006_v10   ;;  %11238 = vmatmul.mubr.bf16.gmra.mxu0 %v12152_v12  ;;  %v3075_v12 = vld [vmem:[%s18629_s20 + $0x2c0] sm:$0xff] }
  0x6e   :  { %11241 = vmatprep.mubr.bf16.mxu0 %v12153_v13  ;;  %v3076_v13 = vld [vmem:[%s18629_s20 + $0x2c8] sm:$0xff] }
  0x70   :  { %3415 = vperm.xlu0 %11565, %v3021_v15  }
  0x71   :  { %3420 = vperm.xlu1 %11566, %v3022_v14   ;;  %v12168_v14 = vld [vmem:[%s18631_s24 + $0x108] sm:$0xff]  }
  0x74   :  { %4455 = vperm.xlu0 %11565, %v3229_v17   ;;  %v12169_v17 = vld [vmem:[%s18631_s24 + $0x110] sm:$0xff]  }
  0x75   :  { %4460 = vperm.xlu1 %11566, %v3230_v16   ;;  %11242 = vmatmul.mubr.bf16.gmra.mxu0 %v12154_v18  ;;  %v3091_v18 = vld [vmem:[%s18629_s20 + $0x340] sm:$0xff] }
  0x76   :  { %11245 = vmatprep.mubr.bf16.mxu0 %v12155_v19  ;;  %v3092_v19 = vld [vmem:[%s18629_s20 + $0x348] sm:$0xff] }
  0x78   :  { %4135 = vperm.xlu0 %11565, %v3165_v21  }
  0x79   :  { %4140 = vperm.xlu1 %11566, %v3166_v20  }
  0x7c   :  { %3670 = vperm.xlu0 %11565, %v3072_v23   ;;  %v3011_v23 = vld [vmem:[%s18629_s20 + $0xc0] sm:$0xff] }
  0x7d   :  { %3665 = vperm.xlu1 %11566, %v3071_v22   ;;  %11246 = vmatmul.mubr.bf16.gmra.mxu0 %v12156_v24  ;;  %v3012_v22 = vld [vmem:[%s18629_s20 + $0xc8] sm:$0xff]  ;;  %v12170_v24 = vld [vmem:[%s18631_s24 + $0x118] sm:$0xff]  }
  0x7e   :  { %11249 = vmatprep.mubr.bf16.mxu0 %v12157_v25 }
  0x80   :  { %3750 = vperm.xlu0 %11565, %v3088_v27   ;;  %v12171_v27 = vld [vmem:[%s18631_s24 + $0x120] sm:$0xff]  }
  0x81   :  { %3745 = vperm.xlu1 %11566, %v3087_v26  }
  0x84   :  { %3345 = vperm.xlu0 %11565, %v3007_v29   ;;  %v3027_v29 = vld [vmem:[%s18629_s20 + $0x140] sm:$0xff] }
  0x85   :  { %3350 = vperm.xlu1 %11566, %v3008_v28   ;;  %11250 = vmatmul.mubr.bf16.gmra.mxu0 %v12158_v30  ;;  %v3028_v28 = vld [vmem:[%s18629_s20 + $0x148] sm:$0xff] }
  0x86   :  { %11253 = vmatprep.mubr.bf16.mxu0 %v12159_v31 }
  0x87   :  { %v13197_v34 = vpop.permute.xlu0 %3805 }
  0x88   :  { %18632 = vst [vmem:[#allocation4_spill] sm:$0xff] %v13197_v34  ;;  %v13199_v35 = vpop.permute.xlu1 %3485  ;;  %3425 = vperm.xlu0 %11565, %v3023_v33   ;;  %v3235_v33 = vld [vmem:[%s18629_s20 + $0x7c0] sm:$0xff] }
  0x89   :  { %3430 = vperm.xlu1 %11566, %v3024_v32   ;;  %v3236_v32 = vld [vmem:[%s18629_s20 + $0x7c8] sm:$0xff]  ;;  %v3147_v34 = vld [vmem:[%s18629_s20 + $0x500] sm:$0xff] }
  0x8b   :  { %v13210_v39 = vpop.permute.xlu0 %3810 }
  0x8c   :  { %18633 = vst [vmem:[#allocation5_spill] sm:$0xff] %v13210_v39  ;;  %v13212_v40 = vpop.permute.xlu1 %3490  ;;  %4465 = vperm.xlu0 %11565, %v3231_v37  }
  0x8d   :  { %4470 = vperm.xlu1 %11566, %v3232_v36   ;;  %11254 = vmatmul.mubr.bf16.gmra.mxu0 %v12160_v38  ;;  %v12172_v36 = vld [vmem:[%s18631_s24 + $0x128] sm:$0xff]  }
  0x8e   :  { %11257 = vmatprep.mubr.bf16.mxu0 %v12161_v41  ;;  %v12173_v41 = vld [vmem:[%s18631_s24 + $0x130] sm:$0xff]  }
  0x8f   :  { %v13223_v44 = vpop.permute.xlu0 %3815 }
  0x90   :  { %18634 = vst [vmem:[#allocation6_spill] sm:$0xff] %v13223_v44  ;;  %v13225_v45 = vpop.permute.xlu1 %3820  ;;  %4145 = vperm.xlu0 %11565, %v3167_v43   ;;  %v3171_v43 = vld [vmem:[%s18629_s20 + $0x5c0] sm:$0xff] }
  0x91   :  { %18635 = vst [vmem:[#allocation7_spill] sm:$0xff] %v13225_v45  ;;  %4150 = vperm.xlu1 %11566, %v3168_v42   ;;  %v3172_v42 = vld [vmem:[%s18629_s20 + $0x5c8] sm:$0xff] }
  0x93   :  { %v13236_v49 = vpop.permute.xlu0 %3495 }
  0x94   :  { %v13238_v50 = vpop.permute.xlu1 %3500  ;;  %3680 = vperm.xlu0 %11565, %v3074_v47  }
  0x95   :  { %3675 = vperm.xlu1 %11566, %v3073_v46   ;;  %11258 = vmatmul.mubr.bf16.gmra.mxu0 %v12162_v48  ;;  %v3077_v48 = vld [vmem:[%s18629_s20 + $0x2d0] sm:$0xff] }
  0x96   :  { %11261 = vmatprep.mubr.bf16.mxu0 %v12163_v51  ;;  %v3078_v51 = vld [vmem:[%s18629_s20 + $0x2d8] sm:$0xff] }
  0x97   :  { %v13249_v54 = vpop.permute.xlu0 %3825 }
  0x98   :  { %18636 = vst [vmem:[#allocation8_spill] sm:$0xff] %v13249_v54  ;;  %v13251_v55 = vpop.permute.xlu1 %3830  ;;  %3760 = vperm.xlu0 %11565, %v3090_v53  }
  0x99   :  { %18637 = vst [vmem:[#allocation9_spill] sm:$0xff] %v13251_v55  ;;  %3755 = vperm.xlu1 %11566, %v3089_v52   ;;  %v12174_v52 = vld [vmem:[%s18631_s24 + $0x138] sm:$0xff]  }
  0x9b   :  { %v13262_v59 = vpop.permute.xlu0 %3505 }
  0x9c   :  { %v13264_v60 = vpop.permute.xlu1 %3510  ;;  %3355 = vperm.xlu0 %11565, %v3009_v57   ;;  %v12175_v57 = vld [vmem:[%s18631_s24 + $0x140] sm:$0xff]  }
  0x9d   :  { %3360 = vperm.xlu1 %11566, %v3010_v56   ;;  %11262 = vmatmul.mubr.bf16.gmra.mxu0 %v12164_v58  ;;  %v3093_v58 = vld [vmem:[%s18629_s20 + $0x350] sm:$0xff] }
  0x9e   :  { %11265 = vmatprep.mubr.bf16.mxu0 %v12165_v61  ;;  %v3094_v61 = vld [vmem:[%s18629_s20 + $0x358] sm:$0xff] }
  0x9f   :  { %v13275_v0 = vpop.permute.xlu0 %3835 }
  0xa0   :  { %18638 = vst [vmem:[#allocation10_spill] sm:$0xff] %v13275_v0  ;;  %v13277_v1 = vpop.permute.xlu1 %3840  ;;  %3435 = vperm.xlu0 %11565, %v3025_v63  }
  0xa1   :  { %18639 = vst [vmem:[#allocation11_spill] sm:$0xff] %v13277_v1  ;;  %3440 = vperm.xlu1 %11566, %v3026_v62  }
  0xa3   :  { %v13288_v5 = vpop.permute.xlu0 %3515 }
  0xa4   :  { %v13290_v6 = vpop.permute.xlu1 %3520  ;;  %4475 = vperm.xlu0 %11565, %v3233_v3   ;;  %v3013_v3 = vld [vmem:[%s18629_s20 + $0xd0] sm:$0xff] }
  0xa5   :  { %4480 = vperm.xlu1 %11566, %v3234_v2   ;;  %11266 = vmatmul.mubr.bf16.gmra.mxu0 %v12166_v4  ;;  %v3014_v2 = vld [vmem:[%s18629_s20 + $0xd8] sm:$0xff]  ;;  %v12176_v4 = vld [vmem:[%s18631_s24 + $0x148] sm:$0xff]  }
  0xa6   :  { %11269 = vmatprep.mubr.bf16.mxu0 %v12167_v7 }
  0xa7   :  { %v13301_v10 = vpop.permute.xlu0 %3845 }
  0xa8   :  { %18640 = vst [vmem:[#allocation12_spill] sm:$0xff] %v13301_v10  ;;  %v13303_v11 = vpop.permute.xlu1 %3850  ;;  %4155 = vperm.xlu0 %11565, %v3169_v9   ;;  %v12177_v9 = vld [vmem:[%s18631_s24 + $0x150] sm:$0xff]  }
  0xa9   :  { %18641 = vst [vmem:[#allocation13_spill] sm:$0xff] %v13303_v11  ;;  %4160 = vperm.xlu1 %11566, %v3170_v8  }
  0xab   :  { %v13314_v15 = vpop.permute.xlu0 %3525 }
  0xac   :  { %v13316_v16 = vpop.permute.xlu1 %3530  ;;  %3690 = vperm.xlu0 %11565, %v3076_v13   ;;  %v3029_v13 = vld [vmem:[%s18629_s20 + $0x150] sm:$0xff] }
  0xad   :  { %3685 = vperm.xlu1 %11566, %v3075_v12   ;;  %11270 = vmatmul.mubr.bf16.gmra.mxu0 %v12168_v14  ;;  %v3030_v12 = vld [vmem:[%s18629_s20 + $0x158] sm:$0xff] }
  0xae   :  { %11273 = vmatprep.mubr.bf16.mxu0 %v12169_v17 }
  0xaf   :  { %v13327_v20 = vpop.permute.xlu0 %3855 }
  0xb0   :  { %18642 = vst [vmem:[#allocation14_spill] sm:$0xff] %v13327_v20  ;;  %v13329_v21 = vpop.permute.xlu1 %3860  ;;  %3770 = vperm.xlu0 %11565, %v3092_v19   ;;  %v3237_v19 = vld [vmem:[%s18629_s20 + $0x7d0] sm:$0xff]  ;;  %v3132_v20 = vld [vmem:[%s18629_s20 + $0x488] sm:$0xff] }
  0xb1   :  { %18643 = vst [vmem:[#allocation15_spill] sm:$0xff] %v13329_v21  ;;  %3765 = vperm.xlu1 %11566, %v3091_v18   ;;  %v3238_v18 = vld [vmem:[%s18629_s20 + $0x7d8] sm:$0xff]  ;;  %v12197_v21 = vld [vmem:[%s18631_s24 + $0x1f0] sm:$0xff]  }
  0xb3   :  { %v13340_v25 = vpop.permute.xlu0 %3535 }
  0xb4   :  { %v13342_v26 = vpop.permute.xlu1 %3540  ;;  %3365 = vperm.xlu0 %11565, %v3011_v23  }
  0xb5   :  { %3370 = vperm.xlu1 %11566, %v3012_v22   ;;  %11274 = vmatmul.mubr.bf16.gmra.mxu0 %v12170_v24  ;;  %v12178_v22 = vld [vmem:[%s18631_s24 + $0x158] sm:$0xff]  }
  0xb6   :  { %11277 = vmatprep.mubr.bf16.mxu0 %v12171_v27  ;;  %v12179_v27 = vld [vmem:[%s18631_s24 + $0x160] sm:$0xff]  }
  0xb7   :  { %v13353_v30 = vpop.permute.xlu0 %3865 }
  0xb8   :  { %18644 = vst [vmem:[#allocation16_spill] sm:$0xff] %v13353_v30  ;;  %v13355_v31 = vpop.permute.xlu1 %3870  ;;  %3445 = vperm.xlu0 %11565, %v3027_v29   ;;  %v3173_v29 = vld [vmem:[%s18629_s20 + $0x5d0] sm:$0xff] }
  0xb9   :  { %18645 = vst [vmem:[#allocation17_spill] sm:$0xff] %v13355_v31  ;;  %3450 = vperm.xlu1 %11566, %v3028_v28   ;;  %v3174_v28 = vld [vmem:[%s18629_s20 + $0x5d8] sm:$0xff] }
  0xbb   :  { %v13366_v37 = vpop.permute.xlu0 %3545 }
  0xbc   :  { %v13368_v38 = vpop.permute.xlu1 %3550  ;;  %4485 = vperm.xlu0 %11565, %v3235_v33  }
  0xbd   :  { %4490 = vperm.xlu1 %11566, %v3236_v32   ;;  %11278 = vmatmul.mubr.bf16.gmra.mxu0 %v12172_v36  ;;  %v3079_v36 = vld [vmem:[%s18629_s20 + $0x2e0] sm:$0xff] }
  0xbe   :  { %11281 = vmatprep.mubr.bf16.mxu0 %v12173_v41  ;;  %v3080_v41 = vld [vmem:[%s18629_s20 + $0x2e8] sm:$0xff] }
  0xbf   :  { %v13379_v46 = vpop.permute.xlu0 %3875 }
  0xc0   :  { %18646 = vst [vmem:[#allocation18_spill] sm:$0xff] %v13379_v46  ;;  %v13381_v47 = vpop.permute.xlu1 %3880  ;;  %4165 = vperm.xlu0 %11565, %v3171_v43  }
  0xc1   :  { %18647 = vst [vmem:[#allocation19_spill] sm:$0xff] %v13381_v47  ;;  %4170 = vperm.xlu1 %11566, %v3172_v42   ;;  %v12180_v42 = vld [vmem:[%s18631_s24 + $0x168] sm:$0xff]  }
  0xc3   :  { %v13392_v53 = vpop.permute.xlu0 %3555 }
  0xc4   :  { %v13394_v56 = vpop.permute.xlu1 %3560  ;;  %3700 = vperm.xlu0 %11565, %v3078_v51   ;;  %v12181_v51 = vld [vmem:[%s18631_s24 + $0x170] sm:$0xff]  }
  0xc5   :  { %3695 = vperm.xlu1 %11566, %v3077_v48   ;;  %11282 = vmatmul.mubr.bf16.gmra.mxu0 %v12174_v52  ;;  %v3095_v52 = vld [vmem:[%s18629_s20 + $0x360] sm:$0xff] }
  0xc6   :  { %11285 = vmatprep.mubr.bf16.mxu0 %v12175_v57  ;;  %v3096_v57 = vld [vmem:[%s18629_s20 + $0x368] sm:$0xff] }
  0xc7   :  { %v13405_v62 = vpop.permute.xlu0 %3645 }
  0xc8   :  { %v13407_v63 = vpop.permute.xlu1 %3650  ;;  %3780 = vperm.xlu0 %11565, %v3094_v61  }
  0xc9   :  { %3775 = vperm.xlu1 %11566, %v3093_v58  }
  0xcb   :  { %v13418_v7 = vpop.permute.xlu0 %3725 }
  0xcc   :  { %18648 = vst [vmem:[#allocation20_spill] sm:$0xff] %v13418_v7  ;;  %v13420_v8 = vpop.permute.xlu1 %3730  ;;  %3375 = vperm.xlu0 %11565, %v3013_v3   ;;  %v3015_v3 = vld [vmem:[%s18629_s20 + $0xe0] sm:$0xff] }
  0xcd   :  { %18649 = vst [vmem:[#allocation21_spill] sm:$0xff] %v13420_v8  ;;  %3380 = vperm.xlu1 %11566, %v3014_v2   ;;  %11286 = vmatmul.mubr.bf16.gmra.mxu0 %v12176_v4  ;;  %v3016_v2 = vld [vmem:[%s18629_s20 + $0xe8] sm:$0xff]  ;;  %v12182_v4 = vld [vmem:[%s18631_s24 + $0x178] sm:$0xff]  }
  0xce   :  { %11289 = vmatprep.mubr.bf16.mxu0 %v12177_v9  ;;  %v3034_v8 = vld [vmem:[%s18629_s20 + $0x178] sm:$0xff] }
  0xcf   :  { %v13433_v17 = vpop.permute.xlu0 %3325 }
  0xd0   :  { %v13431_v14 = vpop.permute.xlu1 %3330  ;;  %3455 = vperm.xlu0 %11565, %v3029_v13   ;;  %v12183_v13 = vld [vmem:[%s18631_s24 + $0x180] sm:$0xff]  }
  0xd1   :  { %3460 = vperm.xlu1 %11566, %v3030_v12  }
  0xd3   :  { %v13446_v24 = vpop.permute.xlu0 %3405 }
  0xd4   :  { %v13444_v23 = vpop.permute.xlu1 %3410  ;;  %18651 = vst [vmem:[#allocation23_spill] sm:$0xff] %v13446_v24  ;;  %4495 = vperm.xlu0 %11565, %v3237_v19   ;;  %v3031_v19 = vld [vmem:[%s18629_s20 + $0x160] sm:$0xff] }
  0xd5   :  { %18650 = vst [vmem:[#allocation22_spill] sm:$0xff] %v13444_v23  ;;  %4500 = vperm.xlu1 %11566, %v3238_v18   ;;  %11290 = vmatmul.mubr.bf16.gmra.mxu0 %v12178_v22  ;;  %v3032_v18 = vld [vmem:[%s18629_s20 + $0x168] sm:$0xff]  ;;  %v3135_v24 = vld [vmem:[%s18629_s20 + $0x4a0] sm:$0xff] }
  0xd6   :  { %11293 = vmatprep.mubr.bf16.mxu0 %v12179_v27 }
  0xd7   :  { %v13459_v33 = vpop.permute.xlu0 %4445 }
  0xd8   :  { %v13457_v32 = vpop.permute.xlu1 %4450  ;;  %18653 = vst [vmem:[#allocation25_spill] sm:$0xff] %v13459_v33  ;;  %4175 = vperm.xlu0 %11565, %v3173_v29   ;;  %v3239_v29 = vld [vmem:[%s18629_s20 + $0x7e0] sm:$0xff]  ;;  %v3097_v33 = vld [vmem:[%s18629_s20 + $0x370] sm:$0xff] }
  0xd9   :  { %18652 = vst [vmem:[#allocation24_spill] sm:$0xff] %v13457_v32  ;;  %4180 = vperm.xlu1 %11566, %v3174_v28   ;;  %v3240_v28 = vld [vmem:[%s18629_s20 + $0x7e8] sm:$0xff]  ;;  %v3098_v32 = vld [vmem:[%s18629_s20 + $0x378] sm:$0xff] }
  0xdb   :  { %v13472_v48 = vpop.permute.xlu0 %4125 }
  0xdc   :  { %v13470_v43 = vpop.permute.xlu1 %4130  ;;  %18655 = vst [vmem:[#allocation27_spill] sm:$0xff] %v13472_v48  ;;  %3710 = vperm.xlu0 %11565, %v3080_v41  }
  0xdd   :  { %18654 = vst [vmem:[#allocation26_spill] sm:$0xff] %v13470_v43  ;;  %3705 = vperm.xlu1 %11566, %v3079_v36   ;;  %11294 = vmatmul.mubr.bf16.gmra.mxu0 %v12180_v42  ;;  %v12184_v36 = vld [vmem:[%s18631_s24 + $0x188] sm:$0xff]   ;;  %v3017_v43 = vld [vmem:[%s18629_s20 + $0xf0] sm:$0xff] }
  0xde   :  { %11297 = vmatprep.mubr.bf16.mxu0 %v12181_v51  ;;  %v12185_v51 = vld [vmem:[%s18631_s24 + $0x190] sm:$0xff]  }
  0xdf   :  { %v13485_v61 = vpop.permute.xlu0 %3660 }
  0xe0   :  { %v13483_v58 = vpop.permute.xlu1 %3655  ;;  %3790 = vperm.xlu0 %11565, %v3096_v57   ;;  %v3175_v57 = vld [vmem:[%s18629_s20 + $0x5e0] sm:$0xff] }
  0xe1   :  { %3785 = vperm.xlu1 %11566, %v3095_v52   ;;  %v3176_v52 = vld [vmem:[%s18629_s20 + $0x5e8] sm:$0xff] }
  0xe3   :  { %v13498_v12 = vpop.permute.xlu0 %3740 }
  0xe4   :  { %v13496_v9 = vpop.permute.xlu1 %3735  ;;  %18657 = vst [vmem:[#allocation29_spill] sm:$0xff] %v13498_v12  ;;  %3385 = vperm.xlu0 %11565, %v3015_v3   ;;  %v3033_v12 = vld [vmem:[%s18629_s20 + $0x170] sm:$0xff] }
  0xe5   :  { %18656 = vst [vmem:[#allocation28_spill] sm:$0xff] %v13496_v9  ;;  %3390 = vperm.xlu1 %11566, %v3016_v2   ;;  %11298 = vmatmul.mubr.bf16.gmra.mxu0 %v12182_v4  ;;  %v3051_v9 = vld [vmem:[%s18629_s20 + $0x200] sm:$0xff] }
  0xe6   :  { %11301 = vmatprep.mubr.bf16.mxu0 %v12183_v13 }
  0xe7   :  { %v13511_v27 = vpop.permute.xlu0 %3335 }
  0xe8   :  { %v13509_v22 = vpop.permute.xlu1 %3340  ;;  %3465 = vperm.xlu0 %11565, %v3031_v19   ;;  %v3082_v19 = vld [vmem:[%s18629_s20 + $0x2f8] sm:$0xff] }
  0xe9   :  { %3470 = vperm.xlu1 %11566, %v3032_v18   ;;  %v3081_v18 = vld [vmem:[%s18629_s20 + $0x2f0] sm:$0xff] }
  0xeb   :  { %v13524_v42 = vpop.permute.xlu0 %3415 }
  0xec   :  { %v13522_v41 = vpop.permute.xlu1 %3420  ;;  %18659 = vst [vmem:[#allocation31_spill] sm:$0xff] %v13524_v42  ;;  %4505 = vperm.xlu0 %11565, %v3239_v29   ;;  %v12186_v29 = vld [vmem:[%s18631_s24 + $0x198] sm:$0xff]  }
  0xed   :  { %18658 = vst [vmem:[#allocation30_spill] sm:$0xff] %v13522_v41  ;;  %4510 = vperm.xlu1 %11566, %v3240_v28   ;;  %v13535_v2 = vpop.f32.mrf.mxu0  ;;  %11302 = vmatmul.mubr.bf16.gmra.mxu0 %v12184_v36  ;;  %v2992_v41 = vld [vmem:[%s18629_s20 + $0x28] sm:$0xff] }
  0xee   :  { %18660 = vst [vmem:[#allocation32_spill] sm:$0xff] %v13535_v2  ;;  %11305 = vmatprep.mubr.bf16.mxu0 %v12185_v51  ;;  %v3211_v2 = vld [vmem:[%s18629_s20 + $0x700] sm:$0xff] }
  0xef   :  { %v13539_v4 = vpop.permute.xlu0 %4455  ;;  %v13541_v13 = vpop.f32.mrf.mxu0 }
  0xf0   :  { %v13537_v3 = vpop.permute.xlu1 %4460  ;;  %18662 = vst [vmem:[#allocation34_spill] sm:$0xff] %v13539_v4  ;;  %4185 = vperm.xlu0 %11565, %v3175_v57   ;;  %18663 = vst [vmem:[#allocation35_spill] sm:$0xff] %v13541_v13  ;;  %v13698_v13 = vld [vmem:[%s18690_s2] ss:$0 sm:$0xff] }
  0xf1   :  { %18661 = vst [vmem:[#allocation33_spill] sm:$0xff] %v13537_v3  ;;  %4190 = vperm.xlu1 %11566, %v3176_v52   ;;  %v13549_v28 = vpop.f32.mrf.mxu0  ;;  %v12187_v52 = vld [vmem:[%s18631_s24 + $0x1a0] sm:$0xff]  }
  0xf2   :  { %18664 = vst [vmem:[#allocation36_spill] sm:$0xff] %v13549_v28 }
  0xf3   :  { %v13556_v51 = vpop.permute.xlu0 %4135  ;;  %v13561_v57 = vpop.f32.mrf.mxu0 }
  0xf4   :  { %v13554_v36 = vpop.permute.xlu1 %4140  ;;  %18666 = vst [vmem:[#allocation38_spill] sm:$0xff] %v13556_v51  ;;  %3720 = vperm.xlu0 %11565, %v3082_v19   ;;  %18667 = vst [vmem:[#allocation39_spill] sm:$0xff] %v13561_v57  ;;  %v3018_v19 = vld [vmem:[%s18629_s20 + $0xf8] sm:$0xff] }
  0xf5   :  { %18665 = vst [vmem:[#allocation37_spill] sm:$0xff] %v13554_v36  ;;  %3715 = vperm.xlu1 %11566, %v3081_v18   ;;  %v13569_v4 = vpop.f32.mrf.mxu0  ;;  %11306 = vmatmul.mubr.bf16.gmra.mxu0 %v12186_v29  ;;  %v12188_v29 = vld [vmem:[%s18631_s24 + $0x1a8] sm:$0xff]  }
  0xf6   :  { %18668 = vst [vmem:[#allocation40_spill] sm:$0xff] %v13569_v4  ;;  %11309 = vmatprep.mubr.bf16.mxu0 %v12187_v52 }
  0xf7   :  { %v13573_v48 = vpop.permute.xlu0 %3670  ;;  %v13575_v18 = vpop.f32.mrf.mxu0 }
  0xf8   :  { %v13571_v3 = vpop.permute.xlu1 %3665  ;;  %3800 = vperm.xlu0 %11565, %v3098_v32   ;;  %18669 = vst [vmem:[#allocation41_spill] sm:$0xff] %v13575_v18  ;;  %v12189_v32 = vld [vmem:[%s18631_s24 + $0x1b0] sm:$0xff]  }
  0xf9   :  { %3795 = vperm.xlu1 %11566, %v3097_v33   ;;  %v13583_v51 = vpop.f32.mrf.mxu0 }
  0xfa   :  { %18670 = vst [vmem:[#allocation42_spill] sm:$0xff] %v13583_v51 }
  0xfb   :  { %v13590_v33 = vpop.permute.xlu0 %3750  ;;  %v13595_v52 = vpop.f32.mrf.mxu0 }
  0xfc   :  { %v13588_v36 = vpop.permute.xlu1 %3745  ;;  %18672 = vst [vmem:[#allocation44_spill] sm:$0xff] %v13590_v33  ;;  %3395 = vperm.xlu0 %11565, %v3017_v43   ;;  %18673 = vst [vmem:[#allocation45_spill] sm:$0xff] %v13595_v52 }
  0xfd   :  { %18671 = vst [vmem:[#allocation43_spill] sm:$0xff] %v13588_v36  ;;  %3400 = vperm.xlu1 %11566, %v3018_v19   ;;  %v13603_v7 = vpop.f32.mrf.mxu0  ;;  %11310 = vmatmul.mubr.bf16.gmra.mxu0 %v12188_v29  ;;  %v3052_v19 = vld [vmem:[%s18629_s20 + $0x208] sm:$0xff]  ;;  %v12190_v29 = vld [vmem:[%s18631_s24 + $0x1b8] sm:$0xff]  }
  0xfe   :  { %18674 = vst [vmem:[#allocation46_spill] sm:$0xff] %v13603_v7  ;;  %11313 = vmatprep.mubr.bf16.mxu0 %v12189_v32 }
  0xff   :  { %v13607_v36 = vpop.permute.xlu0 %3345  ;;  %v13609_v43 = vpop.f32.mrf.mxu0 }
 0x100   :  { %v13605_v33 = vpop.permute.xlu1 %3350  ;;  %3475 = vperm.xlu0 %11565, %v3033_v12   ;;  %18675 = vst [vmem:[#allocation47_spill] sm:$0xff] %v13609_v43  ;;  %v12191_v12 = vld [vmem:[%s18631_s24 + $0x1c0] sm:$0xff]  }
 0x101   :  { %3480 = vperm.xlu1 %11566, %v3034_v8   ;;  %v13617_v52 = vpop.f32.mrf.mxu0  ;;  %v2987_v43 = vld [vmem:[%s18629_s20] sm:$0xff] }
 0x102   :  { %18676 = vst [vmem:[#allocation48_spill] sm:$0xff] %v13617_v52  ;;  %v2988_v52 = vld [vmem:[%s18629_s20 + $0x8] sm:$0xff] }
 0x103   :  { %v13624_v8 = vpop.permute.xlu0 %3425  ;;  %v13629_v32 = vpop.f32.mrf.mxu0 }
 0x104   :  { %v13622_v7 = vpop.permute.xlu1 %3430  ;;  %18678 = vst [vmem:[#allocation50_spill] sm:$0xff] %v13624_v8  ;;  %3565 = vperm.xlu0 %11565, %v3051_v9   ;;  %18679 = vst [vmem:[#allocation51_spill] sm:$0xff] %v13629_v32  ;;  %v3241_v32 = vld [vmem:[%s18629_s20 + $0x7f0] sm:$0xff] }
 0x105   :  { %18677 = vst [vmem:[#allocation49_spill] sm:$0xff] %v13622_v7  ;;  %3570 = vperm.xlu1 %11566, %v3052_v19   ;;  %v13637_v51 = vpop.f32.mrf.mxu0  ;;  %11314 = vmatmul.mubr.bf16.gmra.mxu0 %v12190_v29  ;;  %v3242_v19 = vld [vmem:[%s18629_s20 + $0x7f8] sm:$0xff]  ;;  %v12192_v29 = vld [vmem:[%s18631_s24 + $0x1c8] sm:$0xff]  }
 0x106   :  { %18680 = vst [vmem:[#allocation52_spill] sm:$0xff] %v13637_v51  ;;  %11317 = vmatprep.mubr.bf16.mxu0 %v12191_v12 }
 0x107   :  { %v13641_v4 = vpop.permute.xlu0 %4465  ;;  %v13643_v9 = vpop.f32.mrf.mxu0 }
 0x108   :  { %v13639_v18 = vpop.permute.xlu1 %4470  ;;  %18682 = vst [vmem:[#allocation54_spill] sm:$0xff] %v13641_v4  ;;  %3245 = vperm.xlu0 %11565, %v2987_v43   ;;  %18683 = vst [vmem:[#allocation55_spill] sm:$0xff] %v13643_v9  ;;  %v12193_v43 = vld [vmem:[%s18631_s24 + $0x1d0] sm:$0xff]  }
 0x109   :  { %18681 = vst [vmem:[#allocation53_spill] sm:$0xff] %v13639_v18  ;;  %3250 = vperm.xlu1 %11566, %v2988_v52   ;;  %v13651_v57 = vpop.f32.mrf.mxu0  ;;  %v3178_v18 = vld [vmem:[%s18629_s20 + $0x5f8] sm:$0xff] }
 0x10a   :  { %18684 = vst [vmem:[#allocation56_spill] sm:$0xff] %v13651_v57  ;;  %v3177_v57 = vld [vmem:[%s18629_s20 + $0x5f0] sm:$0xff] }
 0x10b   :  { %v13658_v52 = vpop.permute.xlu0 %4145  ;;  %v13663_v12 = vpop.f32.mrf.mxu0 }
 0x10c   :  { %v13656_v4 = vpop.permute.xlu1 %4150  ;;  %18686 = vst [vmem:[#allocation58_spill] sm:$0xff] %v13658_v52  ;;  %4515 = vperm.xlu0 %11565, %v3241_v32   ;;  %18687 = vst [vmem:[#allocation59_spill] sm:$0xff] %v13663_v12  ;;  %v3196_v12 = vld [vmem:[%s18629_s20 + $0x688] sm:$0xff] }
 0x10d   :  { %18685 = vst [vmem:[#allocation57_spill] sm:$0xff] %v13656_v4  ;;  %4520 = vperm.xlu1 %11566, %v3242_v19   ;;  %v13671_v9 = vpop.f32.mrf.mxu0  ;;  %11318 = vmatmul.mubr.bf16.gmra.mxu0 %v12192_v29  ;;  %v3195_v19 = vld [vmem:[%s18629_s20 + $0x680] sm:$0xff]  ;;  %v12194_v29 = vld [vmem:[%s18631_s24 + $0x1d8] sm:$0xff]  }
 0x10e   :  { %11321 = vmatprep.mubr.bf16.mxu0 %v12193_v43 }
 0x10f   :  { %v13675_v4 = vpop.permute.xlu0 %3680  ;;  %v1260_v32 = vpop.f32.mrf.mxu0 }
 0x110   :  { %v13673_v52 = vpop.permute.xlu1 %3675  ;;  %4195 = vperm.xlu0 %11565, %v3177_v57   ;;  %v12195_v57 = vld [vmem:[%s18631_s24 + $0x1e0] sm:$0xff]   ;;  %v1261_v46 = vadd.f32 %v13698_v13, %v1260_v32 }
 0x111   :  { %4200 = vperm.xlu1 %11566, %v3178_v18   ;;  %v13683_v51 = vpop.f32.mrf.mxu0 }
 0x112   :  { %v2491_v54 = vmul.f32 0.2, %v1261_v46  ;;  %vm2235_vm4 = vcmp.gt.f32.partialorder %v1261_v46, 0.0 }
 0x113   :  { %v13690_v43 = vpop.permute.xlu0 %3760  ;;  %v1263_v18 = vpop.f32.mrf.mxu0 }
 0x114   :  { %v13688_v28 = vpop.permute.xlu1 %3755  ;;  %18689 = vst [vmem:[#allocation61_spill] sm:$0xff] %v13690_v43  ;;  %4290 = vperm.xlu0 %11565, %v3196_v12   ;;  %v3212_v43 = vld [vmem:[%s18629_s20 + $0x708] sm:$0xff] }
 0x115   :  { %18688 = vst [vmem:[#allocation60_spill] sm:$0xff] %v13688_v28  ;;  %4285 = vperm.xlu1 %11566, %v3195_v19   ;;  %v1264_v28 = vadd.f32 %v13698_v13, %v1263_v18  ;;  %v11227_v30 = vpop.f32.mrf.mxu0  ;;  %11322 = vmatmul.mubr.bf16.gmra.mxu0 %v12194_v29  ;;  %v3131_v29 = vld [vmem:[%s18629_s20 + $0x480] sm:$0xff] }
 0x116   :  { %v1285_v12 = vadd.f32 %v11227_v30, %v13698_v13  ;;  %11325 = vmatprep.mubr.bf16.mxu0 %v12195_v57 }
 0x117   :  { %v3356_v31 = vpop.permute.xlu0 %3355  ;;  %v1276_v47 = vpop.f32.mrf.mxu0  ;;  %v2492_v30 = vmul.f32 0.2, %v1264_v28  ;;  %vm2236_vm1 = vcmp.gt.f32.partialorder %v1264_v28, 0.0 }
 0x118   :  { %v3361_v19 = vpop.permute.xlu1 %3360  ;;  %4370 = vperm.xlu0 %11565, %v3212_v43   ;;  %v2497_v10 = vmul.f32 0.2, %v1285_v12  ;;  %v1277_v11 = vadd.f32 %v13698_v13, %v1276_v47  ;;  %vm2241_vm0 = vcmp.gt.f32.partialorder %v1285_v12, 0.0 }
 0x119   :  { %4365 = vperm.xlu1 %11566, %v3211_v2   ;;  %v11228_v18 = vpop.f32.mrf.mxu0  ;;  %v12196_v2 = vld [vmem:[%s18631_s24 + $0x1e8] sm:$0xff]   ;;  %v2748_v8 = vsel %vm2236_vm1, %v1264_v28, %v2492_v30  ;;  %v2747_v28 = vsel %vm2235_vm4, %v1261_v46, %v2491_v54  ;;  %v12198_v54 = vld [vmem:[%s18631_s24 + $0x1f8] sm:$0xff]  }
 0x11a   :  { %v2495_v32 = vmul.f32 0.2, %v1277_v11  ;;  %v1288_v43 = vadd.f32 %v11228_v18, %v13698_v13  ;;  %vm2239_vm2 = vcmp.gt.f32.partialorder %v1277_v11, 0.0  ;;  %v2753_v0 = vsel %vm2241_vm0, %v1285_v12, %v2497_v10  ;;  %v3148_v18 = vld [vmem:[%s18629_s20 + $0x508] sm:$0xff] }
 0x11b   :  { %v13722_v57 = vpop.permute.xlu0 %3435  ;;  %v1279_v55 = vpop.f32.mrf.mxu0 }
 0x11c   :  { %v13720_v47 = vpop.permute.xlu1 %3440  ;;  %18692 = vst [vmem:[#allocation63_spill] sm:$0xff] %v13722_v57  ;;  %3965 = vperm.xlu0 %11565, %v3131_v29   ;;  %vm2242_vm3 = vcmp.gt.f32.partialorder %v1288_v43, 0.0  ;;  %v2498_v1 = vmul.f32 0.2, %v1288_v43  ;;  %v1280_v7 = vadd.f32 %v13698_v13, %v1279_v55  ;;  %v13741_v57 = vmul.f32 %v3356_v31, %v2753_v0 }
 0x11d   :  { %18691 = vst [vmem:[#allocation62_spill] sm:$0xff] %v13720_v47  ;;  %3970 = vperm.xlu1 %11566, %v3132_v20   ;;  %v13735_v47 = vpop.f32.mrf.mxu0  ;;  %11326 = vmatmul.mubr.bf16.gmra.mxu0 %v12196_v2  ;;  %v2751_v20 = vsel %vm2239_vm2, %v1277_v11, %v2495_v32  ;;  %v3054_v11 = vld [vmem:[%s18629_s20 + $0x218] sm:$0xff] }
 0x11e   :  { %v2754_v10 = vsel %vm2242_vm3, %v1288_v43, %v2498_v1  ;;  %vm2240_vm5 = vcmp.gt.f32.partialorder %v1280_v7, 0.0  ;;  %v2496_v12 = vmul.f32 0.2, %v1280_v7  ;;  %11329 = vmatprep.mubr.bf16.mxu0 %v12197_v21  ;;  %v3053_v1 = vld [vmem:[%s18629_s20 + $0x210] sm:$0xff]  ;;  %v4540_v21 = vmul.f32 %v13431_v14, %v2748_v8  ;;  %v12199_v14 = vld [vmem:[%s18631_s24 + $0x200] sm:$0xff]   ;;  %v2990_v2 = vld [vmem:[%s18629_s20 + $0x18] sm:$0xff] }
 0x11f   :  { %v13739_v55 = vpop.permute.xlu0 %4475  ;;  %v13743_v39 = vmul.f32 %v3361_v19, %v2754_v10  ;;  %v1292_v45 = vpop.f32.mrf.mxu0  ;;  %v13754_v0 = vmul.f32 %v13607_v36, %v2751_v20  ;;  %v4539_v36 = vmul.f32 %v13433_v17, %v2747_v28  ;;  %v3198_v28 = vld [vmem:[%s18629_s20 + $0x698] sm:$0xff] }
 0x120   :  { %v13737_v29 = vpop.permute.xlu1 %4480  ;;  %18694 = vst [vmem:[#allocation65_spill] sm:$0xff] %v13739_v55  ;;  %4045 = vperm.xlu0 %11565, %v3147_v34   ;;  %v2752_v30 = vsel %vm2240_vm5, %v1280_v7, %v2496_v12 }
 0x121   :  { %18693 = vst [vmem:[#allocation64_spill] sm:$0xff] %v13737_v29  ;;  %4050 = vperm.xlu1 %11566, %v3148_v18   ;;  %v13757_v31 = vmul.f32 %v13605_v33, %v2752_v30  ;;  %v13759_v34 = vpop.f32.mrf.mxu0  ;;  %v11567_v43 = vpack.i.bf16 %v4540_v21, %v4539_v36  ;;  %v1293_v18 = vadd.f32 %v13698_v13, %v1292_v45  ;;  %v2989_v45 = vld [vmem:[%s18629_s20 + $0x10] sm:$0xff] }
 0x122   :  { %v12201_v36 = vld [vmem:[%s18631_s24 + $0x210] sm:$0xff]  }
 0x123   :  { %v13768_v19 = vpop.permute.xlu0 %4155  ;;  %v1295_v33 = vpop.f32.mrf.mxu0  ;;  %vm2243_vm7 = vcmp.gt.f32.partialorder %v1293_v18, 0.0 }
 0x124   :  { %v13766_v7 = vpop.permute.xlu1 %4160  ;;  %18696 = vst [vmem:[#allocation67_spill] sm:$0xff] %v13768_v19  ;;  %3580 = vperm.xlu0 %11565, %v3054_v11   ;;  %v1296_v20 = vadd.f32 %v13698_v13, %v1295_v33  ;;  %v2499_v11 = vmul.f32 0.2, %v1293_v18  ;;  %v3133_v19 = vld [vmem:[%s18629_s20 + $0x490] sm:$0xff] }
 0x125   :  { %18695 = vst [vmem:[#allocation66_spill] sm:$0xff] %v13766_v7  ;;  %3575 = vperm.xlu1 %11566, %v3053_v1   ;;  %v13779_v32 = vpop.f32.mrf.mxu0  ;;  %11330 = vmatmul.mubr.bf16.gmra.mxu0 %v12198_v54  ;;  %v12200_v1 = vld [vmem:[%s18631_s24 + $0x208] sm:$0xff]  }
 0x126   :  { %11333 = vmatprep.mubr.bf16.mxu0 %v12199_v14  ;;  %v2500_v21 = vmul.f32 0.2, %v1296_v20  ;;  %vm2244_vm6 = vcmp.gt.f32.partialorder %v1296_v20, 0.0 }
 0x127   :  { %v13785_v17 = vpop.permute.xlu0 %3690  ;;  %v13787_v12 = vpop.f32.mrf.mxu0 }
 0x128   :  { %v13783_v10 = vpop.permute.xlu1 %3685  ;;  %3260 = vperm.xlu0 %11565, %v2990_v2   ;;  %v3214_v2 = vld [vmem:[%s18629_s20 + $0x718] sm:$0xff]  ;;  %v2756_v55 = vsel %vm2244_vm6, %v1296_v20, %v2500_v21  ;;  %v12203_v21 = vld [vmem:[%s18631_s24 + $0x220] sm:$0xff]  }
 0x129   :  { %11568 = vrot.lane.b32.xlu1 %v11567_v43, %s12803_s27  ;;  %v13796_v30 = vpop.f32.mrf.mxu0  ;;  %v3197_v43 = vld [vmem:[%s18629_s20 + $0x690] sm:$0xff] }
 0x12b   :  { %v13803_v14 = vpop.permute.xlu0 %3770  ;;  %v13808_v33 = vpop.f32.mrf.mxu0 }
 0x12c   :  { %v13801_v54 = vpop.permute.xlu1 %3765  ;;  %18698 = vst [vmem:[#allocation69_spill] sm:$0xff] %v13803_v14  ;;  %4300 = vperm.xlu0 %11565, %v3198_v28   ;;  %v2755_v28 = vsel %vm2243_vm7, %v1293_v18, %v2499_v11 }
 0x12d   :  { %18697 = vst [vmem:[#allocation68_spill] sm:$0xff] %v13801_v54  ;;  %3255 = vperm.xlu1 %11566, %v2989_v45   ;;  %v13816_v46 = vpop.f32.mrf.mxu0  ;;  %11334 = vmatmul.mubr.bf16.gmra.mxu0 %v12200_v1  ;;  %v3213_v1 = vld [vmem:[%s18629_s20 + $0x710] sm:$0xff] }
 0x12e   :  { %11337 = vmatprep.mubr.bf16.mxu0 %v12201_v36 }
 0x12f   :  { %v3366_v29 = vpop.permute.xlu0 %3365  ;;  %v13822_v54 = vpop.f32.mrf.mxu0 }
 0x130   :  { %v3371_v8 = vpop.permute.xlu1 %3370  ;;  %v13820_v45 = vmul.f32 %v3366_v29, %v2755_v28  ;;  %4380 = vperm.xlu0 %11565, %v3214_v2   ;;  %v12202_v29 = vld [vmem:[%s18631_s24 + $0x218] sm:$0xff]   ;;  %v1269_v2 = vadd.f32 %v13671_v9, %v13698_v13 }
 0x131   :  { %v13818_v14 = vmul.f32 %v3371_v8, %v2756_v55  ;;  %4295 = vperm.xlu1 %11566, %v3197_v43   ;;  %v13832_v20 = vpop.f32.mrf.mxu0  ;;  %v1272_v55 = vadd.f32 %v13683_v51, %v13698_v13  ;;  %v3149_v43 = vld [vmem:[%s18629_s20 + $0x510] sm:$0xff]  ;;  %v3134_v51 = vld [vmem:[%s18629_s20 + $0x498] sm:$0xff] }
 0x132   :  { %vm2237_vm9 = vcmp.gt.f32.partialorder %v1269_v2, 0.0 }
 0x133   :  { %v13841_v11 = vpop.permute.xlu0 %3445  ;;  %v13846_v36 = vpop.f32.mrf.mxu0  ;;  %v2494_v18 = vmul.f32 0.2, %v1272_v55  ;;  %vm2238_vm8 = vcmp.gt.f32.partialorder %v1272_v55, 0.0 }
 0x134   :  { %v13839_v8 = vpop.permute.xlu1 %3450  ;;  %18700 = vst [vmem:[#allocation71_spill] sm:$0xff] %v13841_v11  ;;  %3975 = vperm.xlu0 %11565, %v3133_v19   ;;  %18701 = vst [vmem:[#allocation72_spill] sm:$0xff] %v13846_v36 }
 0x135   :  { %18699 = vst [vmem:[#allocation70_spill] sm:$0xff] %v13839_v8  ;;  %4375 = vperm.xlu1 %11566, %v3213_v1   ;;  %v13856_v28 = vpop.f32.mrf.mxu0  ;;  %11338 = vmatmul.mubr.bf16.gmra.mxu0 %v12202_v29  ;;  %v2493_v1 = vmul.f32 0.2, %v1269_v2  ;;  %v3056_v8 = vld [vmem:[%s18629_s20 + $0x228] sm:$0xff]  ;;  %v3150_v29 = vld [vmem:[%s18629_s20 + $0x518] sm:$0xff] }
 0x136   :  { %18702 = vst [vmem:[#allocation73_spill] sm:$0xff] %v13856_v28  ;;  %11341 = vmatprep.mubr.bf16.mxu0 %v12203_v21  ;;  %v12204_v21 = vld [vmem:[%s18631_s24 + $0x228] sm:$0xff]  }
 0x137   :  { %v13860_v19 = vpop.permute.xlu0 %4485  ;;  %v13862_v9 = vpop.f32.mrf.mxu0  ;;  %v2749_v23 = vsel %vm2237_vm9, %v1269_v2, %v2493_v1 }
 0x138   :  { %v13858_v7 = vpop.permute.xlu1 %4490  ;;  %18704 = vst [vmem:[#allocation75_spill] sm:$0xff] %v13860_v19  ;;  %4055 = vperm.xlu0 %11565, %v3149_v43   ;;  %18705 = vst [vmem:[#allocation76_spill] sm:$0xff] %v13862_v9  ;;  %v2750_v43 = vsel %vm2238_vm8, %v1272_v55, %v2494_v18  ;;  %v3055_v18 = vld [vmem:[%s18629_s20 + $0x220] sm:$0xff] }
 0x139   :  { %18703 = vst [vmem:[#allocation74_spill] sm:$0xff] %v13858_v7  ;;  %3980 = vperm.xlu1 %11566, %v3134_v51   ;;  %v13870_v11 = vpop.f32.mrf.mxu0  ;;  %v12205_v7 = vld [vmem:[%s18631_s24 + $0x230] sm:$0xff]   ;;  %v4542_v55 = vmul.f32 %v13509_v22, %v2750_v43  ;;  %v3200_v22 = vld [vmem:[%s18629_s20 + $0x6a8] sm:$0xff] }
 0x13a   :  { %18706 = vst [vmem:[#allocation77_spill] sm:$0xff] %v13870_v11 }
 0x13b   :  { %v13877_v51 = vpop.permute.xlu0 %4165  ;;  %v13882_v44 = vpop.f32.mrf.mxu0 }
 0x13c   :  { %v13875_v19 = vpop.permute.xlu1 %4170  ;;  %18708 = vst [vmem:[#allocation79_spill] sm:$0xff] %v13877_v51  ;;  %3590 = vperm.xlu0 %11565, %v3056_v8   ;;  %18709 = vst [vmem:[#allocation80_spill] sm:$0xff] %v13882_v44  ;;  %v1301_v8 = vadd.f32 %v13735_v47, %v13698_v13 }
 0x13d   :  { %18707 = vst [vmem:[#allocation78_spill] sm:$0xff] %v13875_v19  ;;  %4060 = vperm.xlu1 %11566, %v3150_v29   ;;  %v13891_v51 = vpop.f32.mrf.mxu0  ;;  %11342 = vmatmul.mubr.bf16.gmra.mxu0 %v12204_v21  ;;  %v1304_v29 = vadd.f32 %v13759_v34, %v13698_v13  ;;  %v4541_v19 = vmul.f32 %v13511_v27, %v2749_v23  ;;  %v12206_v34 = vld [vmem:[%s18631_s24 + $0x238] sm:$0xff]   ;;  %v12207_v27 = vld [vmem:[%s18631_s24 + $0x240] sm:$0xff]  }
 0x13e   :  { %18710 = vst [vmem:[#allocation81_spill] sm:$0xff] %v13891_v51  ;;  %11345 = vmatprep.mubr.bf16.mxu0 %v12205_v7  ;;  %v2501_v43 = vmul.f32 0.2, %v1301_v8  ;;  %vm2245_vm11 = vcmp.gt.f32.partialorder %v1301_v8, 0.0 }
 0x13f   :  { %v13899_v1 = vpop.permute.xlu0 %3700  ;;  %v13902_v44 = vpop.f32.mrf.mxu0  ;;  %v11572_v47 = vpack.i.bf16 %v4542_v55, %v4541_v19  ;;  %v2502_v51 = vmul.f32 0.2, %v1304_v29  ;;  %vm2246_vm10 = vcmp.gt.f32.partialorder %v1304_v29, 0.0  ;;  %v3216_v19 = vld [vmem:[%s18629_s20 + $0x728] sm:$0xff] }
 0x140   :  { %v13897_v2 = vpop.permute.xlu1 %3695  ;;  %3270 = vperm.xlu0 %11565, %v2992_v41   ;;  %18711 = vst [vmem:[#allocation82_spill] sm:$0xff] %v13902_v44  ;;  %v2757_v44 = vsel %vm2245_vm11, %v1301_v8, %v2501_v43 }
 0x141   :  { %3585 = vperm.xlu1 %11566, %v3055_v18   ;;  %v13907_v21 = vpop.f32.mrf.mxu0  ;;  %v2991_v18 = vld [vmem:[%s18629_s20 + $0x20] sm:$0xff] }
 0x142   :  { %18712 = vst [vmem:[#allocation83_spill] sm:$0xff] %v13907_v21 }
 0x143   :  { %v13914_v23 = vpop.permute.xlu0 %3780  ;;  %v13919_v41 = vpop.f32.mrf.mxu0 }
 0x144   :  { %v13912_v7 = vpop.permute.xlu1 %3775  ;;  %18714 = vst [vmem:[#allocation85_spill] sm:$0xff] %v13914_v23  ;;  %4310 = vperm.xlu0 %11565, %v3200_v22   ;;  %18715 = vst [vmem:[#allocation86_spill] sm:$0xff] %v13919_v41 }
 0x145   :  { %18713 = vst [vmem:[#allocation84_spill] sm:$0xff] %v13912_v7  ;;  %11573 = vrot.lane.b32.xlu1 %v11572_v47, %s12803_s27  ;;  %v13928_v55 = vpop.f32.mrf.mxu0  ;;  %11346 = vmatmul.mubr.bf16.gmra.mxu0 %v12206_v34  ;;  %v2758_v7 = vsel %vm2246_vm10, %v1304_v29, %v2502_v51  ;;  %v3199_v34 = vld [vmem:[%s18629_s20 + $0x6a0] sm:$0xff] }
 0x146   :  { %18716 = vst [vmem:[#allocation87_spill] sm:$0xff] %v13928_v55  ;;  %11349 = vmatprep.mubr.bf16.mxu0 %v12207_v27  ;;  %v3151_v27 = vld [vmem:[%s18629_s20 + $0x520] sm:$0xff] }
 0x147   :  { %v3376_v22 = vpop.permute.xlu0 %3375  ;;  %v13934_v21 = vpop.f32.mrf.mxu0 }
 0x148   :  { %v3381_v23 = vpop.permute.xlu1 %3380  ;;  %v13932_v47 = vmul.f32 %v3376_v22, %v2757_v44  ;;  %4390 = vperm.xlu0 %11565, %v3216_v19   ;;  %18719 = vst [vmem:[#allocation90_spill] sm:$0xff] %v13934_v21  ;;  %v12208_v44 = vld [vmem:[%s18631_s24 + $0x248] sm:$0xff]   ;;  %v3215_v19 = vld [vmem:[%s18629_s20 + $0x720] sm:$0xff] }
 0x149   :  { %v13930_v41 = vmul.f32 %v3381_v23, %v2758_v7  ;;  %3265 = vperm.xlu1 %11566, %v2991_v18   ;;  %v13944_v8 = vpop.f32.mrf.mxu0  ;;  %v12209_v7 = vld [vmem:[%s18631_s24 + $0x250] sm:$0xff]  }
 0x14a   :  { %18718 = vst [vmem:[#allocation89_spill] sm:$0xff] %v13932_v47  ;;  %18720 = vst [vmem:[#allocation91_spill] sm:$0xff] %v13944_v8 }
 0x14b   :  { %18717 = vst [vmem:[#allocation88_spill] sm:$0xff] %v13930_v41  ;;  %v13951_v43 = vpop.permute.xlu0 %3455  ;;  %v13956_v23 = vpop.f32.mrf.mxu0 }
 0x14c   :  { %v13949_v29 = vpop.permute.xlu1 %3460  ;;  %18722 = vst [vmem:[#allocation93_spill] sm:$0xff] %v13951_v43  ;;  %3985 = vperm.xlu0 %11565, %v3135_v24   ;;  %18723 = vst [vmem:[#allocation94_spill] sm:$0xff] %v13956_v23  ;;  %v3058_v23 = vld [vmem:[%s18629_s20 + $0x238] sm:$0xff] }
 0x14d   :  { %18721 = vst [vmem:[#allocation92_spill] sm:$0xff] %v13949_v29  ;;  %4305 = vperm.xlu1 %11566, %v3199_v34   ;;  %v11255_v18 = vpop.f32.mrf.mxu0  ;;  %11350 = vmatmul.mubr.bf16.gmra.mxu0 %v12208_v44  ;;  %v3136_v44 = vld [vmem:[%s18629_s20 + $0x4a8] sm:$0xff] }
 0x14e   :  { %v1397_v22 = vadd.f32 %v11255_v18, %v13698_v13  ;;  %11353 = vmatprep.mubr.bf16.mxu0 %v12209_v7  ;;  %v1309_v18 = vadd.f32 %v13698_v13, %v13787_v12  ;;  %v12210_v7 = vld [vmem:[%s18631_s24 + $0x258] sm:$0xff]  }
 0x14f   :  { %v13967_v47 = vpop.permute.xlu0 %4495  ;;  %v1388_v24 = vpop.f32.mrf.mxu0 }
 0x150   :  { %v13965_v51 = vpop.permute.xlu1 %4500  ;;  %18725 = vst [vmem:[#allocation96_spill] sm:$0xff] %v13967_v47  ;;  %4065 = vperm.xlu0 %11565, %v3151_v27   ;;  %vm2269_vm12 = vcmp.gt.f32.partialorder %v1397_v22, 0.0  ;;  %v2525_v34 = vmul.f32 0.2, %v1397_v22  ;;  %v1389_v41 = vadd.f32 %v13698_v13, %v1388_v24  ;;  %vm2247_vm0 = vcmp.gt.f32.partialorder %v1309_v18, 0.0 }
 0x151   :  { %18724 = vst [vmem:[#allocation95_spill] sm:$0xff] %v13965_v51  ;;  %4385 = vperm.xlu1 %11566, %v3215_v19   ;;  %v11256_v47 = vpop.f32.mrf.mxu0  ;;  %v12211_v51 = vld [vmem:[%s18631_s24 + $0x260] sm:$0xff]  }
 0x152   :  { %v1400_v27 = vadd.f32 %v11256_v47, %v13698_v13  ;;  %v2781_v8 = vsel %vm2269_vm12, %v1397_v22, %v2525_v34  ;;  %v2523_v21 = vmul.f32 0.2, %v1389_v41  ;;  %vm2267_vm13 = vcmp.gt.f32.partialorder %v1389_v41, 0.0  ;;  %v2994_v47 = vld [vmem:[%s18629_s20 + $0x38] sm:$0xff] }
 0x153   :  { %v13984_v24 = vpop.permute.xlu0 %4175  ;;  %v1391_v43 = vpop.f32.mrf.mxu0 }
 0x154   :  { %v13982_v19 = vpop.permute.xlu1 %4180  ;;  %18727 = vst [vmem:[#allocation98_spill] sm:$0xff] %v13984_v24  ;;  %3600 = vperm.xlu0 %11565, %v3058_v23   ;;  %vm2270_vm14 = vcmp.gt.f32.partialorder %v1400_v27, 0.0  ;;  %v2526_v12 = vmul.f32 0.2, %v1400_v27  ;;  %v1392_v29 = vadd.f32 %v13698_v13, %v1391_v43  ;;  %v1312_v24 = vadd.f32 %v13698_v13, %v13808_v33 }
 0x155   :  { %18726 = vst [vmem:[#allocation97_spill] sm:$0xff] %v13982_v19  ;;  %3990 = vperm.xlu1 %11566, %v3136_v44   ;;  %v2503_v19 = vmul.f32 0.2, %v1309_v18  ;;  %v11259_v55 = vpop.f32.mrf.mxu0  ;;  %11354 = vmatmul.mubr.bf16.gmra.mxu0 %v12210_v7  ;;  %v4573_v43 = vmul.f32 %v13236_v49, %v2781_v8  ;;  %v2779_v11 = vsel %vm2267_vm13, %v1389_v41, %v2523_v21 }
 0x156   :  { %v2782_v22 = vsel %vm2270_vm14, %v1400_v27, %v2526_v12  ;;  %vm2268_vm15 = vcmp.gt.f32.partialorder %v1392_v29, 0.0  ;;  %v2524_v23 = vmul.f32 0.2, %v1392_v29  ;;  %v1413_v34 = vadd.f32 %v11259_v55, %v13698_v13  ;;  %11357 = vmatprep.mubr.bf16.mxu0 %v12211_v51  ;;  %v3202_v55 = vld [vmem:[%s18629_s20 + $0x6b8] sm:$0xff] }
 0x157   :  { %v13998_v42 = vpop.permute.xlu0 %3710  ;;  %v4574_v9 = vmul.f32 %v13238_v50, %v2782_v22  ;;  %v1404_v33 = vpop.f32.mrf.mxu0  ;;  %v2504_v28 = vmul.f32 0.2, %v1312_v24  ;;  %v12212_v50 = vld [vmem:[%s18631_s24 + $0x268] sm:$0xff]   ;;  %vm2248_vm2 = vcmp.gt.f32.partialorder %v1312_v24, 0.0 }
 0x158   :  { %v13996_v44 = vpop.permute.xlu1 %3705  ;;  %3280 = vperm.xlu0 %11565, %v2994_v47   ;;  %v2780_v7 = vsel %vm2268_vm15, %v1392_v29, %v2524_v23  ;;  %vm2273_vm1 = vcmp.gt.f32.partialorder %v1413_v34, 0.0  ;;  %v2529_v27 = vmul.f32 0.2, %v1413_v34  ;;  %v1405_v12 = vadd.f32 %v13698_v13, %v1404_v33 }
 0x159   :  { %v4572_v51 = vmul.f32 %v13212_v40, %v2780_v7  ;;  %v11260_v49 = vpop.f32.mrf.mxu0  ;;  %v11577_v8 = vpack.i.bf16 %v4574_v9, %v4573_v43  ;;  %v12213_v40 = vld [vmem:[%s18631_s24 + $0x270] sm:$0xff]   ;;  %v4571_v9 = vmul.f32 %v13199_v35, %v2779_v11  ;;  %v2759_v33 = vsel %vm2247_vm0, %v1309_v18, %v2503_v19  ;;  %v3218_v7 = vld [vmem:[%s18629_s20 + $0x738] sm:$0xff] }
 0x15a   :  { %v2785_v21 = vsel %vm2273_vm1, %v1413_v34, %v2529_v27  ;;  %vm2271_vm3 = vcmp.gt.f32.partialorder %v1405_v12, 0.0  ;;  %v2527_v41 = vmul.f32 0.2, %v1405_v12  ;;  %v1416_v29 = vadd.f32 %v11260_v49, %v13698_v13 }
 0x15b   :  { %v14014_v22 = vpop.permute.xlu0 %3790  ;;  %v1407_v23 = vpop.f32.mrf.mxu0  ;;  %11578 = vrot.lane.b32.xlu1 %v11577_v8, %s12803_s27  ;;  %v4577_v27 = vmul.f32 %v13288_v5, %v2785_v21  ;;  %v2760_v35 = vsel %vm2248_vm2, %v1312_v24, %v2504_v28  ;;  %v11582_v11 = vpack.i.bf16 %v4572_v51, %v4571_v9 }
 0x15c   :  { %v14012_v47 = vpop.permute.xlu1 %3785  ;;  %18729 = vst [vmem:[#allocation100_spill] sm:$0xff] %v14014_v22  ;;  %4320 = vperm.xlu0 %11565, %v3202_v55   ;;  %vm2274_vm4 = vcmp.gt.f32.partialorder %v1416_v29, 0.0  ;;  %v2530_v34 = vmul.f32 0.2, %v1416_v29  ;;  %v1408_v43 = vadd.f32 %v13698_v13, %v1407_v23  ;;  %v2783_v49 = vsel %vm2271_vm3, %v1405_v12, %v2527_v41 }
 0x15d   :  { %18728 = vst [vmem:[#allocation99_spill] sm:$0xff] %v14012_v47  ;;  %v11263_v22 = vpop.f32.mrf.mxu0  ;;  %11358 = vmatmul.mubr.bf16.gmra.mxu0 %v12212_v50  ;;  %v3137_v50 = vld [vmem:[%s18629_s20 + $0x4b0] sm:$0xff] }
 0x15e   :  { %v2786_v55 = vsel %vm2274_vm4, %v1416_v29, %v2530_v34  ;;  %vm2272_vm5 = vcmp.gt.f32.partialorder %v1408_v43, 0.0  ;;  %v2528_v8 = vmul.f32 0.2, %v1408_v43  ;;  %v1429_v23 = vadd.f32 %v11263_v22, %v13698_v13  ;;  %11361 = vmatprep.mubr.bf16.mxu0 %v12213_v40  ;;  %v12215_v34 = vld [vmem:[%s18631_s24 + $0x280] sm:$0xff]  }
 0x15f   :  { %v3386_v18 = vpop.permute.xlu0 %3385  ;;  %v4578_v19 = vmul.f32 %v13290_v6, %v2786_v55  ;;  %v1420_v12 = vpop.f32.mrf.mxu0  ;;  %11583 = vrot.lane.b32.xlu1 %v11582_v11, %s12803_s27  ;;  %v3153_v11 = vld [vmem:[%s18629_s20 + $0x530] sm:$0xff] }
 0x160   :  { %v3391_v47 = vpop.permute.xlu1 %3390  ;;  %v14033_v5 = vmul.f32 %v3386_v18, %v2759_v33  ;;  %4400 = vperm.xlu0 %11565, %v3218_v7   ;;  %v2784_v28 = vsel %vm2272_vm5, %v1408_v43, %v2528_v8  ;;  %vm2277_vm6 = vcmp.gt.f32.partialorder %v1429_v23, 0.0  ;;  %v2533_v24 = vmul.f32 0.2, %v1429_v23 }
 0x161   :  { %v14031_v36 = vmul.f32 %v3391_v47, %v2760_v35  ;;  %v1421_v51 = vadd.f32 %v13698_v13, %v1420_v12  ;;  %v4576_v21 = vmul.f32 %v13264_v60, %v2784_v28  ;;  %v11264_v41 = vpop.f32.mrf.mxu0  ;;  %v11587_v29 = vpack.i.bf16 %v4578_v19, %v4577_v27  ;;  %v12214_v47 = vld [vmem:[%s18631_s24 + $0x278] sm:$0xff]  }
 0x162   :  { %v1432_v22 = vadd.f32 %v11264_v41, %v13698_v13  ;;  %v4575_v60 = vmul.f32 %v13262_v59, %v2783_v49  ;;  %v2789_v43 = vsel %vm2277_vm6, %v1429_v23, %v2533_v24 }
 0x163   :  { %v14049_v9 = vpop.permute.xlu0 %3465  ;;  %v2531_v33 = vmul.f32 0.2, %v1421_v51  ;;  %v1423_v7 = vpop.f32.mrf.mxu0  ;;  %11588 = vrot.lane.b32.xlu1 %v11587_v29, %s12803_s27  ;;  %vm2275_vm7 = vcmp.gt.f32.partialorder %v1421_v51, 0.0  ;;  %v4581_v12 = vmul.f32 %v13340_v25, %v2789_v43 }
 0x164   :  { %v14047_v40 = vpop.permute.xlu1 %3470  ;;  %3995 = vperm.xlu0 %11565, %v3137_v50   ;;  %vm2278_vm8 = vcmp.gt.f32.partialorder %v1432_v22, 0.0  ;;  %v2534_v27 = vmul.f32 0.2, %v1432_v22  ;;  %v1424_v35 = vadd.f32 %v13698_v13, %v1423_v7  ;;  %v11592_v8 = vpack.i.bf16 %v4576_v21, %v4575_v60 }
 0x165   :  { %v11267_v55 = vpop.f32.mrf.mxu0  ;;  %11362 = vmatmul.mubr.bf16.gmra.mxu0 %v12214_v47  ;;  %v2787_v28 = vsel %vm2275_vm7, %v1421_v51, %v2531_v33  ;;  %v3060_v47 = vld [vmem:[%s18629_s20 + $0x248] sm:$0xff]  ;;  %v12217_v33 = vld [vmem:[%s18631_s24 + $0x290] sm:$0xff]  }
 0x166   :  { %v2790_v18 = vsel %vm2278_vm8, %v1432_v22, %v2534_v27  ;;  %vm2276_vm9 = vcmp.gt.f32.partialorder %v1424_v35, 0.0  ;;  %v2532_v59 = vmul.f32 0.2, %v1424_v35  ;;  %v1445_v49 = vadd.f32 %v11267_v55, %v13698_v13  ;;  %11365 = vmatprep.mubr.bf16.mxu0 %v12215_v34 }
 0x167   :  { %v14063_v19 = vpop.permute.xlu0 %4505  ;;  %v4582_v24 = vmul.f32 %v13342_v26, %v2790_v18  ;;  %v1436_v50 = vpop.f32.mrf.mxu0  ;;  %11593 = vrot.lane.b32.xlu1 %v11592_v8, %s12803_s27  ;;  %v12216_v26 = vld [vmem:[%s18631_s24 + $0x288] sm:$0xff]   ;;  %v4579_v7 = vmul.f32 %v13314_v15, %v2787_v28  ;;  %v1317_v18 = vadd.f32 %v13779_v32, %v13698_v13 }
 0x168   :  { %v14061_v23 = vpop.permute.xlu1 %4510  ;;  %18731 = vst [vmem:[#allocation102_spill] sm:$0xff] %v14063_v19  ;;  %4075 = vperm.xlu0 %11565, %v3153_v11   ;;  %v2788_v21 = vsel %vm2276_vm9, %v1424_v35, %v2532_v59  ;;  %vm2281_vm10 = vcmp.gt.f32.partialorder %v1445_v49, 0.0  ;;  %v2537_v41 = vmul.f32 0.2, %v1445_v49  ;;  %v1437_v29 = vadd.f32 %v13698_v13, %v1436_v50  ;;  %v2996_v8 = vld [vmem:[%s18629_s20 + $0x48] sm:$0xff] }
 0x169   :  { %18730 = vst [vmem:[#allocation101_spill] sm:$0xff] %v14061_v23  ;;  %v4580_v22 = vmul.f32 %v13316_v16, %v2788_v21  ;;  %v11268_v25 = vpop.f32.mrf.mxu0  ;;  %v11597_v34 = vpack.i.bf16 %v4582_v24, %v4581_v12  ;;  %vm2249_vm15 = vcmp.gt.f32.partialorder %v1317_v18, 0.0 }
 0x16a   :  { %v1448_v51 = vadd.f32 %v11268_v25, %v13698_v13  ;;  %v2793_v27 = vsel %vm2281_vm10, %v1445_v49, %v2537_v41  ;;  %v2535_v35 = vmul.f32 0.2, %v1437_v29  ;;  %vm2279_vm12 = vcmp.gt.f32.partialorder %v1437_v29, 0.0 }
 0x16b   :  { %v14080_v43 = vpop.permute.xlu0 %4185  ;;  %v1439_v16 = vpop.f32.mrf.mxu0  ;;  %11598 = vrot.lane.b32.xlu1 %v11597_v34, %s12803_s27  ;;  %v11602_v15 = vpack.i.bf16 %v4580_v22, %v4579_v7  ;;  %v1320_v49 = vadd.f32 %v13796_v30, %v13698_v13  ;;  %v4585_v21 = vmul.f32 %v13392_v53, %v2793_v27  ;;  %v3204_v22 = vld [vmem:[%s18629_s20 + $0x6c8] sm:$0xff]  ;;  %v12218_v53 = vld [vmem:[%s18631_s24 + $0x298] sm:$0xff]  }
 0x16c   :  { %v14078_v60 = vpop.permute.xlu1 %4190  ;;  %18733 = vst [vmem:[#allocation104_spill] sm:$0xff] %v14080_v43  ;;  %3610 = vperm.xlu0 %11565, %v3060_v47   ;;  %vm2282_vm11 = vcmp.gt.f32.partialorder %v1448_v51, 0.0  ;;  %v2538_v11 = vmul.f32 0.2, %v1448_v51  ;;  %v1440_v55 = vadd.f32 %v13698_v13, %v1439_v16  ;;  %v2791_v47 = vsel %vm2279_vm12, %v1437_v29, %v2535_v35  ;;  %v12219_v29 = vld [vmem:[%s18631_s24 + $0x2a0] sm:$0xff]   ;;  %v3220_v16 = vld [vmem:[%s18629_s20 + $0x748] sm:$0xff] }
 0x16d   :  { %18732 = vst [vmem:[#allocation103_spill] sm:$0xff] %v14078_v60  ;;  %v14093_v59 = vpop.f32.mrf.mxu0  ;;  %11366 = vmatmul.mubr.bf16.gmra.mxu0 %v12216_v26  ;;  %v4583_v27 = vmul.f32 %v13366_v37, %v2791_v47  ;;  %vm2250_vm14 = vcmp.gt.f32.partialorder %v1320_v49, 0.0 }
 0x16e   :  { %v2794_v12 = vsel %vm2282_vm11, %v1448_v51, %v2538_v11  ;;  %vm2280_vm13 = vcmp.gt.f32.partialorder %v1440_v55, 0.0  ;;  %v2536_v28 = vmul.f32 0.2, %v1440_v55  ;;  %11369 = vmatprep.mubr.bf16.mxu0 %v12217_v33  ;;  %v2506_v51 = vmul.f32 0.2, %v1320_v49 }
 0x16f   :  { %v14099_v50 = vpop.permute.xlu0 %3720  ;;  %v4586_v32 = vmul.f32 %v13394_v56, %v2794_v12  ;;  %v14103_v41 = vpop.f32.mrf.mxu0  ;;  %11603 = vrot.lane.b32.xlu1 %v11602_v15, %s12803_s27  ;;  %v2505_v56 = vmul.f32 0.2, %v1317_v18 }
 0x170   :  { %v14097_v24 = vpop.permute.xlu1 %3715  ;;  %3290 = vperm.xlu0 %11565, %v2996_v8   ;;  %v2792_v30 = vsel %vm2280_vm13, %v1440_v55, %v2536_v28  ;;  %v2762_v8 = vsel %vm2250_vm14, %v1320_v49, %v2506_v51  ;;  %v3152_v49 = vld [vmem:[%s18629_s20 + $0x528] sm:$0xff]  ;;  %v3057_v51 = vld [vmem:[%s18629_s20 + $0x230] sm:$0xff] }
 0x171   :  { %v4584_v25 = vmul.f32 %v13368_v38, %v2792_v30  ;;  %v14111_v34 = vpop.f32.mrf.mxu0  ;;  %v11607_v26 = vpack.i.bf16 %v4586_v32, %v4585_v21  ;;  %v2761_v12 = vsel %vm2249_vm15, %v1317_v18, %v2505_v56  ;;  %v3139_v32 = vld [vmem:[%s18629_s20 + $0x4c0] sm:$0xff]  ;;  %v12220_v30 = vld [vmem:[%s18631_s24 + $0x2a8] sm:$0xff]  }
 0x172   :  { %v3155_v56 = vld [vmem:[%s18629_s20 + $0x540] sm:$0xff] }
 0x173   :  { %v14118_v7 = vpop.permute.xlu0 %3800  ;;  %v14124_v38 = vpop.f32.mrf.mxu0  ;;  %11608 = vrot.lane.b32.xlu1 %v11607_v26, %s12803_s27  ;;  %v11612_v11 = vpack.i.bf16 %v4584_v25, %v4583_v27  ;;  %v12221_v26 = vld [vmem:[%s18631_s24 + $0x2b0] sm:$0xff]  }
 0x174   :  { %v14116_v33 = vpop.permute.xlu1 %3795  ;;  %18735 = vst [vmem:[#allocation106_spill] sm:$0xff] %v14118_v7  ;;  %4330 = vperm.xlu0 %11565, %v3204_v22   ;;  %18736 = vst [vmem:[#allocation107_spill] sm:$0xff] %v14124_v38  ;;  %v3141_v7 = vld [vmem:[%s18629_s20 + $0x4d0] sm:$0xff] }
 0x175   :  { %18734 = vst [vmem:[#allocation105_spill] sm:$0xff] %v14116_v33  ;;  %v14130_v35 = vpop.f32.mrf.mxu0  ;;  %11370 = vmatmul.mubr.bf16.gmra.mxu0 %v12218_v53 }
 0x176   :  { %18737 = vst [vmem:[#allocation108_spill] sm:$0xff] %v14130_v35  ;;  %11373 = vmatprep.mubr.bf16.mxu0 %v12219_v29  ;;  %v18813_v35 = vld [vmem:[#allocation6_spill] sm:$0xff] }
 0x177   :  { %v3396_v15 = vpop.permute.xlu0 %3395  ;;  %v14136_v21 = vpop.f32.mrf.mxu0  ;;  %11613 = vrot.lane.b32.xlu1 %v11612_v11, %s12803_s27 }
 0x178   :  { %v3401_v55 = vpop.permute.xlu1 %3400  ;;  %v14134_v28 = vmul.f32 %v3396_v15, %v2761_v12  ;;  %4410 = vperm.xlu0 %11565, %v3220_v16   ;;  %18738 = vst [vmem:[#allocation109_spill] sm:$0xff] %v14136_v21  ;;  %v12222_v15 = vld [vmem:[%s18631_s24 + $0x2b8] sm:$0xff]  }
 0x179   :  { %v14132_v37 = vmul.f32 %v3401_v55, %v2762_v8  ;;  %v14147_v47 = vpop.f32.mrf.mxu0  ;;  %v3062_v55 = vld [vmem:[%s18629_s20 + $0x258] sm:$0xff] }
 0x17a   :  { %18739 = vst [vmem:[#allocation110_spill] sm:$0xff] %v14147_v47 }
 0x17b   :  { %v14154_v25 = vpop.permute.xlu0 %3475  ;;  %v14159_v53 = vpop.f32.mrf.mxu0  ;;  %4070 = vperm.xlu1 %11566, %v3152_v49   ;;  %v12223_v49 = vld [vmem:[%s18631_s24 + $0x2c0] sm:$0xff]  }
 0x17c   :  { %v14152_v22 = vpop.permute.xlu1 %3480  ;;  %4005 = vperm.xlu0 %11565, %v3139_v32   ;;  %18740 = vst [vmem:[#allocation111_spill] sm:$0xff] %v14159_v53 }
 0x17d   :  { %v14167_v29 = vpop.f32.mrf.mxu0  ;;  %11374 = vmatmul.mubr.bf16.gmra.mxu0 %v12220_v30 }
 0x17e   :  { %18741 = vst [vmem:[#allocation112_spill] sm:$0xff] %v14167_v29  ;;  %11377 = vmatprep.mubr.bf16.mxu0 %v12221_v26  ;;  %v18749_v26 = vpack.i.bf16 %v13757_v31, %v13754_v0  ;;  %v3206_v0 = vld [vmem:[%s18629_s20 + $0x6d8] sm:$0xff]  ;;  %v3201_v31 = vld [vmem:[%s18629_s20 + $0x6b0] sm:$0xff] }
 0x17f   :  { %v14171_v16 = vpop.permute.xlu0 %3565  ;;  %v14173_v11 = vpop.f32.mrf.mxu0  ;;  %3595 = vperm.xlu1 %11566, %v3057_v51   ;;  %v2993_v51 = vld [vmem:[%s18629_s20 + $0x30] sm:$0xff] }
 0x180   :  { %v14169_v27 = vpop.permute.xlu1 %3570  ;;  %18743 = vst [vmem:[#allocation114_spill] sm:$0xff] %v14171_v16  ;;  %4085 = vperm.xlu0 %11565, %v3155_v56   ;;  %18744 = vst [vmem:[#allocation115_spill] sm:$0xff] %v14173_v11  ;;  %v2998_v56 = vld [vmem:[%s18629_s20 + $0x58] sm:$0xff] }
 0x181   :  { %18742 = vst [vmem:[#allocation113_spill] sm:$0xff] %v14169_v27  ;;  %v14178_v8 = vpop.f32.mrf.mxu0 }
 0x182   :  { %18745 = vst [vmem:[#allocation116_spill] sm:$0xff] %v14178_v8 }
 0x183   :  { %v14185_v32 = vpop.permute.xlu0 %3245  ;;  %v14190_v30 = vpop.f32.mrf.mxu0  ;;  %11618 = vrot.lane.b32.xlu1 %v18749_v26, %s12803_s27 }
 0x184   :  { %v14183_v12 = vpop.permute.xlu1 %3250  ;;  %18747 = vst [vmem:[#allocation118_spill] sm:$0xff] %v14185_v32  ;;  %3620 = vperm.xlu0 %11565, %v3062_v55   ;;  %18748 = vst [vmem:[#allocation119_spill] sm:$0xff] %v14190_v30 }
 0x185   :  { %18746 = vst [vmem:[#allocation117_spill] sm:$0xff] %v14183_v12  ;;  %v14202_v18 = vpop.f32.mrf.mxu0  ;;  %11378 = vmatmul.mubr.bf16.gmra.mxu0 %v12222_v15  ;;  %v12224_v15 = vld [vmem:[%s18631_s24 + $0x2c8] sm:$0xff]  }
 0x186   :  { %18750 = vst [vmem:[#allocation120_spill] sm:$0xff] %v14202_v18  ;;  %11381 = vmatprep.mubr.bf16.mxu0 %v12223_v49  ;;  %v3224_v12 = vld [vmem:[%s18629_s20 + $0x768] sm:$0xff] }
 0x187   :  { %v14206_v55 = vpop.permute.xlu0 %4515  ;;  %v14208_v19 = vpop.f32.mrf.mxu0  ;;  %3275 = vperm.xlu1 %11566, %v2993_v51  }
 0x188   :  { %v14204_v6 = vpop.permute.xlu1 %4520  ;;  %18752 = vst [vmem:[#allocation122_spill] sm:$0xff] %v14206_v55  ;;  %3300 = vperm.xlu0 %11565, %v2998_v56   ;;  %18753 = vst [vmem:[#allocation123_spill] sm:$0xff] %v14208_v19  ;;  %v12225_v56 = vld [vmem:[%s18631_s24 + $0x2d0] sm:$0xff]   ;;  %v3222_v55 = vld [vmem:[%s18629_s20 + $0x758] sm:$0xff] }
 0x189   :  { %18751 = vst [vmem:[#allocation121_spill] sm:$0xff] %v14204_v6  ;;  %v14216_v26 = vpop.f32.mrf.mxu0  ;;  %v3217_v6 = vld [vmem:[%s18629_s20 + $0x730] sm:$0xff] }
 0x18a   :  { %18754 = vst [vmem:[#allocation124_spill] sm:$0xff] %v14216_v26 }
 0x18b   :  { %v14223_v49 = vpop.permute.xlu0 %4195  ;;  %v14228_v51 = vpop.f32.mrf.mxu0  ;;  %4315 = vperm.xlu1 %11566, %v3201_v31  }
 0x18c   :  { %v14221_v23 = vpop.permute.xlu1 %4200  ;;  %18756 = vst [vmem:[#allocation126_spill] sm:$0xff] %v14223_v49  ;;  %4340 = vperm.xlu0 %11565, %v3206_v0   ;;  %18757 = vst [vmem:[#allocation127_spill] sm:$0xff] %v14228_v51 }
 0x18d   :  { %18755 = vst [vmem:[#allocation125_spill] sm:$0xff] %v14221_v23  ;;  %v11287_v26 = vpop.f32.mrf.mxu0  ;;  %11382 = vmatmul.mubr.bf16.gmra.mxu0 %v12224_v15 }
 0x18e   :  { %v1525_v19 = vadd.f32 %v11287_v26, %v13698_v13  ;;  %11385 = vmatprep.mubr.bf16.mxu0 %v12225_v56  ;;  %v3138_v26 = vld [vmem:[%s18629_s20 + $0x4b8] sm:$0xff] }
 0x18f   :  { %v14239_v30 = vpop.permute.xlu0 %4290  ;;  %v1516_v0 = vpop.f32.mrf.mxu0  ;;  %4395 = vperm.xlu1 %11566, %v3217_v6   ;;  %v12226_v56 = vld [vmem:[%s18631_s24 + $0x2d8] sm:$0xff]  }
 0x190   :  { %v14237_v18 = vpop.permute.xlu1 %4285  ;;  %18759 = vst [vmem:[#allocation129_spill] sm:$0xff] %v14239_v30  ;;  %4420 = vperm.xlu0 %11565, %v3222_v55   ;;  %vm2301_vm0 = vcmp.gt.f32.partialorder %v1525_v19, 0.0  ;;  %v2557_v31 = vmul.f32 0.2, %v1525_v19  ;;  %v1517_v51 = vadd.f32 %v13698_v13, %v1516_v0  ;;  %v12227_v0 = vld [vmem:[%s18631_s24 + $0x2e0] sm:$0xff]  }
 0x191   :  { %18758 = vst [vmem:[#allocation128_spill] sm:$0xff] %v14237_v18  ;;  %v11288_v15 = vpop.f32.mrf.mxu0 }
 0x192   :  { %v1528_v55 = vadd.f32 %v11288_v15, %v13698_v13  ;;  %v2813_v30 = vsel %vm2301_vm0, %v1525_v19, %v2557_v31  ;;  %v2555_v33 = vmul.f32 0.2, %v1517_v51  ;;  %vm2299_vm1 = vcmp.gt.f32.partialorder %v1517_v51, 0.0  ;;  %v3154_v15 = vld [vmem:[%s18629_s20 + $0x538] sm:$0xff] }
 0x193   :  { %v14254_v18 = vpop.permute.xlu0 %4370  ;;  %v1519_v8 = vpop.f32.mrf.mxu0  ;;  %4000 = vperm.xlu1 %11566, %v3138_v26   ;;  %v4605_v26 = vmul.f32 %v13483_v58, %v2813_v30 }
 0x194   :  { %v14252_v6 = vpop.permute.xlu1 %4365  ;;  %18761 = vst [vmem:[#allocation131_spill] sm:$0xff] %v14254_v18  ;;  %4015 = vperm.xlu0 %11565, %v3141_v7   ;;  %vm2302_vm2 = vcmp.gt.f32.partialorder %v1528_v55, 0.0  ;;  %v2558_v16 = vmul.f32 0.2, %v1528_v55  ;;  %v1520_v43 = vadd.f32 %v13698_v13, %v1519_v8  ;;  %v2811_v49 = vsel %vm2299_vm1, %v1517_v51, %v2555_v33 }
 0x195   :  { %18760 = vst [vmem:[#allocation130_spill] sm:$0xff] %v14252_v6  ;;  %v11291_v6 = vpop.f32.mrf.mxu0  ;;  %11386 = vmatmul.mubr.bf16.gmra.mxu0 %v12226_v56  ;;  %v4603_v51 = vmul.f32 %v13405_v62, %v2811_v49 }
 0x196   :  { %v2814_v18 = vsel %vm2302_vm2, %v1528_v55, %v2558_v16  ;;  %vm2300_vm3 = vcmp.gt.f32.partialorder %v1520_v43, 0.0  ;;  %v2556_v60 = vmul.f32 0.2, %v1520_v43  ;;  %v1541_v19 = vadd.f32 %v11291_v6, %v13698_v13  ;;  %11389 = vmatprep.mubr.bf16.mxu0 %v12227_v0  ;;  %v14273_v16 = vld [vmem:[%s18690_s2] ss:$0 sm:$0xff] }
 0x197   :  { %v14266_v7 = vpop.permute.xlu0 %3965  ;;  %v4606_v8 = vmul.f32 %v13485_v61, %v2814_v18  ;;  %v1532_v23 = vpop.f32.mrf.mxu0  ;;  %4080 = vperm.xlu1 %11566, %v3154_v15   ;;  %v3059_v55 = vld [vmem:[%s18629_s20 + $0x240] sm:$0xff] }
 0x198   :  { %v14264_v31 = vpop.permute.xlu1 %3970  ;;  %v2812_v11 = vsel %vm2300_vm3, %v1520_v43, %v2556_v60  ;;  %vm2305_vm4 = vcmp.gt.f32.partialorder %v1541_v19, 0.0  ;;  %v2561_v56 = vmul.f32 0.2, %v1541_v19  ;;  %v1533_v13 = vadd.f32 %v14273_v16, %v1532_v23  ;;  %v12228_v60 = vld [vmem:[%s18631_s24 + $0x2e8] sm:$0xff]   ;;  %v12229_v23 = vld [vmem:[%s18631_s24 + $0x2f0] sm:$0xff]  }
 0x199   :  { %v4604_v58 = vmul.f32 %v13407_v63, %v2812_v11  ;;  %v11292_v33 = vpop.f32.mrf.mxu0  ;;  %v11632_v61 = vpack.i.bf16 %v4606_v8, %v4605_v26 }
 0x19a   :  { %v1544_v43 = vadd.f32 %v14273_v16, %v11292_v33  ;;  %v2817_v6 = vsel %vm2305_vm4, %v1541_v19, %v2561_v56  ;;  %v2559_v11 = vmul.f32 0.2, %v1533_v13  ;;  %vm2303_vm6 = vcmp.gt.f32.partialorder %v1533_v13, 0.0 }
 0x19b   :  { %v14286_v30 = vpop.permute.xlu0 %4045  ;;  %11633 = vrot.lane.b32.xlu0 %v11632_v61, %s12803_s27  ;;  %v1535_v63 = vpop.f32.mrf.mxu0  ;;  %3605 = vperm.xlu1 %11566, %v3059_v55   ;;  %v11637_v8 = vpack.i.bf16 %v4604_v58, %v4603_v51  ;;  %v4609_v49 = vmul.f32 %v13673_v52, %v2817_v6  ;;  %v18766_v55 = vpack.i.bf16 %v13743_v39, %v13741_v57  ;;  %v12230_v51 = vld [vmem:[%s18631_s24 + $0x2f8] sm:$0xff]   ;;  %vm4843_vm4 = vcmask 261120  }
 0x19c   :  { %v14284_v18 = vpop.permute.xlu1 %4050  ;;  %18763 = vst [vmem:[#allocation133_spill] sm:$0xff] %v14286_v30  ;;  %vm2306_vm5 = vcmp.gt.f32.partialorder %v1544_v43, 0.0  ;;  %v2562_v0 = vmul.f32 0.2, %v1544_v43  ;;  %v1536_v15 = vadd.f32 %v14273_v16, %v1535_v63  ;;  %v2815_v58 = vsel %vm2303_vm6, %v1533_v13, %v2559_v11  ;;  %v12231_v13 = vld [vmem:[%s18631_s24 + $0x300] sm:$0xff]  }
 0x19d   :  { %18762 = vst [vmem:[#allocation132_spill] sm:$0xff] %v14284_v18  ;;  %v11295_v26 = vpop.f32.mrf.mxu0  ;;  %11390 = vmatmul.mubr.bf16.gmra.mxu0 %v12228_v60 }
 0x19e   :  { %v2818_v33 = vsel %vm2306_vm5, %v1544_v43, %v2562_v0  ;;  %vm2304_vm7 = vcmp.gt.f32.partialorder %v1536_v15, 0.0  ;;  %v2560_v18 = vmul.f32 0.2, %v1536_v15  ;;  %11393 = vmatprep.mubr.bf16.mxu0 %v12229_v23  ;;  %v2995_v43 = vld [vmem:[%s18629_s20 + $0x40] sm:$0xff] }
 0x19f   :  { %v14296_v62 = vpop.permute.xlu0 %3580  ;;  %v4610_v19 = vmul.f32 %v13675_v4, %v2818_v33  ;;  %v1548_v56 = vpop.f32.mrf.mxu0  ;;  %11638 = vrot.lane.b32.xlu0 %v11637_v8, %s12803_s27  ;;  %11623 = vrot.lane.b32.xlu1 %v18766_v55, %s12803_s27 }
 0x1a0   :  { %v14294_v30 = vpop.permute.xlu1 %3575  ;;  %18765 = vst [vmem:[#allocation135_spill] sm:$0xff] %v14296_v62  ;;  %v2816_v61 = vsel %vm2304_vm7, %v1536_v15, %v2560_v18  ;;  %v1549_v60 = vadd.f32 %v14273_v16, %v1548_v56  ;;  %v4607_v18 = vmul.f32 %v13571_v3, %v2815_v58  ;;  %v3203_v15 = vld [vmem:[%s18629_s20 + $0x6c0] sm:$0xff] }
 0x1a1   :  { %18764 = vst [vmem:[#allocation134_spill] sm:$0xff] %v14294_v30  ;;  %v4608_v52 = vmul.f32 %v13573_v48, %v2816_v61  ;;  %v11296_v23 = vpop.f32.mrf.mxu0  ;;  %v11642_v4 = vpack.i.bf16 %v4610_v19, %v4609_v49  ;;  %v1557_v48 = vadd.f32 %v14273_v16, %v11295_v26 }
 0x1a2   :  { %v1560_v6 = vadd.f32 %v14273_v16, %v11296_v23  ;;  %v2563_v11 = vmul.f32 0.2, %v1549_v60  ;;  %vm2307_vm8 = vcmp.gt.f32.partialorder %v1549_v60, 0.0 }
 0x1a3   :  { %v14314_v39 = vpop.permute.xlu0 %3260  ;;  %v1551_v63 = vpop.f32.mrf.mxu0  ;;  %11643 = vrot.lane.b32.xlu0 %v11642_v4, %s12803_s27  ;;  %3285 = vperm.xlu1 %11566, %v2995_v43   ;;  %v11647_v33 = vpack.i.bf16 %v4608_v52, %v4607_v18  ;;  %vm2309_vm10 = vcmp.gt.f32.partialorder %v1557_v48, 0.0  ;;  %v2565_v55 = vmul.f32 0.2, %v1557_v48  ;;  %v3157_v4 = vld [vmem:[%s18629_s20 + $0x550] sm:$0xff] }
 0x1a4   :  { %18767 = vst [vmem:[#allocation136_spill] sm:$0xff] %v14314_v39  ;;  %v14316_v57 = vpop.permute.xlu1 %11568  ;;  %v1552_v0 = vadd.f32 %v14273_v16, %v1551_v63  ;;  %v2566_v49 = vmul.f32 0.2, %v1560_v6  ;;  %vm2310_vm11 = vcmp.gt.f32.partialorder %v1560_v6, 0.0  ;;  %v2819_v61 = vsel %vm2307_vm8, %v1549_v60, %v2563_v11  ;;  %v12232_v60 = vld [vmem:[%s18631_s24 + $0x308] sm:$0xff]  }
 0x1a5   :  { %v11299_v8 = vpop.f32.mrf.mxu0  ;;  %11394 = vmatmul.mubr.bf16.gmra.mxu0 %v12230_v51  ;;  %v3219_v51 = vld [vmem:[%s18629_s20 + $0x740] sm:$0xff] }
 0x1a6   :  { %vm2308_vm9 = vcmp.gt.f32.partialorder %v1552_v0, 0.0  ;;  %v2564_v3 = vmul.f32 0.2, %v1552_v0  ;;  %v1573_v26 = vadd.f32 %v14273_v16, %v11299_v8  ;;  %11397 = vmatprep.mubr.bf16.mxu0 %v12231_v13  ;;  %v2822_v63 = vsel %vm2310_vm11, %v1560_v6, %v2566_v49 }
 0x1a7   :  { %v14329_v19 = vpop.permute.xlu0 %4300  ;;  %v1564_v58 = vpop.f32.mrf.mxu0  ;;  %11648 = vrot.lane.b32.xlu0 %v11647_v33, %s12803_s27  ;;  %4325 = vperm.xlu1 %11566, %v3203_v15   ;;  %v12233_v33 = vld [vmem:[%s18631_s24 + $0x310] sm:$0xff]  }
 0x1a8   :  { %18768 = vst [vmem:[#allocation137_spill] sm:$0xff] %v14329_v19  ;;  %v14331_v56 = vpop.permute.xlu1 %3255  ;;  %v2820_v43 = vsel %vm2308_vm9, %v1552_v0, %v2564_v3  ;;  %v2569_v52 = vmul.f32 0.2, %v1573_v26  ;;  %v1565_v23 = vadd.f32 %v14273_v16, %v1564_v58  ;;  %vm2313_vm12 = vcmp.gt.f32.partialorder %v1573_v26, 0.0 }
 0x1a9   :  { %18769 = vst [vmem:[#allocation138_spill] sm:$0xff] %v14331_v56  ;;  %v4612_v13 = vmul.f32 %v13785_v17, %v2820_v43  ;;  %v11300_v18 = vpop.f32.mrf.mxu0  ;;  %v2821_v17 = vsel %vm2309_vm10, %v1557_v48, %v2565_v55  ;;  %v4611_v3 = vmul.f32 %v13783_v10, %v2819_v61 }
 0x1aa   :  { %v2567_v11 = vmul.f32 0.2, %v1565_v23  ;;  %v1576_v0 = vadd.f32 %v14273_v16, %v11300_v18  ;;  %vm2311_vm13 = vcmp.gt.f32.partialorder %v1565_v23, 0.0  ;;  %v2825_v6 = vsel %vm2313_vm12, %v1573_v26, %v2569_v52  ;;  %v3140_v18 = vld [vmem:[%s18629_s20 + $0x4c8] sm:$0xff] }
 0x1ab   :  { %v14347_v15 = vpop.permute.xlu0 %4380  ;;  %v1567_v58 = vpop.f32.mrf.mxu0  ;;  %4095 = vperm.xlu0 %11565, %v3157_v4   ;;  %4405 = vperm.xlu1 %11566, %v3219_v51   ;;  %v11652_v48 = vpack.i.bf16 %v4612_v13, %v4611_v3  ;;  %v4613_v52 = vmul.f32 %v13897_v2, %v2821_v17  ;;  %v14369_v51 = vmul.f32 %v14097_v24, %v2825_v6  ;;  %v3156_v13 = vld [vmem:[%s18629_s20 + $0x548] sm:$0xff]  ;;  %v3061_v3 = vld [vmem:[%s18629_s20 + $0x250] sm:$0xff] }
 0x1ac   :  { %18770 = vst [vmem:[#allocation139_spill] sm:$0xff] %v14347_v15  ;;  %v14349_v8 = vpop.permute.xlu1 %4295  ;;  %vm2314_vm14 = vcmp.gt.f32.partialorder %v1576_v0, 0.0  ;;  %v2570_v49 = vmul.f32 0.2, %v1576_v0  ;;  %v1568_v43 = vadd.f32 %v14273_v16, %v1567_v58  ;;  %v4614_v15 = vmul.f32 %v13899_v1, %v2822_v63 }
 0x1ad   :  { %18771 = vst [vmem:[#allocation140_spill] sm:$0xff] %v14349_v8  ;;  %v14361_v62 = vpop.f32.mrf.mxu0  ;;  %11398 = vmatmul.mubr.bf16.gmra.mxu0 %v12232_v60  ;;  %v2823_v10 = vsel %vm2311_vm13, %v1565_v23, %v2567_v11  ;;  %v12234_v11 = vld [vmem:[%s18631_s24 + $0x318] sm:$0xff]   ;;  %v12241_v8 = vld [vmem:[%s18631_s24 + $0x350] sm:$0xff]  }
 0x1ae   :  { %v2826_v55 = vsel %vm2314_vm14, %v1576_v0, %v2570_v49  ;;  %vm2312_vm15 = vcmp.gt.f32.partialorder %v1568_v43, 0.0  ;;  %v2568_v61 = vmul.f32 0.2, %v1568_v43  ;;  %11401 = vmatprep.mubr.bf16.mxu0 %v12233_v33  ;;  %v14381_v60 = vmul.f32 %v13996_v44, %v2823_v10  ;;  %v12235_v44 = vld [vmem:[%s18631_s24 + $0x320] sm:$0xff]  }
 0x1af   :  { %v14363_v4 = vpop.permute.xlu0 %3975  ;;  %v14372_v1 = vmul.f32 %v14099_v50, %v2826_v55  ;;  %v14374_v63 = vpop.f32.mrf.mxu0  ;;  %11653 = vrot.lane.b32.xlu0 %v11652_v48, %s12803_s27  ;;  %4010 = vperm.xlu1 %11566, %v3140_v18   ;;  %v11677_v50 = vpack.i.bf16 %v4614_v15, %v4613_v52  ;;  %v12236_v48 = vld [vmem:[%s18631_s24 + $0x328] sm:$0xff]  }
 0x1b0   :  { %18772 = vst [vmem:[#allocation141_spill] sm:$0xff] %v14363_v4  ;;  %v14365_v26 = vpop.permute.xlu1 %4375  ;;  %v2824_v23 = vsel %vm2312_vm15, %v1568_v43, %v2568_v61  ;;  %v12237_v61 = vld [vmem:[%s18631_s24 + $0x330] sm:$0xff]   ;;  %v18815_v4 = vld [vmem:[#allocation7_spill] sm:$0xff] }
 0x1b1   :  { %18773 = vst [vmem:[#allocation142_spill] sm:$0xff] %v14365_v26  ;;  %v14384_v2 = vmul.f32 %v13998_v42, %v2824_v23  ;;  %v14386_v24 = vpop.f32.mrf.mxu0  ;;  %v18784_v23 = vpack.i.bf16 %v13818_v14, %v13820_v45  ;;  %v3205_v14 = vld [vmem:[%s18629_s20 + $0x6d0] sm:$0xff]  ;;  %v1325_v26 = vadd.f32 %v14273_v16, %v13822_v54 }
 0x1b3   :  { %v14393_v33 = vpop.permute.xlu0 %4055  ;;  %v14400_v42 = vpop.f32.mrf.mxu0  ;;  %11678 = vrot.lane.b32.xlu0 %v11677_v50, %s12803_s27  ;;  %4090 = vperm.xlu1 %11566, %v3156_v13   ;;  %v2997_v13 = vld [vmem:[%s18629_s20 + $0x50] sm:$0xff]  ;;  %vm2251_vm1 = vcmp.gt.f32.partialorder %v1325_v26, 0.0 }
 0x1b4   :  { %18774 = vst [vmem:[#allocation143_spill] sm:$0xff] %v14393_v33  ;;  %v14395_v17 = vpop.permute.xlu1 %3980 }
 0x1b5   :  { %18775 = vst [vmem:[#allocation144_spill] sm:$0xff] %v14395_v17  ;;  %v14408_v58 = vpop.f32.mrf.mxu0  ;;  %11402 = vmatmul.mubr.bf16.gmra.mxu0 %v12234_v11 }
 0x1b6   :  { %18776 = vst [vmem:[#allocation145_spill] sm:$0xff] %v14408_v58  ;;  %11405 = vmatprep.mubr.bf16.mxu0 %v12235_v44 }
 0x1b7   :  { %v14410_v6 = vpop.permute.xlu0 %3590  ;;  %v14414_v43 = vpop.f32.mrf.mxu0  ;;  %3615 = vperm.xlu1 %11566, %v3061_v3  }
 0x1b8   :  { %18777 = vst [vmem:[#allocation146_spill] sm:$0xff] %v14410_v6  ;;  %v14412_v49 = vpop.permute.xlu1 %4060  ;;  %18779 = vst [vmem:[#allocation148_spill] sm:$0xff] %v14414_v43  ;;  %v18804_v43 = vld [vmem:[#allocation77_spill] sm:$0xff] }
 0x1b9   :  { %18778 = vst [vmem:[#allocation147_spill] sm:$0xff] %v14412_v49  ;;  %v14416_v18 = vpop.f32.mrf.mxu0  ;;  %v3221_v49 = vld [vmem:[%s18629_s20 + $0x750] sm:$0xff] }
 0x1ba   :  { %18780 = vst [vmem:[#allocation149_spill] sm:$0xff] %v14416_v18  ;;  %v1352_v18 = vadd.f32 %v14273_v16, %v18804_v43 }
 0x1bb   :  { %v14421_v10 = vpop.permute.xlu0 %3270  ;;  %v14428_v52 = vpop.f32.mrf.mxu0  ;;  %11628 = vrot.lane.b32.xlu1 %v18784_v23, %s12803_s27  ;;  %v12238_v23 = vld [vmem:[%s18631_s24 + $0x338] sm:$0xff]  }
 0x1bc   :  { %18781 = vst [vmem:[#allocation150_spill] sm:$0xff] %v14421_v10  ;;  %v14423_v55 = vpop.permute.xlu1 %3585  ;;  %18783 = vst [vmem:[#allocation152_spill] sm:$0xff] %v14428_v52  ;;  %vm2258_vm8 = vcmp.gt.f32.partialorder %v1352_v18, 0.0 }
 0x1bd   :  { %18782 = vst [vmem:[#allocation151_spill] sm:$0xff] %v14423_v55  ;;  %v14437_v50 = vpop.f32.mrf.mxu0  ;;  %11406 = vmatmul.mubr.bf16.gmra.mxu0 %v12236_v48  ;;  %v18794_v55 = vld [vmem:[#allocation72_spill] sm:$0xff] }
 0x1be   :  { %18785 = vst [vmem:[#allocation153_spill] sm:$0xff] %v14437_v50  ;;  %11409 = vmatprep.mubr.bf16.mxu0 %v12237_v61  ;;  %v12239_v61 = vld [vmem:[%s18631_s24 + $0x340] sm:$0xff]   ;;  %v1328_v6 = vadd.f32 %v14273_v16, %v18794_v55  ;;  %v12240_v55 = vld [vmem:[%s18631_s24 + $0x348] sm:$0xff]  }
 0x1bf   :  { %v14439_v11 = vpop.permute.xlu0 %4310  ;;  %v14443_v3 = vpop.f32.mrf.mxu0  ;;  %3295 = vperm.xlu1 %11566, %v2997_v13   ;;  %v1333_v13 = vadd.f32 %v14273_v16, %v13816_v46  ;;  %v18803_v50 = vld [vmem:[#allocation76_spill] sm:$0xff] }
 0x1c0   :  { %18786 = vst [vmem:[#allocation154_spill] sm:$0xff] %v14439_v11  ;;  %v14441_v44 = vpop.permute.xlu1 %11573  ;;  %18788 = vst [vmem:[#allocation156_spill] sm:$0xff] %v14443_v3  ;;  %v2507_v11 = vmul.f32 0.2, %v1325_v26  ;;  %vm2252_vm3 = vcmp.gt.f32.partialorder %v1328_v6, 0.0  ;;  %v14502_v52 = vadd.f32 %v14273_v16, %v18803_v50 }
 0x1c1   :  { %18787 = vst [vmem:[#allocation155_spill] sm:$0xff] %v14441_v44  ;;  %v14448_v45 = vpop.f32.mrf.mxu0  ;;  %v2509_v54 = vmul.f32 0.2, %v1333_v13  ;;  %vm2253_vm0 = vcmp.gt.f32.partialorder %v1333_v13, 0.0 }
 0x1c2   :  { %18789 = vst [vmem:[#allocation157_spill] sm:$0xff] %v14448_v45  ;;  %vm2255_vm7 = vcmp.gt.f32.partialorder %v14502_v52, 0.0 }
 0x1c3   :  { %v14453_v0 = vpop.permute.xlu0 %4390  ;;  %v14460_v15 = vpop.f32.mrf.mxu0  ;;  %4335 = vperm.xlu1 %11566, %v3205_v14  }
 0x1c4   :  { %18790 = vst [vmem:[#allocation158_spill] sm:$0xff] %v14453_v0  ;;  %v14455_v48 = vpop.permute.xlu1 %3265  ;;  %18792 = vst [vmem:[#allocation160_spill] sm:$0xff] %v14460_v15  ;;  %v1336_v0 = vadd.f32 %v14273_v16, %v13832_v20  ;;  %v3142_v20 = vld [vmem:[%s18629_s20 + $0x4d8] sm:$0xff]  ;;  %v18802_v15 = vld [vmem:[#allocation73_spill] sm:$0xff] }
 0x1c5   :  { %18791 = vst [vmem:[#allocation159_spill] sm:$0xff] %v14455_v48  ;;  %v14471_v33 = vpop.f32.mrf.mxu0  ;;  %11410 = vmatmul.mubr.bf16.gmra.mxu0 %v12238_v23  ;;  %v1349_v45 = vadd.f32 %v14273_v16, %v18802_v15 }
 0x1c6   :  { %18793 = vst [vmem:[#allocation161_spill] sm:$0xff] %v14471_v33  ;;  %11413 = vmatprep.mubr.bf16.mxu0 %v12239_v61  ;;  %v2510_v23 = vmul.f32 0.2, %v1336_v0  ;;  %vm2254_vm2 = vcmp.gt.f32.partialorder %v1336_v0, 0.0  ;;  %v2508_v61 = vmul.f32 0.2, %v1328_v6  ;;  %v2765_v33 = vsel %vm2253_vm0, %v1333_v13, %v2509_v54 }
 0x1c7   :  { %v14475_v14 = vpop.permute.xlu0 %3985  ;;  %v14479_v46 = vpop.f32.mrf.mxu0  ;;  %4415 = vperm.xlu1 %11566, %v3221_v49   ;;  %v18809_v54 = vld [vmem:[#allocation80_spill] sm:$0xff]  ;;  %vm2257_vm5 = vcmp.gt.f32.partialorder %v1349_v45, 0.0 }
 0x1c8   :  { %18795 = vst [vmem:[#allocation72_spill] sm:$0xff] %v14475_v14  ;;  %v14477_v30 = vpop.permute.xlu1 %4305  ;;  %18797 = vst [vmem:[#allocation163_spill] sm:$0xff] %v14479_v46  ;;  %v2766_v3 = vsel %vm2254_vm2, %v1336_v0, %v2510_v23  ;;  %v18808_v0 = vld [vmem:[#allocation23_spill] sm:$0xff]  ;;  %v1344_v50 = vadd.f32 %v14273_v16, %v18809_v54 }
 0x1c9   :  { %18796 = vst [vmem:[#allocation162_spill] sm:$0xff] %v14477_v30  ;;  %v14484_v19 = vpop.f32.mrf.mxu0 }
 0x1ca   :  { %18798 = vst [vmem:[#allocation164_spill] sm:$0xff] %v14484_v19  ;;  %v2763_v19 = vsel %vm2251_vm1, %v1325_v26, %v2507_v11  ;;  %v18807_v26 = vld [vmem:[#allocation31_spill] sm:$0xff]  ;;  %vm2256_vm9 = vcmp.gt.f32.partialorder %v1344_v50, 0.0  ;;  %v2512_v58 = vmul.f32 0.2, %v1344_v50 }
 0x1cb   :  { %v14489_v30 = vpop.permute.xlu0 %4065  ;;  %v14496_v46 = vpop.f32.mrf.mxu0  ;;  %4020 = vperm.xlu1 %11566, %v3142_v20   ;;  %v4557_v15 = vmul.f32 %v18807_v26, %v2765_v33  ;;  %v4555_v11 = vmul.f32 %v18808_v0, %v2763_v19  ;;  %v12242_v19 = vld [vmem:[%s18631_s24 + $0x358] sm:$0xff]   ;;  %v2511_v26 = vmul.f32 0.2, %v14502_v52  ;;  %v2514_v0 = vmul.f32 0.2, %v1352_v18 }
 0x1cc   :  { %18799 = vst [vmem:[#allocation165_spill] sm:$0xff] %v14489_v30  ;;  %v14491_v49 = vpop.permute.xlu1 %4385  ;;  %18801 = vst [vmem:[#allocation167_spill] sm:$0xff] %v14496_v46 }
 0x1cd   :  { %18800 = vst [vmem:[#allocation166_spill] sm:$0xff] %v14491_v49  ;;  %v11319_v30 = vpop.f32.mrf.mxu0  ;;  %11414 = vmatmul.mubr.bf16.gmra.mxu0 %v12240_v55  ;;  %v2764_v49 = vsel %vm2252_vm3, %v1328_v6, %v2508_v61  ;;  %v18810_v6 = vld [vmem:[#allocation30_spill] sm:$0xff]  ;;  %v2513_v61 = vmul.f32 0.2, %v1349_v45 }
 0x1ce   :  { %v1653_v27 = vadd.f32 %v14273_v16, %v11319_v30  ;;  %11417 = vmatprep.mubr.bf16.mxu0 %v12241_v8  ;;  %v4558_v23 = vmul.f32 %v18810_v6, %v2766_v3  ;;  %v18811_v30 = vld [vmem:[#allocation22_spill] sm:$0xff] }
 0x1cf   :  { %v14507_v46 = vpop.permute.xlu0 %3600  ;;  %v1644_v20 = vpop.f32.mrf.mxu0  ;;  %v4556_v55 = vmul.f32 %v18811_v30, %v2764_v49  ;;  %v12243_v49 = vld [vmem:[%s18631_s24 + $0x360] sm:$0xff]  }
 0x1d0   :  { %18805 = vst [vmem:[#allocation73_spill] sm:$0xff] %v14507_v46  ;;  %v14509_v13 = vpop.permute.xlu1 %3990  ;;  %vm2333_vm6 = vcmp.gt.f32.partialorder %v1653_v27, 0.0  ;;  %v2589_v43 = vmul.f32 0.2, %v1653_v27  ;;  %v1645_v8 = vadd.f32 %v14273_v16, %v1644_v20 }
 0x1d1   :  { %18806 = vst [vmem:[#allocation76_spill] sm:$0xff] %v14509_v13  ;;  %v11320_v33 = vpop.f32.mrf.mxu0 }
 0x1d2   :  { %v1656_v3 = vadd.f32 %v14273_v16, %v11320_v33  ;;  %v2845_v20 = vsel %vm2333_vm6, %v1653_v27, %v2589_v43  ;;  %vm2331_vm11 = vcmp.gt.f32.partialorder %v1645_v8, 0.0  ;;  %v2587_v33 = vmul.f32 0.2, %v1645_v8 }
 0x1d3   :  { %v14524_v54 = vpop.permute.xlu0 %3280  ;;  %v1647_v29 = vpop.f32.mrf.mxu0  ;;  %v4637_v38 = vmul.f32 %v18813_v35, %v2845_v20  ;;  %v18816_v35 = vld [vmem:[#allocation81_spill] sm:$0xff] }
 0x1d4   :  { %18812 = vst [vmem:[#allocation77_spill] sm:$0xff] %v14524_v54  ;;  %v11579_v6 = vpop.permute.xlu1 %11578  ;;  %vm2334_vm10 = vcmp.gt.f32.partialorder %v1656_v3, 0.0  ;;  %v2590_v53 = vmul.f32 0.2, %v1656_v3  ;;  %v1648_v14 = vadd.f32 %v14273_v16, %v1647_v29 }
 0x1d5   :  { %v11581_v30 = vunpack.i.h.bf16 %v11579_v6  ;;  %v11580_v46 = vunpack.i.l.bf16 %v11579_v6  ;;  %v14533_v21 = vpop.f32.mrf.mxu0  ;;  %11418 = vmatmul.mubr.bf16.gmra.mxu0 %v12242_v19 }
 0x1d6   :  { %v2846_v27 = vsel %vm2334_vm10, %v1656_v3, %v2590_v53  ;;  %vm2332_vm12 = vcmp.gt.f32.partialorder %v1648_v14, 0.0  ;;  %v2588_v43 = vmul.f32 0.2, %v1648_v14  ;;  %11421 = vmatprep.mubr.bf16.mxu0 %v12243_v49  ;;  %v1365_v53 = vadd.f32 %v14273_v16, %v18816_v35  ;;  %v18824_v35 = vld [vmem:[#allocation86_spill] sm:$0xff] }
 0x1d7   :  { %v4927_v47 = vsel %vm4843_vm4, %v4558_v23, %v11581_v30  ;;  %v4926_v13 = vsel %vm4843_vm4, %v4557_v15, %v11580_v46  ;;  %v14536_v6 = vpop.permute.xlu0 %4320  ;;  %v4638_v29 = vmul.f32 %v18815_v4, %v2846_v27  ;;  %v14539_v10 = vpop.f32.mrf.mxu0  ;;  %v2769_v46 = vsel %vm2257_vm5, %v1349_v45, %v2513_v61 }
 0x1d8   :  { %18814 = vst [vmem:[#allocation31_spill] sm:$0xff] %v14536_v6  ;;  %v11584_v54 = vpop.permute.xlu1 %11583  ;;  %v11657_v23 = vpack.i.bf16 %v4927_v47, %v4926_v13  ;;  %v2770_v15 = vsel %vm2258_vm8, %v1352_v18, %v2514_v0  ;;  %v2844_v19 = vsel %vm2332_vm12, %v1648_v14, %v2588_v43  ;;  %v12244_v47 = vld [vmem:[%s18631_s24 + $0x368] sm:$0xff]   ;;  %v2767_v18 = vsel %vm2255_vm7, %v14502_v52, %v2511_v26  ;;  %v18817_v14 = vld [vmem:[#allocation83_spill] sm:$0xff]  ;;  %v18821_v26 = vld [vmem:[#allocation62_spill] sm:$0xff] }
 0x1d9   :  { %v11586_v48 = vunpack.i.h.bf16 %v11584_v54  ;;  %v11585_v17 = vunpack.i.l.bf16 %v11584_v54  ;;  %v14548_v4 = vpop.f32.mrf.mxu0  ;;  %v11682_v54 = vpack.i.bf16 %v4638_v29, %v4637_v38  ;;  %v2768_v45 = vsel %vm2256_vm9, %v1344_v50, %v2512_v58  ;;  %v12245_v38 = vld [vmem:[%s18631_s24 + $0x370] sm:$0xff]   ;;  %v18820_v52 = vld [vmem:[#allocation63_spill] sm:$0xff] }
 0x1da   :  { %11658 = vrot.lane.b32.xlu1 %v11657_v23, %s12804_s21  ;;  %v4561_v50 = vmul.f32 %v18820_v52, %v2769_v46  ;;  %v18823_v43 = vld [vmem:[#allocation50_spill] sm:$0xff]  ;;  %v2517_v23 = vmul.f32 0.2, %v1365_v53  ;;  %vm2261_vm13 = vcmp.gt.f32.partialorder %v1365_v53, 0.0 }
 0x1db   :  { %v4925_v3 = vsel %vm4843_vm4, %v4556_v55, %v11586_v48  ;;  %v4924_v20 = vsel %vm4843_vm4, %v4555_v11, %v11585_v17  ;;  %v1368_v48 = vadd.f32 %v14273_v16, %v18817_v14  ;;  %v2843_v17 = vsel %vm2331_vm11, %v1645_v8, %v2587_v33  ;;  %v14560_v13 = vpop.permute.xlu0 %4400  ;;  %v18819_v55 = vld [vmem:[#allocation5_spill] sm:$0xff]  ;;  %v14566_v30 = vpop.f32.mrf.mxu0  ;;  %11683 = vrot.lane.b32.xlu0 %v11682_v54, %s12803_s27  ;;  %v18822_v33 = vld [vmem:[#allocation82_spill] sm:$0xff]  ;;  %v18825_v14 = vld [vmem:[#allocation4_spill] sm:$0xff] }
 0x1dc   :  { %18818 = vst [vmem:[#allocation23_spill] sm:$0xff] %v14560_v13  ;;  %v11589_v11 = vpop.permute.xlu1 %11588  ;;  %v4636_v61 = vmul.f32 %v18819_v55, %v2844_v19  ;;  %v11662_v58 = vpack.i.bf16 %v4925_v3, %v4924_v20  ;;  %v4562_v8 = vmul.f32 %v18821_v26, %v2770_v15  ;;  %v1357_v27 = vadd.f32 %v14273_v16, %v18822_v33  ;;  %v18826_v3 = vld [vmem:[#allocation49_spill] sm:$0xff]  ;;  %v18831_v6 = vld [vmem:[#allocation90_spill] sm:$0xff] }
 0x1dd   :  { %v11591_v0 = vunpack.i.h.bf16 %v11589_v11  ;;  %v11590_v49 = vunpack.i.l.bf16 %v11589_v11  ;;  %v4559_v29 = vmul.f32 %v18823_v43, %v2767_v18  ;;  %v1360_v19 = vadd.f32 %v14273_v16, %v18824_v35  ;;  %v14578_v55 = vpop.f32.mrf.mxu0  ;;  %11422 = vmatmul.mubr.bf16.gmra.mxu0 %v12244_v47 }
 0x1de   :  { %v4635_v11 = vmul.f32 %v18825_v14, %v2843_v17  ;;  %11663 = vrot.lane.b32.xlu1 %v11662_v58, %s12804_s21  ;;  %v4560_v46 = vmul.f32 %v18826_v3, %v2768_v45  ;;  %11425 = vmatprep.mubr.bf16.mxu0 %v12245_v38  ;;  %v2518_v52 = vmul.f32 0.2, %v1368_v48  ;;  %vm2259_vm14 = vcmp.gt.f32.partialorder %v1357_v27, 0.0  ;;  %v12246_v38 = vld [vmem:[%s18631_s24 + $0x378] sm:$0xff]   ;;  %v3064_v14 = vld [vmem:[%s18629_s20 + $0x268] sm:$0xff] }
 0x1df   :  { %v4931_v15 = vsel %vm4843_vm4, %v4562_v8, %v11591_v0  ;;  %v4930_v20 = vsel %vm4843_vm4, %v4561_v50, %v11590_v49  ;;  %v14583_v54 = vpop.permute.xlu0 %3995  ;;  %v14585_v17 = vpop.f32.mrf.mxu0  ;;  %v2515_v43 = vmul.f32 0.2, %v1357_v27  ;;  %vm2262_vm15 = vcmp.gt.f32.partialorder %v1368_v48, 0.0 }
 0x1e0   :  { %v11594_v18 = vpop.permute.xlu1 %11593  ;;  %v11687_v58 = vpack.i.bf16 %v4636_v61, %v4635_v11  ;;  %v2516_v47 = vmul.f32 0.2, %v1360_v19  ;;  %v11667_v49 = vpack.i.bf16 %v4931_v15, %v4930_v20  ;;  %vm2260_vm0 = vcmp.gt.f32.partialorder %v1360_v19, 0.0 }
 0x1e1   :  { %v11596_v26 = vunpack.i.h.bf16 %v11594_v18  ;;  %v11595_v33 = vunpack.i.l.bf16 %v11594_v18  ;;  %v14590_v50 = vpop.f32.mrf.mxu0  ;;  %v2773_v61 = vsel %vm2261_vm13, %v1365_v53, %v2517_v23  ;;  %v2774_v11 = vsel %vm2262_vm15, %v1368_v48, %v2518_v52  ;;  %v18828_v23 = vld [vmem:[#allocation87_spill] sm:$0xff] }
 0x1e2   :  { %11688 = vrot.lane.b32.xlu0 %v11687_v58, %s12803_s27  ;;  %11668 = vrot.lane.b32.xlu1 %v11667_v49, %s12804_s21  ;;  %v2771_v53 = vsel %vm2259_vm14, %v1357_v27, %v2515_v43  ;;  %v1381_v18 = vadd.f32 %v14273_v16, %v18828_v23  ;;  %v18830_v58 = vld [vmem:[#allocation93_spill] sm:$0xff]  ;;  %v1373_v48 = vadd.f32 %v14273_v16, %v18831_v6  ;;  %v18832_v52 = vld [vmem:[#allocation91_spill] sm:$0xff]  ;;  %v18833_v27 = vld [vmem:[#allocation94_spill] sm:$0xff] }
 0x1e3   :  { %v4929_v45 = vsel %vm4843_vm4, %v4560_v46, %v11596_v26  ;;  %v4928_v0 = vsel %vm4843_vm4, %v4559_v29, %v11595_v33  ;;  %v14596_v8 = vpop.permute.xlu0 %4075  ;;  %v12247_v29 = vld [vmem:[%s18631_s24 + $0x380] sm:$0xff]   ;;  %v14605_v15 = vpop.f32.mrf.mxu0  ;;  %v4565_v13 = vmul.f32 %v18830_v58, %v2773_v61  ;;  %v1384_v49 = vadd.f32 %v14273_v16, %v18832_v52  ;;  %v3000_v6 = vld [vmem:[%s18629_s20 + $0x68] sm:$0xff]  ;;  %v18836_v23 = vld [vmem:[#allocation70_spill] sm:$0xff] }
 0x1e4   :  { %18827 = vst [vmem:[#allocation80_spill] sm:$0xff] %v14596_v8  ;;  %v11599_v35 = vpop.permute.xlu1 %11598  ;;  %v11672_v20 = vpack.i.bf16 %v4929_v45, %v4928_v0  ;;  %v18829_v26 = vld [vmem:[#allocation92_spill] sm:$0xff]  ;;  %v2772_v8 = vsel %vm2260_vm0, %v1360_v19, %v2516_v47  ;;  %v1376_v43 = vadd.f32 %v14273_v16, %v18833_v27  ;;  %vm2265_vm1 = vcmp.gt.f32.partialorder %v1381_v18, 0.0 }
 0x1e5   :  { %v11601_v3 = vunpack.i.h.bf16 %v11599_v35  ;;  %v11600_v46 = vunpack.i.l.bf16 %v11599_v35  ;;  %v4566_v33 = vmul.f32 %v18829_v26, %v2774_v11  ;;  %v14617_v35 = vpop.f32.mrf.mxu0  ;;  %11426 = vmatmul.mubr.bf16.gmra.mxu0 %v12246_v38  ;;  %v18835_v11 = vld [vmem:[#allocation71_spill] sm:$0xff]  ;;  %v4564_v26 = vmul.f32 %v18836_v23, %v2772_v8 }
 0x1e6   :  { %3630 = vperm.xlu0 %11565, %v3064_v14   ;;  %11429 = vmatprep.mubr.bf16.mxu0 %v12247_v29  ;;  %v2522_v58 = vmul.f32 0.2, %v1384_v49  ;;  %v2520_v52 = vmul.f32 0.2, %v1376_v43  ;;  %vm2266_vm2 = vcmp.gt.f32.partialorder %v1384_v49, 0.0  ;;  %vm2264_vm3 = vcmp.gt.f32.partialorder %v1376_v43, 0.0 }
 0x1e7   :  { %v14622_v45 = vsel %vm4843_vm4, %v4566_v33, %v11601_v3  ;;  %v14625_v0 = vsel %vm4843_vm4, %v4565_v13, %v11600_v46  ;;  %v14627_v19 = vpop.permute.xlu0 %3610  ;;  %11673 = vrot.lane.b32.xlu1 %v11672_v20, %s12804_s21  ;;  %v14633_v14 = vpop.f32.mrf.mxu0  ;;  %v4563_v3 = vmul.f32 %v18835_v11, %v2771_v53  ;;  %v2521_v13 = vmul.f32 0.2, %v1381_v18  ;;  %v3158_v46 = vld [vmem:[%s18629_s20 + $0x558] sm:$0xff] }
 0x1e8   :  { %18834 = vst [vmem:[#allocation30_spill] sm:$0xff] %v14627_v19  ;;  %v11604_v47 = vpop.permute.xlu1 %11603  ;;  %v2519_v33 = vmul.f32 0.2, %v1373_v48  ;;  %vm2263_vm5 = vcmp.gt.f32.partialorder %v1373_v48, 0.0  ;;  %v2776_v44 = vsel %vm2264_vm3, %v1376_v43, %v2520_v52 }
 0x1e9   :  { %v11606_v38 = vunpack.i.h.bf16 %v11604_v47  ;;  %v11605_v61 = vunpack.i.l.bf16 %v11604_v47  ;;  %v14640_v29 = vpop.f32.mrf.mxu0  ;;  %v3208_v47 = vld [vmem:[%s18629_s20 + $0x6e8] sm:$0xff]  ;;  %v2777_v20 = vsel %vm2265_vm1, %v1381_v18, %v2521_v13 }
 0x1ea   :  { %3310 = vperm.xlu0 %11565, %v3000_v6   ;;  %v12248_v6 = vld [vmem:[%s18631_s24 + $0x388] sm:$0xff]   ;;  %v2775_v39 = vsel %vm2263_vm5, %v1373_v48, %v2519_v33  ;;  %v3063_v48 = vld [vmem:[%s18629_s20 + $0x260] sm:$0xff] }
 0x1eb   :  { %v4933_v53 = vsel %vm4843_vm4, %v4564_v26, %v11606_v38  ;;  %v4932_v8 = vsel %vm4843_vm4, %v4563_v3, %v11605_v61  ;;  %4100 = vperm.xlu1 %11566, %v3158_v46   ;;  %v14652_v11 = vpop.permute.xlu0 %3290  ;;  %v14654_v23 = vpop.f32.mrf.mxu0  ;;  %v12249_v38 = vld [vmem:[%s18631_s24 + $0x390] sm:$0xff]   ;;  %v2778_v26 = vsel %vm2266_vm2, %v1384_v49, %v2522_v58  ;;  %v4568_v49 = vmul.f32 %v14047_v40, %v2776_v44  ;;  %v3143_v44 = vld [vmem:[%s18629_s20 + $0x4e0] sm:$0xff] }
 0x1ec   :  { %v11609_v27 = vpop.permute.xlu1 %11608  ;;  %18837 = vst [vmem:[#allocation22_spill] sm:$0xff] %v14652_v11  ;;  %v11692_v19 = vpack.i.bf16 %v4933_v53, %v4932_v8  ;;  %v4570_v46 = vmul.f32 %v14152_v22, %v2778_v26  ;;  %v4569_v11 = vmul.f32 %v14154_v25, %v2777_v20  ;;  %v4567_v18 = vmul.f32 %v14049_v9, %v2775_v39  ;;  %v12251_v20 = vld [vmem:[%s18631_s24 + $0x3a0] sm:$0xff]  }
 0x1ed   :  { %v11611_v61 = vunpack.i.h.bf16 %v11609_v27  ;;  %v11610_v3 = vunpack.i.l.bf16 %v11609_v27  ;;  %v14660_v56 = vpop.f32.mrf.mxu0  ;;  %11430 = vmatmul.mubr.bf16.gmra.mxu0 %v12248_v6  ;;  %v3159_v27 = vld [vmem:[%s18629_s20 + $0x560] sm:$0xff] }
 0x1ee   :  { %4350 = vperm.xlu0 %11565, %v3208_v47   ;;  %18838 = vst [vmem:[#allocation6_spill] sm:$0xff] %v14660_v56  ;;  %11433 = vmatprep.mubr.bf16.mxu0 %v12249_v38  ;;  %v18846_v6 = vld [vmem:[#allocation88_spill] sm:$0xff] }
 0x1ef   :  { %11693 = vrot.lane.b32.xlu1 %v11692_v19, %s12804_s21  ;;  %v14670_v43 = vpop.f32.mrf.mxu0  ;;  %v14673_v22 = vsel %vm4843_vm4, %v4570_v46, %v11611_v61  ;;  %v14676_v25 = vsel %vm4843_vm4, %v4569_v11, %v11610_v3  ;;  %v14681_v40 = vpop.permute.xlu0 %4330  ;;  %v12250_v19 = vld [vmem:[%s18631_s24 + $0x398] sm:$0xff]   ;;  %v18847_v11 = vld [vmem:[#allocation89_spill] sm:$0xff]  ;;  %v1672_v3 = vadd.f32 %v14273_v16, %v14548_v4  ;;  %v2999_v26 = vld [vmem:[%s18629_s20 + $0x60] sm:$0xff] }
 0x1f0   :  { %v11614_v32 = vpop.permute.xlu1 %11613  ;;  %18839 = vst [vmem:[#allocation7_spill] sm:$0xff] %v14670_v43  ;;  %18840 = vst [vmem:[#allocation81_spill] sm:$0xff] %v14681_v40  ;;  %v18848_v38 = vpack.i.bf16 %v18846_v6, %v18847_v11  ;;  %v12253_v4 = vld [vmem:[%s18631_s24 + $0x3b0] sm:$0xff]   ;;  %v1661_v6 = vadd.f32 %v14273_v16, %v14539_v10  ;;  %v1688_v10 = vadd.f32 %v14273_v16, %v14590_v50  ;;  %v12254_v50 = vld [vmem:[%s18631_s24 + $0x3b8] sm:$0xff]  }
 0x1f1   :  { %v11616_v13 = vunpack.i.h.bf16 %v11614_v32  ;;  %v11615_v58 = vunpack.i.l.bf16 %v11614_v32  ;;  %v14689_v39 = vpop.f32.mrf.mxu0  ;;  %vm2338_vm6 = vcmp.gt.f32.partialorder %v1672_v3, 0.0 }
 0x1f2   :  { %4430 = vperm.xlu0 %11565, %v3224_v12   ;;  %18841 = vst [vmem:[#allocation83_spill] sm:$0xff] %v14689_v39  ;;  %v2591_v12 = vmul.f32 0.2, %v1661_v6  ;;  %vm2335_vm9 = vcmp.gt.f32.partialorder %v1661_v6, 0.0  ;;  %vm2342_vm10 = vcmp.gt.f32.partialorder %v1688_v10, 0.0  ;;  %v18916_v39 = vld [vmem:[#allocation48_spill] sm:$0xff] }
 0x1f3   :  { %v14684_v9 = vsel %vm4843_vm4, %v4568_v49, %v11616_v13  ;;  %v14687_v32 = vsel %vm4843_vm4, %v4567_v18, %v11615_v58  ;;  %3625 = vperm.xlu1 %11566, %v3063_v48   ;;  %v14697_v33 = vpop.f32.mrf.mxu0  ;;  %v14713_v47 = vpop.permute.xlu0 %4410  ;;  %v1669_v49 = vadd.f32 %v14273_v16, %v14533_v21  ;;  %v12252_v13 = vld [vmem:[%s18631_s24 + $0x3a8] sm:$0xff]   ;;  %v2594_v48 = vmul.f32 0.2, %v1672_v3 }
 0x1f4   :  { %18842 = vst [vmem:[#allocation5_spill] sm:$0xff] %v14697_v33  ;;  %18845 = vst [vmem:[#allocation82_spill] sm:$0xff] %v14713_v47  ;;  %v18854_v21 = vpack.i.bf16 %v14384_v2, %v14381_v60  ;;  %v18862_v47 = vld [vmem:[#allocation10_spill] sm:$0xff] }
 0x1f5   :  { %v14706_v53 = vpop.f32.mrf.mxu0  ;;  %11434 = vmatmul.mubr.bf16.gmra.mxu0 %v12250_v19  ;;  %vm2337_vm7 = vcmp.gt.f32.partialorder %v1669_v49, 0.0  ;;  %v2850_v2 = vsel %vm2338_vm6, %v1672_v3, %v2594_v48  ;;  %v3002_v3 = vld [vmem:[%s18629_s20 + $0x78] sm:$0xff] }
 0x1f6   :  { %4025 = vperm.xlu0 %11565, %v3143_v44   ;;  %18843 = vst [vmem:[#allocation63_spill] sm:$0xff] %v14706_v53  ;;  %v14708_v8 = vpop.permute.xlu1 %4070  ;;  %11437 = vmatprep.mubr.bf16.mxu0 %v12251_v20  ;;  %v1664_v44 = vadd.f32 %v14273_v16, %v14566_v30  ;;  %v3066_v30 = vld [vmem:[%s18629_s20 + $0x278] sm:$0xff] }
 0x1f7   :  { %18844 = vst [vmem:[#allocation62_spill] sm:$0xff] %v14708_v8  ;;  %11698 = vrot.lane.b32.xlu1 %v18848_v38, %s12803_s27  ;;  %v14719_v61 = vpop.f32.mrf.mxu0  ;;  %v14742_v19 = vpop.permute.xlu0 %4005  ;;  %v18856_v38 = vpack.i.bf16 %v14622_v45, %v14625_v0  ;;  %v1685_v45 = vadd.f32 %v14273_v16, %v14578_v55  ;;  %v12255_v55 = vld [vmem:[%s18631_s24 + $0x3c0] sm:$0xff]  }
 0x1f8   :  { %18849 = vst [vmem:[#allocation50_spill] sm:$0xff] %v14719_v61  ;;  %18853 = vst [vmem:[#allocation87_spill] sm:$0xff] %v14742_v19  ;;  %vm2336_vm8 = vcmp.gt.f32.partialorder %v1664_v44, 0.0  ;;  %v18905_v19 = vld [vmem:[#allocation42_spill] sm:$0xff] }
 0x1f9   :  { %v14726_v46 = vpop.f32.mrf.mxu0  ;;  %vm2341_vm11 = vcmp.gt.f32.partialorder %v1685_v45, 0.0 }
 0x1fa   :  { %4105 = vperm.xlu0 %11565, %v3159_v27   ;;  %18850 = vst [vmem:[#allocation86_spill] sm:$0xff] %v14726_v46  ;;  %v14730_v18 = vpop.permute.xlu1 %3595  ;;  %v2593_v27 = vmul.f32 0.2, %v1669_v49 }
 0x1fb   :  { %18851 = vst [vmem:[#allocation4_spill] sm:$0xff] %v14730_v18  ;;  %3305 = vperm.xlu1 %11566, %v2999_v26   ;;  %v14735_v58 = vpop.f32.mrf.mxu0  ;;  %v2592_v26 = vmul.f32 0.2, %v1664_v44 }
 0x1fc   :  { %18852 = vst [vmem:[#allocation49_spill] sm:$0xff] %v14735_v58  ;;  %v2849_v52 = vsel %vm2337_vm7, %v1669_v49, %v2593_v27 }
 0x1fd   :  { %v14748_v20 = vpop.f32.mrf.mxu0  ;;  %11438 = vmatmul.mubr.bf16.gmra.mxu0 %v12252_v13  ;;  %v3207_v13 = vld [vmem:[%s18629_s20 + $0x6e0] sm:$0xff]  ;;  %v2848_v27 = vsel %vm2336_vm8, %v1664_v44, %v2592_v26  ;;  %v18865_v26 = vld [vmem:[#allocation9_spill] sm:$0xff] }
 0x1fe   :  { %11708 = vrot.lane.b32.xlu0 %v18854_v21, %s12803_s27  ;;  %18855 = vst [vmem:[#allocation92_spill] sm:$0xff] %v14748_v20  ;;  %v14752_v11 = vpop.permute.xlu1 %11618  ;;  %11441 = vmatprep.mubr.bf16.mxu0 %v12253_v4  ;;  %v18859_v4 = vld [vmem:[#allocation11_spill] sm:$0xff]  ;;  %v1680_v20 = vadd.f32 %v14273_v16, %v14605_v15  ;;  %v4640_v15 = vmul.f32 %v18865_v26, %v2848_v27 }
 0x1ff   :  { %11703 = vrot.lane.b32.xlu1 %v18856_v38, %s12804_s21  ;;  %v14761_v60 = vpop.f32.mrf.mxu0  ;;  %v4642_v48 = vmul.f32 %v18859_v4, %v2850_v2  ;;  %v2598_v38 = vmul.f32 0.2, %v1688_v10  ;;  %v4641_v2 = vmul.f32 %v18862_v47, %v2849_v52  ;;  %v2847_v4 = vsel %vm2335_vm9, %v1661_v6, %v2591_v12  ;;  %v18867_v6 = vld [vmem:[#allocation8_spill] sm:$0xff] }
 0x200   :  { %18857 = vst [vmem:[#allocation93_spill] sm:$0xff] %v14761_v60  ;;  %v2597_v60 = vmul.f32 0.2, %v1685_v45  ;;  %v2596_v47 = vmul.f32 0.2, %v1680_v20  ;;  %v1704_v12 = vadd.f32 %v14273_v16, %v14640_v29  ;;  %vm2340_vm12 = vcmp.gt.f32.partialorder %v1680_v20, 0.0 }
 0x201   :  { %v14768_v21 = vpop.f32.mrf.mxu0  ;;  %v2854_v52 = vsel %vm2342_vm10, %v1688_v10, %v2598_v38  ;;  %v1701_v10 = vadd.f32 %v14273_v16, %v14617_v35  ;;  %v12256_v29 = vld [vmem:[%s18631_s24 + $0x3c8] sm:$0xff]   ;;  %v18871_v38 = vld [vmem:[#allocation15_spill] sm:$0xff]  ;;  %v1696_v35 = vadd.f32 %v14273_v16, %v14654_v23 }
 0x202   :  { %3640 = vperm.xlu0 %11565, %v3066_v30   ;;  %18858 = vst [vmem:[#allocation90_spill] sm:$0xff] %v14768_v21  ;;  %v14772_v0 = vpop.permute.xlu1 %3275  ;;  %v14781_v30 = vpop.permute.xlu0 %4085  ;;  %v3223_v21 = vld [vmem:[%s18629_s20 + $0x760] sm:$0xff]  ;;  %v2602_v26 = vmul.f32 0.2, %v1704_v12  ;;  %vm2346_vm14 = vcmp.gt.f32.partialorder %v1704_v12, 0.0  ;;  %v18874_v23 = vld [vmem:[#allocation13_spill] sm:$0xff] }
 0x203   :  { %18860 = vst [vmem:[#allocation91_spill] sm:$0xff] %v14781_v30  ;;  %4345 = vperm.xlu1 %11566, %v3207_v13   ;;  %v14783_v49 = vpop.f32.mrf.mxu0  ;;  %v11717_v30 = vpack.i.bf16 %v4642_v48, %v4641_v2  ;;  %v2853_v48 = vsel %vm2341_vm11, %v1685_v45, %v2597_v60  ;;  %v4646_v2 = vmul.f32 %v18871_v38, %v2854_v52  ;;  %v12257_v60 = vld [vmem:[%s18631_s24 + $0x3d0] sm:$0xff]   ;;  %vm2345_vm15 = vcmp.gt.f32.partialorder %v1701_v10, 0.0 }
 0x204   :  { %18861 = vst [vmem:[#allocation94_spill] sm:$0xff] %v14783_v49  ;;  %v1677_v49 = vadd.f32 %v14273_v16, %v14585_v17  ;;  %v3144_v17 = vld [vmem:[%s18629_s20 + $0x4e8] sm:$0xff]  ;;  %v2852_v45 = vsel %vm2340_vm12, %v1680_v20, %v2596_v47  ;;  %v1693_v20 = vadd.f32 %v14273_v16, %v14633_v14  ;;  %vm2344_vm0 = vcmp.gt.f32.partialorder %v1696_v35, 0.0 }
 0x205   :  { %v14794_v13 = vpop.f32.mrf.mxu0  ;;  %11442 = vmatmul.mubr.bf16.gmra.mxu0 %v12254_v50  ;;  %v18876_v16 = vld [vmem:[#allocation12_spill] sm:$0xff] }
 0x206   :  { %3320 = vperm.xlu0 %11565, %v3002_v3   ;;  %18863 = vst [vmem:[#allocation71_spill] sm:$0xff] %v14794_v13  ;;  %v14798_v44 = vpop.permute.xlu1 %4315  ;;  %11445 = vmatprep.mubr.bf16.mxu0 %v12255_v55  ;;  %v4639_v3 = vmul.f32 %v18867_v6, %v2847_v4  ;;  %v14809_v50 = vpop.permute.xlu0 %3620  ;;  %v2595_v55 = vmul.f32 0.2, %v1677_v49  ;;  %vm2339_vm13 = vcmp.gt.f32.partialorder %v1677_v49, 0.0  ;;  %v3160_v6 = vld [vmem:[%s18629_s20 + $0x568] sm:$0xff]  ;;  %vm2343_vm1 = vcmp.gt.f32.partialorder %v1693_v20, 0.0 }
 0x207   :  { %18864 = vst [vmem:[#allocation70_spill] sm:$0xff] %v14798_v44  ;;  %4425 = vperm.xlu1 %11566, %v3223_v21   ;;  %v14801_v46 = vpop.f32.mrf.mxu0  ;;  %18868 = vst [vmem:[#allocation89_spill] sm:$0xff] %v14809_v50 }
 0x208   :  { %18866 = vst [vmem:[#allocation88_spill] sm:$0xff] %v14801_v46 }
 0x209   :  { %v14812_v21 = vpop.f32.mrf.mxu0 }
 0x20a   :  { %11718 = vrot.lane.b32.xlu0 %v11717_v30, %s12803_s27  ;;  %18869 = vst [vmem:[#allocation11_spill] sm:$0xff] %v14812_v21  ;;  %v14816_v27 = vpop.permute.xlu1 %4395  ;;  %v11722_v30 = vpack.i.bf16 %v4640_v15, %v4639_v3  ;;  %v18873_v21 = vld [vmem:[#allocation14_spill] sm:$0xff]  ;;  %v2851_v15 = vsel %vm2339_vm13, %v1677_v49, %v2595_v55  ;;  %v4644_v3 = vmul.f32 %v18874_v23, %v2852_v45  ;;  %v14841_v38 = vpop.permute.xlu0 %3300  ;;  %v2599_v45 = vmul.f32 0.2, %v1693_v20 }
 0x20b   :  { %18870 = vst [vmem:[#allocation10_spill] sm:$0xff] %v14816_v27  ;;  %4030 = vperm.xlu1 %11566, %v3144_v17   ;;  %v14822_v4 = vpop.f32.mrf.mxu0  ;;  %v4645_v13 = vmul.f32 %v18873_v21, %v2853_v48  ;;  %v2601_v17 = vmul.f32 0.2, %v1701_v10  ;;  %18875 = vst [vmem:[#allocation8_spill] sm:$0xff] %v14841_v38  ;;  %v3065_v49 = vld [vmem:[%s18629_s20 + $0x270] sm:$0xff]  ;;  %v4643_v14 = vmul.f32 %v18876_v16, %v2851_v15  ;;  %v12259_v15 = vld [vmem:[%s18631_s24 + $0x3e0] sm:$0xff]  }
 0x20c   :  { %18872 = vst [vmem:[#allocation9_spill] sm:$0xff] %v14822_v4  ;;  %v2600_v4 = vmul.f32 0.2, %v1696_v35  ;;  %v2855_v46 = vsel %vm2343_vm1, %v1693_v20, %v2599_v45 }
 0x20d   :  { %v14834_v52 = vpop.f32.mrf.mxu0  ;;  %11446 = vmatmul.mubr.bf16.gmra.mxu0 %v12256_v29  ;;  %v11732_v48 = vpack.i.bf16 %v4646_v2, %v4645_v13  ;;  %v2857_v29 = vsel %vm2345_vm15, %v1701_v10, %v2601_v17  ;;  %v12258_v13 = vld [vmem:[%s18631_s24 + $0x3d8] sm:$0xff]  }
 0x20e   :  { %11723 = vrot.lane.b32.xlu0 %v11722_v30, %s12803_s27  ;;  %v14838_v47 = vpop.permute.xlu1 %4000  ;;  %11449 = vmatprep.mubr.bf16.mxu0 %v12257_v60  ;;  %v2858_v30 = vsel %vm2346_vm14, %v1704_v12, %v2602_v26  ;;  %v18878_v12 = vld [vmem:[#allocation19_spill] sm:$0xff]  ;;  %v11737_v26 = vpack.i.bf16 %v4644_v3, %v4643_v14  ;;  %v2856_v23 = vsel %vm2344_vm0, %v1696_v35, %v2600_v4  ;;  %v18879_v10 = vld [vmem:[#allocation18_spill] sm:$0xff]  ;;  %v18882_v14 = vld [vmem:[#allocation17_spill] sm:$0xff] }
 0x20f   :  { %4110 = vperm.xlu1 %11566, %v3160_v6   ;;  %v14843_v21 = vpop.f32.mrf.mxu0  ;;  %v4650_v2 = vmul.f32 %v18878_v12, %v2858_v30  ;;  %v4649_v17 = vmul.f32 %v18879_v10, %v2857_v29  ;;  %v14870_v30 = vld [vmem:[%s18690_s2] ss:$0 sm:$0xff]  ;;  %v4648_v4 = vmul.f32 %v18882_v14, %v2856_v23  ;;  %v18883_v35 = vpack.i.bf16 %v14031_v36, %v14033_v5  ;;  %v3001_v12 = vld [vmem:[%s18629_s20 + $0x70] sm:$0xff]  ;;  %v12260_v36 = vld [vmem:[%s18631_s24 + $0x3e8] sm:$0xff]  }
 0x210   :  { %v15021_v56 = vadd.f32 %v14870_v30, %v18916_v39 }
 0x211   :  { %v14850_v55 = vpop.f32.mrf.mxu0  ;;  %v11742_v20 = vpack.i.bf16 %v4650_v2, %v4649_v17 }
 0x212   :  { %11733 = vrot.lane.b32.xlu0 %v11732_v48, %s12803_s27  ;;  %v14852_v6 = vpop.permute.xlu1 %4080  ;;  %v14864_v48 = vpop.permute.xlu0 %4340  ;;  %vm2230_vm15 = vcmp.gt.f32.partialorder %v15021_v56, 0.0 }
 0x213   :  { %18877 = vst [vmem:[#allocation15_spill] sm:$0xff] %v14852_v6  ;;  %3635 = vperm.xlu1 %11566, %v3065_v49   ;;  %v14858_v60 = vpop.f32.mrf.mxu0  ;;  %18880 = vst [vmem:[#allocation14_spill] sm:$0xff] %v14864_v48  ;;  %v3161_v6 = vld [vmem:[%s18629_s20 + $0x570] sm:$0xff] }
 0x215   :  { %v11355_v16 = vpop.f32.mrf.mxu0  ;;  %11450 = vmatmul.mubr.bf16.gmra.mxu0 %v12258_v13 }
 0x216   :  { %11738 = vrot.lane.b32.xlu0 %v11737_v26, %s12803_s27  ;;  %v1797_v3 = vadd.f32 %v14870_v30, %v11355_v16  ;;  %v14873_v49 = vpop.permute.xlu1 %3605  ;;  %11453 = vmatprep.mubr.bf16.mxu0 %v12259_v15  ;;  %v18884_v26 = vld [vmem:[#allocation16_spill] sm:$0xff]  ;;  %v14893_v5 = vpop.permute.xlu0 %4420 }
 0x217   :  { %18881 = vst [vmem:[#allocation13_spill] sm:$0xff] %v14873_v49  ;;  %11713 = vrot.lane.b32.xlu1 %v18883_v35, %s12803_s27  ;;  %v14880_v29 = vpop.f32.mrf.mxu0  ;;  %v4647_v13 = vmul.f32 %v18884_v26, %v2855_v46  ;;  %18885 = vst [vmem:[#allocation12_spill] sm:$0xff] %v14893_v5  ;;  %v12261_v46 = vld [vmem:[%s18631_s24 + $0x3f0] sm:$0xff]   ;;  %v18898_v5 = vld [vmem:[#allocation35_spill] sm:$0xff] }
 0x218   :  { %v2625_v45 = vmul.f32 0.2, %v1797_v3  ;;  %vm2369_vm2 = vcmp.gt.f32.partialorder %v1797_v3, 0.0  ;;  %v18900_v49 = vld [vmem:[#allocation39_spill] sm:$0xff] }
 0x219   :  { %v11356_v23 = vpop.f32.mrf.mxu0  ;;  %v11747_v15 = vpack.i.bf16 %v4648_v4, %v4647_v13 }
 0x21a   :  { %11743 = vrot.lane.b32.xlu0 %v11742_v20, %s12803_s27  ;;  %v1800_v10 = vadd.f32 %v14870_v30, %v11356_v23  ;;  %v14888_v16 = vpop.permute.xlu1 %11623  ;;  %v2881_v17 = vsel %vm2369_vm2, %v1797_v3, %v2625_v45  ;;  %v18889_v3 = vpack.i.bf16 %v14684_v9, %v14687_v32  ;;  %v3209_v23 = vld [vmem:[%s18629_s20 + $0x6f0] sm:$0xff]  ;;  %v3226_v9 = vld [vmem:[%s18629_s20 + $0x778] sm:$0xff] }
 0x21b   :  { %3315 = vperm.xlu1 %11566, %v3001_v12   ;;  %v14895_v2 = vpop.f32.mrf.mxu0  ;;  %v3210_v12 = vld [vmem:[%s18629_s20 + $0x6f8] sm:$0xff]  ;;  %v14909_v4 = vmul.f32 %v14583_v54, %v2881_v17 }
 0x21c   :  { %vm2370_vm3 = vcmp.gt.f32.partialorder %v1800_v10, 0.0  ;;  %v2626_v14 = vmul.f32 0.2, %v1800_v10  ;;  %v12262_v32 = vld [vmem:[%s18631_s24 + $0x3f8] sm:$0xff]  }
 0x21d   :  { %v14901_v35 = vpop.f32.mrf.mxu0  ;;  %11454 = vmatmul.mubr.bf16.gmra.mxu0 %v12260_v36  ;;  %18887 = vst [vmem:[#allocation18_spill] sm:$0xff] %v14909_v4  ;;  %v1200_v4 = vadd.f32 %v14870_v30, %v18900_v49 }
 0x21e   :  { %11748 = vrot.lane.b32.xlu0 %v11747_v15, %s12803_s27  ;;  %v2882_v20 = vsel %vm2370_vm3, %v1800_v10, %v2626_v14  ;;  %v14903_v26 = vpop.permute.xlu1 %3285  ;;  %11457 = vmatprep.mubr.bf16.mxu0 %v12261_v46  ;;  %v14923_v10 = vpop.permute.xlu0 %4015  ;;  %v3225_v46 = vld [vmem:[%s18629_s20 + $0x770] sm:$0xff] }
 0x21f   :  { %18886 = vst [vmem:[#allocation19_spill] sm:$0xff] %v14903_v26  ;;  %v14912_v13 = vmul.f32 %v14838_v47, %v2882_v20  ;;  %11728 = vrot.lane.b32.xlu1 %v18889_v3, %s12804_s21  ;;  %v14918_v45 = vpop.f32.mrf.mxu0  ;;  %v3145_v20 = vld [vmem:[%s18629_s20 + $0x4f0] sm:$0xff]  ;;  %vm2220_vm7 = vcmp.gt.f32.partialorder %v1200_v4, 0.0 }
 0x220   :  { %18890 = vst [vmem:[#allocation16_spill] sm:$0xff] %v14918_v45 }
 0x221   :  { %18888 = vst [vmem:[#allocation17_spill] sm:$0xff] %v14912_v13  ;;  %v14925_v54 = vpop.f32.mrf.mxu0 }
 0x222   :  { %4360 = vperm.xlu0 %11565, %v3210_v12   ;;  %v14929_v36 = vpop.permute.xlu1 %4325  ;;  %v14949_v12 = vpop.permute.xlu0 %11633 }
 0x223   :  { %18891 = vst [vmem:[#allocation168_spill] sm:$0xff] %v14929_v36  ;;  %4355 = vperm.xlu1 %11566, %v3209_v23   ;;  %v14937_v15 = vpop.f32.mrf.mxu0  ;;  %18895 = vst [vmem:[#allocation172_spill] sm:$0xff] %v14949_v12  ;;  %v18897_v23 = vld [vmem:[#allocation32_spill] sm:$0xff]  ;;  %v18910_v12 = vld [vmem:[#allocation45_spill] sm:$0xff] }
 0x224   :  { %18892 = vst [vmem:[#allocation169_spill] sm:$0xff] %v14937_v15  ;;  %v1205_v47 = vadd.f32 %v14870_v30, %v18897_v23  ;;  %v18903_v23 = vld [vmem:[#allocation41_spill] sm:$0xff]  ;;  %v14990_v58 = vadd.f32 %v14870_v30, %v18910_v12  ;;  %v3115_v36 = vld [vmem:[%s18629_s20 + $0x400] sm:$0xff] }
 0x225   :  { %v14942_v17 = vpop.f32.mrf.mxu0  ;;  %11458 = vmatmul.mubr.bf16.gmra.mxu0 %v12262_v32  ;;  %v3146_v32 = vld [vmem:[%s18629_s20 + $0x4f8] sm:$0xff]  ;;  %v1213_v8 = vadd.f32 %v14870_v30, %v18903_v23  ;;  %v2476_v23 = vmul.f32 0.2, %v1200_v4 }
 0x226   :  { %4440 = vperm.xlu0 %11565, %v3226_v9   ;;  %18893 = vst [vmem:[#allocation170_spill] sm:$0xff] %v14942_v17  ;;  %v14944_v14 = vpop.permute.xlu1 %4405  ;;  %v1197_v9 = vadd.f32 %v14870_v30, %v18898_v5  ;;  %vm2221_vm6 = vcmp.gt.f32.partialorder %v1205_v47, 0.0  ;;  %vm2224_vm12 = vcmp.gt.f32.partialorder %v14990_v58, 0.0  ;;  %v1813_v17 = vadd.f32 %v14870_v30, %v14901_v35 }
 0x227   :  { %18894 = vst [vmem:[#allocation171_spill] sm:$0xff] %v14944_v14  ;;  %4435 = vperm.xlu1 %11566, %v3225_v46   ;;  %v14951_v3 = vpop.f32.mrf.mxu0  ;;  %v18899_v14 = vld [vmem:[#allocation36_spill] sm:$0xff]  ;;  %vm2223_vm9 = vcmp.gt.f32.partialorder %v1213_v8, 0.0 }
 0x228   :  { %18896 = vst [vmem:[#allocation173_spill] sm:$0xff] %v14951_v3  ;;  %v1208_v27 = vadd.f32 %v14870_v30, %v18899_v14  ;;  %v18902_v3 = vld [vmem:[#allocation40_spill] sm:$0xff]  ;;  %v1224_v14 = vadd.f32 %v14870_v30, %v18905_v19  ;;  %v2475_v15 = vmul.f32 0.2, %v1197_v9  ;;  %vm2219_vm5 = vcmp.gt.f32.partialorder %v1197_v9, 0.0 }
 0x229   :  { %v14964_v46 = vpop.f32.mrf.mxu0  ;;  %v1221_v13 = vadd.f32 %v14870_v30, %v18902_v3  ;;  %v3162_v3 = vld [vmem:[%s18629_s20 + $0x578] sm:$0xff]  ;;  %v2479_v19 = vmul.f32 0.2, %v1213_v8 }
 0x22a   :  { %4035 = vperm.xlu0 %11565, %v3145_v20   ;;  %18901 = vst [vmem:[#allocation32_spill] sm:$0xff] %v14964_v46  ;;  %v14970_v5 = vpop.permute.xlu1 %4010  ;;  %v2477_v20 = vmul.f32 0.2, %v1205_v47  ;;  %v2478_v45 = vmul.f32 0.2, %v1208_v27  ;;  %vm2222_vm8 = vcmp.gt.f32.partialorder %v1208_v27, 0.0  ;;  %v15006_v12 = vsel %vm2219_vm5, %v1197_v9, %v2475_v15 }
 0x22b   :  { %18904 = vst [vmem:[#allocation35_spill] sm:$0xff] %v14970_v5  ;;  %4040 = vperm.xlu1 %11566, %v3146_v32   ;;  %v14977_v49 = vpop.f32.mrf.mxu0  ;;  %v14982_v5 = vpop.permute.xlu0 %11638  ;;  %v2481_v18 = vmul.f32 0.2, %v1221_v13  ;;  %vm2225_vm10 = vcmp.gt.f32.partialorder %v1221_v13, 0.0  ;;  %vm2226_vm11 = vcmp.gt.f32.partialorder %v1224_v14, 0.0  ;;  %v15026_v15 = vsel %vm2223_vm9, %v1213_v8, %v2479_v19 }
 0x22c   :  { %18906 = vst [vmem:[#allocation36_spill] sm:$0xff] %v14977_v49  ;;  %18907 = vst [vmem:[#allocation39_spill] sm:$0xff] %v14982_v5  ;;  %v2482_v49 = vmul.f32 0.2, %v1224_v14  ;;  %v18912_v5 = vld [vmem:[#allocation46_spill] sm:$0xff]  ;;  %v15008_v33 = vsel %vm2222_vm8, %v1208_v27, %v2478_v45 }
 0x22d   :  { %v14984_v50 = vpop.f32.mrf.mxu0  ;;  %v15028_v27 = vsel %vm2225_vm10, %v1221_v13, %v2481_v18  ;;  %v18921_v13 = vld [vmem:[#allocation52_spill] sm:$0xff] }
 0x22e   :  { %4115 = vperm.xlu0 %11565, %v3161_v6   ;;  %18908 = vst [vmem:[#allocation40_spill] sm:$0xff] %v14984_v50  ;;  %v14986_v32 = vpop.permute.xlu1 %4090  ;;  %v14996_v6 = vadd.f32 %v14870_v30, %v18912_v5  ;;  %v3179_v50 = vld [vmem:[%s18629_s20 + $0x600] sm:$0xff]  ;;  %v18914_v5 = vpack.i.bf16 %v14372_v1, %v14369_v51  ;;  %v3180_v51 = vld [vmem:[%s18629_s20 + $0x608] sm:$0xff]  ;;  %v2480_v1 = vmul.f32 0.2, %v14990_v58  ;;  %v15042_v39 = vsel %vm2226_vm11, %v1224_v14, %v2482_v49 }
 0x22f   :  { %18909 = vst [vmem:[#allocation41_spill] sm:$0xff] %v14986_v32  ;;  %4120 = vperm.xlu1 %11566, %v3162_v3   ;;  %v14992_v61 = vpop.f32.mrf.mxu0  ;;  %v18913_v32 = vld [vmem:[#allocation47_spill] sm:$0xff]  ;;  %v15011_v3 = vsel %vm2221_vm6, %v1205_v47, %v2477_v20  ;;  %v15044_v8 = vpop.permute.xlu0 %11643  ;;  %v15051_v20 = vadd.f32 %v14870_v30, %v18921_v13  ;;  %v18923_v49 = vld [vmem:[#allocation56_spill] sm:$0xff] }
 0x230   :  { %18911 = vst [vmem:[#allocation42_spill] sm:$0xff] %v14992_v61  ;;  %v15003_v53 = vadd.f32 %v14870_v30, %v18913_v32  ;;  %v15024_v32 = vsel %vm2220_vm7, %v1200_v4, %v2476_v23  ;;  %v18918_v47 = vld [vmem:[#allocation51_spill] sm:$0xff]  ;;  %18919 = vst [vmem:[#allocation47_spill] sm:$0xff] %v15044_v8  ;;  %v2485_v4 = vmul.f32 0.2, %v14996_v6  ;;  %vm2229_vm13 = vcmp.gt.f32.partialorder %v14996_v6, 0.0 }
 0x231   :  { %v15017_v61 = vpop.f32.mrf.mxu0  ;;  %v15038_v9 = vadd.f32 %v14870_v30, %v18918_v47  ;;  %v18922_v23 = vld [vmem:[#allocation55_spill] sm:$0xff]  ;;  %v2489_v8 = vmul.f32 0.2, %v15051_v20  ;;  %vm2233_vm2 = vcmp.gt.f32.partialorder %v15051_v20, 0.0 }
 0x232   :  { %11753 = vrot.lane.b32.xlu0 %v18914_v5, %s12803_s27  ;;  %18915 = vst [vmem:[#allocation45_spill] sm:$0xff] %v15017_v61  ;;  %v15030_v45 = vpop.permute.xlu1 %3615  ;;  %v15055_v19 = vadd.f32 %v14870_v30, %v18922_v23  ;;  %v2483_v14 = vmul.f32 0.2, %v15003_v53  ;;  %v15061_v5 = vadd.f32 %v14870_v30, %v18923_v49  ;;  %vm2227_vm14 = vcmp.gt.f32.partialorder %v15003_v53, 0.0 }
 0x233   :  { %18917 = vst [vmem:[#allocation46_spill] sm:$0xff] %v15030_v45  ;;  %4205 = vperm.xlu1 %11566, %v3179_v50   ;;  %v15046_v18 = vpop.f32.mrf.mxu0  ;;  %v18924_v50 = vld [vmem:[#allocation59_spill] sm:$0xff]  ;;  %v2486_v23 = vmul.f32 0.2, %v15021_v56  ;;  %v15073_v45 = vadd.f32 %v14870_v30, %v14093_v59  ;;  %v1776_v49 = vadd.f32 %v14870_v30, %v14858_v60  ;;  %v15090_v59 = vadd.f32 %v14870_v30, %v14361_v62 }
 0x234   :  { %18920 = vst [vmem:[#allocation48_spill] sm:$0xff] %v15046_v18  ;;  %v15065_v47 = vadd.f32 %v14870_v30, %v18924_v50  ;;  %v3116_v50 = vld [vmem:[%s18629_s20 + $0x408] sm:$0xff]  ;;  %vm2228_vm0 = vcmp.gt.f32.partialorder %v15038_v9, 0.0  ;;  %v18926_v60 = vpack.i.bf16 %v14132_v37, %v14134_v28  ;;  %v2487_v43 = vmul.f32 0.2, %v15055_v19 }
 0x235   :  { %v15068_v13 = vpop.f32.mrf.mxu0  ;;  %v1773_v62 = vadd.f32 %v14870_v30, %v14843_v21  ;;  %v15111_v37 = vmul.f32 0.2, %v15061_v5  ;;  %vm2231_vm1 = vcmp.gt.f32.partialorder %v15055_v19, 0.0  ;;  %v15127_v21 = vadd.f32 %v14870_v30, %v14386_v24 }
 0x236   :  { %4210 = vperm.xlu0 %11565, %v3180_v51   ;;  %18925 = vst [vmem:[#allocation51_spill] sm:$0xff] %v15068_v13  ;;  %v15078_v18 = vpop.permute.xlu1 %11628  ;;  %v2484_v51 = vmul.f32 0.2, %v15038_v9  ;;  %v15086_v13 = vadd.f32 %v14870_v30, %v14103_v41  ;;  %v15103_v41 = vadd.f32 %v14870_v30, %v14374_v63  ;;  %v15114_v28 = vmul.f32 0.2, %v15065_v47 }
 0x237   :  { %11758 = vrot.lane.b32.xlu1 %v18926_v60, %s12803_s27  ;;  %v15097_v61 = vpop.f32.mrf.mxu0  ;;  %v15116_v60 = vpop.permute.xlu0 %11648  ;;  %v15123_v63 = vmul.f32 0.2, %v15073_v45  ;;  %v2620_v40 = vmul.f32 0.2, %v1776_v49  ;;  %vm2234_vm3 = vcmp.gt.f32.partialorder %v15061_v5, 0.0  ;;  %vm2364_vm5 = vcmp.gt.f32.partialorder %v1776_v49, 0.0 }
 0x238   :  { %18927 = vst [vmem:[#allocation52_spill] sm:$0xff] %v15097_v61  ;;  %18928 = vst [vmem:[#allocation55_spill] sm:$0xff] %v15116_v60  ;;  %v15139_v60 = vmul.f32 0.2, %v15090_v59  ;;  %vm2232_vm6 = vcmp.gt.f32.partialorder %v15065_v47, 0.0  ;;  %vm2317_vm7 = vcmp.gt.f32.partialorder %v15090_v59, 0.0  ;;  %v15165_v38 = vsel %vm2229_vm13, %v14996_v6, %v2485_v4 }
 0x239   :  { %v15118_v61 = vpop.f32.mrf.mxu0  ;;  %vm2315_vm8 = vcmp.gt.f32.partialorder %v15103_v41, 0.0  ;;  %v15147_v24 = vmul.f32 0.2, %v15103_v41  ;;  %v2619_v46 = vmul.f32 0.2, %v1773_v62  ;;  %vm2363_vm9 = vcmp.gt.f32.partialorder %v1773_v62, 0.0 }
 0x23a   :  { %3890 = vperm.xlu0 %11565, %v3116_v50   ;;  %18929 = vst [vmem:[#allocation56_spill] sm:$0xff] %v15118_v61  ;;  %v15129_v48 = vpop.permute.xlu1 %3295  ;;  %v3182_v50 = vld [vmem:[%s18629_s20 + $0x618] sm:$0xff]  ;;  %v15136_v61 = vmul.f32 0.2, %v15086_v13  ;;  %v15173_v35 = vmul.f32 0.2, %v15127_v21  ;;  %v1816_v6 = vadd.f32 %v14870_v30, %v14925_v54  ;;  %v18933_v54 = vpack.i.bf16 %v14673_v22, %v14676_v25 }
 0x23b   :  { %18930 = vst [vmem:[#allocation59_spill] sm:$0xff] %v15129_v48  ;;  %3885 = vperm.xlu1 %11566, %v3115_v36   ;;  %v15141_v44 = vpop.f32.mrf.mxu0  ;;  %v15153_v48 = vadd.f32 %v14870_v30, %v14400_v42  ;;  %v15158_v36 = vsel %vm2224_vm12, %v14990_v58, %v2480_v1  ;;  %v12263_v42 = vld [vmem:[%s18569_s4 + $0x78] sm:$0xff]   ;;  %v2876_v58 = vsel %vm2364_vm5, %v1776_v49, %v2620_v40  ;;  %vm2318_vm10 = vcmp.gt.f32.partialorder %v15127_v21, 0.0  ;;  %v3181_v22 = vld [vmem:[%s18629_s20 + $0x610] sm:$0xff] }
 0x23c   :  { %18931 = vst [vmem:[#allocation174_spill] sm:$0xff] %v15141_v44  ;;  %v15160_v44 = vpop.permute.xlu0 %4095  ;;  %v15179_v1 = vsel %vm2227_vm14, %v15003_v53, %v2483_v14  ;;  %v15194_v40 = vsel %vm2228_vm0, %v15038_v9, %v2484_v51  ;;  %v15199_v53 = vsel %vm2230_vm15, %v15021_v56, %v2486_v23  ;;  %v15210_v49 = vsel %vm2233_vm2, %v15051_v20, %v2489_v8 }
 0x23d   :  { %18932 = vst [vmem:[#allocation175_spill] sm:$0xff] %v15160_v44  ;;  %v15167_v26 = vpop.f32.mrf.mxu0  ;;  %v12264_v44 = vld [vmem:[%s18569_s4 + $0x38] sm:$0xff]   ;;  %10899 = vmatprep.subr.bf16.mxu1 %v12263_v42  ;;  %v2875_v9 = vsel %vm2363_vm9, %v1773_v62, %v2619_v46  ;;  %v1784_v56 = vadd.f32 %v14870_v30, %v14850_v55  ;;  %v2629_v23 = vmul.f32 0.2, %v1813_v17  ;;  %vm2316_vm11 = vcmp.gt.f32.partialorder %v15153_v48, 0.0  ;;  %v12265_v55 = vld [vmem:[%s18569_s4 + $0x70] sm:$0xff]  }
 0x23e   :  { %4220 = vperm.xlu0 %11565, %v3182_v50   ;;  %v15183_v4 = vpop.permute.xlu1 %4335  ;;  %v3118_v50 = vld [vmem:[%s18629_s20 + $0x418] sm:$0xff]  ;;  %10900 = vmatpush3.bf16.msra.mxu1 %v12264_v44  ;;  %v4668_v25 = vmul.f32 %v14264_v31, %v2876_v58  ;;  %vm2373_vm12 = vcmp.gt.f32.partialorder %v1813_v17, 0.0  ;;  %v15226_v46 = vsel %vm2231_vm1, %v15055_v19, %v2487_v43  ;;  %v12266_v44 = vld [vmem:[%s18569_s4 + $0x30] sm:$0xff]   ;;  %v15236_v31 = vadd.f32 %v14870_v30, %v14834_v52  ;;  %v3184_v43 = vld [vmem:[%s18629_s20 + $0x628] sm:$0xff] }
 0x23f   :  { %11763 = vrot.lane.b32.xlu1 %v18933_v54, %s12804_s21  ;;  %v15205_v14 = vpop.f32.mrf.mxu0  ;;  %v2630_v20 = vmul.f32 0.2, %v1816_v6  ;;  %vm2374_vm13 = vcmp.gt.f32.partialorder %v1816_v6, 0.0  ;;  %v15247_v19 = vsel %vm2234_vm3, %v15061_v5, %v15111_v37  ;;  %v15251_v62 = vadd.f32 %v14870_v30, %v14111_v34  ;;  %10901 = vmatprep.subr.bf16.mxu1 %v12265_v55 }
 0x240   :  { %18934 = vst [vmem:[#allocation176_spill] sm:$0xff] %v15205_v14  ;;  %v4667_v52 = vmul.f32 %v14266_v7, %v2875_v9  ;;  %v15254_v42 = vpop.permute.xlu0 %11653  ;;  %v11570_v5 = vunpack.i.l.bf16 %v14316_v57  ;;  %v2572_v37 = vmul.f32 0.2, %v15153_v48  ;;  %v2622_v34 = vmul.f32 0.2, %v1784_v56  ;;  %v12267_v7 = vld [vmem:[%s18569_s4 + $0x68] sm:$0xff]  }
 0x241   :  { %v15221_v8 = vpop.f32.mrf.mxu0  ;;  %18937 = vst [vmem:[#allocation179_spill] sm:$0xff] %v15254_v42  ;;  %v2885_v54 = vsel %vm2373_vm12, %v1813_v17, %v2629_v23  ;;  %v12268_v9 = vld [vmem:[%s18569_s4 + $0x28] sm:$0xff]   ;;  %vm2366_vm14 = vcmp.gt.f32.partialorder %v1784_v56, 0.0  ;;  %vm2365_vm15 = vcmp.gt.f32.partialorder %v15236_v31, 0.0  ;;  %vm5484_vm0 = vcmask 523264  }
 0x242   :  { %3900 = vperm.xlu0 %11565, %v3118_v50   ;;  %18935 = vst [vmem:[#allocation177_spill] sm:$0xff] %v15221_v8  ;;  %v15238_v51 = vpop.permute.xlu1 %4415  ;;  %v15262_v50 = vsel %vm2232_vm6, %v15065_v47, %v15114_v28  ;;  %10902 = vmatpush3.bf16.msra.mxu1 %v12266_v44  ;;  %v18939_v47 = vld [vmem:[#allocation117_spill] sm:$0xff]  ;;  %v11767_v17 = vpack.i.bf16 %v4668_v25, %v4667_v52  ;;  %v11571_v44 = vunpack.i.h.bf16 %v14316_v57  ;;  %v2621_v8 = vmul.f32 0.2, %v15236_v31 }
 0x243   :  { %18936 = vst [vmem:[#allocation178_spill] sm:$0xff] %v15238_v51  ;;  %4215 = vperm.xlu1 %11566, %v3181_v22   ;;  %v15256_v58 = vpop.f32.mrf.mxu0  ;;  %v4524_v28 = vmul.f32 %v18939_v47, %v15024_v32  ;;  %v18940_v22 = vld [vmem:[#allocation118_spill] sm:$0xff]  ;;  %v18941_v51 = vld [vmem:[#allocation136_spill] sm:$0xff]  ;;  %10903 = vmatprep.subr.bf16.mxu1 %v12267_v7  ;;  %v2827_v57 = vsel %vm2315_vm8, %v15103_v41, %v15147_v24  ;;  %v18946_v24 = vld [vmem:[#allocation155_spill] sm:$0xff]  ;;  %vm2285_vm1 = vcmp.gt.f32.partialorder %v15073_v45, 0.0  ;;  %vm2283_vm5 = vcmp.gt.f32.partialorder %v15086_v13, 0.0 }
 0x244   :  { %18938 = vst [vmem:[#allocation180_spill] sm:$0xff] %v15256_v58  ;;  %v4523_v55 = vmul.f32 %v18940_v22, %v15006_v12  ;;  %v4526_v42 = vmul.f32 %v18941_v51, %v15008_v33  ;;  %v2886_v58 = vsel %vm2374_vm13, %v1816_v6, %v2630_v20  ;;  %v3120_v32 = vld [vmem:[%s18629_s20 + $0x428] sm:$0xff]  ;;  %v2829_v33 = vsel %vm2317_vm7, %v15090_v59, %v15139_v60  ;;  %v12269_v41 = vld [vmem:[%s18569_s4 + $0x60] sm:$0xff]   ;;  %v15326_v51 = vpop.permute.xlu0 %11678 }
 0x245   :  { %v15279_v23 = vpop.f32.mrf.mxu0  ;;  %v15297_v12 = vmul.f32 %v14923_v10, %v2885_v54  ;;  %v2830_v20 = vsel %vm2318_vm10, %v15127_v21, %v15173_v35  ;;  %v2828_v59 = vsel %vm2316_vm11, %v15153_v48, %v2572_v37  ;;  %v3117_v10 = vld [vmem:[%s18629_s20 + $0x410] sm:$0xff]  ;;  %v12270_v60 = vld [vmem:[%s18569_s4 + $0x20] sm:$0xff]   ;;  %v11576_v48 = vunpack.i.h.bf16 %v18946_v24  ;;  %18947 = vst [vmem:[#allocation155_spill] sm:$0xff] %v15326_v51 }
 0x246   :  { %4230 = vperm.xlu0 %11565, %v3184_v43   ;;  %18942 = vst [vmem:[#allocation117_spill] sm:$0xff] %v15279_v23  ;;  %v4021_v14 = vpop.permute.xlu1 %4020  ;;  %10904 = vmatpush3.bf16.msra.mxu1 %v12268_v9  ;;  %v15321_v21 = vsel %vm4843_vm4, %v4523_v55, %v11570_v5  ;;  %v11575_v35 = vunpack.i.l.bf16 %v18946_v24  ;;  %v18950_v54 = vld [vmem:[#allocation28_spill] sm:$0xff]  ;;  %v15345_v47 = vsel %vm4843_vm4, %v4524_v28, %v11571_v44  ;;  %v18952_v22 = vld [vmem:[#allocation29_spill] sm:$0xff]  ;;  %vm2286_vm10 = vcmp.gt.f32.partialorder %v15251_v62, 0.0 }
 0x247   :  { %11768 = vrot.lane.b32.xlu1 %v11767_v17, %s12803_s27  ;;  %18943 = vst [vmem:[#allocation118_spill] sm:$0xff] %v15297_v12  ;;  %v15299_v6 = vmul.f32 %v4021_v14, %v2886_v58  ;;  %v15301_v25 = vpop.f32.mrf.mxu0  ;;  %v2878_v14 = vsel %vm2366_vm14, %v1784_v56, %v2622_v34  ;;  %v18949_v58 = vld [vmem:[#allocation138_spill] sm:$0xff]  ;;  %v4621_v5 = vmul.f32 %v18950_v54, %v2829_v33  ;;  %v18951_v7 = vld [vmem:[#allocation20_spill] sm:$0xff] }
 0x248   :  { %18945 = vst [vmem:[#allocation181_spill] sm:$0xff] %v15301_v25  ;;  %v4525_v37 = vmul.f32 %v18949_v58, %v15011_v3  ;;  %v15336_v9 = vmul.f32 %v18951_v7, %v2827_v57  ;;  %v3186_v56 = vld [vmem:[%s18629_s20 + $0x638] sm:$0xff]  ;;  %v3183_v34 = vld [vmem:[%s18629_s20 + $0x620] sm:$0xff]  ;;  %10905 = vmatprep.subr.bf16.mxu1 %v12269_v41  ;;  %v4622_v55 = vmul.f32 %v18952_v22, %v2830_v20  ;;  %v18953_v3 = vld [vmem:[#allocation21_spill] sm:$0xff]  ;;  %v11620_v22 = vunpack.i.l.bf16 %v14752_v11 }
 0x249   :  { %18944 = vst [vmem:[#allocation136_spill] sm:$0xff] %v15299_v6  ;;  %v15330_v52 = vpop.f32.mrf.mxu0  ;;  %v15349_v17 = vmul.f32 %v18953_v3, %v2828_v59  ;;  %v2877_v57 = vsel %vm2365_vm15, %v15236_v31, %v2621_v8  ;;  %v18956_v41 = vld [vmem:[#allocation144_spill] sm:$0xff]  ;;  %v12271_v20 = vld [vmem:[%s18569_s4 + $0x58] sm:$0xff]   ;;  %v15369_v59 = vadd.f32 %v14870_v30, %v14880_v29  ;;  %v4847_v7 = vsel %vm4843_vm4, %v4526_v42, %v11576_v48  ;;  %v18958_v3 = vld [vmem:[#allocation141_spill] sm:$0xff] }
 0x24a   :  { %3910 = vperm.xlu0 %11565, %v3120_v32   ;;  %18948 = vst [vmem:[#allocation182_spill] sm:$0xff] %v15330_v52  ;;  %v18954_v32 = vld [vmem:[#allocation150_spill] sm:$0xff]  ;;  %v4670_v54 = vmul.f32 %v18956_v41, %v2878_v14  ;;  %10906 = vmatpush3.bf16.msra.mxu1 %v12270_v60  ;;  %v18957_v8 = vld [vmem:[#allocation159_spill] sm:$0xff]  ;;  %v4846_v60 = vsel %vm4843_vm4, %v4525_v37, %v11575_v35  ;;  %v18960_v42 = vld [vmem:[#allocation77_spill] sm:$0xff] }
 0x24b   :  { %v4528_v33 = vmul.f32 %v18954_v32, %v15158_v36  ;;  %3895 = vperm.xlu1 %11566, %v3117_v10   ;;  %v15356_v58 = vpop.f32.mrf.mxu0  ;;  %v12272_v36 = vld [vmem:[%s18569_s4 + $0x18] sm:$0xff]   ;;  %v4527_v31 = vmul.f32 %v18957_v8, %v15026_v15  ;;  %v4669_v32 = vmul.f32 %v18958_v3, %v2877_v57  ;;  %10907 = vmatprep.subr.bf16.mxu1 %v12271_v20  ;;  %v11621_v15 = vunpack.i.h.bf16 %v14752_v11 }
 0x24c   :  { %v11659_v24 = vpop.permute.xlu1 %11658  ;;  %18955 = vst [vmem:[#allocation138_spill] sm:$0xff] %v15356_v58  ;;  %v15385_v48 = vmul.f32 %v18960_v42, %v15042_v39  ;;  %v12273_v39 = vld [vmem:[%s18569_s4 + $0x50] sm:$0xff]   ;;  %vm2367_vm7 = vcmp.gt.f32.partialorder %v15369_v59, 0.0 }
 0x24d   :  { %v11661_v28 = vunpack.i.h.bf16 %v11659_v24  ;;  %v11660_v44 = vunpack.i.l.bf16 %v11659_v24  ;;  %v11383_v10 = vpop.f32.mrf.mxu0  ;;  %v11684_v14 = vpop.permute.xlu0 %11683  ;;  %v11772_v11 = vpack.i.bf16 %v4670_v54, %v4669_v32 }
 0x24e   :  { %4240 = vperm.xlu0 %11565, %v3186_v56   ;;  %v11686_v24 = vunpack.i.h.bf16 %v11684_v14  ;;  %v11685_v41 = vunpack.i.l.bf16 %v11684_v14  ;;  %v1909_v29 = vadd.f32 %v14870_v30, %v11383_v10  ;;  %10908 = vmatpush3.bf16.msra.mxu1 %v12272_v36  ;;  %v15405_v14 = vsel %vm4843_vm4, %v4527_v31, %v11620_v22  ;;  %v3119_v31 = vld [vmem:[%s18629_s20 + $0x420] sm:$0xff] }
 0x24f   :  { %4225 = vperm.xlu1 %11566, %v3183_v34   ;;  %v1900_v56 = vpop.f32.mrf.mxu0  ;;  %v15378_v43 = vsel %vm5484_vm0, %v4846_v60, %v11660_v44  ;;  %v15381_v35 = vsel %vm5484_vm0, %v4847_v7, %v11661_v28  ;;  %v15390_v34 = vmul.f32 0.2, %v15369_v59  ;;  %v11625_v60 = vunpack.i.l.bf16 %v14888_v16  ;;  %10909 = vmatprep.subr.bf16.mxu1 %v12273_v39 }
 0x250   :  { %v11664_v8 = vpop.permute.xlu1 %11663  ;;  %18959 = vst [vmem:[#allocation28_spill] sm:$0xff] %v15378_v43  ;;  %v5087_v37 = vsel %vm4843_vm4, %v4622_v55, %v11686_v24  ;;  %v5086_v57 = vsel %vm4843_vm4, %v4621_v5, %v11685_v41  ;;  %v15393_v44 = vadd.f32 %v14870_v30, %v1900_v56  ;;  %v12274_v55 = vld [vmem:[%s18569_s4 + $0x10] sm:$0xff]   ;;  %vm2397_vm2 = vcmp.gt.f32.partialorder %v1909_v29, 0.0 }
 0x251   :  { %v11665_v20 = vunpack.i.l.bf16 %v11664_v8  ;;  %v11384_v10 = vpop.f32.mrf.mxu0  ;;  %v11777_v28 = vpack.i.bf16 %v5087_v37, %v5086_v57  ;;  %v11666_v5 = vunpack.i.h.bf16 %v11664_v8  ;;  %v2653_v7 = vmul.f32 0.2, %v1909_v29 }
 0x252   :  { %v1912_v54 = vadd.f32 %v14870_v30, %v11384_v10  ;;  %v4849_v24 = vsel %vm4843_vm4, %v4528_v33, %v11621_v15  ;;  %v1792_v22 = vadd.f32 %v14870_v30, %v14895_v2  ;;  %v2651_v42 = vmul.f32 0.2, %v15393_v44  ;;  %10910 = vmatpush3.bf16.msra.mxu1 %v12274_v55  ;;  %v12275_v15 = vld [vmem:[%s18569_s4 + $0x48] sm:$0xff]  }
 0x253   :  { %11773 = vrot.lane.b32.xlu1 %v11772_v11, %s12803_s27  ;;  %v1903_v32 = vpop.f32.mrf.mxu0  ;;  %11778 = vrot.lane.b32.xlu0 %v11777_v28, %s12804_s21  ;;  %v12276_v11 = vld [vmem:[%s18569_s4 + $0x8] sm:$0xff]   ;;  %v15430_v10 = vsel %vm5484_vm0, %v15321_v21, %v11665_v20  ;;  %v15439_v55 = vsel %vm5484_vm0, %v15345_v47, %v11666_v5  ;;  %v2909_v21 = vsel %vm2397_vm2, %v1909_v29, %v2653_v7  ;;  %vm2395_vm8 = vcmp.gt.f32.partialorder %v15393_v44, 0.0  ;;  %v12277_v7 = vld [vmem:[%s18569_s4 + $0x40] sm:$0xff]  }
 0x254   :  { %v11689_v3 = vpop.permute.xlu0 %11688  ;;  %vm2398_vm3 = vcmp.gt.f32.partialorder %v1912_v54, 0.0  ;;  %v2654_v41 = vmul.f32 0.2, %v1912_v54  ;;  %v11669_v37 = vpop.permute.xlu1 %11668  ;;  %v1904_v57 = vadd.f32 %v14870_v30, %v1903_v32  ;;  %v11626_v32 = vunpack.i.h.bf16 %v14888_v16  ;;  %10911 = vmatprep.subr.bf16.mxu1 %v12275_v15 }
 0x255   :  { %v11691_v8 = vunpack.i.h.bf16 %v11689_v3  ;;  %v11690_v56 = vunpack.i.l.bf16 %v11689_v3  ;;  %v15420_v33 = vpop.f32.mrf.mxu0  ;;  %v4529_v3 = vmul.f32 %v14772_v0, %v15028_v27  ;;  %v18961_v0 = vld [vmem:[#allocation37_spill] sm:$0xff]  ;;  %vm2368_vm9 = vcmp.gt.f32.partialorder %v1792_v22, 0.0 }
 0x256   :  { %v2910_v2 = vsel %vm2398_vm3, %v1912_v54, %v2654_v41  ;;  %vm2396_vm6 = vcmp.gt.f32.partialorder %v1904_v57, 0.0  ;;  %v11670_v54 = vunpack.i.l.bf16 %v11669_v37  ;;  %v2652_v47 = vmul.f32 0.2, %v1904_v57  ;;  %10912 = vmatpush3.bf16.msra.mxu1 %v12276_v11  ;;  %v12278_v41 = vld [vmem:[%s18569_s4] sm:$0xff]   ;;  %v18962_v11 = vld [vmem:[#allocation38_spill] sm:$0xff] }
 0x257   :  { %v5085_v28 = vsel %vm4843_vm4, %v15349_v17, %v11691_v8  ;;  %v5084_v39 = vsel %vm4843_vm4, %v15336_v9, %v11690_v56  ;;  %3905 = vperm.xlu1 %11566, %v3119_v31   ;;  %v15445_v20 = vpop.f32.mrf.mxu0  ;;  %v3185_v17 = vld [vmem:[%s18629_s20 + $0x630] sm:$0xff]  ;;  %v11671_v9 = vunpack.i.h.bf16 %v11669_v37  ;;  %v4702_v16 = vmul.f32 %v18961_v0, %v2910_v2  ;;  %10913 = vmatprep.subr.bf16.mxu1 %v12277_v7  ;;  %v18970_v7 = vld [vmem:[#allocation27_spill] sm:$0xff] }
 0x258   :  { %v11782_v5 = vpack.i.bf16 %v5085_v28, %v5084_v39  ;;  %v2624_v56 = vmul.f32 0.2, %v1792_v22  ;;  %v2908_v31 = vsel %vm2396_vm6, %v1904_v57, %v2652_v47  ;;  %v4850_v15 = vsel %vm4843_vm4, %v4529_v3, %v11625_v60  ;;  %v18966_v3 = vld [vmem:[#allocation107_spill] sm:$0xff]  ;;  %v18980_v8 = vld [vmem:[#allocation66_spill] sm:$0xff] }
 0x259   :  { %v11674_v27 = vpop.permute.xlu1 %11673  ;;  %v11388_v29 = vpop.f32.mrf.mxu0  ;;  %v4701_v2 = vmul.f32 %v18962_v11, %v2909_v21  ;;  %v4851_v0 = vsel %vm4843_vm4, %v15385_v48, %v11626_v32  ;;  %v2907_v36 = vsel %vm2395_vm8, %v15393_v44, %v2651_v42  ;;  %v15474_v47 = vsel %vm5484_vm0, %v4850_v15, %v11670_v54  ;;  %v18973_v11 = vld [vmem:[#allocation76_spill] sm:$0xff] }
 0x25a   :  { %v11676_v37 = vunpack.i.h.bf16 %v11674_v27  ;;  %11783 = vrot.lane.b32.xlu0 %v11782_v5, %s12804_s21  ;;  %v11675_v28 = vunpack.i.l.bf16 %v11674_v27  ;;  %18964 = vst [vmem:[#allocation29_spill] sm:$0xff] %v15474_v47  ;;  %v15477_v60 = vsel %vm5484_vm0, %v4851_v0, %v11671_v9  ;;  %v1456_v21 = vadd.f32 %v14870_v30, %v18966_v3  ;;  %10914 = vmatpush3.bf16.msra.mxu1 %v12278_v41  ;;  %v18981_v47 = vld [vmem:[#allocation67_spill] sm:$0xff] }
 0x25b   :  { %4235 = vperm.xlu1 %11566, %v3185_v17   ;;  %v1919_v39 = vpop.f32.mrf.mxu0  ;;  %18965 = vst [vmem:[#allocation21_spill] sm:$0xff] %v15477_v60  ;;  %v18967_v17 = vld [vmem:[#allocation26_spill] sm:$0xff]  ;;  %v11797_v27 = vpack.i.bf16 %v4702_v16, %v4701_v2  ;;  %v15492_v32 = vsel %vm2285_vm1, %v15073_v45, %v15123_v63  ;;  %v2880_v9 = vsel %vm2368_vm9, %v1792_v22, %v2624_v56  ;;  %v2542_v16 = vmul.f32 0.2, %v15251_v62  ;;  %v18971_v45 = vld [vmem:[#allocation109_spill] sm:$0xff] }
 0x25c   :  { %v15471_v57 = vsel %vm5484_vm0, %v4849_v24, %v11676_v37  ;;  %v4700_v5 = vmul.f32 %v18967_v17, %v2908_v31  ;;  %v15484_v44 = vsel %vm5484_vm0, %v15405_v14, %v11675_v28  ;;  %v18969_v24 = vld [vmem:[#allocation108_spill] sm:$0xff]  ;;  %v1928_v54 = vadd.f32 %v14870_v30, %v11388_v29  ;;  %v18974_v17 = vld [vmem:[#allocation110_spill] sm:$0xff]  ;;  %v18979_v31 = vld [vmem:[#allocation19_spill] sm:$0xff] }
 0x25d   :  { %18963 = vst [vmem:[#allocation20_spill] sm:$0xff] %v15471_v57  ;;  %v11391_v48 = vpop.f32.mrf.mxu0  ;;  %18968 = vst [vmem:[#allocation150_spill] sm:$0xff] %v15484_v44  ;;  %v1477_v42 = vadd.f32 %v14870_v30, %v18969_v24  ;;  %v4699_v41 = vmul.f32 %v18970_v7, %v2907_v36  ;;  %v1469_v63 = vadd.f32 %v14870_v30, %v18971_v45  ;;  %v2540_v15 = vmul.f32 0.2, %v1456_v21 }
 0x25e   :  { %v15511_v22 = vsel %vm2283_vm5, %v15086_v13, %v15136_v61  ;;  %v2879_v36 = vsel %vm2367_vm7, %v15369_v59, %v15390_v34  ;;  %v1925_v29 = vadd.f32 %v14870_v30, %v15420_v33  ;;  %v4672_v2 = vmul.f32 %v18973_v11, %v2880_v9  ;;  %v18975_v34 = vld [vmem:[#allocation72_spill] sm:$0xff] }
 0x25f   :  { %11798 = vrot.lane.b32.xlu1 %v11797_v27, %s12803_s27  ;;  %v15499_v14 = vpop.f32.mrf.mxu0  ;;  %v11802_v28 = vpack.i.bf16 %v4700_v5, %v4699_v41  ;;  %v2545_v3 = vmul.f32 0.2, %v1477_v42  ;;  %vm2284_vm11 = vcmp.gt.f32.partialorder %v1456_v21, 0.0  ;;  %v2658_v61 = vmul.f32 0.2, %v1928_v54 }
 0x260   :  { %v1920_v13 = vadd.f32 %v14870_v30, %v1919_v39  ;;  %v15526_v59 = vadd.f32 %v14870_v30, %v18974_v17  ;;  %vm2289_vm12 = vcmp.gt.f32.partialorder %v1477_v42, 0.0  ;;  %v4671_v33 = vmul.f32 %v18975_v34, %v2879_v36 }
 0x261   :  { %v15519_v56 = vpop.permute.xlu0 %3630  ;;  %v11392_v0 = vpop.f32.mrf.mxu0  ;;  %vm2402_vm13 = vcmp.gt.f32.partialorder %v1928_v54, 0.0  ;;  %v2543_v24 = vmul.f32 0.2, %v1469_v63  ;;  %v15531_v5 = vsel %vm2286_vm10, %v15251_v62, %v2542_v16  ;;  %v2657_v9 = vmul.f32 0.2, %v1925_v29 }
 0x262   :  { %18972 = vst [vmem:[#allocation144_spill] sm:$0xff] %v15519_v56  ;;  %v1917_v7 = vadd.f32 %v14870_v30, %v15445_v20  ;;  %v15537_v41 = vsel %vm2284_vm11, %v1456_v21, %v2540_v15  ;;  %vm2287_vm14 = vcmp.gt.f32.partialorder %v1469_v63, 0.0  ;;  %vm2401_vm15 = vcmp.gt.f32.partialorder %v1925_v29, 0.0  ;;  %v18977_v20 = vld [vmem:[#allocation111_spill] sm:$0xff] }
 0x263   :  { %11803 = vrot.lane.b32.xlu1 %v11802_v28, %s12803_s27  ;;  %v1935_v27 = vpop.f32.mrf.mxu0  ;;  %v11807_v45 = vpack.i.bf16 %v4672_v2, %v4671_v33  ;;  %v15539_v11 = vsel %vm2289_vm12, %v1477_v42, %v2545_v3  ;;  %v2914_v28 = vsel %vm2402_vm13, %v1928_v54, %v2658_v61  ;;  %v2656_v17 = vmul.f32 0.2, %v1920_v13  ;;  %v3121_v61 = vld [vmem:[%s18629_s20 + $0x430] sm:$0xff] }
 0x264   :  { %v1944_v34 = vadd.f32 %v14870_v30, %v11392_v0  ;;  %v15545_v16 = vmul.f32 0.2, %v15526_v59  ;;  %v15549_v37 = vadd.f32 %v14870_v30, %v18977_v20  ;;  %v11631_v21 = vunpack.i.h.bf16 %v15078_v18  ;;  %v18978_v33 = vld [vmem:[#allocation22_spill] sm:$0xff] }
 0x265   :  { %v15535_v39 = vpop.permute.xlu0 %3310  ;;  %v11395_v36 = vpop.f32.mrf.mxu0  ;;  %vm2400_vm1 = vcmp.gt.f32.partialorder %v1920_v13, 0.0  ;;  %v15555_v54 = vsel %vm2287_vm14, %v1469_v63, %v2543_v24  ;;  %v2913_v15 = vsel %vm2401_vm15, %v1925_v29, %v2657_v9  ;;  %v2655_v2 = vmul.f32 0.2, %v1917_v7 }
 0x266   :  { %v15542_v62 = vpop.permute.xlu1 %4100  ;;  %v1941_v0 = vadd.f32 %v14870_v30, %v11391_v48  ;;  %v4532_v20 = vmul.f32 %v18978_v33, %v15194_v40  ;;  %vm2399_vm2 = vcmp.gt.f32.partialorder %v1917_v7, 0.0  ;;  %v4706_v63 = vmul.f32 %v18980_v8, %v2914_v28  ;;  %v15575_v8 = vld [vmem:[%s18690_s2] ss:$0 sm:$0xff] }
 0x267   :  { %18976 = vst [vmem:[#allocation159_spill] sm:$0xff] %v15542_v62  ;;  %11808 = vrot.lane.b32.xlu1 %v11807_v45, %s12803_s27  ;;  %v15553_v42 = vpop.f32.mrf.mxu0  ;;  %v4531_v45 = vmul.f32 %v18979_v31, %v15179_v1  ;;  %v11630_v29 = vunpack.i.l.bf16 %v15078_v18  ;;  %v2912_v9 = vsel %vm2400_vm1, %v1920_v13, %v2656_v17  ;;  %v2662_v48 = vmul.f32 0.2, %v1944_v34  ;;  %v19036_v62 = vld [vmem:[#allocation167_spill] sm:$0xff] }
 0x268   :  { %v1936_v12 = vadd.f32 %v14870_v30, %v1935_v27  ;;  %v4705_v60 = vmul.f32 %v18981_v47, %v2913_v15  ;;  %vm2406_vm3 = vcmp.gt.f32.partialorder %v1944_v34, 0.0  ;;  %v4853_v33 = vsel %vm4843_vm4, %v4532_v20, %v11631_v21  ;;  %v18983_v47 = vld [vmem:[#allocation57_spill] sm:$0xff] }
 0x269   :  { %v15558_v3 = vpop.permute.xlu0 %4350  ;;  %v11396_v24 = vpop.f32.mrf.mxu0  ;;  %v2911_v1 = vsel %vm2399_vm2, %v1917_v7, %v2655_v2  ;;  %v2661_v31 = vmul.f32 0.2, %v1941_v0  ;;  %v1933_v18 = vadd.f32 %v15575_v8, %v15499_v14  ;;  %v4704_v27 = vmul.f32 %v18983_v47, %v2912_v9  ;;  %v18986_v14 = vld [vmem:[#allocation58_spill] sm:$0xff] }
 0x26a   :  { %v11694_v6 = vpop.permute.xlu1 %11693  ;;  %vm2405_vm5 = vcmp.gt.f32.partialorder %v1941_v0, 0.0  ;;  %v11822_v28 = vpack.i.bf16 %v4706_v63, %v4705_v60  ;;  %v2918_v21 = vsel %vm2406_vm3, %v1944_v34, %v2662_v48  ;;  %v2660_v15 = vmul.f32 0.2, %v1936_v12  ;;  %v18990_v48 = vld [vmem:[#allocation97_spill] sm:$0xff] }
 0x26b   :  { %v11696_v56 = vunpack.i.h.bf16 %v11694_v6  ;;  %3915 = vperm.xlu1 %11566, %v3121_v61   ;;  %v1951_v40 = vpop.f32.mrf.mxu0  ;;  %v11695_v30 = vunpack.i.l.bf16 %v11694_v6  ;;  %v1960_v2 = vadd.f32 %v15575_v8, %v11396_v24  ;;  %v4852_v6 = vsel %vm4843_vm4, %v4531_v45, %v11630_v29 }
 0x26c   :  { %vm2290_vm6 = vcmp.gt.f32.partialorder %v15526_v59, 0.0  ;;  %v4703_v20 = vmul.f32 %v18986_v14, %v2911_v1  ;;  %vm2404_vm7 = vcmp.gt.f32.partialorder %v1936_v12, 0.0  ;;  %v2917_v34 = vsel %vm2405_vm5, %v1941_v0, %v2661_v31  ;;  %v18993_v14 = vld [vmem:[#allocation112_spill] sm:$0xff] }
 0x26d   :  { %v15579_v13 = vpop.permute.xlu0 %4430  ;;  %v15582_v17 = vpop.f32.mrf.mxu0  ;;  %v15585_v7 = vsel %vm5484_vm0, %v4853_v33, %v11696_v56  ;;  %v15598_v56 = vsel %vm5484_vm0, %v4852_v6, %v11695_v30  ;;  %v2659_v63 = vmul.f32 0.2, %v1933_v18  ;;  %v1957_v24 = vadd.f32 %v15575_v8, %v11395_v36  ;;  %v18992_v30 = vld [vmem:[#allocation145_spill] sm:$0xff] }
 0x26e   :  { %18982 = vst [vmem:[#allocation141_spill] sm:$0xff] %v15579_v13  ;;  %18984 = vst [vmem:[#allocation77_spill] sm:$0xff] %v15585_v7  ;;  %v15589_v61 = vpop.permute.xlu1 %3625  ;;  %v15606_v29 = vmul.f32 0.2, %v15549_v37  ;;  %vm2403_vm8 = vcmp.gt.f32.partialorder %v1933_v18, 0.0  ;;  %v4710_v33 = vmul.f32 %v18990_v48, %v2918_v21  ;;  %v11827_v1 = vpack.i.bf16 %v4704_v27, %v4703_v20  ;;  %v18994_v27 = vld [vmem:[#allocation98_spill] sm:$0xff] }
 0x26f   :  { %18985 = vst [vmem:[#allocation37_spill] sm:$0xff] %v15589_v61  ;;  %11823 = vrot.lane.b32.xlu1 %v11822_v28, %s12803_s27  ;;  %v15595_v60 = vpop.f32.mrf.mxu0  ;;  %18988 = vst [vmem:[#allocation107_spill] sm:$0xff] %v15598_v56  ;;  %v1605_v0 = vadd.f32 %v15575_v8, %v18992_v30  ;;  %v2916_v31 = vsel %vm2404_vm7, %v1936_v12, %v2660_v15  ;;  %v2666_v28 = vmul.f32 0.2, %v1960_v2  ;;  %vm2410_vm9 = vcmp.gt.f32.partialorder %v1960_v2, 0.0  ;;  %v19000_v56 = vld [vmem:[#allocation115_spill] sm:$0xff] }
 0x270   :  { %18987 = vst [vmem:[#allocation38_spill] sm:$0xff] %v15595_v60  ;;  %v1952_v36 = vadd.f32 %v15575_v8, %v1951_v40  ;;  %v15616_v45 = vadd.f32 %v15575_v8, %v18993_v14  ;;  %v15622_v21 = vsel %vm2290_vm6, %v15526_v59, %v15545_v16  ;;  %v4709_v20 = vmul.f32 %v18994_v27, %v2917_v34  ;;  %v18996_v40 = vld [vmem:[#allocation113_spill] sm:$0xff]  ;;  %v18999_v34 = vld [vmem:[#allocation78_spill] sm:$0xff] }
 0x271   :  { %v15601_v9 = vpop.permute.xlu0 %4025  ;;  %v15609_v47 = vpop.f32.mrf.mxu0  ;;  %v15630_v15 = vmul.f32 %v18996_v40, %v15537_v41  ;;  %v2915_v48 = vsel %vm2403_vm8, %v1933_v18, %v2659_v63  ;;  %v2665_v30 = vmul.f32 0.2, %v1957_v24  ;;  %v1949_v14 = vadd.f32 %v15575_v8, %v15553_v42  ;;  %v18998_v59 = vld [vmem:[#allocation149_spill] sm:$0xff] }
 0x272   :  { %18989 = vst [vmem:[#allocation26_spill] sm:$0xff] %v15601_v9  ;;  %18991 = vst [vmem:[#allocation108_spill] sm:$0xff] %v15609_v47  ;;  %v11699_v6 = vpop.permute.xlu1 %11698  ;;  %v1608_v16 = vadd.f32 %v15575_v8, %v18998_v59  ;;  %v4708_v27 = vmul.f32 %v18999_v34, %v2916_v31  ;;  %vm2409_vm10 = vcmp.gt.f32.partialorder %v1957_v24, 0.0  ;;  %v15644_v41 = vadd.f32 %v15575_v8, %v19000_v56  ;;  %v19001_v59 = vld [vmem:[#allocation148_spill] sm:$0xff]  ;;  %v19002_v34 = vld [vmem:[#allocation79_spill] sm:$0xff] }
 0x273   :  { %11828 = vrot.lane.b32.xlu1 %v11827_v1, %s12803_s27  ;;  %v15626_v12 = vpop.f32.mrf.mxu0  ;;  %v11842_v1 = vpack.i.bf16 %v4710_v33, %v4709_v20  ;;  %vm2321_vm11 = vcmp.gt.f32.partialorder %v1605_v0, 0.0  ;;  %vm2288_vm12 = vcmp.gt.f32.partialorder %v15549_v37, 0.0  ;;  %v2922_v42 = vsel %vm2410_vm9, %v1960_v2, %v2666_v28  ;;  %v19004_v28 = vld [vmem:[#allocation125_spill] sm:$0xff] }
 0x274   :  { %18995 = vst [vmem:[#allocation27_spill] sm:$0xff] %v15626_v12  ;;  %v2664_v18 = vmul.f32 0.2, %v1952_v36  ;;  %v2577_v40 = vmul.f32 0.2, %v1605_v0  ;;  %v1597_v31 = vadd.f32 %v15575_v8, %v19001_v59  ;;  %v4707_v33 = vmul.f32 %v19002_v34, %v2915_v48  ;;  %v19006_v59 = vld [vmem:[#allocation152_spill] sm:$0xff] }
 0x275   :  { %v15635_v13 = vpop.permute.xlu0 %4105  ;;  %v15640_v9 = vpop.f32.mrf.mxu0  ;;  %vm2408_vm13 = vcmp.gt.f32.partialorder %v1952_v36, 0.0  ;;  %v2921_v56 = vsel %vm2409_vm10, %v1957_v24, %v2665_v30  ;;  %v2663_v7 = vmul.f32 0.2, %v1949_v14  ;;  %v11701_v12 = vunpack.i.h.bf16 %v11699_v6  ;;  %v19008_v24 = vld [vmem:[#allocation59_spill] sm:$0xff] }
 0x276   :  { %18997 = vst [vmem:[#allocation109_spill] sm:$0xff] %v15635_v13  ;;  %v15648_v63 = vpop.permute.xlu1 %3305  ;;  %v11700_v61 = vunpack.i.l.bf16 %v11699_v6  ;;  %v2578_v2 = vmul.f32 0.2, %v1608_v16  ;;  %vm2407_vm14 = vcmp.gt.f32.partialorder %v1949_v14, 0.0  ;;  %v4714_v47 = vmul.f32 %v19004_v28, %v2922_v42 }
 0x277   :  { %11843 = vrot.lane.b32.xlu1 %v11842_v1, %s12803_s27  ;;  %v15654_v20 = vpop.f32.mrf.mxu0  ;;  %v11847_v44 = vpack.i.bf16 %v4708_v27, %v4707_v33  ;;  %v1600_v48 = vadd.f32 %v15575_v8, %v19006_v59  ;;  %v19007_v1 = vld [vmem:[#allocation8_spill] sm:$0xff]  ;;  %v4533_v30 = vmul.f32 %v19008_v24, %v15165_v38  ;;  %v2920_v6 = vsel %vm2408_vm13, %v1952_v36, %v2664_v18  ;;  %v19012_v18 = vld [vmem:[#allocation103_spill] sm:$0xff] }
 0x278   :  { %v4534_v34 = vmul.f32 %v19007_v1, %v15199_v53  ;;  %vm2322_vm15 = vcmp.gt.f32.partialorder %v1608_v16, 0.0  ;;  %v2833_v33 = vsel %vm2321_vm11, %v1605_v0, %v2577_v40  ;;  %v2919_v28 = vsel %vm2407_vm14, %v1949_v14, %v2663_v7 }
 0x279   :  { %v15656_v60 = vpop.permute.xlu0 %11708  ;;  %v15659_v57 = vpop.f32.mrf.mxu0  ;;  %v4854_v38 = vsel %vm4843_vm4, %v4533_v30, %v11700_v61  ;;  %v4712_v59 = vmul.f32 %v19012_v18, %v2920_v6  ;;  %vm2319_vm1 = vcmp.gt.f32.partialorder %v1597_v31, 0.0  ;;  %v2575_v0 = vmul.f32 0.2, %v1597_v31  ;;  %v19016_v61 = vld [vmem:[#allocation153_spill] sm:$0xff] }
 0x27a   :  { %19003 = vst [vmem:[#allocation76_spill] sm:$0xff] %v15656_v60  ;;  %19005 = vst [vmem:[#allocation110_spill] sm:$0xff] %v15659_v57  ;;  %v11704_v51 = vpop.permute.xlu1 %11703  ;;  %v19009_v60 = vld [vmem:[#allocation126_spill] sm:$0xff]  ;;  %v4855_v36 = vsel %vm4843_vm4, %v4534_v34, %v11701_v12  ;;  %v2834_v7 = vsel %vm2322_vm15, %v1608_v16, %v2578_v2  ;;  %v2576_v14 = vmul.f32 0.2, %v1600_v48  ;;  %v1621_v12 = vadd.f32 %v15575_v8, %v19016_v61  ;;  %v19021_v30 = vld [vmem:[#allocation157_spill] sm:$0xff] }
 0x27b   :  { %v4713_v13 = vmul.f32 %v19009_v60, %v2921_v56  ;;  %v11706_v58 = vunpack.i.h.bf16 %v11704_v51  ;;  %v11705_v42 = vunpack.i.l.bf16 %v11704_v51  ;;  %11848 = vrot.lane.b32.xlu1 %v11847_v44, %s12803_s27  ;;  %v15670_v27 = vpop.f32.mrf.mxu0  ;;  %v19017_v56 = vld [vmem:[#allocation156_spill] sm:$0xff]  ;;  %v19020_v16 = vld [vmem:[#allocation114_spill] sm:$0xff]  ;;  %vm2320_vm2 = vcmp.gt.f32.partialorder %v1600_v48, 0.0 }
 0x27c   :  { %19010 = vst [vmem:[#allocation72_spill] sm:$0xff] %v15670_v27  ;;  %v15702_v2 = vmul.f32 %v19020_v16, %v15511_v22  ;;  %v1624_v6 = vadd.f32 %v15575_v8, %v19021_v30  ;;  %v15714_v18 = vmul.f32 0.2, %v15644_v41  ;;  %v15720_v22 = vsel %vm2288_vm12, %v15549_v37, %v15606_v29  ;;  %v19025_v16 = vld [vmem:[#allocation60_spill] sm:$0xff] }
 0x27d   :  { %v15674_v53 = vpop.permute.xlu0 %3640  ;;  %v11852_v1 = vpack.i.bf16 %v4714_v47, %v4713_v13  ;;  %v15679_v60 = vpop.f32.mrf.mxu0  ;;  %v15682_v51 = vsel %vm5484_vm0, %v4854_v38, %v11705_v42  ;;  %v15685_v44 = vsel %vm5484_vm0, %v4855_v36, %v11706_v58  ;;  %v1613_v13 = vadd.f32 %v15575_v8, %v19017_v56  ;;  %v19018_v47 = vld [vmem:[#allocation104_spill] sm:$0xff]  ;;  %v19026_v58 = vld [vmem:[#allocation61_spill] sm:$0xff] }
 0x27e   :  { %19011 = vst [vmem:[#allocation111_spill] sm:$0xff] %v15674_v53  ;;  %19013 = vst [vmem:[#allocation22_spill] sm:$0xff] %v15679_v60  ;;  %v15688_v40 = vpop.permute.xlu1 %4345  ;;  %v4711_v34 = vmul.f32 %v19018_v47, %v2919_v28  ;;  %v19022_v42 = vld [vmem:[#allocation160_spill] sm:$0xff]  ;;  %v15711_v28 = vmul.f32 0.2, %v15616_v45  ;;  %v4625_v30 = vmul.f32 %v19025_v16, %v2833_v33  ;;  %v4626_v60 = vmul.f32 %v19026_v58, %v2834_v7  ;;  %v19029_v33 = vld [vmem:[#allocation161_spill] sm:$0xff] }
 0x27f   :  { %19014 = vst [vmem:[#allocation19_spill] sm:$0xff] %v15682_v51  ;;  %19015 = vst [vmem:[#allocation66_spill] sm:$0xff] %v15685_v44  ;;  %11853 = vrot.lane.b32.xlu1 %v11852_v1, %s12803_s27  ;;  %v15696_v24 = vpop.f32.mrf.mxu0  ;;  %v1616_v38 = vadd.f32 %v15575_v8, %v19022_v42  ;;  %v19024_v56 = vld [vmem:[#allocation116_spill] sm:$0xff]  ;;  %v2831_v42 = vsel %vm2319_vm1, %v1597_v31, %v2575_v0  ;;  %v2832_v57 = vsel %vm2320_vm2, %v1600_v48, %v2576_v14  ;;  %v19031_v48 = vld [vmem:[#allocation43_spill] sm:$0xff] }
 0x280   :  { %19019 = vst [vmem:[#allocation67_spill] sm:$0xff] %v15696_v24  ;;  %v11857_v1 = vpack.i.bf16 %v4712_v59, %v4711_v34  ;;  %v15726_v47 = vadd.f32 %v15575_v8, %v19024_v56  ;;  %vm2325_vm3 = vcmp.gt.f32.partialorder %v1621_v12, 0.0  ;;  %v2581_v51 = vmul.f32 0.2, %v1621_v12  ;;  %v19032_v16 = vld [vmem:[#allocation44_spill] sm:$0xff] }
 0x281   :  { %v15708_v36 = vpop.permute.xlu0 %3320  ;;  %v15722_v61 = vpop.f32.mrf.mxu0  ;;  %v2579_v37 = vmul.f32 0.2, %v1613_v13  ;;  %vm2323_vm5 = vcmp.gt.f32.partialorder %v1613_v13, 0.0  ;;  %vm2326_vm6 = vcmp.gt.f32.partialorder %v1624_v6, 0.0  ;;  %v2582_v59 = vmul.f32 0.2, %v1624_v6 }
 0x282   :  { %19023 = vst [vmem:[#allocation57_spill] sm:$0xff] %v15722_v61  ;;  %v15731_v24 = vpop.permute.xlu1 %4425  ;;  %v2580_v34 = vmul.f32 0.2, %v1616_v38  ;;  %vm2324_vm7 = vcmp.gt.f32.partialorder %v1616_v38, 0.0  ;;  %v1637_v31 = vadd.f32 %v15575_v8, %v19029_v33  ;;  %v4623_v14 = vmul.f32 %v19031_v48, %v2831_v42 }
 0x283   :  { %19027 = vst [vmem:[#allocation58_spill] sm:$0xff] %v15731_v24  ;;  %11858 = vrot.lane.b32.xlu1 %v11857_v1, %s12803_s27  ;;  %v15734_v29 = vpop.f32.mrf.mxu0  ;;  %v4624_v24 = vmul.f32 %v19032_v16, %v2832_v57  ;;  %v19033_v1 = vld [vmem:[#allocation163_spill] sm:$0xff]  ;;  %v2837_v53 = vsel %vm2325_vm3, %v1621_v12, %v2581_v51  ;;  %v1632_v33 = vadd.f32 %v15575_v8, %v19036_v62 }
 0x284   :  { %19028 = vst [vmem:[#allocation97_spill] sm:$0xff] %v15734_v29  ;;  %v1629_v61 = vadd.f32 %v15575_v8, %v19033_v1  ;;  %v19034_v29 = vld [vmem:[#allocation164_spill] sm:$0xff]  ;;  %v2835_v57 = vsel %vm2323_vm5, %v1613_v13, %v2579_v37  ;;  %v2838_v48 = vsel %vm2326_vm6, %v1624_v6, %v2582_v59  ;;  %v2836_v16 = vsel %vm2324_vm7, %v1616_v38, %v2580_v34  ;;  %v19040_v6 = vld [vmem:[#allocation170_spill] sm:$0xff] }
 0x285   :  { %v11719_v56 = vpop.permute.xlu0 %11718  ;;  %v15738_v58 = vpop.f32.mrf.mxu0  ;;  %v1640_v44 = vadd.f32 %v15575_v8, %v19034_v29  ;;  %vm2329_vm8 = vcmp.gt.f32.partialorder %v1637_v31, 0.0  ;;  %v2584_v13 = vmul.f32 0.2, %v1632_v33  ;;  %v1829_v38 = vadd.f32 %v15575_v8, %v19040_v6 }
 0x286   :  { %v11721_v0 = vunpack.i.h.bf16 %v11719_v56  ;;  %v11720_v7 = vunpack.i.l.bf16 %v11719_v56  ;;  %19030 = vst [vmem:[#allocation145_spill] sm:$0xff] %v15738_v58  ;;  %v15746_v27 = vpop.permute.xlu1 %4030  ;;  %vm2327_vm9 = vcmp.gt.f32.partialorder %v1629_v61, 0.0  ;;  %v2583_v62 = vmul.f32 0.2, %v1629_v61 }
 0x287   :  { %19035 = vst [vmem:[#allocation112_spill] sm:$0xff] %v15746_v27  ;;  %v15753_v42 = vpop.f32.mrf.mxu0  ;;  %v2585_v27 = vmul.f32 0.2, %v1637_v31  ;;  %vm2330_vm10 = vcmp.gt.f32.partialorder %v1640_v44, 0.0  ;;  %vm2328_vm11 = vcmp.gt.f32.partialorder %v1632_v33, 0.0  ;;  %vm2377_vm13 = vcmp.gt.f32.partialorder %v1829_v38, 0.0 }
 0x288   :  { %v5091_v56 = vsel %vm4843_vm4, %v4626_v60, %v11721_v0  ;;  %v5090_v58 = vsel %vm4843_vm4, %v4625_v30, %v11720_v7  ;;  %19037 = vst [vmem:[#allocation98_spill] sm:$0xff] %v15753_v42  ;;  %v2586_v60 = vmul.f32 0.2, %v1640_v44  ;;  %v19042_v0 = vld [vmem:[#allocation84_spill] sm:$0xff]  ;;  %v19044_v42 = vld [vmem:[#allocation85_spill] sm:$0xff] }
 0x289   :  { %v11724_v29 = vpop.permute.xlu0 %11723  ;;  %v11787_v1 = vpack.i.bf16 %v5091_v56, %v5090_v58  ;;  %v15758_v52 = vpop.f32.mrf.mxu0  ;;  %v4629_v7 = vmul.f32 %v19042_v0, %v2837_v53  ;;  %v19043_v58 = vld [vmem:[#allocation68_spill] sm:$0xff] }
 0x28a   :  { %v11726_v51 = vunpack.i.h.bf16 %v11724_v29  ;;  %v11725_v12 = vunpack.i.l.bf16 %v11724_v29  ;;  %19038 = vst [vmem:[#allocation113_spill] sm:$0xff] %v15758_v52  ;;  %v15760_v30 = vpop.permute.xlu1 %4110  ;;  %v4627_v56 = vmul.f32 %v19043_v58, %v2835_v57  ;;  %v2840_v57 = vsel %vm2328_vm11, %v1632_v33, %v2584_v13  ;;  %v19048_v33 = vld [vmem:[#allocation105_spill] sm:$0xff]  ;;  %v19051_v58 = vld [vmem:[#allocation100_spill] sm:$0xff] }
 0x28b   :  { %19039 = vst [vmem:[#allocation149_spill] sm:$0xff] %v15760_v30  ;;  %11788 = vrot.lane.b32.xlu0 %v11787_v1, %s12804_s21  ;;  %v15767_v34 = vpop.f32.mrf.mxu0  ;;  %v4630_v30 = vmul.f32 %v19044_v42, %v2838_v48  ;;  %v19045_v1 = vld [vmem:[#allocation69_spill] sm:$0xff] }
 0x28c   :  { %v5089_v37 = vsel %vm4843_vm4, %v4624_v24, %v11726_v51  ;;  %v5088_v59 = vsel %vm4843_vm4, %v4623_v14, %v11725_v12  ;;  %19041 = vst [vmem:[#allocation78_spill] sm:$0xff] %v15767_v34  ;;  %v4628_v25 = vmul.f32 %v19045_v1, %v2836_v16  ;;  %v2841_v24 = vsel %vm2329_vm8, %v1637_v31, %v2585_v27 }
 0x28d   :  { %v11734_v29 = vpop.permute.xlu0 %11733  ;;  %v11792_v52 = vpack.i.bf16 %v5089_v37, %v5088_v59  ;;  %v11415_v6 = vpop.f32.mrf.mxu0  ;;  %v2839_v14 = vsel %vm2327_vm9, %v1629_v61, %v2583_v62  ;;  %v2842_v51 = vsel %vm2330_vm10, %v1640_v44, %v2586_v60  ;;  %v2633_v37 = vmul.f32 0.2, %v1829_v38  ;;  %v19047_v59 = vld [vmem:[#allocation32_spill] sm:$0xff] }
 0x28e   :  { %v11736_v23 = vunpack.i.h.bf16 %v11734_v29  ;;  %v11735_v43 = vunpack.i.l.bf16 %v11734_v29  ;;  %v15776_v12 = vpop.permute.xlu1 %3635  ;;  %v2037_v53 = vadd.f32 %v15575_v8, %v11415_v6  ;;  %v15784_v27 = vadd.f32 %v15575_v8, %v19047_v59 }
 0x28f   :  { %19046 = vst [vmem:[#allocation115_spill] sm:$0xff] %v15776_v12  ;;  %11793 = vrot.lane.b32.xlu0 %v11792_v52, %s12804_s21  ;;  %v2028_v16 = vpop.f32.mrf.mxu0  ;;  %v4633_v13 = vmul.f32 %v19048_v33, %v2841_v24  ;;  %v4632_v29 = vmul.f32 %v19051_v58, %v2840_v57  ;;  %vm2293_vm8 = vcmp.gt.f32.partialorder %v15616_v45, 0.0 }
 0x290   :  { %v5095_v42 = vsel %vm4843_vm4, %v4630_v30, %v11736_v23  ;;  %v5094_v48 = vsel %vm4843_vm4, %v4629_v7, %v11735_v43  ;;  %vm2429_vm12 = vcmp.gt.f32.partialorder %v2037_v53, 0.0  ;;  %v2685_v61 = vmul.f32 0.2, %v2037_v53  ;;  %v19049_v23 = vld [vmem:[#allocation99_spill] sm:$0xff]  ;;  %v19050_v43 = vld [vmem:[#allocation106_spill] sm:$0xff] }
 0x291   :  { %v11739_v44 = vpop.permute.xlu0 %11738  ;;  %v11812_v31 = vpack.i.bf16 %v5095_v42, %v5094_v48  ;;  %v2029_v52 = vadd.f32 %v15575_v8, %v2028_v16  ;;  %v11416_v0 = vpop.f32.mrf.mxu0  ;;  %v4631_v30 = vmul.f32 %v19049_v23, %v2839_v14  ;;  %v4634_v7 = vmul.f32 %v19050_v43, %v2842_v51 }
 0x292   :  { %v11741_v62 = vunpack.i.h.bf16 %v11739_v44  ;;  %v11740_v60 = vunpack.i.l.bf16 %v11739_v44  ;;  %v15791_v1 = vpop.permute.xlu1 %11713  ;;  %v2941_v6 = vsel %vm2429_vm12, %v2037_v53, %v2685_v61  ;;  %v2040_v16 = vadd.f32 %v15575_v8, %v11416_v0 }
 0x293   :  { %11813 = vrot.lane.b32.xlu0 %v11812_v31, %s12804_s21  ;;  %v2031_v59 = vpop.f32.mrf.mxu0  ;;  %v15798_v24 = vmul.f32 0.2, %v15784_v27  ;;  %v15802_v14 = vmul.f32 %v15535_v39, %v15262_v50  ;;  %v4535_v51 = vmul.f32 %v15648_v63, %v15226_v46  ;;  %v15807_v53 = vsel %vm2377_vm13, %v1829_v38, %v2633_v37  ;;  %v19052_v31 = vld [vmem:[#allocation140_spill] sm:$0xff] }
 0x294   :  { %v5093_v42 = vsel %vm4843_vm4, %v4628_v25, %v11741_v62  ;;  %v5092_v48 = vsel %vm4843_vm4, %v4627_v56, %v11740_v60  ;;  %vm2427_vm14 = vcmp.gt.f32.partialorder %v2029_v52, 0.0  ;;  %v2032_v61 = vadd.f32 %v15575_v8, %v2031_v59 }
 0x295   :  { %v11744_v57 = vpop.permute.xlu0 %11743  ;;  %v11419_v44 = vpop.f32.mrf.mxu0  ;;  %v15811_v62 = vmul.f32 %v19052_v31, %v2941_v6  ;;  %v2683_v60 = vmul.f32 0.2, %v2029_v52  ;;  %v11817_v50 = vpack.i.bf16 %v5093_v42, %v5092_v48  ;;  %v11715_v46 = vunpack.i.l.bf16 %v15791_v1 }
 0x296   :  { %v11746_v25 = vunpack.i.h.bf16 %v11744_v57  ;;  %v11745_v56 = vunpack.i.l.bf16 %v11744_v57  ;;  %v15813_v0 = vpop.permute.xlu1 %3315  ;;  %v2053_v39 = vadd.f32 %v15575_v8, %v11419_v44  ;;  %v2686_v63 = vmul.f32 0.2, %v2040_v16 }
 0x297   :  { %v2044_v33 = vpop.f32.mrf.mxu0  ;;  %vm2430_vm15 = vcmp.gt.f32.partialorder %v2040_v16, 0.0  ;;  %vm2428_vm1 = vcmp.gt.f32.partialorder %v2032_v61, 0.0  ;;  %v2684_v23 = vmul.f32 0.2, %v2032_v61  ;;  %11818 = vrot.lane.b32.xlu0 %v11817_v50, %s12804_s21  ;;  %vm2378_vm3 = vcmp.gt.f32.partialorder %v15784_v27, 0.0 }
 0x298   :  { %v5099_v38 = vsel %vm4843_vm4, %v4634_v7, %v11746_v25  ;;  %v5098_v37 = vsel %vm4843_vm4, %v4633_v13, %v11745_v56  ;;  %v2689_v43 = vmul.f32 0.2, %v2053_v39  ;;  %vm2433_vm2 = vcmp.gt.f32.partialorder %v2053_v39, 0.0 }
 0x299   :  { %v11749_v58 = vpop.permute.xlu0 %11748  ;;  %v11832_v48 = vpack.i.bf16 %v5099_v38, %v5098_v37  ;;  %v11420_v59 = vpop.f32.mrf.mxu0  ;;  %v2939_v57 = vsel %vm2427_vm14, %v2029_v52, %v2683_v60  ;;  %v11716_v7 = vunpack.i.h.bf16 %v15791_v1  ;;  %v2045_v13 = vadd.f32 %v15575_v8, %v2044_v33 }
 0x29a   :  { %v11751_v6 = vunpack.i.h.bf16 %v11749_v58  ;;  %v11750_v42 = vunpack.i.l.bf16 %v11749_v58  ;;  %v11729_v25 = vpop.permute.xlu1 %11728  ;;  %v2056_v56 = vadd.f32 %v15575_v8, %v11420_v59  ;;  %v2942_v44 = vsel %vm2430_vm15, %v2040_v16, %v2686_v63 }
 0x29b   :  { %v2940_v31 = vsel %vm2428_vm1, %v2032_v61, %v2684_v23  ;;  %v2047_v37 = vpop.f32.mrf.mxu0  ;;  %v2945_v58 = vsel %vm2433_vm2, %v2053_v39, %v2689_v43  ;;  %v11731_v34 = vunpack.i.h.bf16 %v11729_v25  ;;  %v11730_v52 = vunpack.i.l.bf16 %v11729_v25  ;;  %11833 = vrot.lane.b32.xlu0 %v11832_v48, %s12804_s21 }
 0x29c   :  { %v5097_v50 = vsel %vm4843_vm4, %v4632_v29, %v11751_v6  ;;  %v5096_v38 = vsel %vm4843_vm4, %v4631_v30, %v11750_v42  ;;  %v4856_v60 = vsel %vm4843_vm4, %v4535_v51, %v11715_v46  ;;  %vm2434_vm5 = vcmp.gt.f32.partialorder %v2056_v56, 0.0  ;;  %v19053_v29 = vld [vmem:[#allocation137_spill] sm:$0xff]  ;;  %v19055_v46 = vld [vmem:[#allocation70_spill] sm:$0xff] }
 0x29d   :  { %v15831_v1 = vpop.permute.xlu0 %4360  ;;  %v2690_v33 = vmul.f32 0.2, %v2056_v56  ;;  %v2048_v16 = vadd.f32 %v15575_v8, %v2047_v37  ;;  %v11837_v61 = vpack.i.bf16 %v5097_v50, %v5096_v38  ;;  %v11423_v63 = vpop.f32.mrf.mxu0  ;;  %v4734_v23 = vmul.f32 %v19053_v29, %v2942_v44  ;;  %v19054_v30 = vld [vmem:[#allocation129_spill] sm:$0xff]  ;;  %v19056_v37 = vld [vmem:[#allocation31_spill] sm:$0xff] }
 0x29e   :  { %v4732_v6 = vmul.f32 %v19054_v30, %v2940_v31  ;;  %v2687_v42 = vmul.f32 0.2, %v2045_v13  ;;  %v15837_v39 = vpop.permute.xlu1 %4355  ;;  %v2069_v43 = vadd.f32 %v15575_v8, %v11423_v63  ;;  %vm2431_vm6 = vcmp.gt.f32.partialorder %v2045_v13, 0.0  ;;  %v19060_v30 = vld [vmem:[#allocation128_spill] sm:$0xff] }
 0x29f   :  { %v2946_v48 = vsel %vm2434_vm5, %v2056_v56, %v2690_v33  ;;  %vm2432_vm7 = vcmp.gt.f32.partialorder %v2048_v16, 0.0  ;;  %v2688_v59 = vmul.f32 0.2, %v2048_v16  ;;  %v2060_v51 = vpop.f32.mrf.mxu0  ;;  %v15841_v25 = vmul.f32 %v19055_v46, %v2945_v58  ;;  %11838 = vrot.lane.b32.xlu0 %v11837_v61, %s12804_s21 }
 0x2a0   :  { %v15844_v50 = vmul.f32 %v19056_v37, %v2946_v48  ;;  %v2061_v31 = vadd.f32 %v15575_v8, %v2060_v51  ;;  %v4857_v38 = vsel %vm4843_vm4, %v15802_v14, %v11716_v7  ;;  %v2693_v56 = vmul.f32 0.2, %v2069_v43 }
 0x2a1   :  { %v15847_v44 = vpop.permute.xlu0 %4440  ;;  %v2944_v63 = vsel %vm2432_vm7, %v2048_v16, %v2688_v59  ;;  %v11424_v33 = vpop.f32.mrf.mxu0  ;;  %v15853_v29 = vsel %vm5484_vm0, %v4856_v60, %v11730_v52  ;;  %v15856_v58 = vsel %vm5484_vm0, %v4857_v38, %v11731_v34  ;;  %v4731_v61 = vmul.f32 %v19060_v30, %v2939_v57  ;;  %v19062_v60 = vld [vmem:[#allocation154_spill] sm:$0xff] }
 0x2a2   :  { %19057 = vst [vmem:[#allocation148_spill] sm:$0xff] %v15847_v44  ;;  %19058 = vst [vmem:[#allocation79_spill] sm:$0xff] %v15853_v29  ;;  %v2943_v48 = vsel %vm2431_vm6, %v2045_v13, %v2687_v42  ;;  %vm2437_vm9 = vcmp.gt.f32.partialorder %v2069_v43, 0.0  ;;  %v15861_v51 = vpop.permute.xlu1 %4435  ;;  %v11862_v14 = vpack.i.bf16 %v4734_v23, %v15811_v62  ;;  %v2691_v7 = vmul.f32 0.2, %v2061_v31 }
 0x2a3   :  { %19059 = vst [vmem:[#allocation125_spill] sm:$0xff] %v15856_v58  ;;  %19061 = vst [vmem:[#allocation152_spill] sm:$0xff] %v15861_v51  ;;  %v2072_v16 = vadd.f32 %v15575_v8, %v11424_v33  ;;  %v2063_v59 = vpop.f32.mrf.mxu0  ;;  %v4736_v46 = vmul.f32 %v19062_v60, %v2944_v63  ;;  %vm2435_vm10 = vcmp.gt.f32.partialorder %v2061_v31, 0.0  ;;  %v2890_v62 = vsel %vm2378_vm3, %v15784_v27, %v15798_v24  ;;  %v19063_v33 = vld [vmem:[#allocation162_spill] sm:$0xff]  ;;  %v19108_v58 = vld [vmem:[#allocation73_spill] sm:$0xff] }
 0x2a4   :  { %11863 = vrot.lane.b32.xlu0 %v11862_v14, %s12803_s27  ;;  %v2064_v13 = vadd.f32 %v15575_v8, %v2063_v59  ;;  %v2949_v23 = vsel %vm2437_vm9, %v2069_v43, %v2693_v56  ;;  %v11867_v37 = vpack.i.bf16 %v4732_v6, %v4731_v61  ;;  %v4735_v30 = vmul.f32 %v19063_v33, %v2943_v48  ;;  %v19067_v6 = vld [vmem:[#allocation14_spill] sm:$0xff] }
 0x2a5   :  { %v4036_v57 = vpop.permute.xlu0 %4035  ;;  %vm2438_vm11 = vcmp.gt.f32.partialorder %v2072_v16, 0.0  ;;  %v2694_v42 = vmul.f32 0.2, %v2072_v16  ;;  %v11427_v38 = vpop.f32.mrf.mxu0  ;;  %v2947_v34 = vsel %vm2435_vm10, %v2061_v31, %v2691_v7  ;;  %v15884_v24 = vmul.f32 %v15183_v4, %v2949_v23  ;;  %v19069_v31 = vld [vmem:[#allocation81_spill] sm:$0xff] }
 0x2a6   :  { %vm2436_vm12 = vcmp.gt.f32.partialorder %v2064_v13, 0.0  ;;  %v2692_v63 = vmul.f32 0.2, %v2064_v13  ;;  %v4041_v60 = vpop.permute.xlu1 %4040  ;;  %v2085_v14 = vadd.f32 %v15575_v8, %v11427_v38  ;;  %v15879_v59 = vmul.f32 %v4036_v57, %v15807_v53 }
 0x2a7   :  { %v2950_v52 = vsel %vm2438_vm11, %v2072_v16, %v2694_v42  ;;  %v15881_v44 = vmul.f32 %v4041_v60, %v2890_v62  ;;  %v2076_v27 = vpop.f32.mrf.mxu0  ;;  %19066 = vst [vmem:[#allocation126_spill] sm:$0xff] %v15884_v24  ;;  %v11872_v48 = vpack.i.bf16 %v4736_v46, %v4735_v30  ;;  %v19070_v62 = vld [vmem:[#allocation168_spill] sm:$0xff]  ;;  %v19071_v42 = vld [vmem:[#allocation119_spill] sm:$0xff]  ;;  %vm2291_vm14 = vcmp.gt.f32.partialorder %v15644_v41, 0.0 }
 0x2a8   :  { %19064 = vst [vmem:[#allocation8_spill] sm:$0xff] %v15879_v59  ;;  %v15887_v43 = vmul.f32 %v19067_v6, %v2950_v52  ;;  %v2948_v56 = vsel %vm2436_vm12, %v2064_v13, %v2692_v63  ;;  %11868 = vrot.lane.b32.xlu0 %v11867_v37, %s12803_s27  ;;  %v2697_v16 = vmul.f32 0.2, %v2085_v14  ;;  %v2077_v57 = vadd.f32 %v15575_v8, %v2076_v27  ;;  %v19073_v6 = vld [vmem:[#allocation120_spill] sm:$0xff] }
 0x2a9   :  { %19065 = vst [vmem:[#allocation59_spill] sm:$0xff] %v15881_v44  ;;  %v15890_v61 = vpop.permute.xlu0 %4115  ;;  %v15893_v7 = vmul.f32 %v19069_v31, %v2948_v56  ;;  %v11428_v4 = vpop.f32.mrf.mxu0  ;;  %v15899_v23 = vmul.f32 %v19070_v62, %v2947_v34  ;;  %vm2441_vm13 = vcmp.gt.f32.partialorder %v2085_v14, 0.0  ;;  %v1488_v37 = vadd.f32 %v15575_v8, %v19071_v42 }
 0x2aa   :  { %19068 = vst [vmem:[#allocation103_spill] sm:$0xff] %v15887_v43  ;;  %v15901_v52 = vpop.permute.xlu1 %4120  ;;  %v2088_v13 = vadd.f32 %v15575_v8, %v11428_v4  ;;  %vm2439_vm15 = vcmp.gt.f32.partialorder %v2077_v57, 0.0  ;;  %v2695_v38 = vmul.f32 0.2, %v2077_v57  ;;  %v2550_v27 = vmul.f32 0.2, %v15726_v47 }
 0x2ab   :  { %v2079_v33 = vpop.f32.mrf.mxu0  ;;  %v1509_v56 = vadd.f32 %v15575_v8, %v19073_v6  ;;  %v15922_v31 = vsel %vm2293_vm8, %v15616_v45, %v15711_v28  ;;  %v19074_v4 = vld [vmem:[#allocation7_spill] sm:$0xff]  ;;  %vm2294_vm3 = vcmp.gt.f32.partialorder %v15726_v47, 0.0  ;;  %v15936_v45 = vsel %vm2291_vm14, %v15644_v41, %v15714_v18  ;;  %v19082_v41 = vld [vmem:[#allocation124_spill] sm:$0xff] }
 0x2ac   :  { %11873 = vrot.lane.b32.xlu0 %v11872_v48, %s12803_s27  ;;  %vm2442_vm1 = vcmp.gt.f32.partialorder %v2088_v13, 0.0  ;;  %v2698_v34 = vmul.f32 0.2, %v2088_v13  ;;  %v2080_v63 = vadd.f32 %v15575_v8, %v2079_v33  ;;  %v2953_v48 = vsel %vm2441_vm13, %v2085_v14, %v2697_v16 }
 0x2ad   :  { %v15910_v30 = vpop.permute.xlu0 %11753  ;;  %v1709_v62 = vadd.f32 %v15575_v8, %v19074_v4  ;;  %v15929_v53 = vpop.f32.mrf.mxu0  ;;  %v2951_v28 = vsel %vm2439_vm15, %v2077_v57, %v2695_v38  ;;  %v2548_v16 = vmul.f32 0.2, %v1488_v37  ;;  %v15945_v6 = vmul.f32 %v15837_v39, %v2953_v48 }
 0x2ae   :  { %19072 = vst [vmem:[#allocation153_spill] sm:$0xff] %v15910_v30  ;;  %v2954_v42 = vsel %vm2442_vm1, %v2088_v13, %v2698_v34  ;;  %vm2440_vm2 = vcmp.gt.f32.partialorder %v2080_v63, 0.0  ;;  %v2696_v33 = vmul.f32 0.2, %v2080_v63  ;;  %v15927_v46 = vpop.permute.xlu1 %4205  ;;  %19076 = vst [vmem:[#allocation104_spill] sm:$0xff] %v15929_v53  ;;  %v19078_v13 = vld [vmem:[#allocation123_spill] sm:$0xff]  ;;  %v15953_v18 = vadd.f32 %v15575_v8, %v19082_v41 }
 0x2af   :  { %19075 = vst [vmem:[#allocation156_spill] sm:$0xff] %v15927_v46  ;;  %v15940_v14 = vmul.f32 %v15831_v1, %v2954_v42  ;;  %v1501_v34 = vadd.f32 %v15575_v8, %v19078_v13  ;;  %19079 = vst [vmem:[#allocation157_spill] sm:$0xff] %v15945_v6  ;;  %v15949_v51 = vpop.f32.mrf.mxu0  ;;  %v2553_v24 = vmul.f32 0.2, %v1509_v56  ;;  %vm2292_vm5 = vcmp.gt.f32.partialorder %v1488_v37, 0.0  ;;  %v19086_v41 = vld [vmem:[#allocation127_spill] sm:$0xff] }
 0x2b0   :  { %v2952_v4 = vsel %vm2440_vm2, %v2080_v63, %v2696_v33  ;;  %19081 = vst [vmem:[#allocation116_spill] sm:$0xff] %v15949_v51  ;;  %v2603_v57 = vmul.f32 0.2, %v1709_v62  ;;  %v15959_v38 = vmul.f32 %v15688_v40, %v2951_v28  ;;  %vm2347_vm6 = vcmp.gt.f32.partialorder %v1709_v62, 0.0 }
 0x2b1   :  { %19077 = vst [vmem:[#allocation114_spill] sm:$0xff] %v15940_v14  ;;  %v15947_v60 = vpop.permute.xlu0 %4210  ;;  %v15956_v1 = vmul.f32 %v15558_v3, %v2952_v4  ;;  %v15961_v48 = vpop.f32.mrf.mxu0  ;;  %v4538_v42 = vmul.f32 %v15708_v36, %v15247_v19  ;;  %v4537_v33 = vmul.f32 %v15813_v0, %v15210_v49  ;;  %v2551_v4 = vmul.f32 0.2, %v1501_v34 }
 0x2b2   :  { %19080 = vst [vmem:[#allocation160_spill] sm:$0xff] %v15947_v60  ;;  %19084 = vst [vmem:[#allocation61_spill] sm:$0xff] %v15959_v38  ;;  %v11759_v39 = vpop.permute.xlu1 %11758  ;;  %v15971_v40 = vadd.f32 %v15575_v8, %v19086_v41  ;;  %vm2297_vm7 = vcmp.gt.f32.partialorder %v1509_v56, 0.0  ;;  %v2806_v19 = vsel %vm2294_vm3, %v15726_v47, %v2550_v27  ;;  %vm2295_vm8 = vcmp.gt.f32.partialorder %v1501_v34, 0.0  ;;  %v19090_v27 = vld [vmem:[#allocation83_spill] sm:$0xff] }
 0x2b3   :  { %19083 = vst [vmem:[#allocation60_spill] sm:$0xff] %v15956_v1  ;;  %19085 = vst [vmem:[#allocation161_spill] sm:$0xff] %v15961_v48  ;;  %v11761_v13 = vunpack.i.h.bf16 %v11759_v39  ;;  %v11760_v3 = vunpack.i.l.bf16 %v11759_v39  ;;  %v15975_v43 = vpop.f32.mrf.mxu0  ;;  %v15985_v0 = vsel %vm2292_vm5, %v1488_v37, %v2548_v16  ;;  %v19088_v39 = vld [vmem:[#allocation6_spill] sm:$0xff]  ;;  %v1973_v6 = vadd.f32 %v15575_v8, %v15582_v17  ;;  %v19093_v17 = vld [vmem:[#allocation5_spill] sm:$0xff] }
 0x2b4   :  { %19087 = vst [vmem:[#allocation43_spill] sm:$0xff] %v15975_v43  ;;  %v1717_v41 = vadd.f32 %v15575_v8, %v19088_v39  ;;  %v2859_v63 = vsel %vm2347_vm6, %v1709_v62, %v2603_v57  ;;  %v15995_v47 = vmul.f32 0.2, %v15953_v18  ;;  %v16000_v37 = vsel %vm2297_vm7, %v1509_v56, %v2553_v24  ;;  %v19094_v57 = vld [vmem:[#allocation63_spill] sm:$0xff]  ;;  %v19098_v24 = vld [vmem:[#allocation134_spill] sm:$0xff] }
 0x2b5   :  { %v15973_v28 = vpop.permute.xlu0 %3890  ;;  %v4859_v49 = vsel %vm4843_vm4, %v4538_v42, %v11761_v13  ;;  %v4858_v36 = vsel %vm4843_vm4, %v4537_v33, %v11760_v3  ;;  %v15992_v38 = vpop.f32.mrf.mxu0  ;;  %v1720_v42 = vadd.f32 %v15575_v8, %v19090_v27  ;;  %19091 = vst [vmem:[#allocation163_spill] sm:$0xff] %v16000_v37  ;;  %v16005_v33 = vmul.f32 0.2, %v15971_v40  ;;  %v19100_v1 = vld [vmem:[#allocation50_spill] sm:$0xff]  ;;  %v19103_v43 = vld [vmem:[#allocation151_spill] sm:$0xff] }
 0x2b6   :  { %v3886_v14 = vpop.permute.xlu1 %3885  ;;  %19089 = vst [vmem:[#allocation44_spill] sm:$0xff] %v15992_v38  ;;  %v1712_v62 = vadd.f32 %v15575_v8, %v19093_v17  ;;  %v1733_v13 = vadd.f32 %v15575_v8, %v19094_v57  ;;  %v16012_v3 = vsel %vm2295_vm8, %v1501_v34, %v2551_v4  ;;  %v4589_v56 = vmul.f32 %v19098_v24, %v15492_v32  ;;  %v19101_v38 = vld [vmem:[#allocation49_spill] sm:$0xff]  ;;  %v19102_v34 = vld [vmem:[#allocation146_spill] sm:$0xff] }
 0x2b7   :  { %v16002_v16 = vmul.f32 %v3886_v14, %v2859_v63  ;;  %19092 = vst [vmem:[#allocation164_spill] sm:$0xff] %v16005_v33  ;;  %19095 = vst [vmem:[#allocation167_spill] sm:$0xff] %v16012_v3  ;;  %v16016_v27 = vpop.f32.mrf.mxu0  ;;  %v19099_v14 = vld [vmem:[#allocation135_spill] sm:$0xff]  ;;  %v1725_v17 = vadd.f32 %v15575_v8, %v19100_v1  ;;  %v1728_v57 = vadd.f32 %v15575_v8, %v19101_v38  ;;  %v2605_v51 = vmul.f32 0.2, %v1717_v41 }
 0x2b8   :  { %19097 = vst [vmem:[#allocation84_spill] sm:$0xff] %v16016_v27  ;;  %v16022_v63 = vmul.f32 %v19099_v14, %v15531_v5  ;;  %v16030_v4 = vmul.f32 %v19102_v34, %v15720_v22  ;;  %v16034_v27 = vmul.f32 %v19103_v43, %v15555_v54  ;;  %v2669_v32 = vmul.f32 0.2, %v1973_v6 }
 0x2b9   :  { %v16014_v39 = vpop.permute.xlu0 %4220  ;;  %v16036_v48 = vpop.f32.mrf.mxu0  ;;  %v2606_v5 = vmul.f32 0.2, %v1720_v42  ;;  %vm2350_vm9 = vcmp.gt.f32.partialorder %v1720_v42, 0.0  ;;  %vm2413_vm10 = vcmp.gt.f32.partialorder %v1973_v6, 0.0  ;;  %vm2349_vm11 = vcmp.gt.f32.partialorder %v1717_v41, 0.0 }
 0x2ba   :  { %19096 = vst [vmem:[#allocation170_spill] sm:$0xff] %v16014_v39  ;;  %v11764_v24 = vpop.permute.xlu1 %11763  ;;  %19104 = vst [vmem:[#allocation68_spill] sm:$0xff] %v16036_v48  ;;  %v2604_v1 = vmul.f32 0.2, %v1712_v62  ;;  %v2609_v14 = vmul.f32 0.2, %v1733_v13  ;;  %v2925_v43 = vsel %vm2413_vm10, %v1973_v6, %v2669_v32  ;;  %v2861_v46 = vsel %vm2349_vm11, %v1717_v41, %v2605_v51 }
 0x2bb   :  { %v11766_v38 = vunpack.i.h.bf16 %v11764_v24  ;;  %v11765_v53 = vunpack.i.l.bf16 %v11764_v24  ;;  %v16040_v22 = vpop.f32.mrf.mxu0  ;;  %v2607_v34 = vmul.f32 0.2, %v1725_v17  ;;  %v2608_v54 = vmul.f32 0.2, %v1728_v57  ;;  %v19110_v39 = vld [vmem:[#allocation172_spill] sm:$0xff] }
 0x2bc   :  { %19105 = vst [vmem:[#allocation85_spill] sm:$0xff] %v16040_v22  ;;  %vm2348_vm12 = vcmp.gt.f32.partialorder %v1712_v62, 0.0  ;;  %vm2353_vm13 = vcmp.gt.f32.partialorder %v1733_v13, 0.0  ;;  %vm2352_vm14 = vcmp.gt.f32.partialorder %v1728_v57, 0.0  ;;  %vm2351_vm15 = vcmp.gt.f32.partialorder %v1725_v17, 0.0  ;;  %v19116_v41 = vld [vmem:[#allocation16_spill] sm:$0xff] }
 0x2bd   :  { %v16038_v59 = vpop.permute.xlu0 %3900  ;;  %v16042_v29 = vpop.f32.mrf.mxu0  ;;  %v16045_v48 = vsel %vm5484_vm0, %v4858_v36, %v11765_v53  ;;  %v4594_v24 = vmul.f32 %v19108_v58, %v15622_v21  ;;  %v16050_v60 = vsel %vm2350_vm9, %v1720_v42, %v2606_v5  ;;  %v11635_v6 = vunpack.i.l.bf16 %v19110_v39  ;;  %v19114_v21 = vld [vmem:[#allocation4_spill] sm:$0xff]  ;;  %v19115_v36 = vld [vmem:[#allocation89_spill] sm:$0xff] }
 0x2be   :  { %v4216_v44 = vpop.permute.xlu1 %4215  ;;  %19106 = vst [vmem:[#allocation69_spill] sm:$0xff] %v16042_v29  ;;  %19107 = vst [vmem:[#allocation32_spill] sm:$0xff] %v16045_v48  ;;  %v2860_v32 = vsel %vm2348_vm12, %v1712_v62, %v2604_v1  ;;  %v16060_v12 = vsel %vm2353_vm13, %v1733_v13, %v2609_v14  ;;  %v16063_v53 = vsel %vm5484_vm0, %v4859_v49, %v11766_v38  ;;  %v19117_v5 = vld [vmem:[#allocation40_spill] sm:$0xff]  ;;  %v19118_v1 = vld [vmem:[#allocation42_spill] sm:$0xff] }
 0x2bf   :  { %v16052_v22 = vmul.f32 %v4216_v44, %v2925_v43  ;;  %v16058_v29 = vpop.f32.mrf.mxu0  ;;  %19113 = vst [vmem:[#allocation100_spill] sm:$0xff] %v16063_v53  ;;  %v4593_v58 = vmul.f32 %v19114_v21, %v15539_v11  ;;  %v16068_v44 = vmul.f32 %v19115_v36, %v2806_v19  ;;  %v16070_v42 = vsel %vm2352_vm14, %v1728_v57, %v2608_v54  ;;  %v19120_v43 = vld [vmem:[#allocation39_spill] sm:$0xff] }
 0x2c0   :  { %19112 = vst [vmem:[#allocation106_spill] sm:$0xff] %v16058_v29  ;;  %v16072_v51 = vsel %vm2351_vm15, %v1725_v17, %v2607_v34  ;;  %v1805_v62 = vadd.f32 %v15575_v8, %v19116_v41  ;;  %v1845_v13 = vadd.f32 %v15575_v8, %v19117_v5  ;;  %v1837_v49 = vadd.f32 %v15575_v8, %v19118_v1  ;;  %v19122_v11 = vld [vmem:[#allocation47_spill] sm:$0xff] }
 0x2c1   :  { %19109 = vst [vmem:[#allocation105_spill] sm:$0xff] %v16052_v22  ;;  %v16056_v3 = vpop.permute.xlu0 %4230  ;;  %v16080_v38 = vpop.f32.mrf.mxu0  ;;  %v1981_v19 = vadd.f32 %v15575_v8, %v15654_v20  ;;  %v4652_v17 = vmul.f32 %v15973_v28, %v2860_v32  ;;  %v11636_v54 = vunpack.i.h.bf16 %v19110_v39  ;;  %v11641_v21 = vunpack.i.h.bf16 %v19120_v43  ;;  %v19125_v32 = vld [vmem:[#allocation55_spill] sm:$0xff] }
 0x2c2   :  { %19111 = vst [vmem:[#allocation99_spill] sm:$0xff] %v16056_v3  ;;  %v11769_v14 = vpop.permute.xlu1 %11768  ;;  %19119 = vst [vmem:[#allocation140_spill] sm:$0xff] %v16080_v38  ;;  %v11640_v36 = vunpack.i.l.bf16 %v19120_v43  ;;  %v16095_v1 = vsel %vm4843_vm4, %v4589_v56, %v11635_v6  ;;  %v11646_v29 = vunpack.i.h.bf16 %v19122_v11  ;;  %v11645_v20 = vunpack.i.l.bf16 %v19122_v11  ;;  %v19127_v6 = vld [vmem:[#allocation45_spill] sm:$0xff] }
 0x2c3   :  { %v11771_v57 = vunpack.i.h.bf16 %v11769_v14  ;;  %v11770_v34 = vunpack.i.l.bf16 %v11769_v14  ;;  %v16092_v5 = vpop.f32.mrf.mxu0  ;;  %v11651_v14 = vunpack.i.h.bf16 %v19125_v32  ;;  %vm2371_vm1 = vcmp.gt.f32.partialorder %v1805_v62, 0.0 }
 0x2c4   :  { %19121 = vst [vmem:[#allocation137_spill] sm:$0xff] %v16092_v5  ;;  %v2627_v43 = vmul.f32 0.2, %v1805_v62  ;;  %v2637_v38 = vmul.f32 0.2, %v1845_v13  ;;  %v1848_v53 = vadd.f32 %v15575_v8, %v19127_v6  ;;  %vm2381_vm2 = vcmp.gt.f32.partialorder %v1845_v13, 0.0 }
 0x2c5   :  { %v16090_v41 = vpop.permute.xlu0 %3910  ;;  %v16100_v28 = vsel %vm4843_vm4, %v4652_v17, %v11771_v57  ;;  %v16104_v39 = vsel %vm4843_vm4, %v16002_v16, %v11770_v34  ;;  %v16107_v48 = vpop.f32.mrf.mxu0  ;;  %v2635_v56 = vmul.f32 0.2, %v1837_v49  ;;  %v2671_v11 = vmul.f32 0.2, %v1981_v19 }
 0x2c6   :  { %19123 = vst [vmem:[#allocation129_spill] sm:$0xff] %v16100_v28  ;;  %19124 = vst [vmem:[#allocation70_spill] sm:$0xff] %v16104_v39  ;;  %v3896_v5 = vpop.permute.xlu1 %3895  ;;  %vm2379_vm3 = vcmp.gt.f32.partialorder %v1837_v49, 0.0  ;;  %vm2415_vm5 = vcmp.gt.f32.partialorder %v1981_v19, 0.0  ;;  %v5007_v57 = vsel %vm4843_vm4, %v16022_v63, %v11636_v54  ;;  %v11650_v34 = vunpack.i.l.bf16 %v19125_v32  ;;  %v19130_v28 = vld [vmem:[#allocation169_spill] sm:$0xff] }
 0x2c7   :  { %19126 = vst [vmem:[#allocation31_spill] sm:$0xff] %v16107_v48  ;;  %v4653_v3 = vmul.f32 %v3896_v5, %v2861_v46  ;;  %v16113_v16 = vpop.f32.mrf.mxu0  ;;  %v16120_v48 = vadd.f32 %v15575_v8, %v19130_v28  ;;  %v16124_v6 = vsel %vm4843_vm4, %v15702_v2, %v11640_v36  ;;  %v5005_v46 = vsel %vm4843_vm4, %v15630_v15, %v11641_v21 }
 0x2c8   :  { %19129 = vst [vmem:[#allocation154_spill] sm:$0xff] %v16113_v16  ;;  %v2883_v5 = vsel %vm2371_vm1, %v1805_v62, %v2627_v43  ;;  %v16133_v63 = vsel %vm4843_vm4, %v16030_v4, %v11651_v14  ;;  %v16136_v54 = vsel %vm4843_vm4, %v4593_v58, %v11645_v20  ;;  %v16139_v28 = vsel %vm4843_vm4, %v4594_v24, %v11646_v29  ;;  %v19132_v62 = vld [vmem:[#allocation48_spill] sm:$0xff]  ;;  %v19133_v43 = vld [vmem:[#allocation51_spill] sm:$0xff] }
 0x2c9   :  { %v16111_v17 = vpop.permute.xlu0 %4240  ;;  %v2893_v2 = vsel %vm2381_vm2, %v1845_v13, %v2637_v38  ;;  %v2891_v36 = vsel %vm2379_vm3, %v1837_v49, %v2635_v56  ;;  %v2638_v15 = vmul.f32 0.2, %v1848_v53  ;;  %v2927_v21 = vsel %vm2415_vm5, %v1981_v19, %v2671_v11  ;;  %v19136_v38 = vld [vmem:[#allocation87_spill] sm:$0xff] }
 0x2ca   :  { %19128 = vst [vmem:[#allocation128_spill] sm:$0xff] %v16111_v17  ;;  %v4226_v16 = vpop.permute.xlu1 %4225  ;;  %v16129_v17 = vpop.f32.mrf.mxu0  ;;  %vm2382_vm6 = vcmp.gt.f32.partialorder %v1848_v53, 0.0  ;;  %v1840_v32 = vadd.f32 %v15575_v8, %v19132_v62  ;;  %v1861_v4 = vadd.f32 %v15575_v8, %v19133_v43  ;;  %v16152_v29 = vmul.f32 0.2, %v16120_v48  ;;  %v19137_v56 = vld [vmem:[#allocation143_spill] sm:$0xff] }
 0x2cb   :  { %19131 = vst [vmem:[#allocation162_spill] sm:$0xff] %v16129_v17  ;;  %v16147_v14 = vmul.f32 %v4226_v16, %v2927_v21  ;;  %v16156_v49 = vsel %vm4843_vm4, %v16034_v27, %v11650_v34  ;;  %v16159_v19 = vmul.f32 %v19136_v38, %v2883_v5  ;;  %v16162_v11 = vmul.f32 %v19137_v56, %v2893_v2  ;;  %v19138_v16 = vld [vmem:[#allocation133_spill] sm:$0xff]  ;;  %v16175_v2 = vld [vmem:[%s18690_s2] ss:$0 sm:$0xff] }
 0x2cc   :  { %v16149_v20 = vpop.f32.mrf.mxu0  ;;  %v16165_v21 = vmul.f32 %v19138_v16, %v2891_v36  ;;  %v1989_v62 = vadd.f32 %v15575_v8, %v15640_v9  ;;  %v4654_v27 = vmul.f32 %v16038_v59, %v16050_v60  ;;  %vm2380_vm7 = vcmp.gt.f32.partialorder %v1840_v32, 0.0 }
 0x2cd   :  { %19134 = vst [vmem:[#allocation14_spill] sm:$0xff] %v16147_v14  ;;  %v11779_v58 = vpop.permute.xlu0 %11778  ;;  %19135 = vst [vmem:[#allocation81_spill] sm:$0xff] %v16149_v20  ;;  %v2636_v5 = vmul.f32 0.2, %v1840_v32  ;;  %vm2385_vm8 = vcmp.gt.f32.partialorder %v1861_v4, 0.0 }
 0x2ce   :  { %v11781_v24 = vunpack.i.h.bf16 %v11779_v58  ;;  %v11780_v13 = vunpack.i.l.bf16 %v11779_v58  ;;  %v11774_v43 = vpop.permute.xlu1 %11773  ;;  %v11447_v20 = vpop.f32.mrf.mxu0  ;;  %v2894_v58 = vsel %vm2382_vm6, %v1848_v53, %v2638_v15  ;;  %v2641_v15 = vmul.f32 0.2, %v1861_v4 }
 0x2cf   :  { %v11776_v34 = vunpack.i.h.bf16 %v11774_v43  ;;  %v11775_v17 = vunpack.i.l.bf16 %v11774_v43  ;;  %v2165_v36 = vadd.f32 %v16175_v2, %v11447_v20  ;;  %v2673_v56 = vmul.f32 0.2, %v1989_v62 }
 0x2d0   :  { %v2156_v9 = vpop.f32.mrf.mxu0  ;;  %v5567_v59 = vsel %vm5484_vm0, %v16095_v1, %v11780_v13  ;;  %v5568_v60 = vsel %vm5484_vm0, %v5007_v57, %v11781_v24  ;;  %vm2417_vm9 = vcmp.gt.f32.partialorder %v1989_v62, 0.0  ;;  %v2892_v24 = vsel %vm2380_vm7, %v1840_v32, %v2636_v5  ;;  %v19141_v13 = vld [vmem:[#allocation52_spill] sm:$0xff] }
 0x2d1   :  { %v11784_v8 = vpop.permute.xlu0 %11783  ;;  %v16179_v38 = vsel %vm4843_vm4, %v4654_v27, %v11776_v34  ;;  %v16182_v53 = vsel %vm4843_vm4, %v4653_v3, %v11775_v17  ;;  %v2717_v20 = vmul.f32 0.2, %v2165_v36  ;;  %vm2461_vm10 = vcmp.gt.f32.partialorder %v2165_v36, 0.0 }
 0x2d2   :  { %19139 = vst [vmem:[#allocation168_spill] sm:$0xff] %v16179_v38  ;;  %19140 = vst [vmem:[#allocation119_spill] sm:$0xff] %v16182_v53  ;;  %v11786_v16 = vunpack.i.h.bf16 %v11784_v8  ;;  %v3906_v43 = vpop.permute.xlu1 %3905  ;;  %v11448_v39 = vpop.f32.mrf.mxu0  ;;  %v11785_v14 = vunpack.i.l.bf16 %v11784_v8  ;;  %v2157_v3 = vadd.f32 %v16175_v2, %v2156_v9  ;;  %v5746_v57 = vpack.c.bf16 %v5568_v60, %v5567_v59  ;;  %v19142_v38 = vld [vmem:[#allocation56_spill] sm:$0xff] }
 0x2d3   :  { %v16188_v22 = vmul.f32 %v3906_v43, %v16072_v51  ;;  %v2168_v27 = vadd.f32 %v16175_v2, %v11448_v39  ;;  %v1853_v34 = vadd.f32 %v16175_v2, %v19141_v13  ;;  %v1864_v8 = vadd.f32 %v16175_v2, %v19142_v38 }
 0x2d4   :  { %v2159_v17 = vpop.f32.mrf.mxu0  ;;  %v5566_v1 = vsel %vm5484_vm0, %v5005_v46, %v11786_v16  ;;  %v2929_v39 = vsel %vm2417_vm9, %v1989_v62, %v2673_v56  ;;  %v5565_v9 = vsel %vm5484_vm0, %v16124_v6, %v11785_v14  ;;  %v2897_v59 = vsel %vm2385_vm8, %v1861_v4, %v2641_v15  ;;  %v19144_v56 = vld [vmem:[#allocation33_spill] sm:$0xff]  ;;  %v19145_v6 = vld [vmem:[#allocation132_spill] sm:$0xff] }
 0x2d5   :  { %vm2462_vm11 = vcmp.gt.f32.partialorder %v2168_v27, 0.0  ;;  %v2718_v51 = vmul.f32 0.2, %v2168_v27  ;;  %v2160_v43 = vadd.f32 %v16175_v2, %v2159_v17  ;;  %v2973_v32 = vsel %vm2461_vm10, %v2165_v36, %v2717_v20  ;;  %v19143_v17 = vld [vmem:[#allocation147_spill] sm:$0xff] }
 0x2d6   :  { %v4236_v53 = vpop.permute.xlu1 %4235  ;;  %v11451_v46 = vpop.f32.mrf.mxu0  ;;  %v5742_v60 = vpack.c.bf16 %v5566_v1, %v5565_v9  ;;  %v2715_v16 = vmul.f32 0.2, %v2157_v3  ;;  %v4686_v30 = vmul.f32 %v19143_v17, %v2894_v58  ;;  %v2639_v62 = vmul.f32 0.2, %v1853_v34  ;;  %v19148_v58 = vld [vmem:[#allocation174_spill] sm:$0xff] }
 0x2d7   :  { %v16204_v5 = vmul.f32 %v4236_v53, %v2929_v39  ;;  %v2974_v38 = vsel %vm2462_vm11, %v2168_v27, %v2718_v51  ;;  %vm2460_vm12 = vcmp.gt.f32.partialorder %v2160_v43, 0.0  ;;  %v2716_v13 = vmul.f32 0.2, %v2160_v43  ;;  %v19147_v27 = vld [vmem:[#allocation80_spill] sm:$0xff]  ;;  %v19149_v39 = vld [vmem:[#allocation34_spill] sm:$0xff] }
 0x2d8   :  { %v2172_v37 = vpop.f32.mrf.mxu0  ;;  %vm2459_vm13 = vcmp.gt.f32.partialorder %v2157_v3, 0.0  ;;  %v4766_v33 = vmul.f32 %v19144_v56, %v2974_v38  ;;  %6061 = vmatprep.mubr.bf16.mxu1 %v5742_v60  ;;  %v4684_v14 = vmul.f32 %v19145_v6, %v2892_v24  ;;  %vm2383_vm14 = vcmp.gt.f32.partialorder %v1853_v34, 0.0  ;;  %v19150_v38 = vld [vmem:[#allocation176_spill] sm:$0xff] }
 0x2d9   :  { %v2642_v4 = vmul.f32 0.2, %v1864_v8  ;;  %v2972_v36 = vsel %vm2460_vm12, %v2160_v43, %v2716_v13  ;;  %v19146_v53 = vpack.c.bf16 %v15439_v55, %v15430_v10  ;;  %v16213_v1 = vmul.f32 %v19147_v27, %v2897_v59  ;;  %v19151_v59 = vld [vmem:[#allocation24_spill] sm:$0xff] }
 0x2da   :  { %v11799_v15 = vpop.permute.xlu1 %11798  ;;  %v11452_v20 = vpop.f32.mrf.mxu0  ;;  %vm2386_vm15 = vcmp.gt.f32.partialorder %v1864_v8, 0.0  ;;  %v1856_v51 = vadd.f32 %v16175_v2, %v19148_v58  ;;  %v4765_v9 = vmul.f32 %v19149_v39, %v2973_v32  ;;  %v1877_v24 = vadd.f32 %v16175_v2, %v15167_v26 }
 0x2db   :  { %6062 = vmatmul.mubr.bf16.vlgmr.msra.gmra.mxu1 %v19146_v53  ;;  %v2971_v43 = vsel %vm2459_vm13, %v2157_v3, %v2715_v16  ;;  %v11801_v60 = vunpack.i.h.bf16 %v11799_v15  ;;  %v11800_v10 = vunpack.i.l.bf16 %v11799_v15  ;;  %v2895_v55 = vsel %vm2383_vm14, %v1853_v34, %v2639_v62  ;;  %v19152_v16 = vld [vmem:[#allocation25_spill] sm:$0xff] }
 0x2dc   :  { %6069 = vmatprep.mubr.bf16.mxu1 %v5746_v57  ;;  %v1869_v13 = vadd.f32 %v16175_v2, %v19150_v38  ;;  %v4764_v17 = vmul.f32 %v19151_v59, %v2972_v36  ;;  %v11887_v56 = vpack.i.bf16 %v4766_v33, %v4765_v9  ;;  %v2898_v6 = vsel %vm2386_vm15, %v1864_v8, %v2642_v4  ;;  %v2175_v26 = vpop.f32.mrf.mxu0 }
 0x2dd   :  { %v5247_v53 = vsel %vm4843_vm4, %v4686_v30, %v11801_v60  ;;  %v5246_v57 = vsel %vm4843_vm4, %v16162_v11, %v11800_v10  ;;  %v2184_v32 = vadd.f32 %v16175_v2, %v11452_v20  ;;  %vm2384_vm1 = vcmp.gt.f32.partialorder %v1856_v51, 0.0  ;;  %v19155_v10 = vld [vmem:[#allocation180_spill] sm:$0xff] }
 0x2de   :  { %v11804_v27 = vpop.permute.xlu1 %11803  ;;  %v2640_v3 = vmul.f32 0.2, %v1856_v51  ;;  %v4763_v34 = vmul.f32 %v19152_v16, %v2971_v43  ;;  %v11877_v62 = vpack.i.bf16 %v5247_v53, %v5246_v57  ;;  %11888 = vrot.lane.b32.xlu0 %v11887_v56, %s12803_s27  ;;  %vm2389_vm2 = vcmp.gt.f32.partialorder %v1877_v24, 0.0  ;;  %v16236_v9 = vpop.f32.mrf.mxu0  ;;  %v19156_v57 = vld [vmem:[#allocation165_spill] sm:$0xff] }
 0x2df   :  { %v2181_v33 = vadd.f32 %v16175_v2, %v11451_v46  ;;  %v11806_v8 = vunpack.i.h.bf16 %v11804_v27  ;;  %v11805_v4 = vunpack.i.l.bf16 %v11804_v27  ;;  %v2645_v30 = vmul.f32 0.2, %v1877_v24  ;;  %v19153_v46 = vld [vmem:[#allocation28_spill] sm:$0xff]  ;;  %v19157_v16 = vld [vmem:[#allocation177_spill] sm:$0xff] }
 0x2e0   :  { %vm2387_vm3 = vcmp.gt.f32.partialorder %v1869_v13, 0.0  ;;  %v2643_v36 = vmul.f32 0.2, %v1869_v13  ;;  %11878 = vrot.lane.b32.xlu1 %v11877_v62, %s12804_s21  ;;  %v11892_v11 = vpack.i.bf16 %v4764_v17, %v4763_v34  ;;  %v2722_v15 = vmul.f32 0.2, %v2184_v32 }
 0x2e1   :  { %v2176_v20 = vadd.f32 %v16175_v2, %v2175_v26  ;;  %v5245_v58 = vsel %vm4843_vm4, %v4684_v14, %v11806_v8  ;;  %v5244_v39 = vsel %vm4843_vm4, %v16165_v21, %v11805_v4  ;;  %v19154_v43 = vpack.c.bf16 %v15381_v35, %v19153_v46  ;;  %v3122_v35 = vld [vmem:[%s18629_s20 + $0x438] sm:$0xff] }
 0x2e2   :  { %v11809_v60 = vpop.permute.xlu1 %11808  ;;  %v1872_v38 = vadd.f32 %v16175_v2, %v19155_v10  ;;  %v4656_v59 = vmul.f32 %v16090_v41, %v16070_v42  ;;  %vm2466_vm5 = vcmp.gt.f32.partialorder %v2184_v32, 0.0  ;;  %v11882_v17 = vpack.i.bf16 %v5245_v58, %v5244_v39  ;;  %11893 = vrot.lane.b32.xlu0 %v11892_v11, %s12803_s27  ;;  %v19158_v4 = vld [vmem:[#allocation15_spill] sm:$0xff]  ;;  %v19159_v46 = vld [vmem:[#allocation62_spill] sm:$0xff] }
 0x2e3   :  { %6070 = vmatmul.mubr.bf16.gmra.mxu1 %v19154_v43  ;;  %v2721_v14 = vmul.f32 0.2, %v2181_v33  ;;  %v2173_v21 = vadd.f32 %v16175_v2, %v2172_v37  ;;  %v11811_v56 = vunpack.i.h.bf16 %v11809_v60  ;;  %v11810_v53 = vunpack.i.l.bf16 %v11809_v60  ;;  %v2188_v37 = vpop.f32.mrf.mxu0  ;;  %v19161_v10 = vld [vmem:[#allocation175_spill] sm:$0xff] }
 0x2e4   :  { %v16251_v26 = vmul.f32 %v19156_v57, %v2895_v55  ;;  %v2896_v27 = vsel %vm2384_vm1, %v1856_v51, %v2640_v3  ;;  %v1880_v42 = vadd.f32 %v16175_v2, %v19157_v16  ;;  %vm2465_vm6 = vcmp.gt.f32.partialorder %v2181_v33, 0.0  ;;  %11883 = vrot.lane.b32.xlu1 %v11882_v17, %s12804_s21 }
 0x2e5   :  { %v2978_v41 = vsel %vm2466_vm5, %v2184_v32, %v2722_v15  ;;  %v2720_v34 = vmul.f32 0.2, %v2176_v20  ;;  %v16258_v62 = vsel %vm4843_vm4, %v4656_v59, %v11811_v56  ;;  %v16262_v8 = vsel %vm4843_vm4, %v16188_v22, %v11810_v53  ;;  %v19160_v22 = vld [vmem:[#allocation64_spill] sm:$0xff] }
 0x2e6   :  { %v3916_v55 = vpop.permute.xlu1 %3915  ;;  %v4690_v11 = vmul.f32 %v19158_v4, %v2898_v6  ;;  %v2901_v51 = vsel %vm2389_vm2, %v1877_v24, %v2645_v30  ;;  %v2899_v3 = vsel %vm2387_vm3, %v1869_v13, %v2643_v36  ;;  %vm2464_vm7 = vcmp.gt.f32.partialorder %v2176_v20, 0.0  ;;  %3920 = vperm.xlu0 %11565, %v3122_v35   ;;  %v19162_v24 = vld [vmem:[#allocation117_spill] sm:$0xff]  ;;  %v11456_v36 = vpop.f32.mrf.mxu0 }
 0x2e7   :  { %v2644_v58 = vmul.f32 0.2, %v1872_v38  ;;  %v2977_v32 = vsel %vm2465_vm6, %v2181_v33, %v2721_v14  ;;  %v2719_v15 = vmul.f32 0.2, %v2173_v21  ;;  %v16268_v39 = vmul.f32 %v3916_v55, %v16060_v12  ;;  %v19163_v33 = vld [vmem:[#allocation91_spill] sm:$0xff]  ;;  %v19164_v12 = vld [vmem:[#allocation65_spill] sm:$0xff] }
 0x2e8   :  { %v4688_v43 = vmul.f32 %v19159_v46, %v2896_v27  ;;  %vm2388_vm8 = vcmp.gt.f32.partialorder %v1872_v38, 0.0  ;;  %vm2463_vm9 = vcmp.gt.f32.partialorder %v2173_v21, 0.0  ;;  %v4770_v60 = vmul.f32 %v19160_v22, %v2978_v41  ;;  %v19166_v27 = vld [vmem:[#allocation181_spill] sm:$0xff] }
 0x2e9   :  { %v4693_v6 = vmul.f32 %v19161_v10, %v2901_v51  ;;  %v2646_v59 = vmul.f32 0.2, %v1880_v42  ;;  %v1893_v13 = vadd.f32 %v16175_v2, %v19162_v24  ;;  %v2976_v30 = vsel %vm2464_vm7, %v2176_v20, %v2720_v34  ;;  %v19167_v34 = vld [vmem:[#allocation53_spill] sm:$0xff] }
 0x2ea   :  { %v11824_v17 = vpop.permute.xlu1 %11823  ;;  %v16276_v14 = vmul.f32 %v19163_v33, %v2899_v3  ;;  %vm2390_vm10 = vcmp.gt.f32.partialorder %v1880_v42, 0.0  ;;  %v4769_v56 = vmul.f32 %v19164_v12, %v2977_v32  ;;  %v19165_v53 = vpack.i.bf16 %v15844_v50, %v15841_v25  ;;  %v2191_v25 = vpop.f32.mrf.mxu0 }
 0x2eb   :  { %v11826_v35 = vunpack.i.h.bf16 %v11824_v17  ;;  %v2900_v57 = vsel %vm2388_vm8, %v1872_v38, %v2644_v58  ;;  %v1885_v16 = vadd.f32 %v16175_v2, %v19166_v27  ;;  %v2975_v41 = vsel %vm2463_vm9, %v2173_v21, %v2719_v15  ;;  %v19168_v58 = vld [vmem:[#allocation54_spill] sm:$0xff] }
 0x2ec   :  { %11903 = vrot.lane.b32.xlu0 %v19165_v53, %s12803_s27  ;;  %v11825_v20 = vunpack.i.l.bf16 %v11824_v17  ;;  %v4768_v55 = vmul.f32 %v19167_v34, %v2976_v30  ;;  %v2200_v4 = vadd.f32 %v16175_v2, %v11456_v36  ;;  %v11907_v3 = vpack.i.bf16 %v4770_v60, %v4769_v56  ;;  %v19169_v60 = vld [vmem:[#allocation41_spill] sm:$0xff]  ;;  %v16309_v27 = vpop.f32.mrf.mxu0 }
 0x2ed   :  { %v16288_v51 = vsel %vm4843_vm4, %v4690_v11, %v11826_v35  ;;  %v2649_v32 = vmul.f32 0.2, %v1893_v13  ;;  %v2902_v46 = vsel %vm2390_vm10, %v1880_v42, %v2646_v59  ;;  %vm2393_vm11 = vcmp.gt.f32.partialorder %v1893_v13, 0.0  ;;  %v19170_v59 = vld [vmem:[#allocation182_spill] sm:$0xff] }
 0x2ee   :  { %v16292_v50 = vsel %vm4843_vm4, %v16213_v1, %v11825_v20  ;;  %v11829_v38 = vpop.permute.xlu1 %11828  ;;  %v4767_v21 = vmul.f32 %v19168_v58, %v2975_v41  ;;  %v2197_v15 = vadd.f32 %v16175_v2, %v16236_v9  ;;  %v4692_v42 = vmul.f32 %v19169_v60, %v2900_v57  ;;  %v19171_v9 = vld [vmem:[#allocation159_spill] sm:$0xff]  ;;  %v16330_v60 = vpop.f32.mrf.mxu0 }
 0x2ef   :  { %v11922_v22 = vpack.i.bf16 %v16288_v51, %v16292_v50  ;;  %v11831_v11 = vunpack.i.h.bf16 %v11829_v38  ;;  %v2647_v10 = vmul.f32 0.2, %v1885_v16  ;;  %v1896_v24 = vadd.f32 %v16175_v2, %v19170_v59  ;;  %v19187_v50 = vld [vmem:[#allocation20_spill] sm:$0xff] }
 0x2f0   :  { %11908 = vrot.lane.b32.xlu0 %v11907_v3, %s12803_s27  ;;  %v11830_v1 = vunpack.i.l.bf16 %v11829_v38  ;;  %v2726_v30 = vmul.f32 0.2, %v2200_v4  ;;  %v2192_v36 = vadd.f32 %v16175_v2, %v2191_v25  ;;  %v11912_v33 = vpack.i.bf16 %v4768_v55, %v4767_v21  ;;  %v19172_v3 = vld [vmem:[#allocation138_spill] sm:$0xff] }
 0x2f1   :  { %v5249_v17 = vsel %vm4843_vm4, %v4688_v43, %v11831_v11  ;;  %v4694_v12 = vmul.f32 %v19171_v9, %v2902_v46  ;;  %v2189_v56 = vadd.f32 %v16175_v2, %v2188_v37  ;;  %vm2470_vm12 = vcmp.gt.f32.partialorder %v2200_v4, 0.0  ;;  %v3124_v9 = vld [vmem:[%s18629_s20 + $0x448] sm:$0xff] }
 0x2f2   :  { %v5248_v53 = vsel %vm4843_vm4, %v16251_v26, %v11830_v1  ;;  %v11844_v35 = vpop.permute.xlu1 %11843  ;;  %v2725_v57 = vmul.f32 0.2, %v2197_v15  ;;  %v1888_v43 = vadd.f32 %v16175_v2, %v19172_v3  ;;  %vm2391_vm13 = vcmp.gt.f32.partialorder %v1885_v16, 0.0  ;;  %v3188_v26 = vld [vmem:[%s18629_s20 + $0x648] sm:$0xff] }
 0x2f3   :  { %v11897_v41 = vpack.i.bf16 %v5249_v17, %v5248_v53  ;;  %v11846_v20 = vunpack.i.h.bf16 %v11844_v35  ;;  %v11845_v34 = vunpack.i.l.bf16 %v11844_v35  ;;  %v2905_v55 = vsel %vm2393_vm11, %v1893_v13, %v2649_v32  ;;  %v19173_v17 = vld [vmem:[#allocation95_spill] sm:$0xff]  ;;  %v19174_v35 = vld [vmem:[#allocation96_spill] sm:$0xff] }
 0x2f4   :  { %11913 = vrot.lane.b32.xlu0 %v11912_v33, %s12803_s27  ;;  %vm2469_vm14 = vcmp.gt.f32.partialorder %v2197_v15, 0.0  ;;  %v2982_v37 = vsel %vm2470_vm12, %v2200_v4, %v2726_v30  ;;  %v2724_v46 = vmul.f32 0.2, %v2192_v36  ;;  %v2650_v58 = vmul.f32 0.2, %v1896_v24  ;;  %v3187_v4 = vld [vmem:[%s18629_s20 + $0x640] sm:$0xff] }
 0x2f5   :  { %v16319_v25 = vsel %vm4843_vm4, %v4694_v12, %v11846_v20  ;;  %v16322_v38 = vsel %vm4843_vm4, %v4693_v6, %v11845_v34  ;;  %11898 = vrot.lane.b32.xlu1 %v11897_v41, %s12804_s21  ;;  %vm2394_vm15 = vcmp.gt.f32.partialorder %v1896_v24, 0.0  ;;  %vm2468_vm1 = vcmp.gt.f32.partialorder %v2192_v36, 0.0 }
 0x2f6   :  { %v11992_v13 = vpack.i.bf16 %v16319_v25, %v16322_v38  ;;  %v11849_v32 = vpop.permute.xlu1 %11848  ;;  %v2981_v21 = vsel %vm2469_vm14, %v2197_v15, %v2725_v57  ;;  %v2723_v11 = vmul.f32 0.2, %v2189_v56  ;;  %vm2372_vm2 = vcmp.gt.f32.partialorder %v16120_v48, 0.0  ;;  %v3129_v38 = vld [vmem:[%s18629_s20 + $0x470] sm:$0xff] }
 0x2f7   :  { %v11851_v6 = vunpack.i.h.bf16 %v11849_v32  ;;  %v11850_v59 = vunpack.i.l.bf16 %v11849_v32  ;;  %v2648_v1 = vmul.f32 0.2, %v1888_v43  ;;  %v2903_v30 = vsel %vm2391_vm13, %v1885_v16, %v2647_v10 }
 0x2f8   :  { %4250 = vperm.xlu0 %11565, %v3188_v26   ;;  %vm2467_vm3 = vcmp.gt.f32.partialorder %v2189_v56, 0.0  ;;  %v4774_v33 = vmul.f32 %v19173_v17, %v2982_v37  ;;  %vm2392_vm5 = vcmp.gt.f32.partialorder %v1888_v43, 0.0  ;;  %v2980_v15 = vsel %vm2468_vm1, %v2192_v36, %v2724_v46 }
 0x2f9   :  { %v16340_v12 = vsel %vm4843_vm4, %v4692_v42, %v11851_v6  ;;  %v16344_v53 = vsel %vm4843_vm4, %v16276_v14, %v11850_v59  ;;  %4245 = vperm.xlu1 %11566, %v3187_v4   ;;  %v4697_v16 = vmul.f32 %v15890_v61, %v2905_v55  ;;  %v2906_v10 = vsel %vm2394_vm15, %v1896_v24, %v2650_v58  ;;  %v11460_v42 = vpop.f32.mrf.mxu0  ;;  %v19175_v14 = vld [vmem:[#allocation109_spill] sm:$0xff]  ;;  %v19176_v61 = vld [vmem:[#allocation74_spill] sm:$0xff] }
 0x2fa   :  { %v4773_v57 = vmul.f32 %v19174_v35, %v2981_v21  ;;  %v11957_v41 = vpack.i.bf16 %v16340_v12, %v16344_v53  ;;  %v11854_v20 = vpop.permute.xlu1 %11853  ;;  %v4698_v36 = vmul.f32 %v15901_v52, %v2906_v10  ;;  %v2979_v34 = vsel %vm2467_vm3, %v2189_v56, %v2723_v11  ;;  %v19177_v52 = vld [vmem:[#allocation17_spill] sm:$0xff]  ;;  %v19178_v56 = vld [vmem:[#allocation18_spill] sm:$0xff] }
 0x2fb   :  { %v11856_v3 = vunpack.i.h.bf16 %v11854_v20  ;;  %v11855_v26 = vunpack.i.l.bf16 %v11854_v20  ;;  %v4695_v37 = vmul.f32 %v19175_v14, %v2903_v30  ;;  %v2904_v46 = vsel %vm2392_vm5, %v1888_v43, %v2648_v1  ;;  %v19180_v43 = vld [vmem:[#allocation149_spill] sm:$0xff]  ;;  %v19181_v1 = vld [vmem:[#allocation75_spill] sm:$0xff] }
 0x2fc   :  { %3930 = vperm.xlu0 %11565, %v3124_v9   ;;  %v4772_v55 = vmul.f32 %v19176_v61, %v2980_v15  ;;  %v11927_v58 = vpack.i.bf16 %v4774_v33, %v4773_v57  ;;  %v19179_v21 = vpack.i.bf16 %v19177_v52, %v19178_v56  ;;  %vm2298_vm6 = vcmp.gt.f32.partialorder %v15953_v18, 0.0  ;;  %v3123_v15 = vld [vmem:[%s18629_s20 + $0x440] sm:$0xff] }
 0x2fd   :  { %v11789_v24 = vpop.permute.xlu0 %11788  ;;  %v16356_v32 = vsel %vm4843_vm4, %v4698_v36, %v11856_v3  ;;  %v16359_v4 = vsel %vm4843_vm4, %v4697_v16, %v11855_v26  ;;  %v4696_v59 = vmul.f32 %v19180_v43, %v2904_v46  ;;  %v4771_v30 = vmul.f32 %v19181_v1, %v2979_v34  ;;  %v2207_v16 = vpop.f32.mrf.mxu0  ;;  %v19182_v36 = vld [vmem:[#allocation155_spill] sm:$0xff] }
 0x2fe   :  { %11918 = vrot.lane.b32.xlu1 %v19179_v21, %s12803_s27  ;;  %v11791_v11 = vunpack.i.h.bf16 %v11789_v24  ;;  %v11790_v6 = vunpack.i.l.bf16 %v11789_v24  ;;  %v2216_v17 = vadd.f32 %v16175_v2, %v11460_v42  ;;  %v12042_v33 = vpack.i.bf16 %v16356_v32, %v16359_v4  ;;  %v11859_v9 = vpop.permute.xlu1 %11858  ;;  %v19184_v1 = vld [vmem:[#allocation35_spill] sm:$0xff] }
 0x2ff   :  { %vm2296_vm7 = vcmp.gt.f32.partialorder %v15971_v40, 0.0  ;;  %v11861_v10 = vunpack.i.h.bf16 %v11859_v9  ;;  %v11860_v35 = vunpack.i.l.bf16 %v11859_v9  ;;  %v11681_v34 = vunpack.i.h.bf16 %v19182_v36  ;;  %v12287_v32 = vld [vmem:[%s18569_s4 + $0xd8] sm:$0xff]  }
 0x300   :  { %11928 = vrot.lane.b32.xlu0 %v11927_v58, %s12803_s27  ;;  %v5571_v57 = vsel %vm5484_vm0, %v16136_v54, %v11790_v6  ;;  %v5572_v20 = vsel %vm5484_vm0, %v16139_v28, %v11791_v11  ;;  %v2213_v42 = vadd.f32 %v16175_v2, %v16309_v27  ;;  %v11932_v26 = vpack.i.bf16 %v4772_v55, %v4771_v30  ;;  %v19183_v58 = vld [vmem:[#allocation46_spill] sm:$0xff] }
 0x301   :  { %v11794_v3 = vpop.permute.xlu0 %11793  ;;  %v5754_v14 = vpack.c.bf16 %v5572_v20, %v5571_v57  ;;  %v16384_v46 = vsel %vm4843_vm4, %v4696_v59, %v11861_v10  ;;  %v16387_v61 = vsel %vm4843_vm4, %v4695_v37, %v11860_v35  ;;  %v4597_v28 = vmul.f32 %v19183_v58, %v15922_v31  ;;  %v12288_v4 = vld [vmem:[%s18569_s4 + $0x98] sm:$0xff]  }
 0x302   :  { %3925 = vperm.xlu1 %11566, %v3123_v15   ;;  %v11796_v24 = vunpack.i.h.bf16 %v11794_v3  ;;  %v11795_v54 = vunpack.i.l.bf16 %v11794_v3  ;;  %v2730_v52 = vmul.f32 0.2, %v2216_v17  ;;  %v2208_v56 = vadd.f32 %v16175_v2, %v2207_v16  ;;  %v19185_v16 = vld [vmem:[#allocation179_spill] sm:$0xff] }
 0x303   :  { %v12017_v27 = vpack.i.bf16 %v16384_v46, %v16387_v61  ;;  %v2884_v55 = vsel %vm2372_vm2, %v16120_v48, %v16152_v29  ;;  %vm2474_vm8 = vcmp.gt.f32.partialorder %v2216_v17, 0.0  ;;  %v11680_v21 = vunpack.i.l.bf16 %v19182_v36  ;;  %v12283_v46 = vld [vmem:[%s18569_s4 + $0xe8] sm:$0xff]  }
 0x304   :  { %11933 = vrot.lane.b32.xlu0 %v11932_v26, %s12803_s27  ;;  %v5569_v37 = vsel %vm5484_vm0, %v16156_v49, %v11795_v54  ;;  %v5570_v31 = vsel %vm5484_vm0, %v16133_v63, %v11796_v24  ;;  %v2729_v11 = vmul.f32 0.2, %v2213_v42  ;;  %v2205_v6 = vadd.f32 %v16175_v2, %v16330_v60  ;;  %v3189_v60 = vld [vmem:[%s18629_s20 + $0x650] sm:$0xff]  ;;  %v12284_v61 = vld [vmem:[%s18569_s4 + $0xa8] sm:$0xff]  }
 0x305   :  { %v11814_v43 = vpop.permute.xlu0 %11813  ;;  %v5750_v59 = vpack.c.bf16 %v5570_v31, %v5569_v37  ;;  %v4676_v30 = vmul.f32 %v19184_v1, %v2884_v55  ;;  %vm2473_vm9 = vcmp.gt.f32.partialorder %v2213_v42, 0.0  ;;  %v5014_v63 = vsel %vm4843_vm4, %v4597_v28, %v11680_v21  ;;  %v19191_v24 = vld [vmem:[#allocation121_spill] sm:$0xff]  ;;  %v19193_v28 = vld [vmem:[#allocation164_spill] sm:$0xff]  ;;  %v19194_v37 = vld [vmem:[#allocation122_spill] sm:$0xff] }
 0x306   :  { %11923 = vrot.lane.b32.xlu1 %v11922_v22, %s12804_s21  ;;  %v11816_v48 = vunpack.i.h.bf16 %v11814_v43  ;;  %v11815_v29 = vunpack.i.l.bf16 %v11814_v43  ;;  %v2986_v49 = vsel %vm2474_vm8, %v2216_v17, %v2730_v52  ;;  %v2728_v9 = vmul.f32 0.2, %v2208_v56  ;;  %v19188_v22 = vld [vmem:[#allocation150_spill] sm:$0xff]  ;;  %v19196_v1 = vld [vmem:[#allocation101_spill] sm:$0xff] }
 0x307   :  { %6077 = vmatprep.mubr.bf16.mxu1 %v5750_v59  ;;  %v5015_v15 = vsel %vm4843_vm4, %v16068_v44, %v11681_v34  ;;  %v11655_v10 = vunpack.i.l.bf16 %v19185_v16  ;;  %vm2472_vm10 = vcmp.gt.f32.partialorder %v2208_v56, 0.0  ;;  %v19186_v51 = vpack.i.bf16 %v15893_v7, %v15899_v23  ;;  %v3190_v7 = vld [vmem:[%s18629_s20 + $0x658] sm:$0xff]  ;;  %v19190_v34 = vld [vmem:[#allocation13_spill] sm:$0xff] }
 0x308   :  { %v19189_v17 = vpack.c.bf16 %v19187_v50, %v19188_v22  ;;  %v16426_v35 = vsel %vm5484_vm0, %v5014_v63, %v11815_v29  ;;  %v16429_v57 = vsel %vm5484_vm0, %v5015_v15, %v11816_v48  ;;  %v11656_v44 = vunpack.i.h.bf16 %v19185_v16  ;;  %v19197_v29 = vld [vmem:[#allocation108_spill] sm:$0xff]  ;;  %v19200_v15 = vld [vmem:[#allocation115_spill] sm:$0xff] }
 0x309   :  { %11938 = vrot.lane.b32.xlu0 %v19186_v51, %s12803_s27  ;;  %v2985_v20 = vsel %vm2473_vm9, %v2213_v42, %v2729_v11  ;;  %v2727_v36 = vmul.f32 0.2, %v2205_v6  ;;  %v5762_v23 = vpack.c.bf16 %v16429_v57, %v16426_v35  ;;  %v4595_v3 = vmul.f32 %v19190_v34, %v15936_v45  ;;  %v11819_v55 = vpop.permute.xlu0 %11818  ;;  %v19195_v11 = vld [vmem:[#allocation153_spill] sm:$0xff]  ;;  %v19201_v50 = vld [vmem:[#allocation144_spill] sm:$0xff] }
 0x30a   :  { %6078 = vmatmul.mubr.bf16.gmra.mxu1 %v19189_v17  ;;  %v2810_v26 = vsel %vm2298_vm6, %v15953_v18, %v15995_v47  ;;  %vm2471_vm11 = vcmp.gt.f32.partialorder %v2205_v6, 0.0  ;;  %v4778_v42 = vmul.f32 %v19191_v24, %v2986_v49  ;;  %4255 = vperm.xlu1 %11566, %v3189_v60   ;;  %v11942_v58 = vpack.i.bf16 %v4676_v30, %v16159_v19  ;;  %v19198_v49 = vld [vmem:[#allocation111_spill] sm:$0xff]  ;;  %v19202_v17 = vld [vmem:[#allocation102_spill] sm:$0xff]  ;;  %v19204_v34 = vld [vmem:[#allocation29_spill] sm:$0xff] }
 0x30b   :  { %6085 = vmatprep.mubr.bf16.mxu1 %v5754_v14  ;;  %v19192_v14 = vld [vmem:[#allocation30_spill] sm:$0xff]  ;;  %v2808_v52 = vsel %vm2296_vm7, %v15971_v40, %v19193_v28  ;;  %v2984_v45 = vsel %vm2472_vm10, %v2208_v56, %v2728_v9  ;;  %v4777_v31 = vmul.f32 %v19194_v37, %v2985_v20  ;;  %v11821_v18 = vunpack.i.h.bf16 %v11819_v55  ;;  %v19199_v60 = vld [vmem:[#allocation163_spill] sm:$0xff] }
 0x30c   :  { %v4596_v54 = vmul.f32 %v19192_v14, %v15985_v0  ;;  %v11820_v47 = vunpack.i.l.bf16 %v11819_v55  ;;  %v5012_v21 = vsel %vm4843_vm4, %v4595_v3, %v11655_v10  ;;  %v11756_v43 = vunpack.i.h.bf16 %v19195_v11  ;;  %v3125_v10 = vld [vmem:[%s18629_s20 + $0x450] sm:$0xff]  ;;  %v19208_v37 = vld [vmem:[#allocation167_spill] sm:$0xff] }
 0x30d   :  { %4260 = vperm.xlu0 %11565, %v3190_v7   ;;  %v11755_v0 = vunpack.i.l.bf16 %v19195_v11  ;;  %v2983_v19 = vsel %vm2471_vm11, %v2205_v6, %v2727_v36  ;;  %v4776_v30 = vmul.f32 %v19196_v1, %v2984_v45  ;;  %v11947_v40 = vpack.i.bf16 %v4778_v42, %v4777_v31  ;;  %v11834_v6 = vpop.permute.xlu0 %11833  ;;  %v19203_v7 = vld [vmem:[#allocation21_spill] sm:$0xff]  ;;  %v3126_v1 = vld [vmem:[%s18629_s20 + $0x458] sm:$0xff] }
 0x30e   :  { %v5013_v59 = vsel %vm4843_vm4, %v4596_v54, %v11656_v44  ;;  %11943 = vrot.lane.b32.xlu1 %v11942_v58, %s12803_s27  ;;  %v5573_v56 = vsel %vm5484_vm0, %v5012_v21, %v11820_v47  ;;  %v1976_v63 = vadd.f32 %v16175_v2, %v19197_v29  ;;  %v4602_v9 = vmul.f32 %v19198_v49, %v2810_v26  ;;  %v19206_v26 = vld [vmem:[#allocation76_spill] sm:$0xff]  ;;  %v19207_v58 = vld [vmem:[#allocation38_spill] sm:$0xff]  ;;  %v19209_v31 = vld [vmem:[#allocation37_spill] sm:$0xff] }
 0x30f   :  { %v5574_v48 = vsel %vm5484_vm0, %v5013_v59, %v11821_v18  ;;  %v4601_v16 = vmul.f32 %v19200_v15, %v19199_v60  ;;  %v4600_v22 = vmul.f32 %v19201_v50, %v2808_v52  ;;  %v4775_v44 = vmul.f32 %v19202_v17, %v2983_v19  ;;  %v19210_v21 = vld [vmem:[#allocation27_spill] sm:$0xff] }
 0x310   :  { %v5758_v51 = vpack.c.bf16 %v5574_v48, %v5573_v56  ;;  %v11836_v20 = vunpack.i.h.bf16 %v11834_v6  ;;  %v11835_v36 = vunpack.i.l.bf16 %v11834_v6  ;;  %v19205_v3 = vpack.c.bf16 %v19203_v7, %v19204_v34  ;;  %v3191_v6 = vld [vmem:[%s18629_s20 + $0x660] sm:$0xff] }
 0x311   :  { %11948 = vrot.lane.b32.xlu0 %v11947_v40, %s12803_s27  ;;  %v11711_v24 = vunpack.i.h.bf16 %v19206_v26  ;;  %v11710_v42 = vunpack.i.l.bf16 %v19206_v26  ;;  %v5018_v14 = vsel %vm4843_vm4, %v4601_v16, %v11755_v0  ;;  %v5019_v54 = vsel %vm4843_vm4, %v4602_v9, %v11756_v43  ;;  %v11839_v0 = vpop.permute.xlu0 %11838  ;;  %v19211_v9 = vld [vmem:[#allocation72_spill] sm:$0xff] }
 0x312   :  { %6086 = vmatmul.mubr.bf16.gmra.mxu1 %v19205_v3  ;;  %v1965_v28 = vadd.f32 %v16175_v2, %v19207_v58  ;;  %3935 = vperm.xlu1 %11566, %v3125_v10   ;;  %v11952_v52 = vpack.i.bf16 %v4776_v30, %v4775_v44  ;;  %v16483_v45 = vsel %vm5484_vm0, %v5018_v14, %v11835_v36  ;;  %v2670_v47 = vmul.f32 0.2, %v1976_v63  ;;  %v19216_v44 = vld [vmem:[#allocation105_spill] sm:$0xff]  ;;  %v19217_v26 = vld [vmem:[#allocation156_spill] sm:$0xff] }
 0x313   :  { %6093 = vmatprep.mubr.bf16.mxu1 %v5758_v51  ;;  %v16486_v55 = vsel %vm5484_vm0, %v5019_v54, %v11836_v20  ;;  %v4599_v18 = vmul.f32 %v19209_v31, %v19208_v37  ;;  %v1968_v11 = vadd.f32 %v16175_v2, %v19210_v21  ;;  %vm2414_vm12 = vcmp.gt.f32.partialorder %v1976_v63, 0.0  ;;  %v19212_v51 = vld [vmem:[#allocation170_spill] sm:$0xff]  ;;  %v19219_v58 = vld [vmem:[#allocation136_spill] sm:$0xff] }
 0x314   :  { %v5770_v43 = vpack.c.bf16 %v16486_v55, %v16483_v45  ;;  %v11841_v19 = vunpack.i.h.bf16 %v11839_v0  ;;  %v11840_v59 = vunpack.i.l.bf16 %v11839_v0  ;;  %v5017_v40 = vsel %vm4843_vm4, %v4600_v22, %v11711_v24  ;;  %v19214_v22 = vld [vmem:[#allocation107_spill] sm:$0xff] }
 0x315   :  { %11953 = vrot.lane.b32.xlu0 %v11952_v52, %s12803_s27  ;;  %v5016_v30 = vsel %vm4843_vm4, %v4599_v18, %v11710_v42  ;;  %v2667_v56 = vmul.f32 0.2, %v1965_v28  ;;  %vm2411_vm13 = vcmp.gt.f32.partialorder %v1965_v28, 0.0  ;;  %v2668_v49 = vmul.f32 0.2, %v1968_v11  ;;  %v19218_v42 = vld [vmem:[#allocation160_spill] sm:$0xff] }
 0x316   :  { %11958 = vrot.lane.b32.xlu1 %v11957_v41, %s12804_s21  ;;  %v5577_v48 = vsel %vm5484_vm0, %v5016_v30, %v11840_v59  ;;  %v5578_v29 = vsel %vm5484_vm0, %v5017_v40, %v11841_v19  ;;  %v1984_v60 = vadd.f32 %v16175_v2, %v19211_v9  ;;  %v2926_v15 = vsel %vm2414_vm12, %v1976_v63, %v2670_v47  ;;  %v11864_v16 = vpop.permute.xlu0 %11863  ;;  %v19213_v41 = vld [vmem:[#allocation77_spill] sm:$0xff]  ;;  %v19220_v52 = vld [vmem:[#allocation118_spill] sm:$0xff]  ;;  %v3127_v21 = vld [vmem:[%s18629_s20 + $0x460] sm:$0xff] }
 0x317   :  { %v5766_v10 = vpack.c.bf16 %v5578_v29, %v5577_v48  ;;  %vm2412_vm14 = vcmp.gt.f32.partialorder %v1968_v11, 0.0  ;;  %v4718_v50 = vmul.f32 %v19212_v51, %v2926_v15  ;;  %v11866_v12 = vunpack.i.h.bf16 %v11864_v16  ;;  %v19225_v30 = vld [vmem:[#allocation19_spill] sm:$0xff] }
 0x318   :  { %v11865_v53 = vunpack.i.l.bf16 %v11864_v16  ;;  %v19215_v17 = vpack.c.bf16 %v19213_v41, %v19214_v22  ;;  %v2672_v36 = vmul.f32 0.2, %v1984_v60  ;;  %v2923_v7 = vsel %vm2411_vm13, %v1965_v28, %v2667_v56  ;;  %v19222_v28 = vld [vmem:[#allocation36_spill] sm:$0xff]  ;;  %v19227_v56 = vld [vmem:[#allocation173_spill] sm:$0xff]  ;;  %v19233_v22 = vld [vmem:[#allocation26_spill] sm:$0xff] }
 0x319   :  { %3940 = vperm.xlu0 %11565, %v3126_v1   ;;  %v16519_v63 = vsel %vm4843_vm4, %v4718_v50, %v11866_v12  ;;  %v2924_v34 = vsel %vm2412_vm14, %v1968_v11, %v2668_v49  ;;  %vm2416_vm15 = vcmp.gt.f32.partialorder %v1984_v60, 0.0  ;;  %v4715_v24 = vmul.f32 %v19217_v26, %v2923_v7  ;;  %v19223_v11 = vld [vmem:[#allocation99_spill] sm:$0xff]  ;;  %v19224_v1 = vld [vmem:[#allocation66_spill] sm:$0xff]  ;;  %v19230_v50 = vld [vmem:[#allocation125_spill] sm:$0xff] }
 0x31a   :  { %6094 = vmatmul.mubr.bf16.gmra.mxu1 %v19215_v17  ;;  %v16523_v20 = vsel %vm4843_vm4, %v19216_v44, %v11865_v53  ;;  %4265 = vperm.xlu1 %11566, %v3191_v6   ;;  %v11869_v3 = vpop.permute.xlu0 %11868  ;;  %v4716_v14 = vmul.f32 %v19218_v42, %v2924_v34  ;;  %v19221_v37 = vpack.i.bf16 %v19219_v58, %v19220_v52  ;;  %v19228_v49 = vld [vmem:[#allocation14_spill] sm:$0xff]  ;;  %v19231_v12 = vld [vmem:[#allocation79_spill] sm:$0xff]  ;;  %v19235_v44 = vld [vmem:[#allocation32_spill] sm:$0xff] }
 0x31b   :  { %6101 = vmatprep.mubr.bf16.mxu1 %v5762_v23  ;;  %v11871_v35 = vunpack.i.h.bf16 %v11869_v3  ;;  %v11870_v57 = vunpack.i.l.bf16 %v11869_v3  ;;  %v1824_v31 = vadd.f32 %v16175_v2, %v19222_v28  ;;  %v2928_v18 = vsel %vm2416_vm15, %v1984_v60, %v2672_v36  ;;  %v3193_v6 = vld [vmem:[%s18629_s20 + $0x670] sm:$0xff]  ;;  %v12279_v45 = vld [vmem:[%s18569_s4 + $0xf8] sm:$0xff]   ;;  %v19238_v7 = vld [vmem:[#allocation8_spill] sm:$0xff] }
 0x31c   :  { %v4720_v0 = vmul.f32 %v19223_v11, %v2928_v18  ;;  %v19226_v40 = vpack.c.bf16 %v19224_v1, %v19225_v30  ;;  %v1821_v48 = vadd.f32 %v16175_v2, %v19227_v56  ;;  %v19232_v53 = vpack.c.bf16 %v19230_v50, %v19231_v12  ;;  %10963 = vmatprep.subr.bf16.mxu1 %v12279_v45  ;;  %v12280_v55 = vld [vmem:[%s18569_s4 + $0xb8] sm:$0xff]   ;;  %v12281_v3 = vld [vmem:[%s18569_s4 + $0xf0] sm:$0xff]   ;;  %v19242_v58 = vld [vmem:[#allocation116_spill] sm:$0xff] }
 0x31d   :  { %v16529_v23 = vsel %vm4843_vm4, %v4716_v14, %v11871_v35  ;;  %v16532_v54 = vsel %vm4843_vm4, %v4715_v24, %v11870_v57  ;;  %v2632_v60 = vmul.f32 0.2, %v1824_v31  ;;  %vm2376_vm1 = vcmp.gt.f32.partialorder %v1824_v31, 0.0  ;;  %10964 = vmatpush3.bf16.msra.mxu1 %v12280_v55  ;;  %v12282_v26 = vld [vmem:[%s18569_s4 + $0xb0] sm:$0xff]   ;;  %v12286_v24 = vld [vmem:[%s18569_s4 + $0xa0] sm:$0xff]  }
 0x31e   :  { %11978 = vrot.lane.b32.xlu1 %v19221_v37, %s12803_s27  ;;  %v11874_v47 = vpop.permute.xlu0 %11873  ;;  %v2631_v15 = vmul.f32 0.2, %v1821_v48  ;;  %vm2375_vm2 = vcmp.gt.f32.partialorder %v1821_v48, 0.0  ;;  %10965 = vmatprep.subr.bf16.mxu1 %v12281_v3  ;;  %v12289_v14 = vld [vmem:[%s18569_s4 + $0xd0] sm:$0xff]   ;;  %v2093_v52 = vadd.f32 %v16175_v2, %v19242_v58  ;;  %v19243_v28 = vld [vmem:[#allocation43_spill] sm:$0xff] }
 0x31f   :  { %v11876_v19 = vunpack.i.h.bf16 %v11874_v47  ;;  %v11875_v59 = vunpack.i.l.bf16 %v11874_v47  ;;  %v2888_v16 = vsel %vm2376_vm1, %v1824_v31, %v2632_v60  ;;  %v19241_v35 = vld [vmem:[#allocation161_spill] sm:$0xff]  ;;  %v2096_v31 = vadd.f32 %v16175_v2, %v19243_v28  ;;  %v12293_v1 = vld [vmem:[%s18569_s4 + $0xc0] sm:$0xff]   ;;  %v19253_v28 = vld [vmem:[#allocation110_spill] sm:$0xff] }
 0x320   :  { %v2887_v41 = vsel %vm2375_vm2, %v1821_v48, %v2631_v15  ;;  %v2104_v57 = vadd.f32 %v16175_v2, %v19241_v35  ;;  %v12290_v18 = vld [vmem:[%s18569_s4 + $0x90] sm:$0xff]   ;;  %v12291_v47 = vld [vmem:[%s18569_s4 + $0xc8] sm:$0xff]   ;;  %v2699_v11 = vmul.f32 0.2, %v2093_v52  ;;  %vm2443_vm6 = vcmp.gt.f32.partialorder %v2093_v52, 0.0  ;;  %v19245_v60 = vld [vmem:[#allocation139_spill] sm:$0xff] }
 0x321   :  { %v16550_v29 = vsel %vm4843_vm4, %v4720_v0, %v11876_v19  ;;  %v16554_v9 = vsel %vm4843_vm4, %v19228_v49, %v11875_v59  ;;  %v4679_v17 = vmul.f32 %v19233_v22, %v2887_v41  ;;  %10966 = vmatpush3.bf16.msra.mxu1 %v12282_v26  ;;  %v2700_v19 = vmul.f32 0.2, %v2096_v31  ;;  %v12292_v59 = vld [vmem:[%s18569_s4 + $0x88] sm:$0xff]   ;;  %v12294_v22 = vld [vmem:[%s18569_s4 + $0x80] sm:$0xff]  }
 0x322   :  { %6102 = vmatmul.mubr.bf16.gmra.mxu1 %v19226_v40  ;;  %3945 = vperm.xlu1 %11566, %v3127_v21   ;;  %v2702_v21 = vmul.f32 0.2, %v2104_v57  ;;  %vm2446_vm5 = vcmp.gt.f32.partialorder %v2104_v57, 0.0  ;;  %vm2444_vm7 = vcmp.gt.f32.partialorder %v2096_v31, 0.0  ;;  %v19244_v40 = vld [vmem:[#allocation142_spill] sm:$0xff]  ;;  %v2955_v48 = vsel %vm2443_vm6, %v2093_v52, %v2699_v11 }
 0x323   :  { %6109 = vmatprep.mubr.bf16.mxu1 %v5766_v10  ;;  %v19229_v10 = vld [vmem:[#allocation112_spill] sm:$0xff]  ;;  %10967 = vmatprep.subr.bf16.mxu1 %v12283_v46  ;;  %v19256_v11 = vld [vmem:[#allocation126_spill] sm:$0xff] }
 0x324   :  { %v4680_v51 = vmul.f32 %v19229_v10, %v2888_v16  ;;  %v2958_v30 = vsel %vm2446_vm5, %v2104_v57, %v2702_v21  ;;  %v2956_v16 = vsel %vm2444_vm7, %v2096_v31, %v2700_v19  ;;  %v19252_v57 = vld [vmem:[#allocation129_spill] sm:$0xff]  ;;  %v1992_v31 = vadd.f32 %v16175_v2, %v19253_v28  ;;  %v19255_v21 = vld [vmem:[#allocation103_spill] sm:$0xff]  ;;  %v19258_v19 = vld [vmem:[#allocation68_spill] sm:$0xff] }
 0x325   :  { %10968 = vmatpush3.bf16.msra.mxu1 %v12284_v61  ;;  %v4750_v15 = vmul.f32 %v19245_v60, %v2958_v30 }
 0x326   :  { %11993 = vrot.lane.b32.xlu1 %v11992_v13, %s12804_s21  ;;  %v12012_v25 = vpack.i.bf16 %v4680_v51, %v4679_v17  ;;  %v19234_v13 = vld [vmem:[#allocation100_spill] sm:$0xff]  ;;  %v19246_v17 = vld [vmem:[#allocation130_spill] sm:$0xff]  ;;  %v2674_v30 = vmul.f32 0.2, %v1992_v31  ;;  %vm2418_vm10 = vcmp.gt.f32.partialorder %v1992_v31, 0.0 }
 0x327   :  { %v19236_v36 = vpack.c.bf16 %v19234_v13, %v19235_v44 }
 0x32a   :  { %6110 = vmatmul.mubr.bf16.gmra.mxu1 %v19232_v53  ;;  %4275 = vperm.xlu1 %11566, %v3193_v6  }
 0x32b   :  { %6117 = vmatprep.mubr.bf16.mxu1 %v5770_v43  ;;  %v19237_v43 = vld [vmem:[#allocation59_spill] sm:$0xff] }
 0x32c   :  { %v19239_v34 = vpack.i.bf16 %v19237_v43, %v19238_v7  ;;  %v19248_v43 = vld [vmem:[#allocation119_spill] sm:$0xff] }
 0x32e   :  { %12013 = vrot.lane.b32.xlu1 %v12012_v25, %s12803_s27  ;;  %v4747_v25 = vmul.f32 %v19246_v17, %v2955_v48 }
 0x332   :  { %6118 = vmatmul.mubr.bf16.gmra.mxu1 %v19236_v36  ;;  %3955 = vperm.xlu1 %11566, %v3129_v38   ;;  %v19247_v38 = vld [vmem:[#allocation131_spill] sm:$0xff] }
 0x333   :  { %v4748_v13 = vmul.f32 %v19247_v38, %v2956_v16 }
 0x336   :  { %12018 = vrot.lane.b32.xlu1 %v12017_v27, %s12804_s21  ;;  %v12285_v27 = vld [vmem:[%s18569_s4 + $0xe0] sm:$0xff]  }
 0x337   :  { %10969 = vmatprep.subr.bf16.mxu1 %v12285_v27 }
 0x338   :  { %10970 = vmatpush3.bf16.msra.mxu1 %v12286_v24 }
 0x339   :  { %10971 = vmatprep.subr.bf16.mxu1 %v12287_v32 }
 0x33a   :  { %12033 = vrot.lane.b32.xlu1 %v19239_v34, %s12803_s27  ;;  %v19249_v34 = vld [vmem:[#allocation168_spill] sm:$0xff] }
 0x33c   :  { %10972 = vmatpush3.bf16.msra.mxu1 %v12288_v4 }
 0x33d   :  { %10973 = vmatprep.subr.bf16.mxu1 %v12289_v14  ;;  %v19251_v14 = vld [vmem:[#allocation70_spill] sm:$0xff] }
 0x33e   :  { %12043 = vrot.lane.b32.xlu1 %v12042_v33, %s12804_s21  ;;  %v19240_v33 = vld [vmem:[#allocation104_spill] sm:$0xff] }
 0x33f   :  { %v2101_v42 = vadd.f32 %v16175_v2, %v19240_v33  ;;  %v19250_v33 = vld [vmem:[#allocation86_spill] sm:$0xff] }
 0x340   :  { %10974 = vmatpush3.bf16.msra.mxu1 %v12290_v18  ;;  %v19254_v18 = vld [vmem:[#allocation44_spill] sm:$0xff] }
 0x341   :  { %v2701_v37 = vmul.f32 0.2, %v2101_v42  ;;  %vm2445_vm3 = vcmp.gt.f32.partialorder %v2101_v42, 0.0  ;;  %10975 = vmatprep.subr.bf16.mxu1 %v12291_v47  ;;  %v2117_v47 = vadd.f32 %v16175_v2, %v19254_v18 }
 0x343   :  { %v2957_v0 = vsel %vm2445_vm3, %v2101_v42, %v2701_v37  ;;  %v1736_v42 = vadd.f32 %v16175_v2, %v19250_v33  ;;  %vm2449_vm9 = vcmp.gt.f32.partialorder %v2117_v47, 0.0  ;;  %v19264_v33 = vld [vmem:[#allocation23_spill] sm:$0xff] }
 0x344   :  { %v4749_v56 = vmul.f32 %v19244_v40, %v2957_v0  ;;  %10976 = vmatpush3.bf16.msra.mxu1 %v12292_v59  ;;  %v19257_v0 = vpack.i.bf16 %v19255_v21, %v19256_v11  ;;  %v2120_v59 = vadd.f32 %v16175_v2, %v19258_v19  ;;  %v2705_v40 = vmul.f32 0.2, %v2117_v47 }
 0x345   :  { %10977 = vmatprep.subr.bf16.mxu1 %v12293_v1  ;;  %v2610_v37 = vmul.f32 0.2, %v1736_v42  ;;  %vm2354_vm8 = vcmp.gt.f32.partialorder %v1736_v42, 0.0  ;;  %v3192_v1 = vld [vmem:[%s18629_s20 + $0x668] sm:$0xff] }
 0x346   :  { %v2706_v16 = vmul.f32 0.2, %v2120_v59  ;;  %vm2450_vm11 = vcmp.gt.f32.partialorder %v2120_v59, 0.0 }
 0x348   :  { %10978 = vmatpush3.bf16.msra.mxu1 %v12294_v22  ;;  %v19261_v22 = vld [vmem:[#allocation128_spill] sm:$0xff] }
 0x350   :  { %v11889_v49 = vpop.permute.xlu0 %11888 }
 0x351   :  { %v11891_v6 = vunpack.i.h.bf16 %v11889_v49  ;;  %v11890_v10 = vunpack.i.l.bf16 %v11889_v49  ;;  %v19259_v49 = vld [vmem:[#allocation84_spill] sm:$0xff] }
 0x352   :  { %v11879_v51 = vpop.permute.xlu1 %11878  ;;  %v2109_v60 = vadd.f32 %v16175_v2, %v19259_v49  ;;  %v19269_v49 = vld [vmem:[#allocation140_spill] sm:$0xff] }
 0x353   :  { %v5407_v50 = vsel %vm4843_vm4, %v4750_v15, %v11891_v6  ;;  %v5406_v12 = vsel %vm4843_vm4, %v4749_v56, %v11890_v10  ;;  %v11881_v53 = vunpack.i.h.bf16 %v11879_v51  ;;  %v11880_v41 = vunpack.i.l.bf16 %v11879_v51  ;;  %v16698_v6 = vld [vmem:[%s18690_s2] ss:$0 sm:$0xff]  ;;  %v19260_v10 = vld [vmem:[#allocation85_spill] sm:$0xff] }
 0x354   :  { %v11962_v44 = vpack.i.bf16 %v5407_v50, %v5406_v12  ;;  %v11894_v36 = vpop.permute.xlu0 %11893  ;;  %v2866_v56 = vsel %vm2354_vm8, %v1736_v42, %v2610_v37  ;;  %v2112_v51 = vadd.f32 %v16698_v6, %v19260_v10  ;;  %v2961_v50 = vsel %vm2449_vm9, %v2117_v47, %v2705_v40  ;;  %v19265_v47 = vld [vmem:[#allocation94_spill] sm:$0xff] }
 0x355   :  { %v11896_v45 = vunpack.i.h.bf16 %v11894_v36  ;;  %v11895_v55 = vunpack.i.l.bf16 %v11894_v36  ;;  %v16654_v7 = vsel %vm5484_vm0, %v19248_v43, %v11880_v41  ;;  %v16658_v3 = vsel %vm5484_vm0, %v19249_v34, %v11881_v53  ;;  %v19262_v34 = vld [vmem:[#allocation97_spill] sm:$0xff] }
 0x356   :  { %11963 = vrot.lane.b32.xlu0 %v11962_v44, %s12804_s21  ;;  %v11884_v26 = vpop.permute.xlu1 %11883  ;;  %v5747_v46 = vpack.c.bf16 %v16658_v3, %v16654_v7  ;;  %v2930_v12 = vsel %vm2418_vm10, %v1992_v31, %v2674_v30  ;;  %v2703_v41 = vmul.f32 0.2, %v2109_v60  ;;  %v2704_v44 = vmul.f32 0.2, %v2112_v51 }
 0x357   :  { %v5405_v61 = vsel %vm4843_vm4, %v4748_v13, %v11896_v45  ;;  %v5404_v27 = vsel %vm4843_vm4, %v4747_v25, %v11895_v55  ;;  %v11886_v24 = vunpack.i.h.bf16 %v11884_v26  ;;  %v11885_v32 = vunpack.i.l.bf16 %v11884_v26 }
 0x358   :  { %v11967_v4 = vpack.i.bf16 %v5405_v61, %v5404_v27  ;;  %v4722_v2 = vmul.f32 %v19261_v22, %v2930_v12  ;;  %v2962_v13 = vsel %vm2450_vm11, %v2120_v59, %v2706_v16  ;;  %vm2447_vm12 = vcmp.gt.f32.partialorder %v2109_v60, 0.0  ;;  %v19263_v61 = vld [vmem:[#allocation10_spill] sm:$0xff] }
 0x359   :  { %v16669_v35 = vsel %vm5484_vm0, %v19251_v14, %v11885_v32  ;;  %v16673_v58 = vsel %vm5484_vm0, %v19252_v57, %v11886_v24  ;;  %vm2448_vm13 = vcmp.gt.f32.partialorder %v2112_v51, 0.0  ;;  %v2000_v26 = vadd.f32 %v16698_v6, %v19262_v34  ;;  %v19267_v59 = vld [vmem:[#allocation158_spill] sm:$0xff] }
 0x35a   :  { %v5743_v52 = vpack.c.bf16 %v16673_v58, %v16669_v35  ;;  %11968 = vrot.lane.b32.xlu0 %v11967_v4, %s12804_s21  ;;  %v4753_v27 = vmul.f32 %v19263_v61, %v2961_v50  ;;  %v4754_v42 = vmul.f32 %v19264_v33, %v2962_v13  ;;  %v2959_v37 = vsel %vm2447_vm12, %v2109_v60, %v2703_v41 }
 0x35b   :  { %v2960_v28 = vsel %vm2448_vm13, %v2112_v51, %v2704_v44  ;;  %v2676_v21 = vmul.f32 0.2, %v2000_v26  ;;  %vm2420_vm14 = vcmp.gt.f32.partialorder %v2000_v26, 0.0  ;;  %v2136_v60 = vadd.f32 %v16698_v6, %v19269_v49 }
 0x35d   :  { %v2932_v50 = vsel %vm2420_vm14, %v2000_v26, %v2676_v21  ;;  %vm2454_vm2 = vcmp.gt.f32.partialorder %v2136_v60, 0.0  ;;  %v19272_v26 = vld [vmem:[#allocation67_spill] sm:$0xff] }
 0x35e   :  { %11973 = vrot.lane.b32.xlu0 %v19257_v0, %s12803_s27  ;;  %v19266_v0 = vld [vmem:[#allocation166_spill] sm:$0xff]  ;;  %v1997_v61 = vadd.f32 %v16698_v6, %v19272_v26 }
 0x35f   :  { %v4751_v19 = vmul.f32 %v19266_v0, %v2959_v37  ;;  %v19273_v37 = vld [vmem:[#allocation57_spill] sm:$0xff]  ;;  %v19283_v26 = vld [vmem:[#allocation162_spill] sm:$0xff] }
 0x360   :  { %v2675_v0 = vmul.f32 0.2, %v1997_v61  ;;  %vm2419_vm6 = vcmp.gt.f32.partialorder %v1997_v61, 0.0 }
 0x361   :  { %v3921_v48 = vpop.permute.xlu0 %3920 }
 0x362   :  { %v16693_v15 = vmul.f32 %v3921_v48, %v2866_v56  ;;  %4270 = vperm.xlu0 %11565, %v3192_v1   ;;  %v4752_v1 = vmul.f32 %v19267_v59, %v2960_v28  ;;  %v19268_v56 = vld [vmem:[#allocation69_spill] sm:$0xff]  ;;  %v2008_v28 = vadd.f32 %v16698_v6, %v19273_v37 }
 0x363   :  { %v2133_v48 = vadd.f32 %v16698_v6, %v19268_v56  ;;  %v19278_v56 = vld [vmem:[#allocation61_spill] sm:$0xff] }
 0x364   :  { %vm2422_vm7 = vcmp.gt.f32.partialorder %v2008_v28, 0.0 }
 0x365   :  { %v11904_v53 = vpop.permute.xlu0 %11903  ;;  %v2709_v22 = vmul.f32 0.2, %v2133_v48  ;;  %vm2453_vm1 = vcmp.gt.f32.partialorder %v2133_v48, 0.0 }
 0x366   :  { %v11906_v17 = vunpack.i.h.bf16 %v11904_v53  ;;  %v11905_v25 = vunpack.i.l.bf16 %v11904_v53 }
 0x367   :  { %v11899_v38 = vpop.permute.xlu1 %11898 }
 0x368   :  { %v11901_v36 = vunpack.i.h.bf16 %v11899_v38  ;;  %v11900_v45 = vunpack.i.l.bf16 %v11899_v38  ;;  %v16704_v55 = vsel %vm4843_vm4, %v4722_v2, %v11906_v17  ;;  %v16708_v43 = vsel %vm4843_vm4, %v16204_v5, %v11905_v25  ;;  %v19270_v2 = vld [vmem:[#allocation106_spill] sm:$0xff]  ;;  %v19271_v38 = vld [vmem:[#allocation137_spill] sm:$0xff] }
 0x369   :  { %v11909_v24 = vpop.permute.xlu0 %11908  ;;  %v2125_v17 = vadd.f32 %v16698_v6, %v19270_v2  ;;  %v2710_v25 = vmul.f32 0.2, %v2136_v60  ;;  %v2128_v13 = vadd.f32 %v16698_v6, %v19271_v38  ;;  %v19282_v38 = vld [vmem:[#allocation82_spill] sm:$0xff] }
 0x36a   :  { %v16715_v32 = vsel %vm5484_vm0, %v16262_v8, %v11900_v45  ;;  %v16719_v4 = vsel %vm5484_vm0, %v16258_v62, %v11901_v36  ;;  %v11911_v14 = vunpack.i.h.bf16 %v11909_v24  ;;  %v11910_v57 = vunpack.i.l.bf16 %v11909_v24  ;;  %v3128_v36 = vld [vmem:[%s18629_s20 + $0x468] sm:$0xff] }
 0x36b   :  { %v5751_v5 = vpack.c.bf16 %v16719_v4, %v16715_v32  ;;  %v1744_v8 = vadd.f32 %v16698_v6, %v19265_v47  ;;  %v2965_v24 = vsel %vm2453_vm1, %v2133_v48, %v2709_v22  ;;  %v2707_v33 = vmul.f32 0.2, %v2125_v17 }
 0x36c   :  { %v5411_v31 = vsel %vm4843_vm4, %v4754_v42, %v11911_v14  ;;  %v5410_v18 = vsel %vm4843_vm4, %v4753_v27, %v11910_v57  ;;  %v2966_v42 = vsel %vm2454_vm2, %v2136_v60, %v2710_v25  ;;  %v2708_v14 = vmul.f32 0.2, %v2128_v13  ;;  %v19280_v60 = vld [vmem:[#allocation93_spill] sm:$0xff] }
 0x36d   :  { %v11982_v11 = vpack.i.bf16 %v5411_v31, %v5410_v18  ;;  %v11914_v62 = vpop.permute.xlu0 %11913  ;;  %v2612_v53 = vmul.f32 0.2, %v1744_v8  ;;  %vm2356_vm15 = vcmp.gt.f32.partialorder %v1744_v8, 0.0  ;;  %vm2451_vm3 = vcmp.gt.f32.partialorder %v2125_v17, 0.0  ;;  %v19274_v18 = vld [vmem:[#allocation178_spill] sm:$0xff] }
 0x36e   :  { %v11916_v30 = vunpack.i.h.bf16 %v11914_v62  ;;  %v11915_v40 = vunpack.i.l.bf16 %v11914_v62  ;;  %vm2452_vm5 = vcmp.gt.f32.partialorder %v2128_v13, 0.0  ;;  %v4757_v47 = vmul.f32 %v19274_v18, %v2965_v24 }
 0x36f   :  { %11983 = vrot.lane.b32.xlu0 %v11982_v11, %s12804_s21  ;;  %v2868_v45 = vsel %vm2356_vm15, %v1744_v8, %v2612_v53  ;;  %v19275_v8 = vld [vmem:[#allocation12_spill] sm:$0xff]  ;;  %v2964_v59 = vsel %vm2452_vm5, %v2128_v13, %v2708_v14  ;;  %v2152_v24 = vadd.f32 %v16698_v6, %v19283_v26 }
 0x370   :  { %v5409_v16 = vsel %vm4843_vm4, %v4752_v1, %v11916_v30  ;;  %v5408_v10 = vsel %vm4843_vm4, %v4751_v19, %v11915_v40  ;;  %v4758_v21 = vmul.f32 %v19275_v8, %v2966_v42  ;;  %v2963_v19 = vsel %vm2451_vm3, %v2125_v17, %v2707_v33  ;;  %v19276_v1 = vld [vmem:[#allocation31_spill] sm:$0xff]  ;;  %v19277_v40 = vld [vmem:[#allocation60_spill] sm:$0xff] }
 0x371   :  { %v11987_v51 = vpack.i.bf16 %v5409_v16, %v5408_v10  ;;  %v2149_v30 = vadd.f32 %v16698_v6, %v19276_v1  ;;  %v19279_v48 = vpack.i.bf16 %v19277_v40, %v19278_v56  ;;  %v16765_v16 = vadd.f32 %v16698_v6, %v19280_v60  ;;  %v19281_v17 = vld [vmem:[#allocation171_spill] sm:$0xff]  ;;  %v19285_v40 = vld [vmem:[#allocation81_spill] sm:$0xff] }
 0x372   :  { %v4755_v25 = vmul.f32 %v19281_v17, %v2963_v19  ;;  %v4756_v13 = vmul.f32 %v19282_v38, %v2964_v59  ;;  %v2931_v33 = vsel %vm2419_vm6, %v1997_v61, %v2675_v0  ;;  %v19284_v59 = vld [vmem:[#allocation154_spill] sm:$0xff]  ;;  %vm2458_vm9 = vcmp.gt.f32.partialorder %v2152_v24, 0.0 }
 0x373   :  { %v4251_v12 = vpop.permute.xlu0 %4250  ;;  %11988 = vrot.lane.b32.xlu0 %v11987_v51, %s12804_s21  ;;  %v2141_v1 = vadd.f32 %v16698_v6, %v19284_v59  ;;  %vm2457_vm8 = vcmp.gt.f32.partialorder %v2149_v30, 0.0  ;;  %vm2355_vm12 = vcmp.gt.f32.partialorder %v16765_v16, 0.0 }
 0x374   :  { %v16737_v41 = vmul.f32 %v4251_v12, %v2932_v50  ;;  %v4246_v44 = vpop.permute.xlu1 %4245  ;;  %v2678_v50 = vmul.f32 0.2, %v2008_v28 }
 0x375   :  { %v4723_v18 = vmul.f32 %v4246_v44, %v2931_v33  ;;  %v2714_v44 = vmul.f32 0.2, %v2152_v24  ;;  %vm2455_vm10 = vcmp.gt.f32.partialorder %v2141_v1, 0.0 }
 0x377   :  { %v3931_v34 = vpop.permute.xlu0 %3930  ;;  %3950 = vperm.xlu0 %11565, %v3128_v36   ;;  %v2970_v17 = vsel %vm2458_vm9, %v2152_v24, %v2714_v44  ;;  %v19290_v44 = vld [vmem:[#allocation141_spill] sm:$0xff] }
 0x378   :  { %v16749_v27 = vmul.f32 %v3931_v34, %v2868_v45  ;;  %v11919_v57 = vpop.permute.xlu1 %11918  ;;  %v2713_v34 = vmul.f32 0.2, %v2149_v30 }
 0x379   :  { %v11921_v12 = vunpack.i.h.bf16 %v11919_v57  ;;  %v11920_v53 = vunpack.i.l.bf16 %v11919_v57 }
 0x37b   :  { %v11929_v31 = vpop.permute.xlu0 %11928  ;;  %11998 = vrot.lane.b32.xlu0 %v19279_v48, %s12803_s27  ;;  %v5170_v8 = vsel %vm4843_vm4, %v16268_v39, %v11920_v53 }
 0x37c   :  { %v11931_v11 = vunpack.i.h.bf16 %v11929_v31  ;;  %v11930_v62 = vunpack.i.l.bf16 %v11929_v31 }
 0x37d   :  { %v16761_v49 = vpop.permute.xlu1 %3925 }
 0x37e   :  { %v5415_v10 = vsel %vm4843_vm4, %v4758_v21, %v11931_v11  ;;  %v5414_v51 = vsel %vm4843_vm4, %v4757_v47, %v11930_v62  ;;  %v5171_v47 = vsel %vm4843_vm4, %v16693_v15, %v11921_v12  ;;  %v2144_v15 = vadd.f32 %v16698_v6, %v19285_v40 }
 0x37f   :  { %v12002_v22 = vpack.i.bf16 %v5415_v10, %v5414_v51  ;;  %v11934_v2 = vpop.permute.xlu0 %11933  ;;  %v3194_v10 = vld [vmem:[%s18629_s20 + $0x678] sm:$0xff]  ;;  %v2934_v51 = vsel %vm2422_vm7, %v2008_v28, %v2678_v50 }
 0x380   :  { %v11936_v36 = vunpack.i.h.bf16 %v11934_v2  ;;  %v11935_v45 = vunpack.i.l.bf16 %v11934_v2  ;;  %v2711_v2 = vmul.f32 0.2, %v2141_v1  ;;  %vm2456_vm11 = vcmp.gt.f32.partialorder %v2144_v15, 0.0  ;;  %v3130_v28 = vld [vmem:[%s18629_s20 + $0x478] sm:$0xff] }
 0x381   :  { %12003 = vrot.lane.b32.xlu0 %v12002_v22, %s12804_s21  ;;  %v11924_v42 = vpop.permute.xlu1 %11923  ;;  %v2969_v22 = vsel %vm2457_vm8, %v2149_v30, %v2713_v34  ;;  %v19287_v30 = vld [vmem:[#allocation152_spill] sm:$0xff] }
 0x382   :  { %v5413_v14 = vsel %vm4843_vm4, %v4756_v13, %v11936_v36  ;;  %v5412_v57 = vsel %vm4843_vm4, %v4755_v25, %v11935_v45  ;;  %v11926_v37 = vunpack.i.h.bf16 %v11924_v42  ;;  %v11925_v31 = vunpack.i.l.bf16 %v11924_v42  ;;  %v19286_v13 = vld [vmem:[#allocation90_spill] sm:$0xff]  ;;  %v19288_v34 = vld [vmem:[#allocation148_spill] sm:$0xff] }
 0x383   :  { %v12007_v21 = vpack.i.bf16 %v5413_v14, %v5412_v57  ;;  %v11939_v11 = vpop.permute.xlu0 %11938  ;;  %v2712_v25 = vmul.f32 0.2, %v2144_v15  ;;  %v1752_v36 = vadd.f32 %v16698_v6, %v19286_v13  ;;  %v4761_v45 = vmul.f32 %v19287_v30, %v2969_v22 }
 0x384   :  { %v11941_v61 = vunpack.i.h.bf16 %v11939_v11  ;;  %v11940_v62 = vunpack.i.l.bf16 %v11939_v11  ;;  %v16781_v0 = vsel %vm5484_vm0, %v5170_v8, %v11925_v31  ;;  %v16784_v19 = vsel %vm5484_vm0, %v5171_v47, %v11926_v37 }
 0x385   :  { %12008 = vrot.lane.b32.xlu0 %v12007_v21, %s12804_s21  ;;  %v16791_v39 = vpop.permute.xlu1 %4255  ;;  %v5755_v56 = vpack.c.bf16 %v16784_v19, %v16781_v0  ;;  %v4762_v26 = vmul.f32 %v19288_v34, %v2970_v17  ;;  %v2967_v42 = vsel %vm2455_vm10, %v2141_v1, %v2711_v2  ;;  %v2968_v14 = vsel %vm2456_vm11, %v2144_v15, %v2712_v25 }
 0x386   :  { %v16797_v48 = vsel %vm4843_vm4, %v16737_v41, %v11941_v61  ;;  %v16800_v60 = vsel %vm4843_vm4, %v4723_v18, %v11940_v62  ;;  %v2611_v41 = vmul.f32 0.2, %v16765_v16  ;;  %v2614_v37 = vmul.f32 0.2, %v1752_v36  ;;  %v19289_v62 = vld [vmem:[#allocation58_spill] sm:$0xff] }
 0x387   :  { %vm2358_vm13 = vcmp.gt.f32.partialorder %v1752_v36, 0.0  ;;  %v4759_v59 = vmul.f32 %v19289_v62, %v2967_v42  ;;  %v4760_v40 = vmul.f32 %v19290_v44, %v2968_v14 }
 0x388   :  { %v4261_v12 = vpop.permute.xlu0 %4260  ;;  %v2867_v31 = vsel %vm2355_vm12, %v16765_v16, %v2611_v41  ;;  %v2870_v41 = vsel %vm2358_vm13, %v1752_v36, %v2614_v37  ;;  %v19292_v36 = vld [vmem:[#allocation114_spill] sm:$0xff] }
 0x389   :  { %v16806_v53 = vmul.f32 %v4261_v12, %v2934_v51  ;;  %4280 = vperm.xlu0 %11565, %v3194_v10   ;;  %v11944_v38 = vpop.permute.xlu1 %11943  ;;  %v4659_v10 = vmul.f32 %v16761_v49, %v2867_v31 }
 0x38a   :  { %v11946_v8 = vunpack.i.h.bf16 %v11944_v38  ;;  %v11945_v21 = vunpack.i.l.bf16 %v11944_v38 }
 0x38c   :  { %v11949_v50 = vpop.permute.xlu0 %11948  ;;  %v5173_v17 = vsel %vm4843_vm4, %v16749_v27, %v11946_v8  ;;  %v5172_v25 = vsel %vm4843_vm4, %v4659_v10, %v11945_v21  ;;  %v19291_v27 = vld [vmem:[#allocation92_spill] sm:$0xff] }
 0x38d   :  { %v11951_v24 = vunpack.i.h.bf16 %v11949_v50  ;;  %v11950_v33 = vunpack.i.l.bf16 %v11949_v50  ;;  %3960 = vperm.xlu0 %11565, %v3130_v28   ;;  %v3936_v57 = vpop.permute.xlu1 %3935  ;;  %v1749_v34 = vadd.f32 %v16698_v6, %v19291_v27 }
 0x38f   :  { %v5419_v18 = vsel %vm4843_vm4, %v4762_v26, %v11951_v24  ;;  %v5418_v47 = vsel %vm4843_vm4, %v4761_v45, %v11950_v33  ;;  %v19293_v26 = vld [vmem:[#allocation157_spill] sm:$0xff]  ;;  %v2613_v14 = vmul.f32 0.2, %v1749_v34  ;;  %vm2357_vm14 = vcmp.gt.f32.partialorder %v1749_v34, 0.0 }
 0x390   :  { %v12037_v11 = vpack.i.bf16 %v5419_v18, %v5418_v47  ;;  %v11954_v61 = vpop.permute.xlu0 %11953  ;;  %v19294_v24 = vpack.i.bf16 %v19292_v36, %v19293_v26 }
 0x391   :  { %v11956_v1 = vunpack.i.h.bf16 %v11954_v61  ;;  %v11955_v15 = vunpack.i.l.bf16 %v11954_v61  ;;  %v11959_v51 = vpop.permute.xlu1 %11958  ;;  %v2869_v61 = vsel %vm2357_vm14, %v1749_v34, %v2613_v14 }
 0x392   :  { %v11961_v22 = vunpack.i.h.bf16 %v11959_v51  ;;  %v11960_v2 = vunpack.i.l.bf16 %v11959_v51  ;;  %v4661_v62 = vmul.f32 %v3936_v57, %v2869_v61 }
 0x393   :  { %v5417_v16 = vsel %vm4843_vm4, %v4760_v40, %v11956_v1  ;;  %v5416_v12 = vsel %vm4843_vm4, %v4759_v59, %v11955_v15 }
 0x394   :  { %v12022_v38 = vpack.i.bf16 %v5417_v16, %v5416_v12  ;;  %v3941_v13 = vpop.permute.xlu0 %3940  ;;  %v16829_v50 = vsel %vm5484_vm0, %v5172_v25, %v11960_v2  ;;  %v16832_v49 = vsel %vm5484_vm0, %v5173_v17, %v11961_v22 }
 0x395   :  { %v4662_v28 = vmul.f32 %v3941_v13, %v2870_v41  ;;  %v16835_v30 = vpop.permute.xlu1 %4265  ;;  %v5759_v45 = vpack.c.bf16 %v16832_v49, %v16829_v50 }
 0x396   :  { %12023 = vrot.lane.b32.xlu0 %v12022_v38, %s12804_s21 }
 0x399   :  { %v11979_v33 = vpop.permute.xlu1 %11978 }
 0x39a   :  { %12028 = vrot.lane.b32.xlu0 %v19294_v24, %s12803_s27  ;;  %v11981_v47 = vunpack.i.h.bf16 %v11979_v33  ;;  %v11980_v8 = vunpack.i.l.bf16 %v11979_v33 }
 0x39b   :  { %v10915_v42 = vpop.f32.mrf.mxu1 }
 0x39c   :  { %v5175_v15 = vsel %vm4843_vm4, %v4662_v28, %v11981_v47  ;;  %v5174_v10 = vsel %vm4843_vm4, %v4661_v62, %v11980_v8 }
 0x39d   :  { %v10916_v37 = vpop.f32.mrf.mxu1  ;;  %v16846_v31 = vpop.permute.xlu1 %3945 }
 0x39e   :  { %12038 = vrot.lane.b32.xlu0 %v12037_v11, %s12804_s21  ;;  %v16848_v18 = vadd.f32 %v10916_v37, %v10915_v42 }
 0x39f   :  { %v16850_v21 = vpop.f32.mrf.mxu1 }
 0x3a1   :  { %v16852_v59 = vpop.f32.mrf.mxu1  ;;  %v11994_v44 = vpop.permute.xlu1 %11993 }
 0x3a2   :  { %v11996_v40 = vunpack.i.h.bf16 %v11994_v44  ;;  %v11995_v1 = vunpack.i.l.bf16 %v11994_v44 }
 0x3a3   :  { %v10921_v11 = vpop.f32.mrf.mxu1 }
 0x3a4   :  { %v16857_v51 = vsel %vm5484_vm0, %v5174_v10, %v11995_v1  ;;  %v16860_v16 = vsel %vm5484_vm0, %v5175_v15, %v11996_v40 }
 0x3a5   :  { %v10922_v12 = vpop.f32.mrf.mxu1  ;;  %v5763_v57 = vpack.c.bf16 %v16860_v16, %v16857_v51 }
 0x3a6   :  { %v16864_v22 = vadd.f32 %v10922_v12, %v10921_v11  ;;  %v16904_v12 = vpop.permute.xlu1 %4275 }
 0x3a7   :  { %v16866_v2 = vpop.f32.mrf.mxu1 }
 0x3a9   :  { %v16868_v17 = vpop.f32.mrf.mxu1 }
 0x3c8   :  { %v11964_v38 = vpop.permute.xlu0 %11963 }
 0x3c9   :  { %v11966_v13 = vunpack.i.h.bf16 %v11964_v38  ;;  %v11965_v28 = vunpack.i.l.bf16 %v11964_v38 }
 0x3ca   :  { %v10927_v25 = vpop.f32.mrf.mxu1 }
 0x3cb   :  { %v5727_v36 = vsel %vm5484_vm0, %v16523_v20, %v11965_v28  ;;  %v5728_v26 = vsel %vm5484_vm0, %v16519_v63, %v11966_v13 }
 0x3cc   :  { %v10928_v41 = vpop.f32.mrf.mxu1  ;;  %v11969_v24 = vpop.permute.xlu0 %11968  ;;  %v5748_v42 = vpack.c.bf16 %v5728_v26, %v5727_v36 }
 0x3cd   :  { %v16870_v27 = vadd.f32 %v10928_v41, %v10927_v25  ;;  %v11971_v14 = vunpack.i.h.bf16 %v11969_v24  ;;  %v11970_v37 = vunpack.i.l.bf16 %v11969_v24  ;;  %v12014_v36 = vpop.permute.xlu1 %12013 }
 0x3ce   :  { %v16872_v34 = vpop.f32.mrf.mxu1 }
 0x3cf   :  { %v5725_v8 = vsel %vm5484_vm0, %v16532_v54, %v11970_v37  ;;  %v5726_v61 = vsel %vm5484_vm0, %v16529_v23, %v11971_v14 }
 0x3d0   :  { %v16878_v33 = vpop.f32.mrf.mxu1  ;;  %v5744_v44 = vpack.c.bf16 %v5726_v61, %v5725_v8  ;;  %v16893_v54 = vpop.permute.xlu0 %11973 }
 0x3d1   :  { %v11976_v0 = vunpack.i.h.bf16 %v16893_v54  ;;  %v11975_v19 = vunpack.i.l.bf16 %v16893_v54  ;;  %v19299_v54 = vld [vmem:[#allocation11_spill] sm:$0xff] }
 0x3d2   :  { %v10933_v47 = vpop.f32.mrf.mxu1  ;;  %6158 = vmatprep.mubr.bf16.mxu1 %v5744_v44 }
 0x3d3   :  { %6159 = vmatmul.mubr.bf16.vlgmr.msra.gmra.mxu1 %v5743_v52 }
 0x3d4   :  { %v10934_v62 = vpop.f32.mrf.mxu1  ;;  %6166 = vmatprep.mubr.bf16.mxu1 %v5748_v42 }
 0x3d5   :  { %v16884_v40 = vadd.f32 %v10934_v62, %v10933_v47  ;;  %v16922_v62 = vpop.permute.xlu1 %3955 }
 0x3d6   :  { %v16886_v20 = vpop.f32.mrf.mxu1 }
 0x3d8   :  { %v16891_v63 = vpop.f32.mrf.mxu1 }
 0x3da   :  { %v10939_v1 = vpop.f32.mrf.mxu1 }
 0x3db   :  { %6167 = vmatmul.mubr.bf16.gmra.mxu1 %v5747_v46 }
 0x3dc   :  { %v10940_v15 = vpop.f32.mrf.mxu1 }
 0x3dd   :  { %v16895_v10 = vadd.f32 %v10940_v15, %v10939_v1  ;;  %v16906_v35 = vpop.permute.xlu0 %4270  ;;  %v19295_v1 = vld [vmem:[#allocation88_spill] sm:$0xff]  ;;  %v19296_v15 = vld [vmem:[#allocation9_spill] sm:$0xff] }
 0x3de   :  { %v16897_v23 = vpop.f32.mrf.mxu1 }
 0x3e0   :  { %v16902_v11 = vpop.f32.mrf.mxu1 }
 0x3e1   :  { %v11984_v25 = vpop.permute.xlu0 %11983 }
 0x3e2   :  { %v10945_v58 = vpop.f32.mrf.mxu1  ;;  %v11986_v41 = vunpack.i.h.bf16 %v11984_v25  ;;  %v11985_v13 = vunpack.i.l.bf16 %v11984_v25 }
 0x3e4   :  { %v10946_v52 = vpop.f32.mrf.mxu1  ;;  %v5731_v7 = vsel %vm5484_vm0, %v16708_v43, %v11985_v13  ;;  %v5732_v3 = vsel %vm5484_vm0, %v16704_v55, %v11986_v41  ;;  %v1757_v55 = vadd.f32 %v16698_v6, %v19295_v1  ;;  %v12019_v13 = vpop.permute.xlu1 %12018 }
 0x3e5   :  { %v16908_v38 = vadd.f32 %v10946_v52, %v10945_v58  ;;  %v11989_v46 = vpop.permute.xlu0 %11988  ;;  %v5756_v24 = vpack.c.bf16 %v5732_v3, %v5731_v7  ;;  %v1760_v58 = vadd.f32 %v16698_v6, %v19296_v15  ;;  %v19297_v3 = vld [vmem:[#allocation22_spill] sm:$0xff] }
 0x3e6   :  { %v16910_v28 = vpop.f32.mrf.mxu1  ;;  %v11991_v42 = vunpack.i.h.bf16 %v11989_v46  ;;  %v11990_v14 = vunpack.i.l.bf16 %v11989_v46  ;;  %vm2359_vm15 = vcmp.gt.f32.partialorder %v1757_v55, 0.0  ;;  %v2005_v46 = vadd.f32 %v16698_v6, %v19297_v3 }
 0x3e7   :  { %v2616_v41 = vmul.f32 0.2, %v1760_v58  ;;  %vm2360_vm1 = vcmp.gt.f32.partialorder %v1760_v58, 0.0 }
 0x3e8   :  { %v16912_v26 = vpop.f32.mrf.mxu1  ;;  %v5729_v8 = vsel %vm5484_vm0, %v16554_v9, %v11990_v14  ;;  %v5730_v61 = vsel %vm5484_vm0, %v16550_v29, %v11991_v42  ;;  %v2615_v29 = vmul.f32 0.2, %v1757_v55  ;;  %v12015_v42 = vunpack.i.l.bf16 %v12014_v36 }
 0x3e9   :  { %v5752_v43 = vpack.c.bf16 %v5730_v61, %v5729_v8  ;;  %v2872_v32 = vsel %vm2360_vm1, %v1760_v58, %v2616_v41  ;;  %v12021_v61 = vunpack.i.h.bf16 %v12019_v13  ;;  %vm2421_vm2 = vcmp.gt.f32.partialorder %v2005_v46, 0.0 }
 0x3ea   :  { %v10951_v37 = vpop.f32.mrf.mxu1 }
 0x3eb   :  { %6174 = vmatprep.mubr.bf16.mxu1 %v5752_v43  ;;  %v2677_v43 = vmul.f32 0.2, %v2005_v46 }
 0x3ec   :  { %v10952_v47 = vpop.f32.mrf.mxu1  ;;  %6175 = vmatmul.mubr.bf16.gmra.mxu1 %v5751_v5 }
 0x3ed   :  { %v16924_v44 = vadd.f32 %v10952_v47, %v10951_v37  ;;  %6182 = vmatprep.mubr.bf16.mxu1 %v5756_v24  ;;  %v2871_v37 = vsel %vm2359_vm15, %v1757_v55, %v2615_v29  ;;  %v12020_v47 = vunpack.i.l.bf16 %v12019_v13  ;;  %v12016_v24 = vunpack.i.h.bf16 %v12014_v36 }
 0x3ee   :  { %v16930_v52 = vpop.f32.mrf.mxu1  ;;  %v4663_v5 = vmul.f32 %v16846_v31, %v2871_v37 }
 0x3f0   :  { %v16935_v9 = vpop.f32.mrf.mxu1  ;;  %v5176_v1 = vsel %vm4843_vm4, %v4663_v5, %v12015_v42  ;;  %v5335_v42 = vsel %vm4843_vm4, %v16806_v53, %v11976_v0 }
 0x3f1   :  { %v16950_v55 = vsel %vm5484_vm0, %v5176_v1, %v12020_v47  ;;  %v12034_v47 = vpop.permute.xlu1 %12033 }
 0x3f2   :  { %v10957_v25 = vpop.f32.mrf.mxu1  ;;  %v3951_v4 = vpop.permute.xlu0 %3950 }
 0x3f3   :  { %v4664_v8 = vmul.f32 %v3951_v4, %v2872_v32 }
 0x3f4   :  { %v10958_v7 = vpop.f32.mrf.mxu1  ;;  %6183 = vmatmul.mubr.bf16.gmra.mxu1 %v5755_v56  ;;  %v2933_v56 = vsel %vm2421_vm2, %v2005_v46, %v2677_v43  ;;  %v1768_v46 = vadd.f32 %v16698_v6, %v19299_v54  ;;  %v19300_v43 = vld [vmem:[#allocation98_spill] sm:$0xff] }
 0x3f5   :  { %v16939_v14 = vadd.f32 %v10958_v7, %v10957_v25  ;;  %v5177_v15 = vsel %vm4843_vm4, %v4664_v8, %v12016_v24  ;;  %v4725_v58 = vmul.f32 %v16791_v39, %v2933_v56  ;;  %v19298_v7 = vld [vmem:[#allocation71_spill] sm:$0xff]  ;;  %v2013_v1 = vadd.f32 %v16698_v6, %v19300_v43  ;;  %v19303_v43 = vld [vmem:[#allocation113_spill] sm:$0xff] }
 0x3f6   :  { %v16947_v25 = vpop.permute.xlu0 %11998  ;;  %v16953_v31 = vsel %vm5484_vm0, %v5177_v15, %v12021_v61  ;;  %v1765_v3 = vadd.f32 %v16698_v6, %v19298_v7  ;;  %v19301_v15 = vld [vmem:[#allocation78_spill] sm:$0xff]  ;;  %v2618_v56 = vmul.f32 0.2, %v1768_v46  ;;  %vm2362_vm5 = vcmp.gt.f32.partialorder %v1768_v46, 0.0 }
 0x3f7   :  { %v5767_v36 = vpack.c.bf16 %v16953_v31, %v16950_v55  ;;  %v5334_v37 = vsel %vm4843_vm4, %v4725_v58, %v11975_v19  ;;  %v2016_v53 = vadd.f32 %v16698_v6, %v19301_v15  ;;  %vm2423_vm6 = vcmp.gt.f32.partialorder %v2013_v1, 0.0 }
 0x3f8   :  { %v2617_v61 = vmul.f32 0.2, %v1765_v3  ;;  %vm2361_vm3 = vcmp.gt.f32.partialorder %v1765_v3, 0.0  ;;  %v12001_v50 = vunpack.i.h.bf16 %v16947_v25  ;;  %v12000_v49 = vunpack.i.l.bf16 %v16947_v25 }
 0x3f9   :  { %v2680_v7 = vmul.f32 0.2, %v2016_v53  ;;  %vm2424_vm7 = vcmp.gt.f32.partialorder %v2016_v53, 0.0  ;;  %v10920_v55 = vadd.f32 %v16852_v59, %v16850_v21 }
 0x3fa   :  { %v12004_v29 = vpop.permute.xlu0 %12003 }
 0x3fb   :  { %v12006_v41 = vunpack.i.h.bf16 %v12004_v29  ;;  %v12005_v13 = vunpack.i.l.bf16 %v12004_v29  ;;  %v2936_v15 = vsel %vm2424_vm7, %v2016_v53, %v2680_v7 }
 0x3fd   :  { %v5735_v32 = vsel %vm5484_vm0, %v5334_v37, %v12005_v13  ;;  %v5736_v4 = vsel %vm5484_vm0, %v5335_v42, %v12006_v41  ;;  %v12044_v41 = vpop.permute.xlu1 %12043  ;;  %v2679_v13 = vmul.f32 0.2, %v2013_v1  ;;  %v2873_v42 = vsel %vm2361_vm3, %v1765_v3, %v2617_v61 }
 0x3fe   :  { %v12009_v39 = vpop.permute.xlu0 %12008  ;;  %v5764_v5 = vpack.c.bf16 %v5736_v4, %v5735_v32  ;;  %v12035_v37 = vunpack.i.l.bf16 %v12034_v47  ;;  %v2874_v32 = vsel %vm2362_vm5, %v1768_v46, %v2618_v56  ;;  %v19302_v4 = vld [vmem:[#allocation145_spill] sm:$0xff]  ;;  %v2024_v3 = vadd.f32 %v16698_v6, %v19303_v43 }
 0x3ff   :  { %v12011_v24 = vunpack.i.h.bf16 %v12009_v39  ;;  %v12010_v8 = vunpack.i.l.bf16 %v12009_v39  ;;  %v2021_v54 = vadd.f32 %v16698_v6, %v19302_v4  ;;  %v4665_v39 = vmul.f32 %v16922_v62, %v2873_v42 }
 0x400   :  { %v12046_v61 = vunpack.i.h.bf16 %v12044_v41  ;;  %v4728_v62 = vmul.f32 %v16906_v35, %v2936_v15  ;;  %v2682_v53 = vmul.f32 0.2, %v2024_v3  ;;  %vm2426_vm9 = vcmp.gt.f32.partialorder %v2024_v3, 0.0 }
 0x401   :  { %v5733_v0 = vsel %vm5484_vm0, %v16800_v60, %v12010_v8  ;;  %v5734_v19 = vsel %vm5484_vm0, %v16797_v48, %v12011_v24  ;;  %v12045_v60 = vunpack.i.l.bf16 %v12044_v41  ;;  %v12036_v24 = vunpack.i.h.bf16 %v12034_v47 }
 0x402   :  { %v5760_v29 = vpack.c.bf16 %v5734_v19, %v5733_v0  ;;  %v5178_v46 = vsel %vm4843_vm4, %v4665_v39, %v12035_v37  ;;  %v5337_v25 = vsel %vm4843_vm4, %v4728_v62, %v12001_v50  ;;  %vm2425_vm8 = vcmp.gt.f32.partialorder %v2021_v54, 0.0 }
 0x403   :  { %v5659_v19 = vsel %vm5484_vm0, %v5178_v46, %v12045_v60 }
 0x404   :  { %v4281_v58 = vpop.permute.xlu0 %4280  ;;  %6190 = vmatprep.mubr.bf16.mxu1 %v5760_v29 }
 0x405   :  { %6191 = vmatmul.mubr.bf16.gmra.mxu1 %v5759_v45  ;;  %v2935_v45 = vsel %vm2423_vm6, %v2013_v1, %v2679_v13  ;;  %v2681_v13 = vmul.f32 0.2, %v2021_v54 }
 0x406   :  { %6198 = vmatprep.mubr.bf16.mxu1 %v5764_v5  ;;  %v4727_v0 = vmul.f32 %v16835_v30, %v2935_v45 }
 0x408   :  { %v3961_v48 = vpop.permute.xlu0 %3960  ;;  %v5336_v1 = vsel %vm4843_vm4, %v4727_v0, %v12000_v49 }
 0x409   :  { %v4666_v8 = vmul.f32 %v3961_v48, %v2874_v32  ;;  %v2937_v32 = vsel %vm2425_vm8, %v2021_v54, %v2681_v13  ;;  %v2938_v48 = vsel %vm2426_vm9, %v2024_v3, %v2682_v53 }
 0x40a   :  { %v4729_v4 = vmul.f32 %v16904_v12, %v2937_v32  ;;  %v4730_v39 = vmul.f32 %v4281_v58, %v2938_v48  ;;  %v17008_v12 = vpop.f32.mrf.mxu1 }
 0x40b   :  { %v5179_v5 = vsel %vm4843_vm4, %v4666_v8, %v12036_v24 }
 0x40c   :  { %v12024_v47 = vpop.permute.xlu0 %12023  ;;  %v5660_v6 = vsel %vm5484_vm0, %v5179_v5, %v12046_v61  ;;  %v17010_v58 = vpop.f32.mrf.mxu1 }
 0x40d   :  { %v12026_v56 = vunpack.i.h.bf16 %v12024_v47  ;;  %v12025_v29 = vunpack.i.l.bf16 %v12024_v47  ;;  %v5771_v41 = vpack.c.bf16 %v5660_v6, %v5659_v19  ;;  %6199 = vmatmul.mubr.bf16.gmra.mxu1 %v5763_v57 }
 0x40f   :  { %v5737_v30 = vsel %vm5484_vm0, %v5336_v1, %v12025_v29  ;;  %v5738_v35 = vsel %vm5484_vm0, %v5337_v25, %v12026_v56 }
 0x410   :  { %v12029_v7 = vpop.permute.xlu0 %12028  ;;  %v5768_v42 = vpack.c.bf16 %v5738_v35, %v5737_v30 }
 0x411   :  { %v12031_v37 = vunpack.i.h.bf16 %v12029_v7  ;;  %v12030_v60 = vunpack.i.l.bf16 %v12029_v7 }
 0x412   :  { %6206 = vmatprep.mubr.bf16.mxu1 %v5768_v42 }
 0x413   :  { %v5339_v16 = vsel %vm4843_vm4, %v4730_v39, %v12031_v37  ;;  %v5338_v57 = vsel %vm4843_vm4, %v4729_v4, %v12030_v60 }
 0x414   :  { %v12039_v24 = vpop.permute.xlu0 %12038 }
 0x415   :  { %v12041_v8 = vunpack.i.h.bf16 %v12039_v24  ;;  %v12040_v51 = vunpack.i.l.bf16 %v12039_v24  ;;  %6207 = vmatmul.mubr.bf16.gmra.mxu1 %v5767_v36 }
 0x417   :  { %v5739_v43 = vsel %vm5484_vm0, %v5338_v57, %v12040_v51  ;;  %v5740_v61 = vsel %vm5484_vm0, %v5339_v16, %v12041_v8 }
 0x418   :  { %v5772_v54 = vpack.c.bf16 %v5740_v61, %v5739_v43 }
 0x41a   :  { %6214 = vmatprep.mubr.bf16.mxu1 %v5772_v54 }
 0x41d   :  { %6215 = vmatmul.mubr.bf16.gmra.mxu1 %v5771_v41 }
 0x493   :  { %v10979_v3 = vpop.f32.mrf.mxu1 }
 0x495   :  { %v10980_v50 = vpop.f32.mrf.mxu1 }
 0x496   :  { %v10981_v49 = vadd.f32 %v10980_v50, %v10979_v3 }
 0x497   :  { %v10982_v45 = vpop.f32.mrf.mxu1 }
 0x498   :  { %v17015_v31 = vadd.f32 %v10981_v49, %v16848_v18  ;;  %v10926_v18 = vadd.f32 %v16868_v17, %v16866_v2  ;;  %v10932_v2 = vadd.f32 %v16878_v33, %v16872_v34  ;;  %v10938_v34 = vadd.f32 %v16891_v63, %v16886_v20 }
 0x499   :  { %v10983_v46 = vpop.f32.mrf.mxu1  ;;  %v10944_v20 = vadd.f32 %v16902_v11, %v16897_v23 }
 0x49a   :  { %v10984_v36 = vadd.f32 %v10983_v46, %v10982_v45  ;;  %v6223_v62 = vsel %vm5484_vm0, %v17015_v31, 0.0 }
 0x49b   :  { %v10985_v15 = vpop.f32.mrf.mxu1 }
 0x49c   :  { %v17017_v5 = vadd.f32 %v10984_v36, %v10920_v55 }
 0x49d   :  { %v10986_v0 = vpop.f32.mrf.mxu1 }
 0x49e   :  { %v6224_v47 = vsel %vm5484_vm0, %v17017_v5, 0.0  ;;  %v10987_v19 = vadd.f32 %v10986_v0, %v10985_v15 }
 0x49f   :  { %v6225_v6 = vadd.f32 %v6224_v47, %v6223_v62  ;;  %v10988_v56 = vpop.f32.mrf.mxu1 }
 0x4a0   :  { %v17024_v29 = vadd.f32 %v10987_v19, %v16864_v22 }
 0x4a1   :  { %v10989_v21 = vpop.f32.mrf.mxu1 }
 0x4a2   :  { %v6226_v59 = vsel %vm5484_vm0, %v17024_v29, 0.0  ;;  %v10990_v41 = vadd.f32 %v10989_v21, %v10988_v56 }
 0x4a3   :  { %v6227_v25 = vadd.f32 %v6226_v59, %v6225_v6 }
 0x4a4   :  { %v17030_v1 = vadd.f32 %v10990_v41, %v10926_v18  ;;  %v10950_v41 = vadd.f32 %v16912_v26, %v16910_v28 }
 0x4a6   :  { %v6228_v13 = vsel %vm5484_vm0, %v17030_v1, 0.0 }
 0x4a7   :  { %v6229_v53 = vadd.f32 %v6228_v13, %v6227_v25 }
 0x4ac   :  { %v10991_v30 = vpop.f32.mrf.mxu1 }
 0x4ae   :  { %v10992_v35 = vpop.f32.mrf.mxu1 }
 0x4af   :  { %v10993_v7 = vadd.f32 %v10992_v35, %v10991_v30 }
 0x4b0   :  { %v10994_v22 = vpop.f32.mrf.mxu1 }
 0x4b1   :  { %v17035_v42 = vadd.f32 %v10993_v7, %v16870_v27 }
 0x4b2   :  { %v10995_v37 = vpop.f32.mrf.mxu1 }
 0x4b3   :  { %v6230_v17 = vsel %vm5484_vm0, %v17035_v42, 0.0  ;;  %v10996_v60 = vadd.f32 %v10995_v37, %v10994_v22 }
 0x4b4   :  { %v6231_v32 = vadd.f32 %v6230_v17, %v6229_v53  ;;  %v10997_v48 = vpop.f32.mrf.mxu1 }
 0x4b5   :  { %v17041_v4 = vadd.f32 %v10996_v60, %v10932_v2 }
 0x4b6   :  { %v10998_v39 = vpop.f32.mrf.mxu1 }
 0x4b7   :  { %v6232_v24 = vsel %vm5484_vm0, %v17041_v4, 0.0  ;;  %v10999_v8 = vadd.f32 %v10998_v39, %v10997_v48 }
 0x4b8   :  { %v6233_v51 = vadd.f32 %v6232_v24, %v6231_v32  ;;  %v11000_v27 = vpop.f32.mrf.mxu1 }
 0x4b9   :  { %v17046_v16 = vadd.f32 %v10999_v8, %v16884_v40 }
 0x4ba   :  { %v11001_v57 = vpop.f32.mrf.mxu1 }
 0x4bb   :  { %v6234_v33 = vsel %vm5484_vm0, %v17046_v16, 0.0  ;;  %v11002_v43 = vadd.f32 %v11001_v57, %v11000_v27 }
 0x4bc   :  { %v6235_v61 = vadd.f32 %v6234_v33, %v6233_v51 }
 0x4bd   :  { %v17052_v54 = vadd.f32 %v11002_v43, %v10938_v34 }
 0x4bf   :  { %v6236_v3 = vsel %vm5484_vm0, %v17052_v54, 0.0 }
 0x4c0   :  { %v6237_v50 = vadd.f32 %v6236_v3, %v6235_v61  ;;  %v12295_v61 = vld [vmem:[%s18570_s7] sm:$0xff]  }
 0x4c1   :  { %11477 = vmatprep.mubr.bf16.mxu1 %v12295_v61 }
 0x4c5   :  { %v11003_v49 = vpop.f32.mrf.mxu1 }
 0x4c7   :  { %v11004_v45 = vpop.f32.mrf.mxu1 }
 0x4c8   :  { %v11005_v46 = vadd.f32 %v11004_v45, %v11003_v49 }
 0x4c9   :  { %v11006_v40 = vpop.f32.mrf.mxu1 }
 0x4ca   :  { %v17057_v55 = vadd.f32 %v11005_v46, %v16895_v10 }
 0x4cb   :  { %v11007_v36 = vpop.f32.mrf.mxu1 }
 0x4cc   :  { %v6238_v63 = vsel %vm5484_vm0, %v17057_v55, 0.0  ;;  %v11008_v15 = vadd.f32 %v11007_v36, %v11006_v40 }
 0x4cd   :  { %v6239_v0 = vadd.f32 %v6238_v63, %v6237_v50  ;;  %v11009_v62 = vpop.f32.mrf.mxu1 }
 0x4ce   :  { %v6196_v47 = vadd.f32 %v11008_v15, %v10944_v20 }
 0x4cf   :  { %v11010_v19 = vpop.f32.mrf.mxu1 }
 0x4d0   :  { %v6240_v6 = vsel %vm5484_vm0, %v6196_v47, 0.0  ;;  %v11011_v56 = vadd.f32 %v11010_v19, %v11009_v62 }
 0x4d1   :  { %v6241_v21 = vadd.f32 %v6240_v6, %v6239_v0  ;;  %v11012_v18 = vpop.f32.mrf.mxu1 }
 0x4d2   :  { %v6201_v10 = vadd.f32 %v11011_v56, %v16908_v38  ;;  %v10956_v38 = vadd.f32 %v16935_v9, %v16930_v52 }
 0x4d3   :  { %v11013_v59 = vpop.f32.mrf.mxu1 }
 0x4d4   :  { %v6242_v23 = vsel %vm5484_vm0, %v6201_v10, 0.0  ;;  %v11014_v11 = vadd.f32 %v11013_v59, %v11012_v18 }
 0x4d5   :  { %v6243_v25 = vadd.f32 %v6242_v23, %v6241_v21  ;;  %v11015_v13 = vpop.f32.mrf.mxu1 }
 0x4d6   :  { %v6204_v53 = vadd.f32 %v11014_v11, %v10950_v41 }
 0x4d7   :  { %v11016_v30 = vpop.f32.mrf.mxu1 }
 0x4d8   :  { %v6244_v35 = vsel %vm5484_vm0, %v6204_v53, 0.0  ;;  %v11017_v7 = vadd.f32 %v11016_v30, %v11015_v13 }
 0x4d9   :  { %v6245_v22 = vadd.f32 %v6244_v35, %v6243_v25  ;;  %v11018_v37 = vpop.f32.mrf.mxu1 }
 0x4da   :  { %v6209_v2 = vadd.f32 %v11017_v7, %v16924_v44  ;;  %v10962_v44 = vadd.f32 %v17010_v58, %v17008_v12 }
 0x4db   :  { %v11019_v17 = vpop.f32.mrf.mxu1 }
 0x4dc   :  { %v6246_v28 = vsel %vm5484_vm0, %v6209_v2, 0.0  ;;  %v11020_v26 = vadd.f32 %v11019_v17, %v11018_v37 }
 0x4dd   :  { %v6247_v60 = vadd.f32 %v6246_v28, %v6245_v22  ;;  %v11021_v32 = vpop.f32.mrf.mxu1 }
 0x4de   :  { %v6212_v48 = vadd.f32 %v11020_v26, %v10956_v38 }
 0x4df   :  { %v11022_v39 = vpop.f32.mrf.mxu1 }
 0x4e0   :  { %v6248_v24 = vsel %vm5484_vm0, %v6212_v48, 0.0  ;;  %v11023_v8 = vadd.f32 %v11022_v39, %v11021_v32 }
 0x4e1   :  { %v6249_v51 = vadd.f32 %v6248_v24, %v6247_v60  ;;  %v11024_v27 = vpop.f32.mrf.mxu1 }
 0x4e2   :  { %v6217_v57 = vadd.f32 %v11023_v8, %v16939_v14 }
 0x4e3   :  { %v11025_v34 = vpop.f32.mrf.mxu1 }
 0x4e4   :  { %v6250_v52 = vsel %vm5484_vm0, %v6217_v57, 0.0  ;;  %v11026_v9 = vadd.f32 %v11025_v34, %v11024_v27 }
 0x4e5   :  { %v6251_v33 = vadd.f32 %v6250_v52, %v6249_v51 }
 0x4e6   :  { %v6220_v43 = vadd.f32 %v11026_v9, %v10962_v44 }
 0x4e8   :  { %v6252_v3 = vsel %vm5484_vm0, %v6220_v43, 0.0 }
 0x4e9   :  { %v6253_v50 = vadd.f32 %v6252_v3, %v6251_v33 }
 0x4eb   :  { %v6254_v49 = vrot.slane %v6253_v50, 4 }
 0x4ed   :  { %v6255_v45 = vadd.f32 %v6254_v49, %v6253_v50 }
 0x4ef   :  { %v6256_v14 = vrot.slane %v6255_v45, 2 }
 0x4f1   :  { %v6257_v46 = vadd.f32 %v6256_v14, %v6255_v45 }
 0x4f3   :  { %v6258_v40 = vrot.slane %v6257_v46, 1 }
 0x4f5   :  { %v6259_v36 = vadd.f32 %v6258_v40, %v6257_v46 }
 0x4f7   :  { %v6261_v12 = vmul.f32 0.0078125, %v6259_v36 }
 0x4f9   :  { %v17083_v58 = vsub.f32 %v17015_v31, %v6261_v12  ;;  %v17086_v20 = vsub.f32 %v17017_v5, %v6261_v12  ;;  %v17089_v63 = vsub.f32 %v17024_v29, %v6261_v12  ;;  %v17092_v15 = vsub.f32 %v17030_v1, %v6261_v12 }
 0x4fa   :  { %v17095_v0 = vsub.f32 %v17035_v42, %v6261_v12  ;;  %v17098_v62 = vsub.f32 %v17041_v4, %v6261_v12  ;;  %v17101_v19 = vsub.f32 %v17046_v16, %v6261_v12  ;;  %v17104_v31 = vsub.f32 %v17052_v54, %v6261_v12 }
 0x4fb   :  { %v17107_v5 = vsub.f32 %v17057_v55, %v6261_v12  ;;  %v17109_v29 = vsub.f32 %v6196_v47, %v6261_v12  ;;  %v17111_v6 = vsub.f32 %v6201_v10, %v6261_v12  ;;  %v17113_v1 = vsub.f32 %v6204_v53, %v6261_v12 }
 0x4fc   :  { %v17115_v42 = vsub.f32 %v6209_v2, %v6261_v12  ;;  %v17117_v56 = vsub.f32 %v6212_v48, %v6261_v12  ;;  %v17119_v4 = vsub.f32 %v6217_v57, %v6261_v12  ;;  %v6277_v16 = vsub.f32 %v6220_v43, %v6261_v12 }
 0x4fd   :  { %v6278_v54 = vmul.f32 %v17083_v58, %v17083_v58  ;;  %v6279_v55 = vmul.f32 %v17086_v20, %v17086_v20  ;;  %v6280_v47 = vmul.f32 %v17089_v63, %v17089_v63  ;;  %v6281_v21 = vmul.f32 %v17092_v15, %v17092_v15 }
 0x4fe   :  { %v6282_v41 = vmul.f32 %v17095_v0, %v17095_v0  ;;  %v6283_v25 = vmul.f32 %v17098_v62, %v17098_v62  ;;  %v6284_v30 = vmul.f32 %v17101_v19, %v17101_v19  ;;  %v6285_v22 = vmul.f32 %v17104_v31, %v17104_v31 }
 0x4ff   :  { %v6294_v18 = vsel %vm5484_vm0, %v6278_v54, 0.0  ;;  %v6295_v10 = vsel %vm5484_vm0, %v6279_v55, 0.0  ;;  %v6297_v23 = vsel %vm5484_vm0, %v6280_v47, 0.0  ;;  %v6299_v13 = vsel %vm5484_vm0, %v6281_v21, 0.0 }
 0x500   :  { %v6296_v59 = vadd.f32 %v6295_v10, %v6294_v18  ;;  %v6301_v35 = vsel %vm5484_vm0, %v6282_v41, 0.0  ;;  %v6303_v37 = vsel %vm5484_vm0, %v6283_v25, 0.0  ;;  %v6286_v17 = vmul.f32 %v17107_v5, %v17107_v5 }
 0x501   :  { %v6305_v38 = vsel %vm5484_vm0, %v6284_v30, 0.0  ;;  %v6287_v26 = vmul.f32 %v17109_v29, %v17109_v29  ;;  %v6307_v60 = vsel %vm5484_vm0, %v6285_v22, 0.0  ;;  %v6288_v48 = vmul.f32 %v17111_v6, %v17111_v6  ;;  %v17184_v30 = vld [vmem:[%s18572_s6] ss:$0 sm:$0xff] }
 0x502   :  { %v6298_v11 = vadd.f32 %v6297_v23, %v6296_v59  ;;  %v6309_v39 = vsel %vm5484_vm0, %v6286_v17, 0.0  ;;  %v6289_v8 = vmul.f32 %v17113_v1, %v17113_v1  ;;  %v6290_v57 = vmul.f32 %v17115_v42, %v17115_v42  ;;  %v17172_v23 = vld [vmem:[%s18571_s5] ss:$0 sm:$0xff] }
 0x503   :  { %v6311_v51 = vsel %vm5484_vm0, %v6287_v26, 0.0  ;;  %v6313_v34 = vsel %vm5484_vm0, %v6288_v48, 0.0  ;;  %v6291_v52 = vmul.f32 %v17117_v56, %v17117_v56  ;;  %v6292_v43 = vmul.f32 %v17119_v4, %v17119_v4 }
 0x504   :  { %v6300_v53 = vadd.f32 %v6299_v13, %v6298_v11  ;;  %v6315_v9 = vsel %vm5484_vm0, %v6289_v8, 0.0  ;;  %v6317_v61 = vsel %vm5484_vm0, %v6290_v57, 0.0  ;;  %v6293_v50 = vmul.f32 %v6277_v16, %v6277_v16 }
 0x505   :  { %v6319_v49 = vsel %vm5484_vm0, %v6291_v52, 0.0  ;;  %v6321_v14 = vsel %vm5484_vm0, %v6292_v43, 0.0 }
 0x506   :  { %v6302_v7 = vadd.f32 %v6301_v35, %v6300_v53  ;;  %v6323_v40 = vsel %vm5484_vm0, %v6293_v50, 0.0 }
 0x508   :  { %v6304_v2 = vadd.f32 %v6303_v37, %v6302_v7 }
 0x50a   :  { %v6306_v28 = vadd.f32 %v6305_v38, %v6304_v2 }
 0x50c   :  { %v6308_v32 = vadd.f32 %v6307_v60, %v6306_v28 }
 0x50e   :  { %v6310_v24 = vadd.f32 %v6309_v39, %v6308_v32 }
 0x510   :  { %v6312_v27 = vadd.f32 %v6311_v51, %v6310_v24 }
 0x512   :  { %v6314_v44 = vadd.f32 %v6313_v34, %v6312_v27 }
 0x514   :  { %v6316_v33 = vadd.f32 %v6315_v9, %v6314_v44 }
 0x516   :  { %v6318_v3 = vadd.f32 %v6317_v61, %v6316_v33 }
 0x518   :  { %v6320_v45 = vadd.f32 %v6319_v49, %v6318_v3 }
 0x51a   :  { %v6322_v46 = vadd.f32 %v6321_v14, %v6320_v45 }
 0x51c   :  { %v6324_v36 = vadd.f32 %v6323_v40, %v6322_v46 }
 0x51e   :  { %v6325_v12 = vrot.slane %v6324_v36, 4 }
 0x520   :  { %v6326_v54 = vadd.f32 %v6325_v12, %v6324_v36 }
 0x522   :  { %v6327_v55 = vrot.slane %v6326_v54, 2 }
 0x524   :  { %v6328_v47 = vadd.f32 %v6327_v55, %v6326_v54 }
 0x526   :  { %v6329_v21 = vrot.slane %v6328_v47, 1 }
 0x528   :  { %v6330_v18 = vadd.f32 %v6329_v21, %v6328_v47 }
 0x52a   :  { %v6331_v10 = vmul.f32 0.0078125, %v6330_v18 }
 0x52c   :  { %v6332_v59 = vadd.f32 1e-05, %v6331_v10 }
 0x52e   :  { %12783 = vrsqrt.f32 %v6332_v59 }
 0x53b   :  { %v17167_v41 = vpop.eup %12783 }
 0x53c   :  { %v6349_v11 = vmul.f32 %v17167_v41, %v6277_v16  ;;  %v6348_v25 = vmul.f32 %v17167_v41, %v17119_v4  ;;  %v6346_v13 = vmul.f32 %v17167_v41, %v17115_v42  ;;  %v6347_v53 = vmul.f32 %v17167_v41, %v17117_v56 }
 0x53d   :  { %v6344_v35 = vmul.f32 %v17167_v41, %v17111_v6  ;;  %v6345_v16 = vmul.f32 %v17167_v41, %v17113_v1  ;;  %v6342_v4 = vmul.f32 %v17167_v41, %v17107_v5  ;;  %v6343_v42 = vmul.f32 %v17167_v41, %v17109_v29 }
 0x53e   :  { %v6372_v7 = vmul.f32 %v17172_v23, %v6349_v11  ;;  %v6371_v56 = vmul.f32 %v17172_v23, %v6348_v25  ;;  %v6369_v22 = vmul.f32 %v17172_v23, %v6346_v13  ;;  %v6370_v37 = vmul.f32 %v17172_v23, %v6347_v53 }
 0x53f   :  { %v6367_v2 = vmul.f32 %v17172_v23, %v6344_v35  ;;  %v6368_v6 = vmul.f32 %v17172_v23, %v6345_v16  ;;  %v6365_v1 = vmul.f32 %v17172_v23, %v6342_v4  ;;  %v6366_v17 = vmul.f32 %v17172_v23, %v6343_v42 }
 0x540   :  { %v6394_v5 = vadd.f32 %v17184_v30, %v6371_v56  ;;  %v6395_v29 = vadd.f32 %v17184_v30, %v6372_v7  ;;  %v6392_v38 = vadd.f32 %v17184_v30, %v6369_v22  ;;  %v6393_v28 = vadd.f32 %v17184_v30, %v6370_v37 }
 0x541   :  { %v6390_v26 = vadd.f32 %v17184_v30, %v6367_v2  ;;  %v6391_v60 = vadd.f32 %v17184_v30, %v6368_v6  ;;  %v6388_v32 = vadd.f32 %v17184_v30, %v6365_v1  ;;  %v6389_v48 = vadd.f32 %v17184_v30, %v6366_v17 }
 0x542   :  { %vm6410_vm10 = vcmp.gt.f32.partialorder %v6394_v5, 0.0  ;;  %vm6411_vm11 = vcmp.gt.f32.partialorder %v6395_v29, 0.0  ;;  %v6426_v39 = vmul.f32 0.2, %v6394_v5  ;;  %v6427_v24 = vmul.f32 0.2, %v6395_v29 }
 0x543   :  { %vm6408_vm12 = vcmp.gt.f32.partialorder %v6392_v38, 0.0  ;;  %vm6409_vm13 = vcmp.gt.f32.partialorder %v6393_v28, 0.0  ;;  %v6424_v8 = vmul.f32 0.2, %v6392_v38  ;;  %v6425_v51 = vmul.f32 0.2, %v6393_v28 }
 0x544   :  { %v6442_v27 = vsel %vm6410_vm10, %v6394_v5, %v6426_v39  ;;  %v6443_v57 = vsel %vm6411_vm11, %v6395_v29, %v6427_v24  ;;  %vm6406_vm14 = vcmp.gt.f32.partialorder %v6390_v26, 0.0  ;;  %vm6407_vm15 = vcmp.gt.f32.partialorder %v6391_v60, 0.0  ;;  %v12297_v24 = vld [vmem:[%s18570_s7 + $0x10] sm:$0xff]  }
 0x545   :  { %v6515_v34 = vpack.c.bf16 %v6443_v57, %v6442_v27  ;;  %v6440_v44 = vsel %vm6408_vm12, %v6392_v38, %v6424_v8  ;;  %v6441_v52 = vsel %vm6409_vm13, %v6393_v28, %v6425_v51  ;;  %v6422_v9 = vmul.f32 0.2, %v6390_v26  ;;  %v12298_v8 = vld [vmem:[%s18570_s7 + $0x18] sm:$0xff]   ;;  %v12299_v51 = vld [vmem:[%s18570_s7 + $0x20] sm:$0xff]   ;;  %v12300_v27 = vld [vmem:[%s18570_s7 + $0x28] sm:$0xff]  }
 0x546   :  { %v6514_v33 = vpack.c.bf16 %v6441_v52, %v6440_v44  ;;  %v6423_v43 = vmul.f32 0.2, %v6391_v60  ;;  %vm6404_vm1 = vcmp.gt.f32.partialorder %v6388_v32, 0.0  ;;  %vm6405_vm2 = vcmp.gt.f32.partialorder %v6389_v48, 0.0  ;;  %v12301_v57 = vld [vmem:[%s18570_s7 + $0x30] sm:$0xff]   ;;  %v12303_v44 = vld [vmem:[%s18570_s7 + $0x40] sm:$0xff]  }
 0x547   :  { %11461 = vmatprep.subr.bf16.mxu1 %v6515_v34  ;;  %v6438_v61 = vsel %vm6406_vm14, %v6390_v26, %v6422_v9  ;;  %v6420_v3 = vmul.f32 0.2, %v6388_v32  ;;  %v6421_v50 = vmul.f32 0.2, %v6389_v48  ;;  %v6340_v49 = vmul.f32 %v17167_v41, %v17101_v19  ;;  %v12304_v52 = vld [vmem:[%s18570_s7 + $0x48] sm:$0xff]   ;;  %v12305_v9 = vld [vmem:[%s18570_s7 + $0x50] sm:$0xff]  }
 0x548   :  { %11462 = vmatpush3.bf16.msra.mxu1 %v6515_v34  ;;  %v6439_v45 = vsel %vm6407_vm15, %v6391_v60, %v6423_v43  ;;  %v6341_v14 = vmul.f32 %v17167_v41, %v17104_v31  ;;  %v6338_v46 = vmul.f32 %v17167_v41, %v17095_v0  ;;  %v6339_v40 = vmul.f32 %v17167_v41, %v17098_v62  ;;  %v12302_v34 = vld [vmem:[%s18570_s7 + $0x38] sm:$0xff]   ;;  %v12307_v43 = vld [vmem:[%s18570_s7 + $0x60] sm:$0xff]  }
 0x549   :  { %11463 = vmatprep.subr.bf16.mxu1 %v6514_v33  ;;  %v6513_v36 = vpack.c.bf16 %v6439_v45, %v6438_v61  ;;  %v6436_v12 = vsel %vm6404_vm1, %v6388_v32, %v6420_v3  ;;  %v6437_v54 = vsel %vm6405_vm2, %v6389_v48, %v6421_v50  ;;  %v6363_v55 = vmul.f32 %v17172_v23, %v6340_v49  ;;  %v12308_v61 = vld [vmem:[%s18570_s7 + $0x68] sm:$0xff]   ;;  %v12309_v3 = vld [vmem:[%s18570_s7 + $0x70] sm:$0xff]   ;;  %v12310_v50 = vld [vmem:[%s18570_s7 + $0x78] sm:$0xff]  }
 0x54a   :  { %v6512_v47 = vpack.c.bf16 %v6437_v54, %v6436_v12  ;;  %v6364_v19 = vmul.f32 %v17172_v23, %v6341_v14  ;;  %v6361_v21 = vmul.f32 %v17172_v23, %v6338_v46  ;;  %v6362_v18 = vmul.f32 %v17172_v23, %v6339_v40  ;;  %v12311_v49 = vld [vmem:[%s18570_s7 + $0x80] sm:$0xff]   ;;  %v12312_v45 = vld [vmem:[%s18570_s7 + $0x88] sm:$0xff]   ;;  %v12313_v14 = vld [vmem:[%s18570_s7 + $0x90] sm:$0xff]  }
 0x54b   :  { %v6386_v31 = vadd.f32 %v17184_v30, %v6363_v55  ;;  %v6336_v0 = vmul.f32 %v17167_v41, %v17089_v63  ;;  %v6337_v62 = vmul.f32 %v17167_v41, %v17092_v15  ;;  %v6334_v10 = vmul.f32 %v17167_v41, %v17083_v58  ;;  %v12314_v46 = vld [vmem:[%s18570_s7 + $0x98] sm:$0xff]   ;;  %v12315_v40 = vld [vmem:[%s18570_s7 + $0xa0] sm:$0xff]   ;;  %v12317_v12 = vld [vmem:[%s18570_s7 + $0xb0] sm:$0xff]  }
 0x54c   :  { %11464 = vmatpush3.bf16.msra.mxu1 %v6514_v33  ;;  %v6387_v59 = vadd.f32 %v17184_v30, %v6364_v19  ;;  %v6384_v11 = vadd.f32 %v17184_v30, %v6361_v21  ;;  %v6385_v25 = vadd.f32 %v17184_v30, %v6362_v18  ;;  %v6335_v13 = vmul.f32 %v17167_v41, %v17086_v20  ;;  %v12306_v33 = vld [vmem:[%s18570_s7 + $0x58] sm:$0xff]   ;;  %v12319_v55 = vld [vmem:[%s18570_s7 + $0xc0] sm:$0xff]   ;;  %v12321_v19 = vld [vmem:[%s18570_s7 + $0xd0] sm:$0xff]  }
 0x54d   :  { %11465 = vmatprep.subr.bf16.mxu1 %v6513_v36  ;;  %vm6402_vm3 = vcmp.gt.f32.partialorder %v6386_v31, 0.0  ;;  %v6418_v53 = vmul.f32 0.2, %v6386_v31  ;;  %v6359_v63 = vmul.f32 %v17172_v23, %v6336_v0  ;;  %v6360_v15 = vmul.f32 %v17172_v23, %v6337_v62  ;;  %v12318_v54 = vld [vmem:[%s18570_s7 + $0xb8] sm:$0xff]   ;;  %v12323_v18 = vld [vmem:[%s18570_s7 + $0xe0] sm:$0xff]   ;;  %v12325_v0 = vld [vmem:[%s18570_s7 + $0xf0] sm:$0xff]  }
 0x54e   :  { %vm6403_vm5 = vcmp.gt.f32.partialorder %v6387_v59, 0.0  ;;  %v6419_v35 = vmul.f32 0.2, %v6387_v59  ;;  %vm6400_vm6 = vcmp.gt.f32.partialorder %v6384_v11, 0.0  ;;  %vm6401_vm7 = vcmp.gt.f32.partialorder %v6385_v25, 0.0  ;;  %v12322_v21 = vld [vmem:[%s18570_s7 + $0xd8] sm:$0xff]  }
 0x54f   :  { %v6434_v58 = vsel %vm6402_vm3, %v6386_v31, %v6418_v53  ;;  %v6416_v16 = vmul.f32 0.2, %v6384_v11  ;;  %v6417_v4 = vmul.f32 0.2, %v6385_v25  ;;  %v6382_v42 = vadd.f32 %v17184_v30, %v6359_v63  ;;  %v12324_v31 = vld [vmem:[%s18570_s7 + $0xe8] sm:$0xff]   ;;  %v12326_v62 = vld [vmem:[%s18570_s7 + $0xf8] sm:$0xff]  }
 0x550   :  { %11466 = vmatpush3.bf16.msra.mxu1 %v6513_v36  ;;  %v6435_v7 = vsel %vm6403_vm5, %v6387_v59, %v6419_v35  ;;  %v6383_v20 = vadd.f32 %v17184_v30, %v6360_v15  ;;  %v6357_v41 = vmul.f32 %v17172_v23, %v6334_v10  ;;  %v6358_v56 = vmul.f32 %v17172_v23, %v6335_v13  ;;  %v12316_v36 = vld [vmem:[%s18570_s7 + $0xa8] sm:$0xff]   ;;  %v12327_v10 = vld [vmem:[%s18573_s8 + $0x78] sm:$0xff]   ;;  %v12333_v63 = vld [vmem:[%s18573_s8 + $0x60] sm:$0xff]  }
 0x551   :  { %11467 = vmatprep.subr.bf16.mxu1 %v6512_v47  ;;  %v6511_v22 = vpack.c.bf16 %v6435_v7, %v6434_v58  ;;  %v6432_v37 = vsel %vm6400_vm6, %v6384_v11, %v6416_v16  ;;  %v6433_v2 = vsel %vm6401_vm7, %v6385_v25, %v6417_v4  ;;  %v6414_v6 = vmul.f32 0.2, %v6382_v42  ;;  %v12328_v59 = vld [vmem:[%s18573_s8 + $0x38] sm:$0xff]   ;;  %v12329_v11 = vld [vmem:[%s18573_s8 + $0x70] sm:$0xff]   ;;  %v12331_v13 = vld [vmem:[%s18573_s8 + $0x68] sm:$0xff]  }
 0x552   :  { %v6415_v1 = vmul.f32 0.2, %v6383_v20  ;;  %v6380_v17 = vadd.f32 %v17184_v30, %v6357_v41  ;;  %v6381_v5 = vadd.f32 %v17184_v30, %v6358_v56  ;;  %vm6398_vm8 = vcmp.gt.f32.partialorder %v6382_v42, 0.0  ;;  %v12296_v30 = vld [vmem:[%s18570_s7 + $0x8] sm:$0xff]   ;;  %v12330_v25 = vld [vmem:[%s18573_s8 + $0x30] sm:$0xff]   ;;  %v12334_v15 = vld [vmem:[%s18573_s8 + $0x20] sm:$0xff]  }
 0x553   :  { %vm6399_vm9 = vcmp.gt.f32.partialorder %v6383_v20, 0.0  ;;  %v6510_v29 = vpack.c.bf16 %v6433_v2, %v6432_v37  ;;  %v6430_v38 = vsel %vm6398_vm8, %v6382_v42, %v6414_v6  ;;  %v12332_v53 = vld [vmem:[%s18573_s8 + $0x28] sm:$0xff]   ;;  %v12335_v35 = vld [vmem:[%s18573_s8 + $0x58] sm:$0xff]   ;;  %v12337_v56 = vld [vmem:[%s18573_s8 + $0x50] sm:$0xff]   ;;  %vm10087_vm1 = vcmask 64512  }
 0x554   :  { %11468 = vmatpush3.bf16.msra.mxu1 %v6512_v47  ;;  %v6431_v28 = vsel %vm6399_vm9, %v6383_v20, %v6415_v1  ;;  %v6412_v26 = vmul.f32 0.2, %v6380_v17  ;;  %v6413_v23 = vmul.f32 0.2, %v6381_v5  ;;  %vm6396_vm10 = vcmp.gt.f32.partialorder %v6380_v17, 0.0  ;;  %v12320_v47 = vld [vmem:[%s18570_s7 + $0xc8] sm:$0xff]  }
 0x555   :  { %11469 = vmatprep.subr.bf16.mxu1 %v6511_v22  ;;  %vm6397_vm11 = vcmp.gt.f32.partialorder %v6381_v5, 0.0  ;;  %v6509_v60 = vpack.c.bf16 %v6431_v28, %v6430_v38  ;;  %v12336_v58 = vld [vmem:[%s18573_s8 + $0x18] sm:$0xff]   ;;  %v12339_v37 = vld [vmem:[%s18573_s8 + $0x48] sm:$0xff]   ;;  %vm10162_vm2 = vcmask 1041408   ;;  %vm10212_vm3 = vcmask 1024  }
 0x556   :  { %v6428_v32 = vsel %vm6396_vm10, %v6380_v17, %v6412_v26  ;;  %v6429_v48 = vsel %vm6397_vm11, %v6381_v5, %v6413_v23  ;;  %v12340_v1 = vld [vmem:[%s18573_s8 + $0x8] sm:$0xff]   ;;  %v12341_v26 = vld [vmem:[%s18573_s8 + $0x40] sm:$0xff]  }
 0x557   :  { %v6508_v39 = vpack.c.bf16 %v6429_v48, %v6428_v32  ;;  %v12342_v23 = vld [vmem:[%s18573_s8] sm:$0xff]  }
 0x558   :  { %11470 = vmatpush3.bf16.msra.mxu1 %v6511_v22  ;;  %v12338_v22 = vld [vmem:[%s18573_s8 + $0x10] sm:$0xff]  }
 0x559   :  { %11471 = vmatprep.subr.bf16.mxu1 %v6510_v29 }
 0x55c   :  { %11472 = vmatpush3.bf16.msra.mxu1 %v6510_v29 }
 0x55d   :  { %11473 = vmatprep.subr.bf16.mxu1 %v6509_v60 }
 0x560   :  { %11474 = vmatpush3.bf16.msra.mxu1 %v6509_v60 }
 0x561   :  { %11475 = vmatprep.subr.bf16.mxu1 %v6508_v39 }
 0x564   :  { %11476 = vmatpush3.bf16.msra.mxu1 %v6508_v39  ;;  %v12343_v39 = vld [vmem:[%s18573_s8 + $0xf8] sm:$0xff]  }
 0x565   :  { %11067 = vmatprep.subr.bf16.mxu1 %v12327_v10 }
 0x567   :  { %11478 = vmatmul.mubr.bf16.vlgmr.msra.gmra.mxu1 %v12296_v30 }
 0x568   :  { %11481 = vmatprep.mubr.bf16.mxu1 %v12297_v24  ;;  %11068 = vmatpush3.bf16.msra.mxu1 %v12328_v59 }
 0x569   :  { %11069 = vmatprep.subr.bf16.mxu1 %v12329_v11 }
 0x56c   :  { %11070 = vmatpush3.bf16.msra.mxu1 %v12330_v25 }
 0x56d   :  { %11071 = vmatprep.subr.bf16.mxu1 %v12331_v13 }
 0x56f   :  { %11482 = vmatmul.mubr.bf16.gmra.mxu1 %v12298_v8 }
 0x570   :  { %11485 = vmatprep.mubr.bf16.mxu1 %v12299_v51  ;;  %11072 = vmatpush3.bf16.msra.mxu1 %v12332_v53 }
 0x571   :  { %11073 = vmatprep.subr.bf16.mxu1 %v12333_v63 }
 0x574   :  { %11074 = vmatpush3.bf16.msra.mxu1 %v12334_v15 }
 0x575   :  { %11075 = vmatprep.subr.bf16.mxu1 %v12335_v35 }
 0x577   :  { %11486 = vmatmul.mubr.bf16.gmra.mxu1 %v12300_v27 }
 0x578   :  { %11489 = vmatprep.mubr.bf16.mxu1 %v12301_v57  ;;  %11076 = vmatpush3.bf16.msra.mxu1 %v12336_v58 }
 0x579   :  { %11077 = vmatprep.subr.bf16.mxu1 %v12337_v56 }
 0x57c   :  { %11078 = vmatpush3.bf16.msra.mxu1 %v12338_v22 }
 0x57d   :  { %11079 = vmatprep.subr.bf16.mxu1 %v12339_v37 }
 0x57f   :  { %11490 = vmatmul.mubr.bf16.gmra.mxu1 %v12302_v34 }
 0x580   :  { %11493 = vmatprep.mubr.bf16.mxu1 %v12303_v44  ;;  %11080 = vmatpush3.bf16.msra.mxu1 %v12340_v1 }
 0x581   :  { %11081 = vmatprep.subr.bf16.mxu1 %v12341_v26 }
 0x584   :  { %11082 = vmatpush3.bf16.msra.mxu1 %v12342_v23 }
 0x585   :  { %11095 = vmatprep.subr.bf16.mxu1 %v12343_v39 }
 0x587   :  { %11494 = vmatmul.mubr.bf16.gmra.mxu1 %v12304_v52 }
 0x588   :  { %11497 = vmatprep.mubr.bf16.mxu1 %v12305_v9 }
 0x58f   :  { %11498 = vmatmul.mubr.bf16.gmra.mxu1 %v12306_v33 }
 0x590   :  { %11501 = vmatprep.mubr.bf16.mxu1 %v12307_v43 }
 0x597   :  { %11502 = vmatmul.mubr.bf16.gmra.mxu1 %v12308_v61 }
 0x598   :  { %11505 = vmatprep.mubr.bf16.mxu1 %v12309_v3 }
 0x59f   :  { %11506 = vmatmul.mubr.bf16.gmra.mxu1 %v12310_v50 }
 0x5a0   :  { %11509 = vmatprep.mubr.bf16.mxu1 %v12311_v49 }
 0x5a7   :  { %11510 = vmatmul.mubr.bf16.gmra.mxu1 %v12312_v45 }
 0x5a8   :  { %11513 = vmatprep.mubr.bf16.mxu1 %v12313_v14 }
 0x5af   :  { %11514 = vmatmul.mubr.bf16.gmra.mxu1 %v12314_v46 }
 0x5b0   :  { %11517 = vmatprep.mubr.bf16.mxu1 %v12315_v40 }
 0x5b7   :  { %11518 = vmatmul.mubr.bf16.gmra.mxu1 %v12316_v36 }
 0x5b8   :  { %11521 = vmatprep.mubr.bf16.mxu1 %v12317_v12 }
 0x5bf   :  { %11522 = vmatmul.mubr.bf16.gmra.mxu1 %v12318_v54 }
 0x5c0   :  { %11525 = vmatprep.mubr.bf16.mxu1 %v12319_v55 }
 0x5c7   :  { %11526 = vmatmul.mubr.bf16.gmra.mxu1 %v12320_v47 }
 0x5c8   :  { %11529 = vmatprep.mubr.bf16.mxu1 %v12321_v19 }
 0x5cf   :  { %11530 = vmatmul.mubr.bf16.gmra.mxu1 %v12322_v21 }
 0x5d0   :  { %11533 = vmatprep.mubr.bf16.mxu1 %v12323_v18 }
 0x5d7   :  { %11534 = vmatmul.mubr.bf16.gmra.mxu1 %v12324_v31 }
 0x5d8   :  { %11537 = vmatprep.mubr.bf16.mxu1 %v12325_v0 }
 0x5df   :  { %11538 = vmatmul.mubr.bf16.gmra.mxu1 %v12326_v62 }
 0x627   :  { %v17365_v16 = vpop.f32.mrf.mxu1 }
 0x629   :  { %v17367_v4 = vpop.f32.mrf.mxu1 }
 0x62b   :  { %v17369_v42 = vpop.f32.mrf.mxu1 }
 0x62d   :  { %v17371_v7 = vpop.f32.mrf.mxu1 }
 0x62f   :  { %v11483_v20 = vpop.f32.mrf.mxu1 }
 0x631   :  { %v6758_v41 = vpop.f32.mrf.mxu1 }
 0x633   :  { %v11484_v2 = vpop.f32.mrf.mxu1 }
 0x634   :  { %v12062_v38 = vpack.i.bf16 %v11484_v2, %v11483_v20 }
 0x635   :  { %v6761_v6 = vpop.f32.mrf.mxu1 }
 0x636   :  { %v12052_v17 = vpack.i.bf16 %v6761_v6, %v6758_v41 }
 0x637   :  { %v17385_v5 = vpop.f32.mrf.mxu1 }
 0x638   :  { %12053 = vrot.lane.b32.xlu1 %v12052_v17, %s12804_s21 }
 0x639   :  { %v17388_v29 = vpop.f32.mrf.mxu1 }
 0x63b   :  { %v17390_v28 = vpop.f32.mrf.mxu1 }
 0x63c   :  { %12063 = vrot.lane.b32.xlu1 %v12062_v38, %s12804_s21 }
 0x63d   :  { %v17399_v60 = vpop.f32.mrf.mxu1 }
 0x63f   :  { %v11491_v32 = vpop.f32.mrf.mxu1 }
 0x641   :  { %v6790_v48 = vpop.f32.mrf.mxu1 }
 0x643   :  { %v11492_v30 = vpop.f32.mrf.mxu1 }
 0x644   :  { %v12057_v57 = vpack.i.bf16 %v11492_v30, %v11491_v32 }
 0x645   :  { %v6793_v24 = vpop.f32.mrf.mxu1 }
 0x646   :  { %v12047_v8 = vpack.i.bf16 %v6793_v24, %v6790_v48 }
 0x647   :  { %v17404_v51 = vpop.f32.mrf.mxu1 }
 0x648   :  { %12048 = vrot.lane.b32.xlu0 %v12047_v8, %s12804_s21 }
 0x649   :  { %v17407_v27 = vpop.f32.mrf.mxu1 }
 0x64b   :  { %v17409_v34 = vpop.f32.mrf.mxu1 }
 0x64c   :  { %12058 = vrot.lane.b32.xlu0 %v12057_v57, %s12804_s21 }
 0x64d   :  { %v17412_v44 = vpop.f32.mrf.mxu1 }
 0x64f   :  { %v11499_v52 = vpop.f32.mrf.mxu1 }
 0x651   :  { %v6822_v9 = vpop.f32.mrf.mxu1 }
 0x653   :  { %v11500_v33 = vpop.f32.mrf.mxu1 }
 0x654   :  { %v12082_v49 = vpack.i.bf16 %v11500_v33, %v11499_v52 }
 0x655   :  { %v6825_v43 = vpop.f32.mrf.mxu1 }
 0x656   :  { %v12072_v61 = vpack.i.bf16 %v6825_v43, %v6822_v9 }
 0x657   :  { %v17414_v3 = vpop.f32.mrf.mxu1 }
 0x658   :  { %12073 = vrot.lane.b32.xlu1 %v12072_v61, %s12804_s21 }
 0x659   :  { %v17417_v50 = vpop.f32.mrf.mxu1 }
 0x65b   :  { %v17419_v45 = vpop.f32.mrf.mxu1 }
 0x65c   :  { %12083 = vrot.lane.b32.xlu1 %v12082_v49, %s12804_s21 }
 0x65d   :  { %v17422_v14 = vpop.f32.mrf.mxu1 }
 0x65f   :  { %v11507_v46 = vpop.f32.mrf.mxu1 }
 0x661   :  { %v6854_v40 = vpop.f32.mrf.mxu1 }
 0x663   :  { %v11508_v36 = vpop.f32.mrf.mxu1 }
 0x664   :  { %v12077_v19 = vpack.i.bf16 %v11508_v36, %v11507_v46 }
 0x665   :  { %v6857_v12 = vpop.f32.mrf.mxu1 }
 0x666   :  { %v12067_v54 = vpack.i.bf16 %v6857_v12, %v6854_v40 }
 0x667   :  { %v17424_v55 = vpop.f32.mrf.mxu1 }
 0x668   :  { %12068 = vrot.lane.b32.xlu0 %v12067_v54, %s12804_s21 }
 0x669   :  { %v17427_v47 = vpop.f32.mrf.mxu1 }
 0x66b   :  { %v17429_v21 = vpop.f32.mrf.mxu1 }
 0x66c   :  { %12078 = vrot.lane.b32.xlu0 %v12077_v19, %s12804_s21 }
 0x66d   :  { %v17432_v18 = vpop.f32.mrf.mxu1 }
 0x66f   :  { %v11515_v31 = vpop.f32.mrf.mxu1 }
 0x671   :  { %v6886_v0 = vpop.f32.mrf.mxu1 }
 0x673   :  { %v11516_v62 = vpop.f32.mrf.mxu1 }
 0x674   :  { %v12102_v13 = vpack.i.bf16 %v11516_v62, %v11515_v31 }
 0x675   :  { %v6889_v10 = vpop.f32.mrf.mxu1 }
 0x676   :  { %v12092_v59 = vpack.i.bf16 %v6889_v10, %v6886_v0 }
 0x677   :  { %v17434_v11 = vpop.f32.mrf.mxu1 }
 0x678   :  { %12093 = vrot.lane.b32.xlu1 %v12092_v59, %s12804_s21 }
 0x679   :  { %v17437_v25 = vpop.f32.mrf.mxu1 }
 0x67b   :  { %v17439_v53 = vpop.f32.mrf.mxu1 }
 0x67c   :  { %12103 = vrot.lane.b32.xlu1 %v12102_v13, %s12804_s21  ;;  %v12344_v13 = vld [vmem:[%s18573_s8 + $0xb8] sm:$0xff]  }
 0x67d   :  { %v17442_v63 = vpop.f32.mrf.mxu1 }
 0x67f   :  { %v11523_v15 = vpop.f32.mrf.mxu1 }
 0x681   :  { %v6918_v35 = vpop.f32.mrf.mxu1 }
 0x683   :  { %v11524_v58 = vpop.f32.mrf.mxu1 }
 0x684   :  { %v12097_v37 = vpack.i.bf16 %v11524_v58, %v11523_v15 }
 0x685   :  { %v6921_v20 = vpop.f32.mrf.mxu1 }
 0x686   :  { %v12087_v41 = vpack.i.bf16 %v6921_v20, %v6918_v35 }
 0x687   :  { %v17444_v56 = vpop.f32.mrf.mxu1 }
 0x688   :  { %12088 = vrot.lane.b32.xlu0 %v12087_v41, %s12804_s21 }
 0x689   :  { %v17447_v22 = vpop.f32.mrf.mxu1 }
 0x68b   :  { %v17449_v2 = vpop.f32.mrf.mxu1 }
 0x68c   :  { %12098 = vrot.lane.b32.xlu0 %v12097_v37, %s12804_s21  ;;  %v12346_v37 = vld [vmem:[%s18573_s8 + $0xb0] sm:$0xff]  }
 0x68d   :  { %v17452_v6 = vpop.f32.mrf.mxu1 }
 0x68f   :  { %v11531_v1 = vpop.f32.mrf.mxu1 }
 0x691   :  { %v6950_v17 = vpop.f32.mrf.mxu1 }
 0x693   :  { %v11532_v38 = vpop.f32.mrf.mxu1 }
 0x694   :  { %v12122_v39 = vpack.i.bf16 %v11532_v38, %v11531_v1  ;;  %v12347_v1 = vld [vmem:[%s18573_s8 + $0xe8] sm:$0xff]  }
 0x695   :  { %v6953_v26 = vpop.f32.mrf.mxu1 }
 0x696   :  { %v12112_v23 = vpack.i.bf16 %v6953_v26, %v6950_v17  ;;  %v12349_v26 = vld [vmem:[%s18573_s8 + $0xe0] sm:$0xff]  }
 0x697   :  { %v17454_v32 = vpop.f32.mrf.mxu1 }
 0x698   :  { %12113 = vrot.lane.b32.xlu1 %v12112_v23, %s12804_s21  ;;  %v12352_v23 = vld [vmem:[%s18573_s8 + $0x98] sm:$0xff]  }
 0x699   :  { %v17457_v48 = vpop.f32.mrf.mxu1 }
 0x69b   :  { %v17459_v30 = vpop.f32.mrf.mxu1 }
 0x69c   :  { %12123 = vrot.lane.b32.xlu1 %v12122_v39, %s12804_s21  ;;  %v12353_v39 = vld [vmem:[%s18573_s8 + $0xd0] sm:$0xff]  }
 0x69d   :  { %v17462_v24 = vpop.f32.mrf.mxu1 }
 0x69f   :  { %v11539_v8 = vpop.f32.mrf.mxu1 }
 0x6a1   :  { %v6982_v57 = vpop.f32.mrf.mxu1 }
 0x6a3   :  { %v11540_v52 = vpop.f32.mrf.mxu1 }
 0x6a4   :  { %v12117_v43 = vpack.i.bf16 %v11540_v52, %v11539_v8  ;;  %v12354_v8 = vld [vmem:[%s18573_s8 + $0x90] sm:$0xff]  }
 0x6a5   :  { %v6985_v9 = vpop.f32.mrf.mxu1 }
 0x6a6   :  { %v12107_v33 = vpack.i.bf16 %v6985_v9, %v6982_v57  ;;  %v12355_v57 = vld [vmem:[%s18573_s8 + $0xc8] sm:$0xff]  }
 0x6a7   :  { %v12356_v9 = vld [vmem:[%s18573_s8 + $0x88] sm:$0xff]  }
 0x6a8   :  { %12108 = vrot.lane.b32.xlu0 %v12107_v33, %s12804_s21  ;;  %v12357_v33 = vld [vmem:[%s18573_s8 + $0xc0] sm:$0xff]  }
 0x6aa   :  { %v12054_v61 = vpop.permute.xlu1 %12053 }
 0x6ab   :  { %v12056_v49 = vunpack.i.h.bf16 %v12054_v61  ;;  %v12055_v46 = vunpack.i.l.bf16 %v12054_v61 }
 0x6ac   :  { %12118 = vrot.lane.b32.xlu0 %v12117_v43, %s12804_s21 }
 0x6ad   :  { %v7014_v54 = vsel %vm5484_vm0, %v17371_v7, %v12056_v49  ;;  %v7013_v19 = vsel %vm5484_vm0, %v17367_v4, %v12055_v46  ;;  %v12345_v4 = vld [vmem:[%s18573_s8 + $0xf0] sm:$0xff]   ;;  %v12358_v46 = vld [vmem:[%s18573_s8 + $0x80] sm:$0xff]  }
 0x6ae   :  { %v12064_v31 = vpop.permute.xlu1 %12063  ;;  %v7157_v15 = vpack.c.bf16 %v7014_v54, %v7013_v19 }
 0x6af   :  { %v12066_v7 = vunpack.i.h.bf16 %v12064_v31  ;;  %v12065_v20 = vunpack.i.l.bf16 %v12064_v31 }
 0x6b1   :  { %v7016_v17 = vsel %vm5484_vm0, %v17369_v42, %v12066_v7  ;;  %v12350_v42 = vld [vmem:[%s18573_s8 + $0xa0] sm:$0xff]  }
 0x6ba   :  { %v12049_v40 = vpop.permute.xlu0 %12048 }
 0x6bb   :  { %v12051_v36 = vunpack.i.h.bf16 %v12049_v40  ;;  %v12050_v12 = vunpack.i.l.bf16 %v12049_v40 }
 0x6bd   :  { %v7033_v0 = vsel %vm5484_vm0, %v17388_v29, %v12050_v12  ;;  %v7034_v62 = vsel %vm5484_vm0, %v17399_v60, %v12051_v36  ;;  %v12359_v12 = vld [vmem:[%s18573_s8 + $0x178] sm:$0xff]  }
 0x6be   :  { %v12059_v10 = vpop.permute.xlu0 %12058  ;;  %v7158_v59 = vpack.c.bf16 %v7034_v62, %v7033_v0 }
 0x6bf   :  { %v12061_v35 = vunpack.i.h.bf16 %v12059_v10  ;;  %v12060_v58 = vunpack.i.l.bf16 %v12059_v10 }
 0x6c0   :  { %7717 = vmatprep.mubr.bf16.mxu1 %v7158_v59 }
 0x6c1   :  { %7718 = vmatmul.mubr.bf16.vlgmr.msra.gmra.mxu1 %v7157_v15  ;;  %v7035_v29 = vsel %vm5484_vm0, %v17385_v5, %v12060_v58  ;;  %v7036_v60 = vsel %vm5484_vm0, %v17390_v28, %v12061_v35  ;;  %v7015_v5 = vsel %vm5484_vm0, %v17365_v16, %v12065_v20  ;;  %v12348_v28 = vld [vmem:[%s18573_s8 + $0xa8] sm:$0xff]   ;;  %v12351_v16 = vld [vmem:[%s18573_s8 + $0xd8] sm:$0xff]   ;;  %v12362_v20 = vld [vmem:[%s18573_s8 + $0x130] sm:$0xff]  }
 0x6c2   :  { %11096 = vmatpush3.bf16.msra.mxu1 %v12344_v13  ;;  %v7166_v41 = vpack.c.bf16 %v7036_v60, %v7035_v29  ;;  %v7165_v38 = vpack.c.bf16 %v7016_v17, %v7015_v5  ;;  %v12360_v13 = vld [vmem:[%s18573_s8 + $0x138] sm:$0xff]   ;;  %v12363_v29 = vld [vmem:[%s18573_s8 + $0x168] sm:$0xff]   ;;  %v12369_v17 = vld [vmem:[%s18573_s8 + $0x150] sm:$0xff]  }
 0x6c3   :  { %11097 = vmatprep.subr.bf16.mxu1 %v12345_v4  ;;  %v12370_v5 = vld [vmem:[%s18573_s8 + $0x110] sm:$0xff]  }
 0x6c4   :  { %7725 = vmatprep.mubr.bf16.mxu1 %v7166_v41 }
 0x6c6   :  { %11098 = vmatpush3.bf16.msra.mxu1 %v12346_v37  ;;  %v12365_v37 = vld [vmem:[%s18573_s8 + $0x160] sm:$0xff]  }
 0x6c7   :  { %11099 = vmatprep.subr.bf16.mxu1 %v12347_v1  ;;  %v12368_v1 = vld [vmem:[%s18573_s8 + $0x118] sm:$0xff]  }
 0x6c9   :  { %7726 = vmatmul.mubr.bf16.gmra.mxu1 %v7165_v38 }
 0x6ca   :  { %11100 = vmatpush3.bf16.msra.mxu1 %v12348_v28  ;;  %v12074_v52 = vpop.permute.xlu1 %12073  ;;  %v12371_v28 = vld [vmem:[%s18573_s8 + $0x148] sm:$0xff]  }
 0x6cb   :  { %11101 = vmatprep.subr.bf16.mxu1 %v12349_v26  ;;  %v12076_v43 = vunpack.i.h.bf16 %v12074_v52  ;;  %v12075_v61 = vunpack.i.l.bf16 %v12074_v52  ;;  %v12372_v26 = vld [vmem:[%s18573_s8 + $0x108] sm:$0xff]  }
 0x6cd   :  { %v7054_v54 = vsel %vm5484_vm0, %v17412_v44, %v12076_v43  ;;  %v7053_v19 = vsel %vm5484_vm0, %v17407_v27, %v12075_v61  ;;  %v12361_v27 = vld [vmem:[%s18573_s8 + $0x170] sm:$0xff]  }
 0x6ce   :  { %11102 = vmatpush3.bf16.msra.mxu1 %v12350_v42  ;;  %v12084_v31 = vpop.permute.xlu1 %12083  ;;  %v7159_v15 = vpack.c.bf16 %v7054_v54, %v7053_v19  ;;  %v12373_v42 = vld [vmem:[%s18573_s8 + $0x140] sm:$0xff]  }
 0x6cf   :  { %11103 = vmatprep.subr.bf16.mxu1 %v12351_v16  ;;  %v12086_v58 = vunpack.i.h.bf16 %v12084_v31 }
 0x6d1   :  { %v7056_v60 = vsel %vm5484_vm0, %v17409_v34, %v12086_v58  ;;  %v12366_v34 = vld [vmem:[%s18573_s8 + $0x120] sm:$0xff]   ;;  %v12386_v58 = vld [vmem:[%s18573_s8 + $0x190] sm:$0xff]  }
 0x6d2   :  { %11104 = vmatpush3.bf16.msra.mxu1 %v12352_v23 }
 0x6d3   :  { %11105 = vmatprep.subr.bf16.mxu1 %v12353_v39 }
 0x6d6   :  { %11106 = vmatpush3.bf16.msra.mxu1 %v12354_v8  ;;  %v12374_v8 = vld [vmem:[%s18573_s8 + $0x100] sm:$0xff]  }
 0x6d7   :  { %11107 = vmatprep.subr.bf16.mxu1 %v12355_v57 }
 0x6da   :  { %11108 = vmatpush3.bf16.msra.mxu1 %v12356_v9  ;;  %v12069_v49 = vpop.permute.xlu0 %12068  ;;  %v12375_v9 = vld [vmem:[%s18573_s8 + $0x1f8] sm:$0xff]  }
 0x6db   :  { %v12071_v40 = vunpack.i.h.bf16 %v12069_v49  ;;  %v12070_v36 = vunpack.i.l.bf16 %v12069_v49  ;;  %11109 = vmatprep.subr.bf16.mxu1 %v12357_v33 }
 0x6dd   :  { %v7073_v0 = vsel %vm5484_vm0, %v17417_v50, %v12070_v36  ;;  %v7074_v62 = vsel %vm5484_vm0, %v17422_v14, %v12071_v40  ;;  %v12085_v50 = vunpack.i.l.bf16 %v12084_v31 }
 0x6de   :  { %11110 = vmatpush3.bf16.msra.mxu1 %v12358_v46  ;;  %v12079_v10 = vpop.permute.xlu0 %12078  ;;  %v7160_v59 = vpack.c.bf16 %v7074_v62, %v7073_v0 }
 0x6df   :  { %v12081_v35 = vunpack.i.h.bf16 %v12079_v10  ;;  %v12080_v44 = vunpack.i.l.bf16 %v12079_v10  ;;  %11123 = vmatprep.subr.bf16.mxu1 %v12359_v12  ;;  %v12376_v12 = vld [vmem:[%s18573_s8 + $0x1b8] sm:$0xff]   ;;  %v12378_v10 = vld [vmem:[%s18573_s8 + $0x1b0] sm:$0xff]  }
 0x6e0   :  { %7766 = vmatprep.mubr.bf16.mxu1 %v7160_v59  ;;  %v12379_v59 = vld [vmem:[%s18573_s8 + $0x1e8] sm:$0xff]  }
 0x6e1   :  { %7767 = vmatmul.mubr.bf16.vlgmr.msra.gmra.mxu1 %v7159_v15  ;;  %v7075_v14 = vsel %vm5484_vm0, %v17414_v3, %v12080_v44  ;;  %v7076_v4 = vsel %vm5484_vm0, %v17419_v45, %v12081_v35  ;;  %v7055_v3 = vsel %vm5484_vm0, %v17404_v51, %v12085_v50  ;;  %v12364_v45 = vld [vmem:[%s18573_s8 + $0x128] sm:$0xff]   ;;  %v12367_v51 = vld [vmem:[%s18573_s8 + $0x158] sm:$0xff]   ;;  %v12381_v35 = vld [vmem:[%s18573_s8 + $0x1e0] sm:$0xff]  }
 0x6e2   :  { %11124 = vmatpush3.bf16.msra.mxu1 %v12360_v13  ;;  %v7168_v7 = vpack.c.bf16 %v7076_v4, %v7075_v14  ;;  %v7167_v41 = vpack.c.bf16 %v7056_v60, %v7055_v3  ;;  %v12384_v44 = vld [vmem:[%s18573_s8 + $0x198] sm:$0xff]   ;;  %v12387_v50 = vld [vmem:[%s18573_s8 + $0x1c8] sm:$0xff]   ;;  %v12390_v3 = vld [vmem:[%s18573_s8 + $0x180] sm:$0xff]  }
 0x6e3   :  { %11125 = vmatprep.subr.bf16.mxu1 %v12361_v27  ;;  %v12385_v27 = vld [vmem:[%s18573_s8 + $0x1d0] sm:$0xff]   ;;  %v12388_v4 = vld [vmem:[%s18573_s8 + $0x188] sm:$0xff]  }
 0x6e4   :  { %7774 = vmatprep.mubr.bf16.mxu1 %v7168_v7  ;;  %v12389_v7 = vld [vmem:[%s18573_s8 + $0x1c0] sm:$0xff]  }
 0x6e6   :  { %11126 = vmatpush3.bf16.msra.mxu1 %v12362_v20 }
 0x6e7   :  { %11127 = vmatprep.subr.bf16.mxu1 %v12363_v29 }
 0x6e9   :  { %7775 = vmatmul.mubr.bf16.gmra.mxu1 %v7167_v41 }
 0x6ea   :  { %11128 = vmatpush3.bf16.msra.mxu1 %v12364_v45  ;;  %v12094_v38 = vpop.permute.xlu1 %12093 }
 0x6eb   :  { %11129 = vmatprep.subr.bf16.mxu1 %v12365_v37  ;;  %v12096_v16 = vunpack.i.h.bf16 %v12094_v38  ;;  %v12095_v23 = vunpack.i.l.bf16 %v12094_v38 }
 0x6ed   :  { %v7094_v33 = vsel %vm5484_vm0, %v17432_v18, %v12096_v16  ;;  %v7093_v43 = vsel %vm5484_vm0, %v17427_v47, %v12095_v23  ;;  %v12377_v47 = vld [vmem:[%s18573_s8 + $0x1f0] sm:$0xff]  }
 0x6ee   :  { %11130 = vmatpush3.bf16.msra.mxu1 %v12366_v34  ;;  %v12104_v61 = vpop.permute.xlu1 %12103  ;;  %v7161_v54 = vpack.c.bf16 %v7094_v33, %v7093_v43 }
 0x6ef   :  { %11131 = vmatprep.subr.bf16.mxu1 %v12367_v51  ;;  %v12106_v31 = vunpack.i.h.bf16 %v12104_v61 }
 0x6f1   :  { %v7096_v13 = vsel %vm5484_vm0, %v17429_v21, %v12106_v31  ;;  %v12382_v21 = vld [vmem:[%s18573_s8 + $0x1a0] sm:$0xff]   ;;  %v12405_v31 = vld [vmem:[%s18574_s12 + $0x234] ss:$8 sps:$4 sm:$0xff]  }
 0x6f2   :  { %11132 = vmatpush3.bf16.msra.mxu1 %v12368_v1 }
 0x6f3   :  { %11133 = vmatprep.subr.bf16.mxu1 %v12369_v17 }
 0x6f6   :  { %11134 = vmatpush3.bf16.msra.mxu1 %v12370_v5 }
 0x6f7   :  { %11135 = vmatprep.subr.bf16.mxu1 %v12371_v28 }
 0x6fa   :  { %11136 = vmatpush3.bf16.msra.mxu1 %v12372_v26  ;;  %v12089_v39 = vpop.permute.xlu0 %12088 }
 0x6fb   :  { %v12091_v57 = vunpack.i.h.bf16 %v12089_v39  ;;  %v12090_v52 = vunpack.i.l.bf16 %v12089_v39  ;;  %11137 = vmatprep.subr.bf16.mxu1 %v12373_v42 }
 0x6fd   :  { %v7113_v49 = vsel %vm5484_vm0, %v17437_v25, %v12090_v52  ;;  %v7114_v46 = vsel %vm5484_vm0, %v17442_v63, %v12091_v57  ;;  %v12105_v25 = vunpack.i.l.bf16 %v12104_v61  ;;  %v12391_v57 = vld [vmem:[%s18574_s12 + $0x270] ss:$8 sps:$4 sm:$0xff]   ;;  %v12399_v52 = vld [vmem:[%s18574_s12 + $0x254] ss:$8 sps:$4 sm:$0xff]  }
 0x6fe   :  { %11138 = vmatpush3.bf16.msra.mxu1 %v12374_v8  ;;  %v12099_v40 = vpop.permute.xlu0 %12098  ;;  %v7162_v36 = vpack.c.bf16 %v7114_v46, %v7113_v49 }
 0x6ff   :  { %v12101_v19 = vunpack.i.h.bf16 %v12099_v40  ;;  %v12100_v18 = vunpack.i.l.bf16 %v12099_v40  ;;  %11151 = vmatprep.subr.bf16.mxu1 %v12375_v9 }
 0x700   :  { %7815 = vmatprep.mubr.bf16.mxu1 %v7162_v36 }
 0x701   :  { %7816 = vmatmul.mubr.bf16.vlgmr.msra.gmra.mxu1 %v7161_v54  ;;  %v7115_v63 = vsel %vm5484_vm0, %v17434_v11, %v12100_v18  ;;  %v7116_v0 = vsel %vm5484_vm0, %v17439_v53, %v12101_v19  ;;  %v7095_v11 = vsel %vm5484_vm0, %v17424_v55, %v12105_v25  ;;  %v12380_v53 = vld [vmem:[%s18573_s8 + $0x1a8] sm:$0xff]   ;;  %v12383_v55 = vld [vmem:[%s18573_s8 + $0x1d8] sm:$0xff]  }
 0x702   :  { %11152 = vmatpush3.bf16.msra.mxu1 %v12376_v12  ;;  %v7170_v62 = vpack.c.bf16 %v7116_v0, %v7115_v63  ;;  %v7169_v15 = vpack.c.bf16 %v7096_v13, %v7095_v11  ;;  %v12400_v18 = vld [vmem:[%s18574_s12 + $0x240] ss:$8 sps:$4 sm:$0xff]   ;;  %v12403_v63 = vld [vmem:[%s18574_s12 + $0x230] ss:$8 sps:$4 sm:$0xff]   ;;  %v12410_v11 = vld [vmem:[%s18574_s12 + $0x224] ss:$8 sps:$4 sm:$0xff]  }
 0x703   :  { %11153 = vmatprep.subr.bf16.mxu1 %v12377_v47  ;;  %v12402_v47 = vld [vmem:[%s18574_s12 + $0x244] ss:$8 sps:$4 sm:$0xff]   ;;  %v12408_v13 = vld [vmem:[%s18574_s12 + $0x220] ss:$8 sps:$4 sm:$0xff]  }
 0x704   :  { %7823 = vmatprep.mubr.bf16.mxu1 %v7170_v62 }
 0x706   :  { %11154 = vmatpush3.bf16.msra.mxu1 %v12378_v10 }
 0x707   :  { %11155 = vmatprep.subr.bf16.mxu1 %v12379_v59  ;;  %v12406_v59 = vld [vmem:[%s18575_s11] sm:$0xff]  }
 0x709   :  { %7824 = vmatmul.mubr.bf16.gmra.mxu1 %v7169_v15 }
 0x70a   :  { %11156 = vmatpush3.bf16.msra.mxu1 %v12380_v53  ;;  %v12114_v14 = vpop.permute.xlu1 %12113  ;;  %v12413_v53 = vld [vmem:[%s18574_s12 + $0x214] ss:$8 sps:$4 sm:$0xff]  }
 0x70b   :  { %11157 = vmatprep.subr.bf16.mxu1 %v12381_v35  ;;  %v12116_v20 = vunpack.i.h.bf16 %v12114_v14  ;;  %v12115_v29 = vunpack.i.l.bf16 %v12114_v14  ;;  %v12411_v35 = vld [vmem:[%s18574_s12 + $0x210] ss:$8 sps:$4 sm:$0xff]  }
 0x70d   :  { %v7134_v37 = vsel %vm5484_vm0, %v17452_v6, %v12116_v20  ;;  %v7133_v34 = vsel %vm5484_vm0, %v17447_v22, %v12115_v29  ;;  %v12426_v20 = vld [vmem:[%s18574_s12 + $0x2e4] ss:$8 sps:$4 sm:$0xff]  }
 0x70e   :  { %11158 = vmatpush3.bf16.msra.mxu1 %v12382_v21  ;;  %v12124_v51 = vpop.permute.xlu1 %12123  ;;  %v7163_v38 = vpack.c.bf16 %v7134_v37, %v7133_v34 }
 0x70f   :  { %11159 = vmatprep.subr.bf16.mxu1 %v12383_v55  ;;  %v12126_v16 = vunpack.i.h.bf16 %v12124_v51  ;;  %v12125_v23 = vunpack.i.l.bf16 %v12124_v51 }
 0x711   :  { %v7135_v39 = vsel %vm5484_vm0, %v17444_v56, %v12125_v23  ;;  %v12396_v56 = vld [vmem:[%s18574_s12 + $0x264] ss:$8 sps:$4 sm:$0xff]  }
 0x712   :  { %11160 = vmatpush3.bf16.msra.mxu1 %v12384_v44  ;;  %v12416_v44 = vld [vmem:[%s18574_s12 + $0x200] ss:$8 sps:$4 sm:$0xff]  }
 0x713   :  { %11161 = vmatprep.subr.bf16.mxu1 %v12385_v27  ;;  %v12418_v27 = vld [vmem:[%s18574_s12 + $0x204] ss:$8 sps:$4 sm:$0xff]  }
 0x716   :  { %11162 = vmatpush3.bf16.msra.mxu1 %v12386_v58  ;;  %v12421_v58 = vld [vmem:[%s18574_s12 + $0x2f4] ss:$8 sps:$4 sm:$0xff]  }
 0x717   :  { %11163 = vmatprep.subr.bf16.mxu1 %v12387_v50  ;;  %v12419_v50 = vld [vmem:[%s18574_s12 + $0x2f0] ss:$8 sps:$4 sm:$0xff]  }
 0x71a   :  { %11164 = vmatpush3.bf16.msra.mxu1 %v12388_v4  ;;  %v12109_v60 = vpop.permute.xlu0 %12108 }
 0x71b   :  { %v12111_v45 = vunpack.i.h.bf16 %v12109_v60  ;;  %v12110_v41 = vunpack.i.l.bf16 %v12109_v60  ;;  %11165 = vmatprep.subr.bf16.mxu1 %v12389_v7  ;;  %v12424_v7 = vld [vmem:[%s18574_s12 + $0x2e0] ss:$8 sps:$4 sm:$0xff]  }
 0x71d   :  { %v7153_v1 = vsel %vm5484_vm0, %v17457_v48, %v12110_v41  ;;  %v7154_v17 = vsel %vm5484_vm0, %v17462_v24, %v12111_v45  ;;  %v7136_v24 = vsel %vm5484_vm0, %v17449_v2, %v12126_v16  ;;  %v12394_v2 = vld [vmem:[%s18574_s12 + $0x260] ss:$8 sps:$4 sm:$0xff]   ;;  %v12451_v45 = vld [vmem:[%s18574_s12 + $0x2d0] ss:$8 sps:$4 sm:$0xff]   ;;  %v12453_v41 = vld [vmem:[%s18574_s12 + $0x2d4] ss:$8 sps:$4 sm:$0xff]  }
 0x71e   :  { %11166 = vmatpush3.bf16.msra.mxu1 %v12390_v3  ;;  %v12119_v5 = vpop.permute.xlu0 %12118  ;;  %v7164_v28 = vpack.c.bf16 %v7154_v17, %v7153_v1  ;;  %v7171_v8 = vpack.c.bf16 %v7136_v24, %v7135_v39 }
 0x71f   :  { %v12121_v26 = vunpack.i.h.bf16 %v12119_v5  ;;  %v12120_v42 = vunpack.i.l.bf16 %v12119_v5 }
 0x720   :  { %7864 = vmatprep.mubr.bf16.mxu1 %v7164_v28 }
 0x721   :  { %7865 = vmatmul.mubr.bf16.vlgmr.msra.gmra.mxu1 %v7163_v38  ;;  %v7155_v22 = vsel %vm5484_vm0, %v17454_v32, %v12120_v42  ;;  %v7156_v6 = vsel %vm5484_vm0, %v17459_v30, %v12121_v26  ;;  %v12393_v32 = vld [vmem:[%s18574_s12 + $0x274] ss:$8 sps:$4 sm:$0xff]   ;;  %v12397_v30 = vld [vmem:[%s18574_s12 + $0x250] ss:$8 sps:$4 sm:$0xff]  }
 0x722   :  { %v7172_v48 = vpack.c.bf16 %v7156_v6, %v7155_v22  ;;  %9763 = vmatprep.subr.bf16.mxu0 %v12393_v32 }
 0x723   :  { %9764 = vmatpush1.bf16.msra.mxu0 %v12391_v57 }
 0x724   :  { %7872 = vmatprep.mubr.bf16.mxu1 %v7172_v48  ;;  %9765 = vmatprep.subr.bf16.mxu0 %v12396_v56 }
 0x727   :  { %9766 = vmatpush1.bf16.msra.mxu0 %v12394_v2 }
 0x728   :  { %9767 = vmatprep.subr.bf16.mxu0 %v12399_v52 }
 0x729   :  { %7873 = vmatmul.mubr.bf16.gmra.mxu1 %v7171_v8 }
 0x72a   :  { %11545 = vmatprep.mubr.msk.bf16.mxu1 %vm4843_vm4, %v12406_v59 }
 0x72b   :  { %9768 = vmatpush1.bf16.msra.mxu0 %v12397_v30 }
 0x72c   :  { %9769 = vmatprep.subr.bf16.mxu0 %v12402_v47 }
 0x72f   :  { %9770 = vmatpush1.bf16.msra.mxu0 %v12400_v18 }
 0x730   :  { %9771 = vmatprep.subr.bf16.mxu0 %v12405_v31 }
 0x733   :  { %9772 = vmatpush1.bf16.msra.mxu0 %v12403_v63 }
 0x734   :  { %9773 = vmatprep.subr.bf16.mxu0 %v12410_v11 }
 0x737   :  { %9774 = vmatpush1.bf16.msra.mxu0 %v12408_v13 }
 0x738   :  { %9775 = vmatprep.subr.bf16.mxu0 %v12413_v53 }
 0x73b   :  { %9776 = vmatpush1.bf16.msra.mxu0 %v12411_v35 }
 0x73c   :  { %9777 = vmatprep.subr.bf16.mxu0 %v12418_v27 }
 0x73f   :  { %9778 = vmatpush1.bf16.msra.mxu0 %v12416_v44 }
 0x740   :  { %9779 = vmatprep.subr.bf16.mxu0 %v12421_v58 }
 0x743   :  { %9780 = vmatpush2.bf16.msra.mxu0 %v12419_v50 }
 0x744   :  { %9781 = vmatprep.subr.bf16.mxu0 %v12426_v20 }
 0x747   :  { %9782 = vmatpush2.bf16.msra.mxu0 %v12424_v7 }
 0x748   :  { %9783 = vmatprep.subr.bf16.mxu0 %v12453_v41 }
 0x74b   :  { %9784 = vmatpush2.bf16.msra.mxu0 %v12451_v45 }
 0x781   :  { %v17689_v9 = vpop.f32.mrf.mxu1 }
 0x783   :  { %v17691_v33 = vpop.f32.mrf.mxu1 }
 0x784   :  { %v11085_v42 = vadd.f32 %v17691_v33, %v17689_v9 }
 0x785   :  { %v11086_v43 = vpop.f32.mrf.mxu1 }
 0x787   :  { %v11087_v61 = vpop.f32.mrf.mxu1 }
 0x788   :  { %v11088_v28 = vadd.f32 %v11087_v61, %v11086_v43 }
 0x789   :  { %v17693_v49 = vpop.f32.mrf.mxu1 }
 0x78b   :  { %v17695_v46 = vpop.f32.mrf.mxu1 }
 0x78c   :  { %v11091_v22 = vadd.f32 %v17695_v46, %v17693_v49 }
 0x78d   :  { %v17697_v40 = vpop.f32.mrf.mxu1 }
 0x78f   :  { %v17699_v36 = vpop.f32.mrf.mxu1 }
 0x790   :  { %v11094_v30 = vadd.f32 %v17699_v36, %v17697_v40 }
 0x7a1   :  { %v11111_v12 = vpop.f32.mrf.mxu1 }
 0x7a3   :  { %v11112_v54 = vpop.f32.mrf.mxu1 }
 0x7a4   :  { %v11113_v17 = vadd.f32 %v11112_v54, %v11111_v12 }
 0x7a5   :  { %v11114_v19 = vpop.f32.mrf.mxu1 }
 0x7a6   :  { %v7769_v39 = vadd.f32 %v11113_v17, %v11085_v42 }
 0x7a7   :  { %v11115_v25 = vpop.f32.mrf.mxu1 }
 0x7a8   :  { %v11116_v1 = vadd.f32 %v11115_v25, %v11114_v19 }
 0x7a9   :  { %v11117_v0 = vpop.f32.mrf.mxu1 }
 0x7aa   :  { %v7772_v6 = vadd.f32 %v11116_v1, %v11088_v28  ;;  %v10485_v1 = vld [vmem:[%s18576_s9] ss:$0 sm:$0xff] }
 0x7ab   :  { %v11118_v62 = vpop.f32.mrf.mxu1 }
 0x7ac   :  { %v11119_v38 = vadd.f32 %v11118_v62, %v11117_v0 }
 0x7ad   :  { %v11120_v10 = vpop.f32.mrf.mxu1 }
 0x7ae   :  { %v7777_v57 = vadd.f32 %v11119_v38, %v11091_v22 }
 0x7af   :  { %v11121_v15 = vpop.f32.mrf.mxu1 }
 0x7b0   :  { %v11122_v32 = vadd.f32 %v11121_v15, %v11120_v10 }
 0x7b2   :  { %v7780_v49 = vadd.f32 %v11122_v32, %v11094_v30 }
 0x7c1   :  { %v11139_v21 = vpop.f32.mrf.mxu1 }
 0x7c3   :  { %v11140_v55 = vpop.f32.mrf.mxu1 }
 0x7c4   :  { %v11141_v16 = vadd.f32 %v11140_v55, %v11139_v21 }
 0x7c5   :  { %v11142_v14 = vpop.f32.mrf.mxu1 }
 0x7c6   :  { %v7818_v52 = vadd.f32 %v11141_v16, %v7769_v39 }
 0x7c7   :  { %v11143_v4 = vpop.f32.mrf.mxu1 }
 0x7c8   :  { %v11144_v26 = vadd.f32 %v11143_v4, %v11142_v14 }
 0x7c9   :  { %v11145_v29 = vpop.f32.mrf.mxu1 }
 0x7ca   :  { %v7821_v2 = vadd.f32 %v11144_v26, %v7772_v6  ;;  %v10486_v26 = vld [vmem:[%s18577_s10] ss:$0 sm:$0xff] }
 0x7cb   :  { %v11146_v60 = vpop.f32.mrf.mxu1 }
 0x7cc   :  { %v11147_v48 = vadd.f32 %v11146_v60, %v11145_v29 }
 0x7cd   :  { %v11148_v3 = vpop.f32.mrf.mxu1 }
 0x7ce   :  { %v7826_v9 = vadd.f32 %v11147_v48, %v7777_v57 }
 0x7cf   :  { %v11149_v37 = vpop.f32.mrf.mxu1 }
 0x7d0   :  { %v11150_v33 = vadd.f32 %v11149_v37, %v11148_v3 }
 0x7d2   :  { %v7829_v47 = vadd.f32 %v11150_v33, %v7780_v49  ;;  %v12427_v49 = vld [vmem:[%s18574_s12 + $0x70] ss:$8 sps:$4 sm:$0xff]  }
 0x7e1   :  { %v11167_v34 = vpop.f32.mrf.mxu1 }
 0x7e3   :  { %v11168_v51 = vpop.f32.mrf.mxu1 }
 0x7e4   :  { %v11169_v56 = vadd.f32 %v11168_v51, %v11167_v34 }
 0x7e5   :  { %v11170_v5 = vpop.f32.mrf.mxu1 }
 0x7e6   :  { %v7867_v46 = vadd.f32 %v11169_v56, %v7818_v52 }
 0x7e7   :  { %v11171_v23 = vpop.f32.mrf.mxu1 }
 0x7e8   :  { %v11172_v24 = vadd.f32 %v11171_v23, %v11170_v5 }
 0x7e9   :  { %v11173_v8 = vpop.f32.mrf.mxu1 }
 0x7ea   :  { %v7870_v61 = vadd.f32 %v11172_v24, %v7821_v2 }
 0x7eb   :  { %v11174_v43 = vpop.f32.mrf.mxu1 }
 0x7ec   :  { %v11175_v12 = vadd.f32 %v11174_v43, %v11173_v8  ;;  %v7881_v31 = vadd.f32 %v7870_v61, %v7867_v46 }
 0x7ed   :  { %v11176_v54 = vpop.f32.mrf.mxu1 }
 0x7ee   :  { %v7875_v19 = vadd.f32 %v11175_v12, %v7826_v9  ;;  %v12407_v12 = vld [vmem:[%s18575_s11 + $0x8] sm:$0xff]  }
 0x7ef   :  { %v11177_v18 = vpop.f32.mrf.mxu1 }
 0x7f0   :  { %v11178_v25 = vadd.f32 %v11177_v18, %v11176_v54  ;;  %v7882_v63 = vadd.f32 %v7881_v31, %v7875_v19  ;;  %v12414_v54 = vld [vmem:[%s18575_s11 + $0x10] sm:$0xff]   ;;  %v12422_v31 = vld [vmem:[%s18575_s11 + $0x20] sm:$0xff]  }
 0x7f1   :  { %v12435_v18 = vld [vmem:[%s18574_s12 + $0x54] ss:$8 sps:$4 sm:$0xff]  }
 0x7f2   :  { %v7878_v0 = vadd.f32 %v11178_v25, %v7829_v47  ;;  %v12415_v47 = vld [vmem:[%s18575_s11 + $0x18] sm:$0xff]  }
 0x7f3   :  { %v12433_v25 = vld [vmem:[%s18574_s12 + $0x50] ss:$8 sps:$4 sm:$0xff]  }
 0x7f4   :  { %v7883_v62 = vadd.f32 %v7882_v63, %v7878_v0  ;;  %v12438_v63 = vld [vmem:[%s18574_s12 + $0x44] ss:$8 sps:$4 sm:$0xff]  }
 0x7f6   :  { %v7884_v10 = vrot.slane %v7883_v62, 4 }
 0x7f8   :  { %v7885_v59 = vadd.f32 %v7884_v10, %v7883_v62  ;;  %v12441_v62 = vld [vmem:[%s18574_s12 + $0x34] ss:$8 sps:$4 sm:$0xff]   ;;  %v12423_v10 = vld [vmem:[%s18575_s11 + $0x28] sm:$0xff]  }
 0x7fa   :  { %v7886_v40 = vrot.slane %v7885_v59, 2 }
 0x7fc   :  { %v7887_v36 = vadd.f32 %v7886_v40, %v7885_v59  ;;  %v12439_v59 = vld [vmem:[%s18574_s12 + $0x30] ss:$8 sps:$4 sm:$0xff]   ;;  %v12444_v40 = vld [vmem:[%s18574_s12 + $0x24] ss:$8 sps:$4 sm:$0xff]  }
 0x7fe   :  { %v7888_v13 = vrot.slane %v7887_v36, 1 }
 0x800   :  { %v7889_v11 = vadd.f32 %v7888_v13, %v7887_v36  ;;  %v12442_v36 = vld [vmem:[%s18574_s12 + $0x20] ss:$8 sps:$4 sm:$0xff]   ;;  %v12447_v13 = vld [vmem:[%s18574_s12 + $0x14] ss:$8 sps:$4 sm:$0xff]  }
 0x802   :  { %v7891_v53 = vmul.f32 0.03125, %v7889_v11  ;;  %v12445_v11 = vld [vmem:[%s18574_s12 + $0x10] ss:$8 sps:$4 sm:$0xff]  }
 0x804   :  { %v7892_v15 = vsub.f32 %v7867_v46, %v7891_v53  ;;  %v7893_v35 = vsub.f32 %v7870_v61, %v7891_v53  ;;  %v7894_v21 = vsub.f32 %v7875_v19, %v7891_v53  ;;  %v7895_v55 = vsub.f32 %v7878_v0, %v7891_v53  ;;  %v12429_v61 = vld [vmem:[%s18574_s12 + $0x74] ss:$8 sps:$4 sm:$0xff]   ;;  %v12432_v46 = vld [vmem:[%s18574_s12 + $0x64] ss:$8 sps:$4 sm:$0xff]   ;;  %v12430_v19 = vld [vmem:[%s18574_s12 + $0x60] ss:$8 sps:$4 sm:$0xff]  }
 0x805   :  { %v12436_v0 = vld [vmem:[%s18574_s12 + $0x40] ss:$8 sps:$4 sm:$0xff]   ;;  %v12450_v53 = vld [vmem:[%s18574_s12 + $0x4] ss:$8 sps:$4 sm:$0xff]  }
 0x806   :  { %v7896_v44 = vmul.f32 %v7892_v15, %v7892_v15  ;;  %v7897_v27 = vmul.f32 %v7893_v35, %v7893_v35  ;;  %v7898_v58 = vmul.f32 %v7894_v21, %v7894_v21  ;;  %v7899_v14 = vmul.f32 %v7895_v55, %v7895_v55 }
 0x808   :  { %v7900_v50 = vadd.f32 %v7897_v27, %v7896_v44  ;;  %v12457_v44 = vld [vmem:[%s18574_s12 + $0xe0] ss:$8 sps:$4 sm:$0xff]   ;;  %v12462_v27 = vld [vmem:[%s18574_s12 + $0xd4] ss:$8 sps:$4 sm:$0xff]  }
 0x80a   :  { %v7901_v4 = vadd.f32 %v7900_v50, %v7898_v58  ;;  %v12460_v58 = vld [vmem:[%s18574_s12 + $0xd0] ss:$8 sps:$4 sm:$0xff]   ;;  %v12465_v50 = vld [vmem:[%s18574_s12 + $0xc4] ss:$8 sps:$4 sm:$0xff]  }
 0x80c   :  { %v7902_v7 = vadd.f32 %v7901_v4, %v7899_v14  ;;  %v12463_v14 = vld [vmem:[%s18574_s12 + $0xc0] ss:$8 sps:$4 sm:$0xff]   ;;  %v12468_v4 = vld [vmem:[%s18574_s12 + $0xb4] ss:$8 sps:$4 sm:$0xff]  }
 0x80e   :  { %v7903_v20 = vrot.slane %v7902_v7, 4 }
 0x810   :  { %v7904_v29 = vadd.f32 %v7903_v20, %v7902_v7  ;;  %v12466_v7 = vld [vmem:[%s18574_s12 + $0xb0] ss:$8 sps:$4 sm:$0xff]   ;;  %v12471_v20 = vld [vmem:[%s18574_s12 + $0xa4] ss:$8 sps:$4 sm:$0xff]  }
 0x812   :  { %v7905_v60 = vrot.slane %v7904_v29, 2 }
 0x814   :  { %v7906_v3 = vadd.f32 %v7905_v60, %v7904_v29  ;;  %v12469_v29 = vld [vmem:[%s18574_s12 + $0xa0] ss:$8 sps:$4 sm:$0xff]   ;;  %v12472_v60 = vld [vmem:[%s18575_s11 + $0x30] sm:$0xff]  }
 0x816   :  { %v7907_v45 = vrot.slane %v7906_v3, 1 }
 0x818   :  { %v7908_v41 = vadd.f32 %v7907_v45, %v7906_v3  ;;  %v12473_v3 = vld [vmem:[%s18575_s11 + $0x38] sm:$0xff]  }
 0x819   :  { %v12474_v45 = vld [vmem:[%s18574_s12 + $0x90] ss:$8 sps:$4 sm:$0xff]  }
 0x81a   :  { %v7909_v37 = vmul.f32 0.03125, %v7908_v41  ;;  %v12476_v41 = vld [vmem:[%s18574_s12 + $0x94] ss:$8 sps:$4 sm:$0xff]  }
 0x81c   :  { %v7910_v34 = vadd.f32 1e-05, %v7909_v37  ;;  %v12477_v37 = vld [vmem:[%s18574_s12 + $0x80] ss:$8 sps:$4 sm:$0xff]  }
 0x81e   :  { %12785 = vrsqrt.f32 %v7910_v34  ;;  %v12479_v34 = vld [vmem:[%s18574_s12 + $0x84] ss:$8 sps:$4 sm:$0xff]  }
 0x82b   :  { %v12786_v51 = vpop.eup %12785 }
 0x82c   :  { %v7915_v17 = vmul.f32 %v12786_v51, %v7895_v55  ;;  %v7914_v5 = vmul.f32 %v12786_v51, %v7894_v21  ;;  %v7912_v28 = vmul.f32 %v12786_v51, %v7892_v15  ;;  %v7913_v38 = vmul.f32 %v12786_v51, %v7893_v35  ;;  %v12448_v15 = vld [vmem:[%s18574_s12] ss:$8 sps:$4 sm:$0xff]   ;;  %v12456_v35 = vld [vmem:[%s18574_s12 + $0xf4] ss:$8 sps:$4 sm:$0xff]   ;;  %v12454_v21 = vld [vmem:[%s18574_s12 + $0xf0] ss:$8 sps:$4 sm:$0xff]  }
 0x82d   :  { %v12459_v55 = vld [vmem:[%s18574_s12 + $0xe4] ss:$8 sps:$4 sm:$0xff]   ;;  %v12480_v51 = vld [vmem:[%s18574_s12 + $0x2c0] ss:$8 sps:$4 sm:$0xff]  }
 0x82e   :  { %v7926_v42 = vmul.f32 %v10485_v1, %v7915_v17  ;;  %v7925_v16 = vmul.f32 %v10485_v1, %v7914_v5  ;;  %v7923_v23 = vmul.f32 %v10485_v1, %v7912_v28  ;;  %v7924_v22 = vmul.f32 %v10485_v1, %v7913_v38  ;;  %v12482_v1 = vld [vmem:[%s18574_s12 + $0x2c4] ss:$8 sps:$4 sm:$0xff]   ;;  %v12485_v17 = vld [vmem:[%s18574_s12 + $0x174] ss:$8 sps:$4 sm:$0xff]   ;;  %v12507_v5 = vld [vmem:[%s18574_s12 + $0x2b0] ss:$8 sps:$4 sm:$0xff]  }
 0x82f   :  { %9785 = vmatprep.subr.bf16.mxu0 %v12482_v1  ;;  %v12509_v28 = vld [vmem:[%s18574_s12 + $0x2b4] ss:$8 sps:$4 sm:$0xff]   ;;  %v12528_v38 = vld [vmem:[%s18574_s12 + $0x2a0] ss:$8 sps:$4 sm:$0xff]  }
 0x830   :  { %v7936_v6 = vadd.f32 %v10486_v26, %v7925_v16  ;;  %v7937_v48 = vadd.f32 %v10486_v26, %v7926_v42  ;;  %v7934_v24 = vadd.f32 %v10486_v26, %v7923_v23  ;;  %v7935_v39 = vadd.f32 %v10486_v26, %v7924_v22  ;;  %9786 = vmatpush2.bf16.msra.mxu0 %v12480_v51  ;;  %v12530_v26 = vld [vmem:[%s18574_s12 + $0x2a4] ss:$8 sps:$4 sm:$0xff]   ;;  %v12534_v42 = vld [vmem:[%s18574_s12 + $0x290] ss:$8 sps:$4 sm:$0xff]   ;;  %v12536_v16 = vld [vmem:[%s18574_s12 + $0x294] ss:$8 sps:$4 sm:$0xff]  }
 0x831   :  { %9787 = vmatprep.subr.bf16.mxu0 %v12509_v28  ;;  %v12540_v23 = vld [vmem:[%s18574_s12 + $0x280] ss:$8 sps:$4 sm:$0xff]   ;;  %v12542_v22 = vld [vmem:[%s18574_s12 + $0x284] ss:$8 sps:$4 sm:$0xff]   ;;  %v12518_v51 = vld [vmem:[%s18574_s12 + $0x1d4] ss:$8 sps:$4 sm:$0xff]  }
 0x832   :  { %vm7940_vm0 = vcmp.gt.f32.partialorder %v7936_v6, 0.0  ;;  %vm7941_vm12 = vcmp.gt.f32.partialorder %v7937_v48, 0.0  ;;  %v7944_v8 = vmul.f32 0.2, %v7936_v6  ;;  %v7945_v57 = vmul.f32 0.2, %v7937_v48 }
 0x833   :  { %vm7938_vm13 = vcmp.gt.f32.partialorder %v7934_v24, 0.0  ;;  %vm7939_vm14 = vcmp.gt.f32.partialorder %v7935_v39, 0.0  ;;  %v7942_v32 = vmul.f32 0.2, %v7934_v24  ;;  %v7943_v2 = vmul.f32 0.2, %v7935_v39 }
 0x834   :  { %v7948_v56 = vsel %vm7940_vm0, %v7936_v6, %v7944_v8  ;;  %v7949_v30 = vsel %vm7941_vm12, %v7937_v48, %v7945_v57  ;;  %9788 = vmatpush2.bf16.msra.mxu0 %v12507_v5  ;;  %v12548_v6 = vld [vmem:[%s18574_s12 + $0x474] ss:$8 sps:$4 sm:$0xff]   ;;  %v12594_v5 = vld [vmem:[%s18574_s12 + $0x4f0] ss:$8 sps:$4 sm:$0xff]   ;;  %v12521_v28 = vld [vmem:[%s18574_s12 + $0x1c4] ss:$8 sps:$4 sm:$0xff]  }
 0x835   :  { %v7967_v52 = vpack.c.bf16 %v7949_v30, %v7948_v56  ;;  %v7946_v43 = vsel %vm7938_vm13, %v7934_v24, %v7942_v32  ;;  %v7947_v9 = vsel %vm7939_vm14, %v7935_v39, %v7943_v2  ;;  %9789 = vmatprep.subr.bf16.mxu0 %v12530_v26  ;;  %v12483_v32 = vld [vmem:[%s18574_s12 + $0x170] ss:$8 sps:$4 sm:$0xff]   ;;  %v12488_v56 = vld [vmem:[%s18574_s12 + $0x164] ss:$8 sps:$4 sm:$0xff]   ;;  %v12596_v1 = vld [vmem:[%s18574_s12 + $0x4f4] ss:$8 sps:$4 sm:$0xff]  }
 0x836   :  { %v7966_v33 = vpack.c.bf16 %v7947_v9, %v7946_v43  ;;  %v12486_v9 = vld [vmem:[%s18574_s12 + $0x160] ss:$8 sps:$4 sm:$0xff]  }
 0x837   :  { %11541 = vmatprep.subr.bf16.mxu1 %v7967_v52  ;;  %v12519_v26 = vld [vmem:[%s18574_s12 + $0x1c0] ss:$8 sps:$4 sm:$0xff]  }
 0x838   :  { %11542 = vmatpush3.bf16.msra.mxu1 %v7967_v52  ;;  %9790 = vmatpush2.bf16.msra.mxu0 %v12528_v38  ;;  %v12602_v38 = vld [vmem:[%s18574_s12 + $0x4e4] ss:$8 sps:$4 sm:$0xff]  }
 0x839   :  { %11543 = vmatprep.subr.bf16.mxu1 %v7966_v33  ;;  %9791 = vmatprep.subr.bf16.mxu0 %v12536_v16  ;;  %v12524_v16 = vld [vmem:[%s18574_s12 + $0x1b4] ss:$8 sps:$4 sm:$0xff]  }
 0x83c   :  { %11544 = vmatpush3.bf16.msra.mxu1 %v7966_v33  ;;  %9792 = vmatpush2.bf16.msra.mxu0 %v12534_v42  ;;  %v12491_v33 = vld [vmem:[%s18574_s12 + $0x154] ss:$8 sps:$4 sm:$0xff]   ;;  %v12600_v42 = vld [vmem:[%s18574_s12 + $0x4e0] ss:$8 sps:$4 sm:$0xff]  }
 0x83d   :  { %9681 = vmatprep.subr.bf16.mxu1 %v12429_v61  ;;  %9793 = vmatprep.subr.bf16.mxu0 %v12542_v22  ;;  %v12522_v22 = vld [vmem:[%s18574_s12 + $0x1b0] ss:$8 sps:$4 sm:$0xff]  }
 0x83f   :  { %11546 = vmatmul.mubr.msk.bf16.vlgmr.msra.gmra.mxu1 %vm4843_vm4, %v12407_v12 }
 0x840   :  { %11549 = vmatprep.mubr.msk.bf16.mxu1 %vm4843_vm4, %v12414_v54  ;;  %9682 = vmatpush1.bf16.msra.mxu1 %v12427_v49  ;;  %v12489_v49 = vld [vmem:[%s18574_s12 + $0x150] ss:$8 sps:$4 sm:$0xff]  }
 0x841   :  { %9683 = vmatprep.subr.bf16.mxu1 %v12432_v46  ;;  %9794 = vmatpush2.bf16.msra.mxu0 %v12540_v23  ;;  %v12608_v23 = vld [vmem:[%s18574_s12 + $0x4d4] ss:$8 sps:$4 sm:$0xff]  }
 0x842   :  { %9845 = vmatprep.subr.bf16.mxu0 %v12548_v6  ;;  %v12606_v6 = vld [vmem:[%s18574_s12 + $0x4d0] ss:$8 sps:$4 sm:$0xff]  }
 0x844   :  { %9684 = vmatpush1.bf16.msra.mxu1 %v12430_v19  ;;  %v12546_v19 = vld [vmem:[%s18574_s12 + $0x470] ss:$8 sps:$4 sm:$0xff]  }
 0x845   :  { %9685 = vmatprep.subr.bf16.mxu1 %v12435_v18  ;;  %v12494_v18 = vld [vmem:[%s18574_s12 + $0x144] ss:$8 sps:$4 sm:$0xff]  }
 0x847   :  { %11550 = vmatmul.mubr.msk.bf16.gmra.mxu1 %vm4843_vm4, %v12415_v47  ;;  %v12554_v47 = vld [vmem:[%s18574_s12 + $0x464] ss:$8 sps:$4 sm:$0xff]  }
 0x848   :  { %11553 = vmatprep.mubr.msk.bf16.mxu1 %vm4843_vm4, %v12422_v31  ;;  %9686 = vmatpush1.bf16.msra.mxu1 %v12433_v25 }
 0x849   :  { %9687 = vmatprep.subr.bf16.mxu1 %v12438_v63  ;;  %v12492_v63 = vld [vmem:[%s18574_s12 + $0x140] ss:$8 sps:$4 sm:$0xff]  }
 0x84c   :  { %9688 = vmatpush1.bf16.msra.mxu1 %v12436_v0  ;;  %v12552_v0 = vld [vmem:[%s18574_s12 + $0x460] ss:$8 sps:$4 sm:$0xff]  }
 0x84d   :  { %9689 = vmatprep.subr.bf16.mxu1 %v12441_v62  ;;  %v12497_v62 = vld [vmem:[%s18574_s12 + $0x134] ss:$8 sps:$4 sm:$0xff]  }
 0x84f   :  { %11554 = vmatmul.mubr.msk.bf16.gmra.mxu1 %vm4843_vm4, %v12423_v10  ;;  %v12560_v10 = vld [vmem:[%s18574_s12 + $0x454] ss:$8 sps:$4 sm:$0xff]  }
 0x850   :  { %9690 = vmatpush1.bf16.msra.mxu1 %v12439_v59  ;;  %11557 = vmatprep.mubr.msk.bf16.mxu1 %vm4843_vm4, %v12472_v60  ;;  %v12510_v60 = vld [vmem:[%s18574_s12 + $0x1f0] ss:$8 sps:$4 sm:$0xff]  }
 0x851   :  { %9691 = vmatprep.subr.bf16.mxu1 %v12444_v40 }
 0x854   :  { %9692 = vmatpush1.bf16.msra.mxu1 %v12442_v36  ;;  %v12495_v36 = vld [vmem:[%s18574_s12 + $0x130] ss:$8 sps:$4 sm:$0xff]  }
 0x855   :  { %9693 = vmatprep.subr.bf16.mxu1 %v12447_v13  ;;  %v12558_v13 = vld [vmem:[%s18574_s12 + $0x450] ss:$8 sps:$4 sm:$0xff]  }
 0x857   :  { %11558 = vmatmul.mubr.msk.bf16.gmra.mxu1 %vm4843_vm4, %v12473_v3  ;;  %v12582_v3 = vld [vmem:[%s18574_s12 + $0x410] ss:$8 sps:$4 sm:$0xff]  }
 0x858   :  { %9694 = vmatpush1.bf16.msra.mxu1 %v12445_v11 }
 0x859   :  { %9695 = vmatprep.subr.bf16.mxu1 %v12450_v53  ;;  %v12500_v53 = vld [vmem:[%s18574_s12 + $0x124] ss:$8 sps:$4 sm:$0xff]  }
 0x85c   :  { %9696 = vmatpush1.bf16.msra.mxu1 %v12448_v15  ;;  %v12566_v15 = vld [vmem:[%s18574_s12 + $0x444] ss:$8 sps:$4 sm:$0xff]  }
 0x85d   :  { %9697 = vmatprep.subr.bf16.mxu1 %v12456_v35  ;;  %v12498_v35 = vld [vmem:[%s18574_s12 + $0x120] ss:$8 sps:$4 sm:$0xff]  }
 0x860   :  { %9698 = vmatpush2.bf16.msra.mxu1 %v12454_v21  ;;  %v12564_v21 = vld [vmem:[%s18574_s12 + $0x440] ss:$8 sps:$4 sm:$0xff]  }
 0x861   :  { %9699 = vmatprep.subr.bf16.mxu1 %v12459_v55  ;;  %v12503_v55 = vld [vmem:[%s18574_s12 + $0x114] ss:$8 sps:$4 sm:$0xff]  }
 0x864   :  { %9700 = vmatpush2.bf16.msra.mxu1 %v12457_v44  ;;  %v12572_v44 = vld [vmem:[%s18574_s12 + $0x434] ss:$8 sps:$4 sm:$0xff]  }
 0x865   :  { %9701 = vmatprep.subr.bf16.mxu1 %v12462_v27  ;;  %v12501_v27 = vld [vmem:[%s18574_s12 + $0x110] ss:$8 sps:$4 sm:$0xff]  }
 0x868   :  { %9702 = vmatpush2.bf16.msra.mxu1 %v12460_v58  ;;  %v12570_v58 = vld [vmem:[%s18574_s12 + $0x430] ss:$8 sps:$4 sm:$0xff]  }
 0x869   :  { %9703 = vmatprep.subr.bf16.mxu1 %v12465_v50  ;;  %v12506_v50 = vld [vmem:[%s18574_s12 + $0x104] ss:$8 sps:$4 sm:$0xff]  }
 0x86c   :  { %9704 = vmatpush2.bf16.msra.mxu1 %v12463_v14  ;;  %v12578_v14 = vld [vmem:[%s18574_s12 + $0x424] ss:$8 sps:$4 sm:$0xff]  }
 0x86d   :  { %9705 = vmatprep.subr.bf16.mxu1 %v12468_v4  ;;  %v12504_v4 = vld [vmem:[%s18574_s12 + $0x100] ss:$8 sps:$4 sm:$0xff]  }
 0x870   :  { %9706 = vmatpush2.bf16.msra.mxu1 %v12466_v7  ;;  %v12576_v7 = vld [vmem:[%s18574_s12 + $0x420] ss:$8 sps:$4 sm:$0xff]  }
 0x871   :  { %9707 = vmatprep.subr.bf16.mxu1 %v12471_v20  ;;  %v12512_v20 = vld [vmem:[%s18574_s12 + $0x1f4] ss:$8 sps:$4 sm:$0xff]  }
 0x874   :  { %9708 = vmatpush2.bf16.msra.mxu1 %v12469_v29  ;;  %v12584_v29 = vld [vmem:[%s18574_s12 + $0x414] ss:$8 sps:$4 sm:$0xff]  }
 0x875   :  { %9709 = vmatprep.subr.bf16.mxu1 %v12476_v41  ;;  %v12590_v41 = vld [vmem:[%s18574_s12 + $0x404] ss:$8 sps:$4 sm:$0xff]  }
 0x878   :  { %9710 = vmatpush2.bf16.msra.mxu1 %v12474_v45  ;;  %v12515_v45 = vld [vmem:[%s18574_s12 + $0x1e4] ss:$8 sps:$4 sm:$0xff]  }
 0x879   :  { %9711 = vmatprep.subr.bf16.mxu1 %v12479_v34  ;;  %v12588_v34 = vld [vmem:[%s18574_s12 + $0x400] ss:$8 sps:$4 sm:$0xff]  }
 0x87c   :  { %9712 = vmatpush2.bf16.msra.mxu1 %v12477_v37  ;;  %v12513_v37 = vld [vmem:[%s18574_s12 + $0x1e0] ss:$8 sps:$4 sm:$0xff]  }
 0x87d   :  { %9722 = vmatprep.subr.bf16.mxu1 %v12485_v17  ;;  %v12516_v17 = vld [vmem:[%s18574_s12 + $0x1d0] ss:$8 sps:$4 sm:$0xff]  }
 0x8ff   :  { %v17925_v48 = vpop.f32.mrf.mxu1 }
 0x901   :  { %v8066_v24 = vpop.f32.mrf.mxu1 }
 0x902   :  { %v8129_v2 = vpack.c.bf16 %v8066_v24, %v8066_v24  ;;  %v12527_v24 = vld [vmem:[%s18574_s12 + $0x1a4] ss:$8 sps:$4 sm:$0xff]  }
 0x903   :  { %v11548_v39 = vpop.f32.mrf.mxu1 }
 0x904   :  { %v8132_v52 = vpack.c.bf16 %v11548_v39, %v11548_v39  ;;  %v12614_v39 = vld [vmem:[%s18574_s12 + $0x4c4] ss:$8 sps:$4 sm:$0xff]  }
 0x905   :  { %v8069_v8 = vpop.f32.mrf.mxu1 }
 0x906   :  { %v8130_v57 = vpack.c.bf16 %v8069_v8, %v8069_v8  ;;  %v12525_v8 = vld [vmem:[%s18574_s12 + $0x1a0] ss:$8 sps:$4 sm:$0xff]  }
 0x907   :  { %v17933_v30 = vpop.f32.mrf.mxu1 }
 0x908   :  { %9713 = vmatprep.mubr.bf16.mxu1 %v8130_v57  ;;  %v12612_v57 = vld [vmem:[%s18574_s12 + $0x4c0] ss:$8 sps:$4 sm:$0xff]  }
 0x909   :  { %9714 = vmatmul.mubr.bf16.vlgmr.msra.gmra.mxu1 %v8129_v2  ;;  %v8082_v43 = vpop.f32.mrf.mxu1  ;;  %v12620_v2 = vld [vmem:[%s18574_s12 + $0x4b4] ss:$8 sps:$4 sm:$0xff]  }
 0x90a   :  { %9723 = vmatpush1.bf16.msra.mxu1 %v12483_v32  ;;  %9754 = vmatprep.mubr.bf16.mxu1 %v8132_v52  ;;  %v8133_v12 = vpack.c.bf16 %v8082_v43, %v8082_v43  ;;  %v12533_v32 = vld [vmem:[%s18574_s12 + $0x194] ss:$8 sps:$4 sm:$0xff]   ;;  %v12618_v52 = vld [vmem:[%s18574_s12 + $0x4b0] ss:$8 sps:$4 sm:$0xff]   ;;  %v12539_v43 = vld [vmem:[%s18574_s12 + $0x184] ss:$8 sps:$4 sm:$0xff]  }
 0x90b   :  { %9724 = vmatprep.subr.bf16.mxu1 %v12488_v56  ;;  %v17941_v61 = vpop.f32.mrf.mxu1  ;;  %v12531_v56 = vld [vmem:[%s18574_s12 + $0x190] ss:$8 sps:$4 sm:$0xff]  }
 0x90d   :  { %v8085_v54 = vpop.f32.mrf.mxu1 }
 0x90e   :  { %9725 = vmatpush1.bf16.msra.mxu1 %v12486_v9  ;;  %v8134_v46 = vpack.c.bf16 %v8085_v54, %v8085_v54  ;;  %v12626_v9 = vld [vmem:[%s18574_s12 + $0x4a4] ss:$8 sps:$4 sm:$0xff]   ;;  %v12545_v54 = vld [vmem:[%s18574_s12 + $0x374] ss:$8 sps:$4 sm:$0xff]  }
 0x90f   :  { %9726 = vmatprep.subr.bf16.mxu1 %v12491_v33  ;;  %v17955_v31 = vpop.f32.mrf.mxu1  ;;  %v12537_v33 = vld [vmem:[%s18574_s12 + $0x180] ss:$8 sps:$4 sm:$0xff]  }
 0x910   :  { %9795 = vmatprep.mubr.bf16.mxu0 %v8134_v46 }
 0x911   :  { %9796 = vmatmul.mubr.bf16.vlgmr.msra.gmra.mxu0 %v8133_v12  ;;  %v17957_v25 = vpop.f32.mrf.mxu1  ;;  %v12624_v12 = vld [vmem:[%s18574_s12 + $0x4a0] ss:$8 sps:$4 sm:$0xff]  }
 0x912   :  { %9727 = vmatpush1.bf16.msra.mxu1 %v12489_v49  ;;  %9846 = vmatpush1.bf16.msra.mxu0 %v12546_v19  ;;  %v12632_v49 = vld [vmem:[%s18574_s12 + $0x494] ss:$8 sps:$4 sm:$0xff]  }
 0x913   :  { %9728 = vmatprep.subr.bf16.mxu1 %v12494_v18  ;;  %9847 = vmatprep.subr.bf16.mxu0 %v12554_v47  ;;  %v17971_v59 = vpop.f32.mrf.mxu1  ;;  %v12543_v18 = vld [vmem:[%s18574_s12 + $0x370] ss:$8 sps:$4 sm:$0xff]  }
 0x914   :  { %v12630_v47 = vld [vmem:[%s18574_s12 + $0x490] ss:$8 sps:$4 sm:$0xff]  }
 0x915   :  { %v8101_v40 = vpop.f32.mrf.mxu1 }
 0x916   :  { %9729 = vmatpush1.bf16.msra.mxu1 %v12492_v63  ;;  %9848 = vmatpush1.bf16.msra.mxu0 %v12552_v0  ;;  %v8138_v11 = vpack.c.bf16 %v8101_v40, %v8101_v40  ;;  %v8131_v63 = vpack.c.bf16 %v17925_v48, %v17925_v48  ;;  %v12551_v0 = vld [vmem:[%s18574_s12 + $0x364] ss:$8 sps:$4 sm:$0xff]   ;;  %v12549_v48 = vld [vmem:[%s18574_s12 + $0x360] ss:$8 sps:$4 sm:$0xff]  }
 0x917   :  { %9730 = vmatprep.subr.bf16.mxu1 %v12497_v62  ;;  %9849 = vmatprep.subr.bf16.mxu0 %v12560_v10  ;;  %v18117_v46 = vpop.f32.mrf.mxu1  ;;  %v12638_v62 = vld [vmem:[%s18574_s12 + $0x484] ss:$8 sps:$4 sm:$0xff]   ;;  %v8136_v10 = vpack.c.bf16 %v17941_v61, %v17941_v61  ;;  %v12644_v61 = vld [vmem:[%s18574_s12 + $0x674] ss:$8 sps:$4 sm:$0xff]  }
 0x918   :  { %9877 = vmatprep.mubr.bf16.mxu0 %v8138_v11  ;;  %v8137_v11 = vpack.c.bf16 %v17957_v25, %v17957_v25  ;;  %v12650_v25 = vld [vmem:[%s18574_s12 + $0x664] ss:$8 sps:$4 sm:$0xff]  }
 0x919   :  { %v18119_v19 = vpop.f32.mrf.mxu1 }
 0x91a   :  { %9731 = vmatpush1.bf16.msra.mxu1 %v12495_v36  ;;  %9850 = vmatpush1.bf16.msra.mxu0 %v12558_v13  ;;  %v12636_v36 = vld [vmem:[%s18574_s12 + $0x480] ss:$8 sps:$4 sm:$0xff]   ;;  %v12557_v13 = vld [vmem:[%s18574_s12 + $0x354] ss:$8 sps:$4 sm:$0xff]  }
 0x91b   :  { %9732 = vmatprep.subr.bf16.mxu1 %v12500_v53  ;;  %9851 = vmatprep.subr.bf16.mxu0 %v12566_v15  ;;  %v18137_v40 = vpop.f32.mrf.mxu1  ;;  %v12555_v15 = vld [vmem:[%s18574_s12 + $0x350] ss:$8 sps:$4 sm:$0xff]  }
 0x91d   :  { %v8117_v53 = vpop.f32.mrf.mxu1 }
 0x91e   :  { %9733 = vmatpush1.bf16.msra.mxu1 %v12498_v35  ;;  %9852 = vmatpush1.bf16.msra.mxu0 %v12564_v21  ;;  %v12642_v35 = vld [vmem:[%s18574_s12 + $0x670] ss:$8 sps:$4 sm:$0xff]   ;;  %v12563_v21 = vld [vmem:[%s18574_s12 + $0x344] ss:$8 sps:$4 sm:$0xff]  }
 0x91f   :  { %9734 = vmatprep.subr.bf16.mxu1 %v12503_v55  ;;  %9853 = vmatprep.subr.bf16.mxu0 %v12572_v44  ;;  %v8142_v55 = vpack.c.bf16 %v8117_v53, %v8117_v53  ;;  %v12561_v44 = vld [vmem:[%s18574_s12 + $0x340] ss:$8 sps:$4 sm:$0xff]   ;;  %v12639_v53 = vld [vmem:[%s18574_s12 + $0x570] ss:$8 sps:$4 sm:$0xff]  }
 0x922   :  { %9735 = vmatpush1.bf16.msra.mxu1 %v12501_v27  ;;  %9854 = vmatpush1.bf16.msra.mxu0 %v12570_v58  ;;  %v12648_v27 = vld [vmem:[%s18574_s12 + $0x660] ss:$8 sps:$4 sm:$0xff]   ;;  %v12569_v58 = vld [vmem:[%s18574_s12 + $0x334] ss:$8 sps:$4 sm:$0xff]  }
 0x923   :  { %9736 = vmatprep.subr.bf16.mxu1 %v12506_v50  ;;  %9855 = vmatprep.subr.bf16.mxu0 %v12578_v14  ;;  %v12656_v50 = vld [vmem:[%s18574_s12 + $0x654] ss:$8 sps:$4 sm:$0xff]   ;;  %v12567_v14 = vld [vmem:[%s18574_s12 + $0x330] ss:$8 sps:$4 sm:$0xff]  }
 0x926   :  { %9737 = vmatpush1.bf16.msra.mxu1 %v12504_v4  ;;  %9856 = vmatpush1.bf16.msra.mxu0 %v12576_v7  ;;  %v12654_v4 = vld [vmem:[%s18574_s12 + $0x650] ss:$8 sps:$4 sm:$0xff]   ;;  %v12575_v7 = vld [vmem:[%s18574_s12 + $0x324] ss:$8 sps:$4 sm:$0xff]  }
 0x927   :  { %9738 = vmatprep.subr.bf16.mxu1 %v12512_v20  ;;  %9857 = vmatprep.subr.bf16.mxu0 %v12584_v29  ;;  %v12662_v20 = vld [vmem:[%s18574_s12 + $0x644] ss:$8 sps:$4 sm:$0xff]   ;;  %v12573_v29 = vld [vmem:[%s18574_s12 + $0x320] ss:$8 sps:$4 sm:$0xff]  }
 0x92a   :  { %9739 = vmatpush2.bf16.msra.mxu1 %v12510_v60  ;;  %9858 = vmatpush1.bf16.msra.mxu0 %v12582_v3  ;;  %v12660_v60 = vld [vmem:[%s18574_s12 + $0x640] ss:$8 sps:$4 sm:$0xff]   ;;  %v12581_v3 = vld [vmem:[%s18574_s12 + $0x314] ss:$8 sps:$4 sm:$0xff]  }
 0x92b   :  { %9740 = vmatprep.subr.bf16.mxu1 %v12515_v45  ;;  %9859 = vmatprep.subr.bf16.mxu0 %v12590_v41  ;;  %v12668_v45 = vld [vmem:[%s18574_s12 + $0x634] ss:$8 sps:$4 sm:$0xff]   ;;  %v12579_v41 = vld [vmem:[%s18574_s12 + $0x310] ss:$8 sps:$4 sm:$0xff]  }
 0x92e   :  { %9741 = vmatpush2.bf16.msra.mxu1 %v12513_v37  ;;  %9860 = vmatpush1.bf16.msra.mxu0 %v12588_v34  ;;  %v12666_v37 = vld [vmem:[%s18574_s12 + $0x630] ss:$8 sps:$4 sm:$0xff]   ;;  %v12587_v34 = vld [vmem:[%s18574_s12 + $0x304] ss:$8 sps:$4 sm:$0xff]  }
 0x92f   :  { %9742 = vmatprep.subr.bf16.mxu1 %v12518_v51  ;;  %9861 = vmatprep.subr.bf16.mxu0 %v12596_v1  ;;  %v12674_v51 = vld [vmem:[%s18574_s12 + $0x624] ss:$8 sps:$4 sm:$0xff]   ;;  %v12585_v1 = vld [vmem:[%s18574_s12 + $0x300] ss:$8 sps:$4 sm:$0xff]  }
 0x932   :  { %9743 = vmatpush2.bf16.msra.mxu1 %v12516_v17  ;;  %9862 = vmatpush2.bf16.msra.mxu0 %v12594_v5  ;;  %v12672_v17 = vld [vmem:[%s18574_s12 + $0x620] ss:$8 sps:$4 sm:$0xff]   ;;  %v12593_v5 = vld [vmem:[%s18574_s12 + $0x3f4] ss:$8 sps:$4 sm:$0xff]  }
 0x933   :  { %9744 = vmatprep.subr.bf16.mxu1 %v12521_v28  ;;  %9863 = vmatprep.subr.bf16.mxu0 %v12602_v38  ;;  %v12680_v28 = vld [vmem:[%s18574_s12 + $0x614] ss:$8 sps:$4 sm:$0xff]   ;;  %v12591_v38 = vld [vmem:[%s18574_s12 + $0x3f0] ss:$8 sps:$4 sm:$0xff]  }
 0x936   :  { %9745 = vmatpush2.bf16.msra.mxu1 %v12519_v26  ;;  %9864 = vmatpush2.bf16.msra.mxu0 %v12600_v42  ;;  %v12678_v26 = vld [vmem:[%s18574_s12 + $0x610] ss:$8 sps:$4 sm:$0xff]   ;;  %v12599_v42 = vld [vmem:[%s18574_s12 + $0x3e4] ss:$8 sps:$4 sm:$0xff]  }
 0x937   :  { %9746 = vmatprep.subr.bf16.mxu1 %v12524_v16  ;;  %9865 = vmatprep.subr.bf16.mxu0 %v12608_v23  ;;  %v12686_v16 = vld [vmem:[%s18574_s12 + $0x604] ss:$8 sps:$4 sm:$0xff]   ;;  %v12597_v23 = vld [vmem:[%s18574_s12 + $0x3e0] ss:$8 sps:$4 sm:$0xff]  }
 0x93a   :  { %9747 = vmatpush2.bf16.msra.mxu1 %v12522_v22  ;;  %9866 = vmatpush2.bf16.msra.mxu0 %v12606_v6  ;;  %v12684_v22 = vld [vmem:[%s18574_s12 + $0x600] ss:$8 sps:$4 sm:$0xff]   ;;  %v12605_v6 = vld [vmem:[%s18574_s12 + $0x3d4] ss:$8 sps:$4 sm:$0xff]  }
 0x93b   :  { %9748 = vmatprep.subr.bf16.mxu1 %v12527_v24  ;;  %9867 = vmatprep.subr.bf16.mxu0 %v12614_v39  ;;  %v12692_v24 = vld [vmem:[%s18574_s12 + $0x6f4] ss:$8 sps:$4 sm:$0xff]   ;;  %v12603_v39 = vld [vmem:[%s18574_s12 + $0x3d0] ss:$8 sps:$4 sm:$0xff]  }
 0x93e   :  { %9749 = vmatpush2.bf16.msra.mxu1 %v12525_v8  ;;  %9868 = vmatpush2.bf16.msra.mxu0 %v12612_v57  ;;  %v12690_v8 = vld [vmem:[%s18574_s12 + $0x6f0] ss:$8 sps:$4 sm:$0xff]   ;;  %v12611_v57 = vld [vmem:[%s18574_s12 + $0x3c4] ss:$8 sps:$4 sm:$0xff]  }
 0x93f   :  { %9750 = vmatprep.subr.bf16.mxu1 %v12533_v32  ;;  %9869 = vmatprep.subr.bf16.mxu0 %v12620_v2  ;;  %v12698_v32 = vld [vmem:[%s18574_s12 + $0x6e4] ss:$8 sps:$4 sm:$0xff]   ;;  %v12609_v2 = vld [vmem:[%s18574_s12 + $0x3c0] ss:$8 sps:$4 sm:$0xff]  }
 0x942   :  { %9751 = vmatpush2.bf16.msra.mxu1 %v12531_v56  ;;  %9870 = vmatpush2.bf16.msra.mxu0 %v12618_v52  ;;  %v12696_v56 = vld [vmem:[%s18574_s12 + $0x6e0] ss:$8 sps:$4 sm:$0xff]   ;;  %v12617_v52 = vld [vmem:[%s18574_s12 + $0x3b4] ss:$8 sps:$4 sm:$0xff]  }
 0x943   :  { %9752 = vmatprep.subr.bf16.mxu1 %v12539_v43  ;;  %9871 = vmatprep.subr.bf16.mxu0 %v12626_v9  ;;  %v12704_v43 = vld [vmem:[%s18574_s12 + $0x6d4] ss:$8 sps:$4 sm:$0xff]   ;;  %v12615_v9 = vld [vmem:[%s18574_s12 + $0x3b0] ss:$8 sps:$4 sm:$0xff]  }
 0x946   :  { %9753 = vmatpush2.bf16.msra.mxu1 %v12537_v33  ;;  %9872 = vmatpush2.bf16.msra.mxu0 %v12624_v12  ;;  %v12702_v33 = vld [vmem:[%s18574_s12 + $0x6d0] ss:$8 sps:$4 sm:$0xff]   ;;  %v12623_v12 = vld [vmem:[%s18574_s12 + $0x3a4] ss:$8 sps:$4 sm:$0xff]  }
 0x947   :  { %9804 = vmatprep.subr.bf16.mxu1 %v12545_v54  ;;  %9873 = vmatprep.subr.bf16.mxu0 %v12632_v49  ;;  %v12710_v54 = vld [vmem:[%s18574_s12 + $0x6c4] ss:$8 sps:$4 sm:$0xff]   ;;  %v12621_v49 = vld [vmem:[%s18574_s12 + $0x3a0] ss:$8 sps:$4 sm:$0xff]  }
 0x949   :  { %9755 = vmatmul.mubr.bf16.vlgmr.msra.gmra.mxu1 %v8131_v63  ;;  %v12716_v63 = vld [vmem:[%s18574_s12 + $0x6b4] ss:$8 sps:$4 sm:$0xff]  }
 0x94a   :  { %9805 = vmatpush1.bf16.msra.mxu1 %v12543_v18  ;;  %9874 = vmatpush2.bf16.msra.mxu0 %v12630_v47  ;;  %v12708_v18 = vld [vmem:[%s18574_s12 + $0x6c0] ss:$8 sps:$4 sm:$0xff]   ;;  %v12629_v47 = vld [vmem:[%s18574_s12 + $0x394] ss:$8 sps:$4 sm:$0xff]  }
 0x94b   :  { %9806 = vmatprep.subr.bf16.mxu1 %v12551_v0  ;;  %9875 = vmatprep.subr.bf16.mxu0 %v12638_v62  ;;  %v12627_v0 = vld [vmem:[%s18574_s12 + $0x390] ss:$8 sps:$4 sm:$0xff]  }
 0x94c   :  { %9836 = vmatprep.mubr.bf16.mxu1 %v8136_v10  ;;  %v12714_v62 = vld [vmem:[%s18574_s12 + $0x6b0] ss:$8 sps:$4 sm:$0xff]   ;;  %v12635_v10 = vld [vmem:[%s18574_s12 + $0x384] ss:$8 sps:$4 sm:$0xff]  }
 0x94e   :  { %9807 = vmatpush1.bf16.msra.mxu1 %v12549_v48  ;;  %9876 = vmatpush2.bf16.msra.mxu0 %v12636_v36  ;;  %v12722_v48 = vld [vmem:[%s18574_s12 + $0x6a4] ss:$8 sps:$4 sm:$0xff]   ;;  %v12633_v36 = vld [vmem:[%s18574_s12 + $0x380] ss:$8 sps:$4 sm:$0xff]  }
 0x94f   :  { %9808 = vmatprep.subr.bf16.mxu1 %v12557_v13  ;;  %9927 = vmatprep.subr.bf16.mxu0 %v12644_v61  ;;  %v12720_v13 = vld [vmem:[%s18574_s12 + $0x6a0] ss:$8 sps:$4 sm:$0xff]   ;;  %v12641_v61 = vld [vmem:[%s18574_s12 + $0x574] ss:$8 sps:$4 sm:$0xff]  }
 0x951   :  { %9878 = vmatmul.mubr.bf16.vlgmr.msra.gmra.mxu0 %v8137_v11  ;;  %v12728_v11 = vld [vmem:[%s18574_s12 + $0x694] ss:$8 sps:$4 sm:$0xff]  }
 0x952   :  { %9809 = vmatpush1.bf16.msra.mxu1 %v12555_v15  ;;  %9928 = vmatpush1.bf16.msra.mxu0 %v12642_v35  ;;  %v12726_v15 = vld [vmem:[%s18574_s12 + $0x690] ss:$8 sps:$4 sm:$0xff]   ;;  %v8135_v35 = vpack.c.bf16 %v17933_v30, %v17933_v30  ;;  %v12732_v30 = vld [vmem:[%s18574_s12 + $0x680] ss:$8 sps:$4 sm:$0xff]  }
 0x953   :  { %9810 = vmatprep.subr.bf16.mxu1 %v12563_v21  ;;  %9929 = vmatprep.subr.bf16.mxu0 %v12650_v25  ;;  %v12647_v21 = vld [vmem:[%s18574_s12 + $0x564] ss:$8 sps:$4 sm:$0xff]  }
 0x954   :  { %9959 = vmatprep.mubr.bf16.mxu0 %v8142_v55  ;;  %v12734_v25 = vld [vmem:[%s18574_s12 + $0x684] ss:$8 sps:$4 sm:$0xff]   ;;  %v8140_v55 = vpack.c.bf16 %v17971_v59, %v17971_v59  ;;  %v8141_v59 = vpack.c.bf16 %v18119_v19, %v18119_v19  ;;  %v12665_v19 = vld [vmem:[%s18574_s12 + $0x534] ss:$8 sps:$4 sm:$0xff]  }
 0x956   :  { %9811 = vmatpush1.bf16.msra.mxu1 %v12561_v44  ;;  %9930 = vmatpush1.bf16.msra.mxu0 %v12648_v27  ;;  %v12645_v44 = vld [vmem:[%s18574_s12 + $0x560] ss:$8 sps:$4 sm:$0xff]   ;;  %v12653_v27 = vld [vmem:[%s18574_s12 + $0x554] ss:$8 sps:$4 sm:$0xff]  }
 0x957   :  { %9812 = vmatprep.subr.bf16.mxu1 %v12569_v58  ;;  %9931 = vmatprep.subr.bf16.mxu0 %v12656_v50  ;;  %v12651_v58 = vld [vmem:[%s18574_s12 + $0x550] ss:$8 sps:$4 sm:$0xff]   ;;  %v12659_v50 = vld [vmem:[%s18574_s12 + $0x544] ss:$8 sps:$4 sm:$0xff]  }
 0x95a   :  { %9813 = vmatpush1.bf16.msra.mxu1 %v12567_v14  ;;  %9932 = vmatpush1.bf16.msra.mxu0 %v12654_v4  ;;  %v12657_v14 = vld [vmem:[%s18574_s12 + $0x540] ss:$8 sps:$4 sm:$0xff]   ;;  %v12663_v4 = vld [vmem:[%s18574_s12 + $0x530] ss:$8 sps:$4 sm:$0xff]  }
 0x95b   :  { %9814 = vmatprep.subr.bf16.mxu1 %v12575_v7  ;;  %9933 = vmatprep.subr.bf16.mxu0 %v12662_v20  ;;  %v12671_v7 = vld [vmem:[%s18574_s12 + $0x524] ss:$8 sps:$4 sm:$0xff]   ;;  %v12669_v20 = vld [vmem:[%s18574_s12 + $0x520] ss:$8 sps:$4 sm:$0xff]  }
 0x95e   :  { %9815 = vmatpush1.bf16.msra.mxu1 %v12573_v29  ;;  %9934 = vmatpush1.bf16.msra.mxu0 %v12660_v60  ;;  %v12677_v29 = vld [vmem:[%s18574_s12 + $0x514] ss:$8 sps:$4 sm:$0xff]   ;;  %v12675_v60 = vld [vmem:[%s18574_s12 + $0x510] ss:$8 sps:$4 sm:$0xff]  }
 0x95f   :  { %9816 = vmatprep.subr.bf16.mxu1 %v12581_v3  ;;  %9935 = vmatprep.subr.bf16.mxu0 %v12668_v45  ;;  %v12683_v3 = vld [vmem:[%s18574_s12 + $0x504] ss:$8 sps:$4 sm:$0xff]   ;;  %v12681_v45 = vld [vmem:[%s18574_s12 + $0x500] ss:$8 sps:$4 sm:$0xff]  }
 0x962   :  { %9817 = vmatpush1.bf16.msra.mxu1 %v12579_v41  ;;  %9936 = vmatpush1.bf16.msra.mxu0 %v12666_v37  ;;  %v12689_v41 = vld [vmem:[%s18574_s12 + $0x5f4] ss:$8 sps:$4 sm:$0xff]   ;;  %v12687_v37 = vld [vmem:[%s18574_s12 + $0x5f0] ss:$8 sps:$4 sm:$0xff]  }
 0x963   :  { %9818 = vmatprep.subr.bf16.mxu1 %v12587_v34  ;;  %9937 = vmatprep.subr.bf16.mxu0 %v12674_v51  ;;  %v12695_v34 = vld [vmem:[%s18574_s12 + $0x5e4] ss:$8 sps:$4 sm:$0xff]   ;;  %v12693_v51 = vld [vmem:[%s18574_s12 + $0x5e0] ss:$8 sps:$4 sm:$0xff]  }
 0x966   :  { %9819 = vmatpush1.bf16.msra.mxu1 %v12585_v1  ;;  %9938 = vmatpush1.bf16.msra.mxu0 %v12672_v17  ;;  %v12701_v1 = vld [vmem:[%s18574_s12 + $0x5d4] ss:$8 sps:$4 sm:$0xff]   ;;  %v12699_v17 = vld [vmem:[%s18574_s12 + $0x5d0] ss:$8 sps:$4 sm:$0xff]  }
 0x967   :  { %9820 = vmatprep.subr.bf16.mxu1 %v12593_v5  ;;  %9939 = vmatprep.subr.bf16.mxu0 %v12680_v28  ;;  %v12707_v5 = vld [vmem:[%s18574_s12 + $0x5c4] ss:$8 sps:$4 sm:$0xff]   ;;  %v12705_v28 = vld [vmem:[%s18574_s12 + $0x5c0] ss:$8 sps:$4 sm:$0xff]  }
 0x96a   :  { %9821 = vmatpush2.bf16.msra.mxu1 %v12591_v38  ;;  %9940 = vmatpush1.bf16.msra.mxu0 %v12678_v26  ;;  %v12713_v38 = vld [vmem:[%s18574_s12 + $0x5b4] ss:$8 sps:$4 sm:$0xff]   ;;  %v12711_v26 = vld [vmem:[%s18574_s12 + $0x5b0] ss:$8 sps:$4 sm:$0xff]  }
 0x96b   :  { %9822 = vmatprep.subr.bf16.mxu1 %v12599_v42  ;;  %9941 = vmatprep.subr.bf16.mxu0 %v12686_v16  ;;  %v12719_v42 = vld [vmem:[%s18574_s12 + $0x5a4] ss:$8 sps:$4 sm:$0xff]   ;;  %v12717_v16 = vld [vmem:[%s18574_s12 + $0x5a0] ss:$8 sps:$4 sm:$0xff]  }
 0x96e   :  { %9823 = vmatpush2.bf16.msra.mxu1 %v12597_v23  ;;  %9942 = vmatpush1.bf16.msra.mxu0 %v12684_v22  ;;  %v12725_v23 = vld [vmem:[%s18574_s12 + $0x594] ss:$8 sps:$4 sm:$0xff]   ;;  %v12723_v22 = vld [vmem:[%s18574_s12 + $0x590] ss:$8 sps:$4 sm:$0xff]  }
 0x96f   :  { %9824 = vmatprep.subr.bf16.mxu1 %v12605_v6  ;;  %9943 = vmatprep.subr.bf16.mxu0 %v12692_v24  ;;  %v12731_v6 = vld [vmem:[%s18574_s12 + $0x584] ss:$8 sps:$4 sm:$0xff]   ;;  %v12729_v24 = vld [vmem:[%s18574_s12 + $0x580] ss:$8 sps:$4 sm:$0xff]  }
 0x972   :  { %9825 = vmatpush2.bf16.msra.mxu1 %v12603_v39  ;;  %9944 = vmatpush2.bf16.msra.mxu0 %v12690_v8  ;;  %v12737_v39 = vld [vmem:[%s18574_s12 + $0x774] ss:$8 sps:$4 sm:$0xff]   ;;  %v12735_v8 = vld [vmem:[%s18574_s12 + $0x770] ss:$8 sps:$4 sm:$0xff]  }
 0x973   :  { %9826 = vmatprep.subr.bf16.mxu1 %v12611_v57  ;;  %9945 = vmatprep.subr.bf16.mxu0 %v12698_v32  ;;  %v8139_v57 = vpack.c.bf16 %v17955_v31, %v17955_v31  ;;  %v12740_v32 = vld [vmem:[%s18574_s12 + $0x764] ss:$8 sps:$4 sm:$0xff]   ;;  %v12743_v31 = vld [vmem:[%s18574_s12 + $0x754] ss:$8 sps:$4 sm:$0xff]  }
 0x976   :  { %9827 = vmatpush2.bf16.msra.mxu1 %v12609_v2  ;;  %9946 = vmatpush2.bf16.msra.mxu0 %v12696_v56  ;;  %v8144_v2 = vpack.c.bf16 %v18137_v40, %v18137_v40  ;;  %v12741_v40 = vld [vmem:[%s18574_s12 + $0x750] ss:$8 sps:$4 sm:$0xff]  }
 0x977   :  { %9828 = vmatprep.subr.bf16.mxu1 %v12617_v52  ;;  %9947 = vmatprep.subr.bf16.mxu0 %v12704_v43  ;;  %v12738_v52 = vld [vmem:[%s18574_s12 + $0x760] ss:$8 sps:$4 sm:$0xff]  }
 0x97a   :  { %9829 = vmatpush2.bf16.msra.mxu1 %v12615_v9  ;;  %9948 = vmatpush2.bf16.msra.mxu0 %v12702_v33  ;;  %v12746_v33 = vld [vmem:[%s18574_s12 + $0x744] ss:$8 sps:$4 sm:$0xff]  }
 0x97b   :  { %9830 = vmatprep.subr.bf16.mxu1 %v12623_v12  ;;  %9949 = vmatprep.subr.bf16.mxu0 %v12710_v54 }
 0x97e   :  { %9831 = vmatpush2.bf16.msra.mxu1 %v12621_v49  ;;  %9950 = vmatpush2.bf16.msra.mxu0 %v12708_v18  ;;  %v12744_v49 = vld [vmem:[%s18574_s12 + $0x740] ss:$8 sps:$4 sm:$0xff]   ;;  %v12749_v18 = vld [vmem:[%s18574_s12 + $0x734] ss:$8 sps:$4 sm:$0xff]  }
 0x97f   :  { %9832 = vmatprep.subr.bf16.mxu1 %v12629_v47  ;;  %9951 = vmatprep.subr.bf16.mxu0 %v12716_v63 }
 0x982   :  { %9833 = vmatpush2.bf16.msra.mxu1 %v12627_v0  ;;  %9952 = vmatpush2.bf16.msra.mxu0 %v12714_v62  ;;  %v12747_v0 = vld [vmem:[%s18574_s12 + $0x730] ss:$8 sps:$4 sm:$0xff]   ;;  %v12752_v62 = vld [vmem:[%s18574_s12 + $0x724] ss:$8 sps:$4 sm:$0xff]  }
 0x983   :  { %9834 = vmatprep.subr.bf16.mxu1 %v12635_v10  ;;  %9953 = vmatprep.subr.bf16.mxu0 %v12722_v48  ;;  %v12750_v48 = vld [vmem:[%s18574_s12 + $0x720] ss:$8 sps:$4 sm:$0xff]  }
 0x986   :  { %9835 = vmatpush2.bf16.msra.mxu1 %v12633_v36  ;;  %9954 = vmatpush2.bf16.msra.mxu0 %v12720_v13  ;;  %v12755_v36 = vld [vmem:[%s18574_s12 + $0x714] ss:$8 sps:$4 sm:$0xff]   ;;  %v12753_v13 = vld [vmem:[%s18574_s12 + $0x710] ss:$8 sps:$4 sm:$0xff]  }
 0x987   :  { %9886 = vmatprep.subr.bf16.mxu1 %v12641_v61  ;;  %9955 = vmatprep.subr.bf16.mxu0 %v12728_v11  ;;  %v12758_v61 = vld [vmem:[%s18574_s12 + $0x704] ss:$8 sps:$4 sm:$0xff]   ;;  %v12756_v11 = vld [vmem:[%s18574_s12 + $0x700] ss:$8 sps:$4 sm:$0xff]  }
 0x989   :  { %9837 = vmatmul.mubr.bf16.vlgmr.msra.gmra.mxu1 %v8135_v35  ;;  %v12764_v35 = vld [vmem:[%s18574_s12 + $0x7e4] ss:$8 sps:$4 sm:$0xff]  }
 0x98a   :  { %9887 = vmatpush1.bf16.msra.mxu1 %v12639_v53  ;;  %9956 = vmatpush2.bf16.msra.mxu0 %v12726_v15  ;;  %v12761_v53 = vld [vmem:[%s18574_s12 + $0x7f4] ss:$8 sps:$4 sm:$0xff]   ;;  %v12759_v15 = vld [vmem:[%s18574_s12 + $0x7f0] ss:$8 sps:$4 sm:$0xff]  }
 0x98b   :  { %9888 = vmatprep.subr.bf16.mxu1 %v12647_v21  ;;  %9957 = vmatprep.subr.bf16.mxu0 %v12734_v25  ;;  %v12762_v21 = vld [vmem:[%s18574_s12 + $0x7e0] ss:$8 sps:$4 sm:$0xff]   ;;  %v12767_v25 = vld [vmem:[%s18574_s12 + $0x7d4] ss:$8 sps:$4 sm:$0xff]  }
 0x98c   :  { %9918 = vmatprep.mubr.bf16.mxu1 %v8140_v55  ;;  %v12765_v55 = vld [vmem:[%s18574_s12 + $0x7d0] ss:$8 sps:$4 sm:$0xff]  }
 0x98e   :  { %9889 = vmatpush1.bf16.msra.mxu1 %v12645_v44  ;;  %9958 = vmatpush2.bf16.msra.mxu0 %v12732_v30  ;;  %v12770_v44 = vld [vmem:[%s18574_s12 + $0x7c4] ss:$8 sps:$4 sm:$0xff]   ;;  %v12768_v30 = vld [vmem:[%s18574_s12 + $0x7c0] ss:$8 sps:$4 sm:$0xff]  }
 0x98f   :  { %9890 = vmatprep.subr.bf16.mxu1 %v12653_v27  ;;  %v12773_v27 = vld [vmem:[%s18574_s12 + $0x7b4] ss:$8 sps:$4 sm:$0xff]  }
 0x991   :  { %9960 = vmatmul.mubr.bf16.vlgmr.msra.gmra.mxu0 %v8141_v59  ;;  %v12771_v59 = vld [vmem:[%s18574_s12 + $0x7b0] ss:$8 sps:$4 sm:$0xff]  }
 0x992   :  { %9891 = vmatpush1.bf16.msra.mxu1 %v12651_v58  ;;  %v12776_v58 = vld [vmem:[%s18574_s12 + $0x7a4] ss:$8 sps:$4 sm:$0xff]  }
 0x993   :  { %9892 = vmatprep.subr.bf16.mxu1 %v12659_v50  ;;  %v12774_v50 = vld [vmem:[%s18574_s12 + $0x7a0] ss:$8 sps:$4 sm:$0xff]  }
 0x996   :  { %9893 = vmatpush1.bf16.msra.mxu1 %v12657_v14  ;;  %v12779_v14 = vld [vmem:[%s18574_s12 + $0x794] ss:$8 sps:$4 sm:$0xff]  }
 0x997   :  { %9894 = vmatprep.subr.bf16.mxu1 %v12665_v19  ;;  %v12777_v19 = vld [vmem:[%s18574_s12 + $0x790] ss:$8 sps:$4 sm:$0xff]  }
 0x99a   :  { %9895 = vmatpush1.bf16.msra.mxu1 %v12663_v4  ;;  %v12782_v4 = vld [vmem:[%s18574_s12 + $0x784] ss:$8 sps:$4 sm:$0xff]  }
 0x99b   :  { %9896 = vmatprep.subr.bf16.mxu1 %v12671_v7  ;;  %v12780_v7 = vld [vmem:[%s18574_s12 + $0x780] ss:$8 sps:$4 sm:$0xff]  }
 0x99e   :  { %9897 = vmatpush1.bf16.msra.mxu1 %v12669_v20  ;;  %v8143_v20 = vpack.c.bf16 %v18117_v46, %v18117_v46 }
 0x99f   :  { %9898 = vmatprep.subr.bf16.mxu1 %v12677_v29 }
 0x9a2   :  { %9899 = vmatpush1.bf16.msra.mxu1 %v12675_v60 }
 0x9a3   :  { %9900 = vmatprep.subr.bf16.mxu1 %v12683_v3 }
 0x9a6   :  { %9901 = vmatpush1.bf16.msra.mxu1 %v12681_v45 }
 0x9a7   :  { %9902 = vmatprep.subr.bf16.mxu1 %v12689_v41 }
 0x9aa   :  { %9903 = vmatpush2.bf16.msra.mxu1 %v12687_v37 }
 0x9ab   :  { %9904 = vmatprep.subr.bf16.mxu1 %v12695_v34 }
 0x9ae   :  { %9905 = vmatpush2.bf16.msra.mxu1 %v12693_v51 }
 0x9af   :  { %9906 = vmatprep.subr.bf16.mxu1 %v12701_v1 }
 0x9b2   :  { %9907 = vmatpush2.bf16.msra.mxu1 %v12699_v17 }
 0x9b3   :  { %9908 = vmatprep.subr.bf16.mxu1 %v12707_v5 }
 0x9b6   :  { %9909 = vmatpush2.bf16.msra.mxu1 %v12705_v28 }
 0x9b7   :  { %9910 = vmatprep.subr.bf16.mxu1 %v12713_v38 }
 0x9ba   :  { %9911 = vmatpush2.bf16.msra.mxu1 %v12711_v26 }
 0x9bb   :  { %9912 = vmatprep.subr.bf16.mxu1 %v12719_v42 }
 0x9be   :  { %9913 = vmatpush2.bf16.msra.mxu1 %v12717_v16 }
 0x9bf   :  { %9914 = vmatprep.subr.bf16.mxu1 %v12725_v23 }
 0x9c2   :  { %9915 = vmatpush2.bf16.msra.mxu1 %v12723_v22 }
 0x9c3   :  { %9916 = vmatprep.subr.bf16.mxu1 %v12731_v6 }
 0x9c6   :  { %9917 = vmatpush2.bf16.msra.mxu1 %v12729_v24 }
 0x9c7   :  { %9968 = vmatprep.subr.bf16.mxu1 %v12737_v39 }
 0x9c9   :  { %9919 = vmatmul.mubr.bf16.vlgmr.msra.gmra.mxu1 %v8139_v57  ;;  %v18442_v56 = vpop.f32.mrf.mxu1 }
 0x9ca   :  { %9969 = vmatpush1.bf16.msra.mxu1 %v12735_v8  ;;  %10000 = vmatprep.mubr.bf16.mxu1 %v8144_v2 }
 0x9cb   :  { %9970 = vmatprep.subr.bf16.mxu1 %v12740_v32  ;;  %v18450_v43 = vpop.f32.mrf.mxu1 }
 0x9cd   :  { %v9719_v9 = vpop.f32.mrf.mxu1 }
 0x9ce   :  { %9971 = vmatpush1.bf16.msra.mxu1 %v12738_v52  ;;  %v12805_v52 = vmov 0.0  }
 0x9cf   :  { %9972 = vmatprep.subr.bf16.mxu1 %v12743_v31  ;;  %v9720_v12 = vpop.f32.mrf.mxu1  ;;  %10155 = vmatprep.mubr.f32.mxu0 %v12805_v52 }
 0x9d1   :  { %v9797_v54 = vpop.f32.mrf.mxu0 }
 0x9d2   :  { %9973 = vmatpush1.bf16.msra.mxu1 %v12741_v40 }
 0x9d3   :  { %9974 = vmatprep.subr.bf16.mxu1 %v12746_v33  ;;  %v9799_v47 = vpop.f32.mrf.mxu0 }
 0x9d5   :  { %v9801_v63 = vpop.f32.mrf.mxu0 }
 0x9d6   :  { %9975 = vmatpush1.bf16.msra.mxu1 %v12744_v49 }
 0x9d7   :  { %9976 = vmatprep.subr.bf16.mxu1 %v12749_v18  ;;  %v9802_v10 = vpop.f32.mrf.mxu0 }
 0x9da   :  { %9977 = vmatpush1.bf16.msra.mxu1 %v12747_v0 }
 0x9db   :  { %9978 = vmatprep.subr.bf16.mxu1 %v12752_v62 }
 0x9de   :  { %9979 = vmatpush1.bf16.msra.mxu1 %v12750_v48 }
 0x9df   :  { %9980 = vmatprep.subr.bf16.mxu1 %v12755_v36 }
 0x9e2   :  { %9981 = vmatpush1.bf16.msra.mxu1 %v12753_v13 }
 0x9e3   :  { %9982 = vmatprep.subr.bf16.mxu1 %v12758_v61 }
 0x9e6   :  { %9983 = vmatpush1.bf16.msra.mxu1 %v12756_v11 }
 0x9e7   :  { %9984 = vmatprep.subr.bf16.mxu1 %v12761_v53 }
 0x9ea   :  { %9985 = vmatpush2.bf16.msra.mxu1 %v12759_v15 }
 0x9eb   :  { %9986 = vmatprep.subr.bf16.mxu1 %v12764_v35 }
 0x9ee   :  { %9987 = vmatpush2.bf16.msra.mxu1 %v12762_v21 }
 0x9ef   :  { %9988 = vmatprep.subr.bf16.mxu1 %v12767_v25 }
 0x9f2   :  { %9989 = vmatpush2.bf16.msra.mxu1 %v12765_v55 }
 0x9f3   :  { %9990 = vmatprep.subr.bf16.mxu1 %v12770_v44 }
 0x9f6   :  { %9991 = vmatpush2.bf16.msra.mxu1 %v12768_v30 }
 0x9f7   :  { %9992 = vmatprep.subr.bf16.mxu1 %v12773_v27 }
 0x9fa   :  { %9993 = vmatpush2.bf16.msra.mxu1 %v12771_v59 }
 0x9fb   :  { %9994 = vmatprep.subr.bf16.mxu1 %v12776_v58 }
 0x9fe   :  { %9995 = vmatpush2.bf16.msra.mxu1 %v12774_v50 }
 0x9ff   :  { %9996 = vmatprep.subr.bf16.mxu1 %v12779_v14 }
 0xa02   :  { %9997 = vmatpush2.bf16.msra.mxu1 %v12777_v19 }
 0xa03   :  { %9998 = vmatprep.subr.bf16.mxu1 %v12782_v4 }
 0xa06   :  { %9999 = vmatpush2.bf16.msra.mxu1 %v12780_v7 }
 0xa09   :  { %v9756_v29 = vpop.f32.mrf.mxu1  ;;  %10001 = vmatmul.mubr.bf16.vlgmr.msra.gmra.mxu1 %v8143_v20 }
 0xa0a   :  { %v9757_v60 = vadd.f32 %v9756_v29, %v18442_v56 }
 0xa0b   :  { %v9758_v3 = vpop.f32.mrf.mxu1 }
 0xa0c   :  { %v9759_v45 = vadd.f32 %v9758_v3, %v18450_v43  ;;  %v9798_v41 = vadd.f32 %v9797_v54, %v9757_v60 }
 0xa0d   :  { %v9760_v37 = vpop.f32.mrf.mxu1 }
 0xa0e   :  { %v9800_v34 = vadd.f32 %v9799_v47, %v9759_v45 }
 0xa0f   :  { %v9761_v51 = vpop.f32.mrf.mxu1 }
 0xa11   :  { %v9879_v1 = vpop.f32.mrf.mxu0 }
 0xa13   :  { %v9881_v17 = vpop.f32.mrf.mxu0 }
 0xa15   :  { %v9883_v5 = vpop.f32.mrf.mxu0 }
 0xa17   :  { %v9884_v28 = vpop.f32.mrf.mxu0 }
 0xa49   :  { %v9838_v38 = vpop.f32.mrf.mxu1 }
 0xa4a   :  { %v9839_v26 = vadd.f32 %v9838_v38, %v9798_v41  ;;  %v10048_v38 = vld [vmem:[%s18578_s13] sm:$0x3] }
 0xa4b   :  { %v9840_v42 = vpop.f32.mrf.mxu1 }
 0xa4c   :  { %v9841_v16 = vadd.f32 %v9840_v42, %v9800_v34  ;;  %v9880_v46 = vadd.f32 %v9879_v1, %v9839_v26  ;;  %v10050_v1 = vlaneseq  ;;  %v10062_v42 = vld [vmem:[%s18579_s14] sm:$0x3] }
 0xa4d   :  { %v9842_v23 = vpop.f32.mrf.mxu1 }
 0xa4e   :  { %v9882_v22 = vadd.f32 %v9881_v17, %v9841_v16  ;;  %v10051_v5 = vshrl.u32 %v10050_v1, 7 }
 0xa4f   :  { %v9843_v6 = vpop.f32.mrf.mxu1 }
 0xa50   :  { %v10052_v28 = vsub.s32 0, %v10051_v5  ;;  %v10056_v26 = vsub.s32 1, %v10051_v5 }
 0xa51   :  { %v9961_v24 = vpop.f32.mrf.mxu0 }
 0xa52   :  { %v10053_v16 = vrot.slane %v10048_v38, %v10052_v28  ;;  %v10057_v6 = vrot.slane %v10048_v38, %v10056_v26 }
 0xa53   :  { %v9963_v39 = vpop.f32.mrf.mxu0 }
 0xa55   :  { %v9965_v8 = vpop.f32.mrf.mxu0 }
 0xa57   :  { %v9966_v57 = vpop.f32.mrf.mxu0 }
 0xa58   :  { %v10071_v57 = vrot.slane %v10062_v42, %v10056_v26 }
 0xa89   :  { %v9920_v32 = vpop.f32.mrf.mxu1 }
 0xa8a   :  { %v9921_v2 = vadd.f32 %v9920_v32, %v9880_v46 }
 0xa8b   :  { %v9922_v56 = vpop.f32.mrf.mxu1 }
 0xa8c   :  { %v9923_v31 = vadd.f32 %v9922_v56, %v9882_v22  ;;  %v9962_v43 = vadd.f32 %v9961_v24, %v9921_v2  ;;  %v10067_v22 = vrot.slane %v10062_v42, %v10052_v28 }
 0xa8d   :  { %v9924_v9 = vpop.f32.mrf.mxu1 }
 0xa8e   :  { %v9964_v40 = vadd.f32 %v9963_v39, %v9923_v31  ;;  %v10082_v9 = vld [vmem:[%s18580_s15] sm:$0xff] }
 0xa8f   :  { %v9925_v33 = vpop.f32.mrf.mxu1 }
 0xac9   :  { %v10002_v12 = vpop.f32.mrf.mxu1 }
 0xaca   :  { %v10003_v54 = vadd.f32 %v10002_v12, %v9962_v43  ;;  %v10083_v43 = vld [vmem:[%s18580_s15 + $0x8] sm:$0xff] }
 0xacb   :  { %v10004_v49 = vpop.f32.mrf.mxu1 }
 0xacc   :  { %v10009_v18 = vrot.slane %v10003_v54, 4  ;;  %v10005_v47 = vadd.f32 %v10004_v49, %v9964_v40  ;;  %v10086_v49 = vld [vmem:[%s18581_s16] sm:$0x3] }
 0xacd   :  { %v10006_v63 = vpop.f32.mrf.mxu1 }
 0xace   :  { %v10010_v0 = vadd.f32 %v10009_v18, %v10003_v54  ;;  %v10015_v62 = vrot.slane %v10005_v47, 4  ;;  %v24_v18 = vstv %s18582_s17 }
 0xacf   :  { %v10007_v10 = vpop.f32.mrf.mxu1  ;;  %25 = vst [vmem:[#allocation2] sm:$0x1] %v24_v18 }
 0xad0   :  { %v10011_v48 = vrot.slane %v10010_v0, 2  ;;  %v10016_v36 = vadd.f32 %v10015_v62, %v10005_v47 }
 0xad2   :  { %v10012_v13 = vadd.f32 %v10011_v48, %v10010_v0  ;;  %v10017_v61 = vrot.slane %v10016_v36, 2 }
 0xad4   :  { %v10013_v11 = vrot.slane %v10012_v13, 1  ;;  %v10018_v53 = vadd.f32 %v10017_v61, %v10016_v36 }
 0xad6   :  { %v10014_v15 = vadd.f32 %v10013_v11, %v10012_v13  ;;  %v10019_v35 = vrot.slane %v10018_v53, 1 }
 0xad8   :  { %v10022_v21 = vmul.f32 0.125, %v10014_v15  ;;  %v10020_v25 = vadd.f32 %v10019_v35, %v10018_v53 }
 0xada   :  { %v10024_v55 = vsub.f32 %v10003_v54, %v10022_v21  ;;  %v10023_v44 = vmul.f32 0.125, %v10020_v25 }
 0xadc   :  { %v10026_v30 = vmul.f32 %v10024_v55, %v10024_v55  ;;  %v10025_v27 = vsub.f32 %v10005_v47, %v10023_v44  ;;  %v26_v47 = vstv %s18583_s18 }
 0xadd   :  { %27 = vst [vmem:[#allocation3] sm:$0x1] %v26_v47 }
 0xade   :  { %v10028_v59 = vrot.slane %v10026_v30, 4  ;;  %v10027_v58 = vmul.f32 %v10025_v27, %v10025_v27 }
 0xae0   :  { %v10029_v50 = vadd.f32 %v10028_v59, %v10026_v30  ;;  %v10034_v14 = vrot.slane %v10027_v58, 4 }
 0xae2   :  { %v10030_v19 = vrot.slane %v10029_v50, 2  ;;  %v10035_v4 = vadd.f32 %v10034_v14, %v10027_v58 }
 0xae4   :  { %v10031_v7 = vadd.f32 %v10030_v19, %v10029_v50  ;;  %v10036_v20 = vrot.slane %v10035_v4, 2 }
 0xae6   :  { %v10032_v29 = vrot.slane %v10031_v7, 1  ;;  %v10037_v60 = vadd.f32 %v10036_v20, %v10035_v4 }
 0xae8   :  { %v10033_v3 = vadd.f32 %v10032_v29, %v10031_v7  ;;  %v10038_v45 = vrot.slane %v10037_v60, 1  ;;  %v10760_v29 = vld [vmem:[#allocation2] ss:$0 sm:$0xff] }
 0xaea   :  { %v10040_v41 = vmul.f32 0.125, %v10033_v3  ;;  %v10039_v37 = vadd.f32 %v10038_v45, %v10037_v60  ;;  %v10761_v3 = vld [vmem:[#allocation3] ss:$0 sm:$0xff] }
 0xaec   :  { %v10042_v34 = vadd.f32 1e-05, %v10040_v41  ;;  %v10041_v51 = vmul.f32 0.125, %v10039_v37 }
 0xaee   :  { %12787 = vrsqrt.f32 %v10042_v34  ;;  %v10043_v17 = vadd.f32 1e-05, %v10041_v51 }
 0xaf0   :  { %12789 = vrsqrt.f32 %v10043_v17 }
 0xafb   :  { %v12788_v46 = vpop.eup %12787 }
 0xafc   :  { %v10046_v23 = vmul.f32 %v12788_v46, %v10024_v55 }
 0xafd   :  { %v12790_v24 = vpop.eup %12789 }
 0xafe   :  { %v10060_v39 = vmul.f32 %v10053_v16, %v10046_v23  ;;  %v10047_v8 = vmul.f32 %v12790_v24, %v10025_v27 }
 0xb00   :  { %v10074_v32 = vadd.f32 %v10067_v22, %v10060_v39  ;;  %v10061_v2 = vmul.f32 %v10057_v6, %v10047_v8 }
 0xb02   :  { %v10075_v56 = vadd.f32 %v10071_v57, %v10061_v2  ;;  %vm10076_vm4 = vcmp.gt.f32.partialorder %v10074_v32, 0.0  ;;  %v10078_v52 = vmul.f32 0.2, %v10074_v32 }
 0xb04   :  { %vm10077_vm15 = vcmp.gt.f32.partialorder %v10075_v56, 0.0  ;;  %v10079_v31 = vmul.f32 0.2, %v10075_v56  ;;  %v10080_v40 = vsel %vm10076_vm4, %v10074_v32, %v10078_v52 }
 0xb05   :  { %v10084_v54 = vmul.f32 %v10082_v9, %v10080_v40 }
 0xb06   :  { %v10081_v33 = vsel %vm10077_vm15, %v10075_v56, %v10079_v31 }
 0xb07   :  { %v10085_v12 = vmul.f32 %v10083_v43, %v10081_v33 }
 0xb09   :  { %10121 = vmatprep.subr.mxu0 %v10085_v12 }
 0xb0a   :  { %10122 = vmatpush1.msra.mxu0 %v10084_v54 }
 0xb0b   :  { %10759 = vmatmul.mubr.msk.f32.vlgmr.msra.gmra.mxu0 %vm10087_vm1, %v10086_v49 }
 0xbcb   :  { %v10157_v63 = vpop.f32.mrf.mxu0 }
 0xbcc   :  { %v10163_v62 = vsel %vm10162_vm2, %v10157_v63, 0.0 }
 0xbcd   :  { %v10159_v0 = vpop.f32.mrf.mxu0 }
 0xbce   :  { %v10164_v10 = vsel %vm10162_vm2, %v10159_v0, 0.0 }
 0xbcf   :  { %v10165_v48 = vadd.f32 %v10164_v10, %v10163_v62 }
 0xbd1   :  { %10166 = vadd.xlane.f32.xlu0 %v10165_v48 }
 0xc5a   :  { %v10167_v36 = vpop.xlane.xlu0 %10166 }
 0xc5b   :  { %v10168_v13 = vsel %vm10162_vm2, %v10167_v36, 0.0 }
 0xc5c   :  { %v10169_v61 = vrot.slane %v10168_v13, 4 }
 0xc5e   :  { %v10170_v11 = vadd.f32 %v10169_v61, %v10168_v13 }
 0xc60   :  { %v10171_v53 = vrot.slane %v10170_v11, 2 }
 0xc62   :  { %v10172_v15 = vadd.f32 %v10171_v53, %v10170_v11 }
 0xc64   :  { %v10173_v35 = vrot.slane %v10172_v15, 1 }
 0xc66   :  { %v10174_v21 = vadd.f32 %v10173_v35, %v10172_v15 }
 0xc68   :  { %v10176_v25 = vmul.f32 0.5, %v10174_v21 }
 0xc6a   :  { %v10177_v55 = vsub.f32 %v10167_v36, %v10176_v25 }
 0xc6c   :  { %v10178_v44 = vmul.f32 %v10177_v55, %v10177_v55 }
 0xc6e   :  { %v10179_v30 = vsel %vm10162_vm2, %v10178_v44, 0.0 }
 0xc6f   :  { %v10180_v27 = vrot.slane %v10179_v30, 4 }
 0xc71   :  { %v10181_v59 = vadd.f32 %v10180_v27, %v10179_v30 }
 0xc73   :  { %v10182_v58 = vrot.slane %v10181_v59, 2 }
 0xc75   :  { %v10183_v50 = vadd.f32 %v10182_v58, %v10181_v59 }
 0xc77   :  { %v10184_v14 = vrot.slane %v10183_v50, 1 }
 0xc79   :  { %v10185_v19 = vadd.f32 %v10184_v14, %v10183_v50 }
 0xc7b   :  { %v10186_v4 = vmul.f32 0.5, %v10185_v19 }
 0xc7d   :  { %v10187_v7 = vadd.f32 1e-05, %v10186_v4 }
 0xc7f   :  { %12791 = vrsqrt.f32 %v10187_v7 }
 0xc8c   :  { %v12792_v20 = vpop.eup %12791 }
 0xc8d   :  { %v10189_v60 = vmul.f32 %v12792_v20, %v10177_v55 }
 0xc8f   :  { %v10197_v45 = vmul.f32 %v10760_v29, %v10189_v60 }
 0xc91   :  { %v10205_v41 = vadd.f32 %v10761_v3, %v10197_v45 }
 0xc93   :  { %v10762_v37 = vmul.f32 -1.442695, %v10205_v41 }
 0xc95   :  { %12793 = vpow2.f32 %v10762_v37 }
 0xca2   :  { %v12794_v34 = vpop.eup %12793 }
 0xca3   :  { %v10209_v51 = vadd.f32 1.0, %v12794_v34 }
 0xca5   :  { %12795 = vrcp.f32 %v10209_v51 }
 0xcb2   :  { %v12796_v1 = vpop.eup %12795 }
 0xcb3   :  { %10213 = vst.msk [vmem:[%s18584_s19] sm:$0x3] %vm10212_vm3, %v12796_v1 }

</bundles_post_ra>
